<compile_context>
chip_gen: v7x
topology: tpu7x:2x2x1
jax: 0.10.0
libtpu: 0.0.40
codegen_flags: <defaults>
</compile_context>

<pallas_src>
import math

import jax
import jax.numpy as jnp
from jax import lax
from jax.experimental import pallas as pl
from jax.experimental.pallas import tpu as pltpu

# ---------------- configuration (small, consistent with the module) ----------------
EMBED_DIM = 32
LATENT_DIM = 8
KERNEL_SIZE = 5
OUT_DIM = 1
VOCAB = 24
PAD_IDX = 0
SEP_IDX = 1
MAX_LEN = 18                      # tokenizer-derived max_len (>= seq len used below)
BN_SCALE = 1.0 / math.sqrt(1.0 + 1e-5)   # eval-mode BatchNorm1d with fresh running stats

# TILE_B sequences per grid step.  64 keeps VMEM well under the 16 MiB default scoped
# limit on v5e; on v6e/v7x it can be raised (with vmem_limit_bytes) for more
# amortization.  With L=16 this gives M = TILE_B*L = 1024 rows per matmul.
DEFAULT_TILE_B = 64


def _round_up(x, m):
    return ((x + m - 1) // m) * m


# ---------------------------- in-kernel building blocks ----------------------------
def _swish(x):
    return x * jax.nn.sigmoid(x)


def _shift_rows(x, d):
    """y[r] = x[r + d] with zero fill at the slab ends (d is a static Python int)."""
    if d == 0:
        return x
    n, c = x.shape
    z = jnp.zeros((abs(d), c), x.dtype)
    if d > 0:
        return jnp.concatenate([x[d:, :], z], axis=0)
    return jnp.concatenate([z, x[:n + d, :]], axis=0)


def _conv1d(h_bf, w, bias, tap_masks):
    """'same'-padded masked Conv1d over the batched (M, Cin) slab.

    h_bf:      (M, Cin) bf16, already padding-masked.
    w:         (K, Cin, Cout) bf16 value.
    bias:      (1, Cout) f32.
    tap_masks: dict d -> (M, 1) bf16, zero where a tap would cross a sequence
               boundary inside the slab (== per-sequence zero padding).
    """
    k = w.shape[0]
    pad = k // 2
    out = None
    for t in range(k):                                  # static unroll over taps
        d = t - pad
        xt = _shift_rows(h_bf, d)
        if d != 0:
            xt = xt * tap_masks[d]
        c = jnp.dot(xt, w[t], preferred_element_type=jnp.float32)
        out = c if out is None else out + c
    return out + bias


def _res_block(h, mask, tap_masks, w_a, b_a, w_b, b_b, w_skip=None, b_skip=None):
    """Masked residual block (eval mode): norm->swish->conv twice + (1x1) skip."""
    a = _swish(h * BN_SCALE)
    a = _conv1d((a * mask).astype(jnp.bfloat16), w_a, b_a, tap_masks)
    a = _swish(a * BN_SCALE)
    a = _conv1d((a * mask).astype(jnp.bfloat16), w_b, b_b, tap_masks)
    if w_skip is None:
        skip = h
    else:  # channel change -> masked 1x1 conv on the skip path
        skip = jnp.dot((h * mask).astype(jnp.bfloat16), w_skip,
                       preferred_element_type=jnp.float32) + b_skip
    return a + skip


# ------------------------------------ the kernel ------------------------------------
def _make_kernel(tile_b, seq_len, embed_dim):
    M = tile_b * seq_len
    sqrt_c = math.sqrt(embed_dim)
    pad = KERNEL_SIZE // 2

    def kernel(idpos_ref, emb_ref, pe_ref,
               wenc_ref, benc_ref, w3a_ref, b3a_ref,
               wlat_ref, blat_ref, wsk_ref, bsk_ref,
               wl_ref, bl_ref, out_ref):
        idpos = idpos_ref[...]                          # (M, 2) int32: [token id, pos]
        ids = idpos[:, 0:1]                             # (M, 1)
        lpos = idpos[:, 1:2]                            # (M, 1) position inside sequence

        mask = (ids != PAD_IDX).astype(jnp.float32)                 # (M, 1)
        pool_mask = mask * (ids != SEP_IDX).astype(jnp.float32)     # (M, 1)

        # per-tap boundary masks: computed once, reused by all 8 convolutions.
        tap_masks = {}
        for d in range(-pad, pad + 1):
            if d == 0:
                continue
            ok = ((lpos + d) >= 0) & ((lpos + d) < seq_len)
            tap_masks[d] = ok.astype(jnp.bfloat16)

        # Embedding lookup as one-hot matmul (MXU friendly, keeps the gather in-kernel).
        V = emb_ref.shape[0]
        vocab_iota = lax.broadcasted_iota(jnp.int32, (M, V), 1)
        onehot = (ids == vocab_iota).astype(jnp.float32)            # (M, V)
        x = jnp.dot(onehot, emb_ref[...], preferred_element_type=jnp.float32)
        x = x * jnp.float32(sqrt_c) + pe_ref[...]       # sinusoidal positional encoding

        # encoder: 3 masked residual conv blocks
        h = _res_block(x, mask, tap_masks, wenc_ref[0], benc_ref[0],
                       wenc_ref[1], benc_ref[1])                    # embed -> embed
        h = _res_block(h, mask, tap_masks, wenc_ref[2], benc_ref[2],
                       wenc_ref[3], benc_ref[3])                    # embed -> embed
        h = _res_block(h, mask, tap_masks, w3a_ref[...], b3a_ref[...],
                       wlat_ref[0], blat_ref[0],
                       wsk_ref[...], bsk_ref[...])                  # embed -> latent

        # FunctionHead (type='conv'): masked residual block, masked mean pool, Linear
        h = _res_block(h, mask, tap_masks, wlat_ref[1], blat_ref[1],
                       wlat_ref[2], blat_ref[2])                    # latent -> latent

        latent = h.shape[1]
        num = jnp.sum((pool_mask * h).reshape(tile_b, seq_len, latent), axis=1)
        den = jnp.sum(pool_mask.reshape(tile_b, seq_len, 1), axis=1) + 1e-6
        pooled = num * pl.reciprocal(den, approx=True)              # (tile_b, latent)
        out = jnp.dot(pooled.astype(jnp.bfloat16), wl_ref[...],
                      preferred_element_type=jnp.float32) + bl_ref[...]
        out_ref[...] = out                                          # (tile_b, out_dim)

    return kernel


# ------------------------------------ host glue -------------------------------------
def make_positional_encoding(max_len, d_model):
    position = jnp.arange(max_len, dtype=jnp.float32)[:, None]
    div_term = jnp.exp(jnp.arange(0, d_model, 2, dtype=jnp.float32)
                       * (-math.log(10000.0) / d_model))
    pe = jnp.zeros((max_len, d_model), jnp.float32)
    pe = pe.at[:, 0::2].set(jnp.sin(position * div_term))
    pe = pe.at[:, 1::2].set(jnp.cos(position * div_term))
    return pe


def init_params(key):
    ks = iter(jax.random.split(key, 32))

    def conv(cin, cout, ksize):
        # PyTorch layout (cout, cin, k) -> kernel layout (k, cin, cout)
        w = jax.random.normal(next(ks), (cout, cin, ksize), jnp.float32)
        w = w * (1.0 / math.sqrt(cin * ksize))
        b = jax.random.normal(next(ks), (cout,), jnp.float32) * 0.02
        return jnp.transpose(w, (2, 1, 0)), b.reshape(1, cout)

    p = {}
    emb = jax.random.normal(next(ks), (VOCAB, EMBED_DIM), jnp.float32) * 0.5
    p['emb'] = emb.at[PAD_IDX].set(0.0)                 # nn.Embedding padding_idx row = 0
    p['pe'] = make_positional_encoding(MAX_LEN + 1, EMBED_DIM)
    p['w1a'], p['b1a'] = conv(EMBED_DIM, EMBED_DIM, KERNEL_SIZE)
    p['w1b'], p['b1b'] = conv(EMBED_DIM, EMBED_DIM, KERNEL_SIZE)
    p['w2a'], p['b2a'] = conv(EMBED_DIM, EMBED_DIM, KERNEL_SIZE)
    p['w2b'], p['b2b'] = conv(EMBED_DIM, EMBED_DIM, KERNEL_SIZE)
    p['w3a'], p['b3a'] = conv(EMBED_DIM, LATENT_DIM, KERNEL_SIZE)
    p['w3b'], p['b3b'] = conv(LATENT_DIM, LATENT_DIM, KERNEL_SIZE)
    ws, bs = conv(EMBED_DIM, LATENT_DIM, 1)             # 1x1 skip conv
    p['w3s'], p['b3s'] = ws[0], bs                      # (32, 8), (1, 8)
    p['wha'], p['bha'] = conv(LATENT_DIM, LATENT_DIM, KERNEL_SIZE)
    p['whb'], p['bhb'] = conv(LATENT_DIM, LATENT_DIM, KERNEL_SIZE)
    wl = jax.random.normal(next(ks), (OUT_DIM, LATENT_DIM), jnp.float32) \
        * (1.0 / math.sqrt(LATENT_DIM))
    p['wl'] = wl.T                                      # (latent, out_dim)
    p['bl'] = jax.random.normal(next(ks), (1, OUT_DIM), jnp.float32) * 0.02
    return p


def mcnn_forward(src_tok_idxs, params, max_tile_b=DEFAULT_TILE_B):
    B, L = src_tok_idxs.shape
    if L > MAX_LEN:                                     # faithful truncation
        src_tok_idxs = src_tok_idxs[:, :MAX_LEN + 1]
        L = src_tok_idxs.shape[1]

    # batch tiling: TILE_B sequences per grid step (padded with PAD-only rows).
    tile_b = min(max_tile_b, _round_up(B, 8))
    B_pad = _round_up(B, tile_b)
    M = tile_b * L

    ids = src_tok_idxs.astype(jnp.int32)
    if B_pad != B:
        ids = jnp.pad(ids, ((0, B_pad - B), (0, 0)), constant_values=PAD_IDX)

    # (B_pad*L, 2) int32 slab: column 0 = token id, column 1 = position within sequence.
    lpos = jnp.tile(jnp.arange(L, dtype=jnp.int32), B_pad)
    idpos = jnp.stack([ids.reshape(-1), lpos], axis=1)

    # positional encoding pre-tiled to the slab layout (constant across grid steps).
    pe_slab = jnp.tile(params['pe'][:L], (tile_b, 1)).astype(jnp.float32)   # (M, C)

    bf = lambda a: a.astype(jnp.bfloat16)
    weights = [
        params['emb'].astype(jnp.float32),                                   # (V, C)
        pe_slab,                                                             # (M, C)
        bf(jnp.stack([params['w1a'], params['w1b'],
                      params['w2a'], params['w2b']])),                       # (4,K,32,32)
        jnp.stack([params['b1a'], params['b1b'],
                   params['b2a'], params['b2b']]),                           # (4,1,32)
        bf(params['w3a']), params['b3a'],                                    # (K,32,8),(1,8)
        bf(jnp.stack([params['w3b'], params['wha'], params['whb']])),        # (3,K,8,8)
        jnp.stack([params['b3b'], params['bha'], params['bhb']]),            # (3,1,8)
        bf(params['w3s']), params['b3s'],                                    # (32,8),(1,8)
        bf(params['wl']), params['bl'],                                      # (8,1),(1,1)
    ]

    def _const_spec(a):
        zeros = (0,) * a.ndim

        def index_map(b):
            return zeros

        return pl.BlockSpec(a.shape, index_map)

    in_specs = ([pl.BlockSpec((M, 2), lambda b: (b, 0))]
                + [_const_spec(a) for a in weights])

    kernel = _make_kernel(tile_b, L, EMBED_DIM)
    out = pl.pallas_call(
        kernel,
        out_shape=jax.ShapeDtypeStruct((B_pad, OUT_DIM), jnp.float32),
        grid=(B_pad // tile_b,),
        in_specs=in_specs,
        out_specs=pl.BlockSpec((tile_b, OUT_DIM), lambda b: (b, 0)),
        compiler_params=pltpu.CompilerParams(dimension_semantics=("parallel",)),
    )(idpos, *weights)
    return out[:B]                                      # (B, out_dim)


# -------------------------------------- main ----------------------------------------
if __name__ == "__main__":
    key = jax.random.PRNGKey(0)
    k_ids, k_params = jax.random.split(key)

    params = init_params(k_params)

    B, L = 2, 16
    lens = jnp.array([12, 16], dtype=jnp.int32)          # one padded, one full sequence
    base = jax.random.randint(k_ids, (B, L), 2, VOCAB, dtype=jnp.int32)
    pos = jnp.arange(L, dtype=jnp.int32)[None, :]
    ids = jnp.where(pos == (lens[:, None] - 1), SEP_IDX, base)   # SEP at end of sequence
    ids = jnp.where(pos >= lens[:, None], PAD_IDX, ids)          # padding after

    pooled = jax.block_until_ready(mcnn_forward(ids, params))
    assert pooled.shape == (B, OUT_DIM)
    assert bool(jnp.all(jnp.isfinite(pooled)))
    print("KERNEL_OK")
</pallas_src>

<mosaic_0001>
module attributes {stable_mosaic.version = 11 : i64} {
  func.func @kernel(%arg0: i32, %arg1: memref<128x2xi32, #tpu.memory_space<vmem>>, %arg2: memref<24x32xf32, #tpu.memory_space<vmem>>, %arg3: memref<128x32xf32, #tpu.memory_space<vmem>>, %arg4: memref<4x5x32x32xbf16, #tpu.memory_space<vmem>>, %arg5: memref<4x1x32xf32, #tpu.memory_space<vmem>>, %arg6: memref<5x32x8xbf16, #tpu.memory_space<vmem>>, %arg7: memref<1x8xf32, #tpu.memory_space<vmem>>, %arg8: memref<3x5x8x8xbf16, #tpu.memory_space<vmem>>, %arg9: memref<3x1x8xf32, #tpu.memory_space<vmem>>, %arg10: memref<32x8xbf16, #tpu.memory_space<vmem>>, %arg11: memref<1x8xf32, #tpu.memory_space<vmem>>, %arg12: memref<8x1xbf16, #tpu.memory_space<vmem>>, %arg13: memref<1x1xf32, #tpu.memory_space<vmem>>, %arg14: memref<8x1xf32, #tpu.memory_space<vmem>>) attributes {dimension_semantics = [#tpu.dimension_semantics<parallel>], iteration_bounds = array<i64: 1>, scalar_prefetch = 0 : i64, scratch_operands = 0 : i64, tpu.core_type = #tpu.core_type<tc>, window_params = [{transform_indices = @transform_0, window_bounds = array<i64: 128, 2>}, {pipeline_mode = #tpu.pipeline_mode<synchronous>, transform_indices = @transform_1, window_bounds = array<i64: 24, 32>}, {pipeline_mode = #tpu.pipeline_mode<synchronous>, transform_indices = @transform_2, window_bounds = array<i64: 128, 32>}, {pipeline_mode = #tpu.pipeline_mode<synchronous>, transform_indices = @transform_3, window_bounds = array<i64: 4, 5, 32, 32>}, {pipeline_mode = #tpu.pipeline_mode<synchronous>, transform_indices = @transform_4, window_bounds = array<i64: 4, 1, 32>}, {pipeline_mode = #tpu.pipeline_mode<synchronous>, transform_indices = @transform_5, window_bounds = array<i64: 5, 32, 8>}, {pipeline_mode = #tpu.pipeline_mode<synchronous>, transform_indices = @transform_6, window_bounds = array<i64: 1, 8>}, {pipeline_mode = #tpu.pipeline_mode<synchronous>, transform_indices = @transform_7, window_bounds = array<i64: 3, 5, 8, 8>}, {pipeline_mode = #tpu.pipeline_mode<synchronous>, transform_indices = @transform_8, window_bounds = array<i64: 3, 1, 8>}, {pipeline_mode = #tpu.pipeline_mode<synchronous>, transform_indices = @transform_9, window_bounds = array<i64: 32, 8>}, {pipeline_mode = #tpu.pipeline_mode<synchronous>, transform_indices = @transform_10, window_bounds = array<i64: 1, 8>}, {pipeline_mode = #tpu.pipeline_mode<synchronous>, transform_indices = @transform_11, window_bounds = array<i64: 8, 1>}, {pipeline_mode = #tpu.pipeline_mode<synchronous>, transform_indices = @transform_12, window_bounds = array<i64: 1, 1>}, {transform_indices = @transform_13, window_bounds = array<i64: 8, 1>}]} {
    %c0 = arith.constant 0 : index
    %c0_0 = arith.constant 0 : index
    %0 = vector.load %arg1[%c0, %c0_0] : memref<128x2xi32, #tpu.memory_space<vmem>>, vector<128x2xi32>
    %1 = vector.extract_strided_slice %0 {offsets = [0, 0], sizes = [128, 1], strides = [1, 1]} : vector<128x2xi32> to vector<128x1xi32>
    %2 = vector.extract_strided_slice %0 {offsets = [0, 1], sizes = [128, 1], strides = [1, 1]} : vector<128x2xi32> to vector<128x1xi32>
    %c0_i32 = arith.constant 0 : i32
    %3 = vector.broadcast %c0_i32 : i32 to vector<128x1xi32>
    %4 = arith.cmpi ne, %1, %3 : vector<128x1xi32>
    %5 = arith.extui %4 : vector<128x1xi1> to vector<128x1xi32>
    %6 = arith.sitofp %5 : vector<128x1xi32> to vector<128x1xf32>
    %c1_i32 = arith.constant 1 : i32
    %7 = vector.broadcast %c1_i32 : i32 to vector<128x1xi32>
    %8 = arith.cmpi ne, %1, %7 : vector<128x1xi32>
    %9 = arith.extui %8 : vector<128x1xi1> to vector<128x1xi32>
    %10 = arith.sitofp %9 : vector<128x1xi32> to vector<128x1xf32>
    %11 = arith.mulf %6, %10 : vector<128x1xf32>
    %c-2_i32 = arith.constant -2 : i32
    %12 = vector.broadcast %c-2_i32 : i32 to vector<128x1xi32>
    %13 = arith.addi %2, %12 : vector<128x1xi32>
    %c0_i32_1 = arith.constant 0 : i32
    %14 = vector.broadcast %c0_i32_1 : i32 to vector<128x1xi32>
    %15 = arith.cmpi sge, %13, %14 : vector<128x1xi32>
    %c-2_i32_2 = arith.constant -2 : i32
    %16 = vector.broadcast %c-2_i32_2 : i32 to vector<128x1xi32>
    %17 = arith.addi %2, %16 : vector<128x1xi32>
    %c16_i32 = arith.constant 16 : i32
    %18 = vector.broadcast %c16_i32 : i32 to vector<128x1xi32>
    %19 = arith.cmpi slt, %17, %18 : vector<128x1xi32>
    %20 = arith.andi %15, %19 : vector<128x1xi1>
    %21 = arith.extui %20 : vector<128x1xi1> to vector<128x1xi32>
    %22 = arith.sitofp %21 : vector<128x1xi32> to vector<128x1xf32>
    %23 = arith.truncf %22 : vector<128x1xf32> to vector<128x1xbf16>
    %c-1_i32 = arith.constant -1 : i32
    %24 = vector.broadcast %c-1_i32 : i32 to vector<128x1xi32>
    %25 = arith.addi %2, %24 : vector<128x1xi32>
    %c0_i32_3 = arith.constant 0 : i32
    %26 = vector.broadcast %c0_i32_3 : i32 to vector<128x1xi32>
    %27 = arith.cmpi sge, %25, %26 : vector<128x1xi32>
    %c-1_i32_4 = arith.constant -1 : i32
    %28 = vector.broadcast %c-1_i32_4 : i32 to vector<128x1xi32>
    %29 = arith.addi %2, %28 : vector<128x1xi32>
    %c16_i32_5 = arith.constant 16 : i32
    %30 = vector.broadcast %c16_i32_5 : i32 to vector<128x1xi32>
    %31 = arith.cmpi slt, %29, %30 : vector<128x1xi32>
    %32 = arith.andi %27, %31 : vector<128x1xi1>
    %33 = arith.extui %32 : vector<128x1xi1> to vector<128x1xi32>
    %34 = arith.sitofp %33 : vector<128x1xi32> to vector<128x1xf32>
    %35 = arith.truncf %34 : vector<128x1xf32> to vector<128x1xbf16>
    %c1_i32_6 = arith.constant 1 : i32
    %36 = vector.broadcast %c1_i32_6 : i32 to vector<128x1xi32>
    %37 = arith.addi %2, %36 : vector<128x1xi32>
    %c0_i32_7 = arith.constant 0 : i32
    %38 = vector.broadcast %c0_i32_7 : i32 to vector<128x1xi32>
    %39 = arith.cmpi sge, %37, %38 : vector<128x1xi32>
    %c1_i32_8 = arith.constant 1 : i32
    %40 = vector.broadcast %c1_i32_8 : i32 to vector<128x1xi32>
    %41 = arith.addi %2, %40 : vector<128x1xi32>
    %c16_i32_9 = arith.constant 16 : i32
    %42 = vector.broadcast %c16_i32_9 : i32 to vector<128x1xi32>
    %43 = arith.cmpi slt, %41, %42 : vector<128x1xi32>
    %44 = arith.andi %39, %43 : vector<128x1xi1>
    %45 = arith.extui %44 : vector<128x1xi1> to vector<128x1xi32>
    %46 = arith.sitofp %45 : vector<128x1xi32> to vector<128x1xf32>
    %47 = arith.truncf %46 : vector<128x1xf32> to vector<128x1xbf16>
    %c2_i32 = arith.constant 2 : i32
    %48 = vector.broadcast %c2_i32 : i32 to vector<128x1xi32>
    %49 = arith.addi %2, %48 : vector<128x1xi32>
    %c0_i32_10 = arith.constant 0 : i32
    %50 = vector.broadcast %c0_i32_10 : i32 to vector<128x1xi32>
    %51 = arith.cmpi sge, %49, %50 : vector<128x1xi32>
    %c2_i32_11 = arith.constant 2 : i32
    %52 = vector.broadcast %c2_i32_11 : i32 to vector<128x1xi32>
    %53 = arith.addi %2, %52 : vector<128x1xi32>
    %c16_i32_12 = arith.constant 16 : i32
    %54 = vector.broadcast %c16_i32_12 : i32 to vector<128x1xi32>
    %55 = arith.cmpi slt, %53, %54 : vector<128x1xi32>
    %56 = arith.andi %51, %55 : vector<128x1xi1>
    %57 = arith.extui %56 : vector<128x1xi1> to vector<128x1xi32>
    %58 = arith.sitofp %57 : vector<128x1xi32> to vector<128x1xf32>
    %59 = arith.truncf %58 : vector<128x1xf32> to vector<128x1xbf16>
    %60 = tpu.iota {dimensions = array<i32: 1>} : vector<128x24xi32>
    %61 = vector.broadcast %1 : vector<128x1xi32> to vector<128x24xi32>
    %62 = arith.cmpi eq, %61, %60 : vector<128x24xi32>
    %63 = arith.extui %62 : vector<128x24xi1> to vector<128x24xi32>
    %64 = arith.sitofp %63 : vector<128x24xi32> to vector<128x24xf32>
    %c0_13 = arith.constant 0 : index
    %c0_14 = arith.constant 0 : index
    %65 = vector.load %arg2[%c0_13, %c0_14] : memref<24x32xf32, #tpu.memory_space<vmem>>, vector<24x32xf32>
    %cst = arith.constant dense<0.000000e+00> : vector<128x32xf32>
    %66 = tpu.matmul %64, %65, %cst {dimension_numbers = #tpu.dot_dimension_numbers<[1], [0], [0], [1], [0, 0, 1, 1], [], []>} : vector<128x24xf32>, vector<24x32xf32>, vector<128x32xf32> -> vector<128x32xf32>
    %cst_15 = arith.constant 5.65685415 : f32
    %67 = vector.broadcast %cst_15 : f32 to vector<128x32xf32>
    %68 = arith.mulf %66, %67 : vector<128x32xf32>
    %c0_16 = arith.constant 0 : index
    %c0_17 = arith.constant 0 : index
    %69 = vector.load %arg3[%c0_16, %c0_17] : memref<128x32xf32, #tpu.memory_space<vmem>>, vector<128x32xf32>
    %70 = arith.addf %68, %69 : vector<128x32xf32>
    %c0_18 = arith.constant 0 : index
    %c0_19 = arith.constant 0 : index
    %c0_20 = arith.constant 0 : index
    %c0_21 = arith.constant 0 : index
    %71 = vector.load %arg4[%c0_18, %c0_19, %c0_20, %c0_21] : memref<4x5x32x32xbf16, #tpu.memory_space<vmem>>, vector<1x5x32x32xbf16>
    %72 = vector.shape_cast %71 : vector<1x5x32x32xbf16> to vector<5x32x32xbf16>
    %c0_22 = arith.constant 0 : index
    %c0_23 = arith.constant 0 : index
    %c0_24 = arith.constant 0 : index
    %73 = vector.load %arg5[%c0_22, %c0_23, %c0_24] : memref<4x1x32xf32, #tpu.memory_space<vmem>>, vector<1x1x32xf32>
    %74 = vector.shape_cast %73 : vector<1x1x32xf32> to vector<1x32xf32>
    %c1 = arith.constant 1 : index
    %c0_25 = arith.constant 0 : index
    %c0_26 = arith.constant 0 : index
    %c0_27 = arith.constant 0 : index
    %75 = vector.load %arg4[%c1, %c0_25, %c0_26, %c0_27] : memref<4x5x32x32xbf16, #tpu.memory_space<vmem>>, vector<1x5x32x32xbf16>
    %76 = vector.shape_cast %75 : vector<1x5x32x32xbf16> to vector<5x32x32xbf16>
    %c1_28 = arith.constant 1 : index
    %c0_29 = arith.constant 0 : index
    %c0_30 = arith.constant 0 : index
    %77 = vector.load %arg5[%c1_28, %c0_29, %c0_30] : memref<4x1x32xf32, #tpu.memory_space<vmem>>, vector<1x1x32xf32>
    %78 = vector.shape_cast %77 : vector<1x1x32xf32> to vector<1x32xf32>
    %cst_31 = arith.constant 0.999994993 : f32
    %79 = vector.broadcast %cst_31 : f32 to vector<128x32xf32>
    %80 = arith.mulf %70, %79 : vector<128x32xf32>
    %81 = arith.negf %80 : vector<128x32xf32>
    %82 = math.exp %81 : vector<128x32xf32>
    %cst_32 = arith.constant 1.000000e+00 : f32
    %83 = vector.broadcast %cst_32 : f32 to vector<128x32xf32>
    %84 = arith.addf %83, %82 : vector<128x32xf32>
    %85 = arith.divf %83, %84 : vector<128x32xf32>
    %86 = arith.mulf %80, %85 : vector<128x32xf32>
    %87 = vector.broadcast %6 : vector<128x1xf32> to vector<128x32xf32>
    %88 = arith.mulf %86, %87 : vector<128x32xf32>
    %89 = arith.truncf %88 : vector<128x32xf32> to vector<128x32xbf16>
    %cst_33 = arith.constant 0.000000e+00 : bf16
    %90 = vector.broadcast %cst_33 : bf16 to vector<2x32xbf16>
    %91 = vector.extract_strided_slice %89 {offsets = [0, 0], sizes = [126, 32], strides = [1, 1]} : vector<128x32xbf16> to vector<126x32xbf16>
    %92 = tpu.concatenate %90, %91 in 0 : vector<2x32xbf16>, vector<126x32xbf16> -> vector<128x32xbf16>
    %93 = vector.broadcast %23 : vector<128x1xbf16> to vector<128x32xbf16>
    %94 = arith.mulf %92, %93 : vector<128x32xbf16>
    %95 = vector.extract_strided_slice %72 {offsets = [0, 0, 0], sizes = [1, 32, 32], strides = [1, 1, 1]} : vector<5x32x32xbf16> to vector<1x32x32xbf16>
    %96 = vector.shape_cast %95 : vector<1x32x32xbf16> to vector<32x32xbf16>
    %cst_34 = arith.constant dense<0.000000e+00> : vector<128x32xf32>
    %97 = tpu.matmul %94, %96, %cst_34 {dimension_numbers = #tpu.dot_dimension_numbers<[1], [0], [0], [1], [0, 0, 1, 1], [], []>} : vector<128x32xbf16>, vector<32x32xbf16>, vector<128x32xf32> -> vector<128x32xf32>
    %cst_35 = arith.constant 0.000000e+00 : bf16
    %98 = vector.broadcast %cst_35 : bf16 to vector<1x32xbf16>
    %99 = vector.extract_strided_slice %89 {offsets = [0, 0], sizes = [127, 32], strides = [1, 1]} : vector<128x32xbf16> to vector<127x32xbf16>
    %100 = tpu.concatenate %98, %99 in 0 : vector<1x32xbf16>, vector<127x32xbf16> -> vector<128x32xbf16>
    %101 = vector.broadcast %35 : vector<128x1xbf16> to vector<128x32xbf16>
    %102 = arith.mulf %100, %101 : vector<128x32xbf16>
    %103 = vector.extract_strided_slice %72 {offsets = [1, 0, 0], sizes = [1, 32, 32], strides = [1, 1, 1]} : vector<5x32x32xbf16> to vector<1x32x32xbf16>
    %104 = vector.shape_cast %103 : vector<1x32x32xbf16> to vector<32x32xbf16>
    %cst_36 = arith.constant dense<0.000000e+00> : vector<128x32xf32>
    %105 = tpu.matmul %102, %104, %cst_36 {dimension_numbers = #tpu.dot_dimension_numbers<[1], [0], [0], [1], [0, 0, 1, 1], [], []>} : vector<128x32xbf16>, vector<32x32xbf16>, vector<128x32xf32> -> vector<128x32xf32>
    %106 = arith.addf %97, %105 : vector<128x32xf32>
    %107 = vector.extract_strided_slice %72 {offsets = [2, 0, 0], sizes = [1, 32, 32], strides = [1, 1, 1]} : vector<5x32x32xbf16> to vector<1x32x32xbf16>
    %108 = vector.shape_cast %107 : vector<1x32x32xbf16> to vector<32x32xbf16>
    %cst_37 = arith.constant dense<0.000000e+00> : vector<128x32xf32>
    %109 = tpu.matmul %89, %108, %cst_37 {dimension_numbers = #tpu.dot_dimension_numbers<[1], [0], [0], [1], [0, 0, 1, 1], [], []>} : vector<128x32xbf16>, vector<32x32xbf16>, vector<128x32xf32> -> vector<128x32xf32>
    %110 = arith.addf %106, %109 : vector<128x32xf32>
    %cst_38 = arith.constant 0.000000e+00 : bf16
    %111 = vector.broadcast %cst_38 : bf16 to vector<1x32xbf16>
    %112 = vector.extract_strided_slice %89 {offsets = [1, 0], sizes = [127, 32], strides = [1, 1]} : vector<128x32xbf16> to vector<127x32xbf16>
    %113 = tpu.concatenate %112, %111 in 0 : vector<127x32xbf16>, vector<1x32xbf16> -> vector<128x32xbf16>
    %114 = vector.broadcast %47 : vector<128x1xbf16> to vector<128x32xbf16>
    %115 = arith.mulf %113, %114 : vector<128x32xbf16>
    %116 = vector.extract_strided_slice %72 {offsets = [3, 0, 0], sizes = [1, 32, 32], strides = [1, 1, 1]} : vector<5x32x32xbf16> to vector<1x32x32xbf16>
    %117 = vector.shape_cast %116 : vector<1x32x32xbf16> to vector<32x32xbf16>
    %cst_39 = arith.constant dense<0.000000e+00> : vector<128x32xf32>
    %118 = tpu.matmul %115, %117, %cst_39 {dimension_numbers = #tpu.dot_dimension_numbers<[1], [0], [0], [1], [0, 0, 1, 1], [], []>} : vector<128x32xbf16>, vector<32x32xbf16>, vector<128x32xf32> -> vector<128x32xf32>
    %119 = arith.addf %110, %118 : vector<128x32xf32>
    %cst_40 = arith.constant 0.000000e+00 : bf16
    %120 = vector.broadcast %cst_40 : bf16 to vector<2x32xbf16>
    %121 = vector.extract_strided_slice %89 {offsets = [2, 0], sizes = [126, 32], strides = [1, 1]} : vector<128x32xbf16> to vector<126x32xbf16>
    %122 = tpu.concatenate %121, %120 in 0 : vector<126x32xbf16>, vector<2x32xbf16> -> vector<128x32xbf16>
    %123 = vector.broadcast %59 : vector<128x1xbf16> to vector<128x32xbf16>
    %124 = arith.mulf %122, %123 : vector<128x32xbf16>
    %125 = vector.extract_strided_slice %72 {offsets = [4, 0, 0], sizes = [1, 32, 32], strides = [1, 1, 1]} : vector<5x32x32xbf16> to vector<1x32x32xbf16>
    %126 = vector.shape_cast %125 : vector<1x32x32xbf16> to vector<32x32xbf16>
    %cst_41 = arith.constant dense<0.000000e+00> : vector<128x32xf32>
    %127 = tpu.matmul %124, %126, %cst_41 {dimension_numbers = #tpu.dot_dimension_numbers<[1], [0], [0], [1], [0, 0, 1, 1], [], []>} : vector<128x32xbf16>, vector<32x32xbf16>, vector<128x32xf32> -> vector<128x32xf32>
    %128 = arith.addf %119, %127 : vector<128x32xf32>
    %129 = vector.broadcast %74 : vector<1x32xf32> to vector<128x32xf32>
    %130 = arith.addf %128, %129 : vector<128x32xf32>
    %cst_42 = arith.constant 0.999994993 : f32
    %131 = vector.broadcast %cst_42 : f32 to vector<128x32xf32>
    %132 = arith.mulf %130, %131 : vector<128x32xf32>
    %133 = arith.negf %132 : vector<128x32xf32>
    %134 = math.exp %133 : vector<128x32xf32>
    %cst_43 = arith.constant 1.000000e+00 : f32
    %135 = vector.broadcast %cst_43 : f32 to vector<128x32xf32>
    %136 = arith.addf %135, %134 : vector<128x32xf32>
    %137 = arith.divf %135, %136 : vector<128x32xf32>
    %138 = arith.mulf %132, %137 : vector<128x32xf32>
    %139 = vector.broadcast %6 : vector<128x1xf32> to vector<128x32xf32>
    %140 = arith.mulf %138, %139 : vector<128x32xf32>
    %141 = arith.truncf %140 : vector<128x32xf32> to vector<128x32xbf16>
    %cst_44 = arith.constant 0.000000e+00 : bf16
    %142 = vector.broadcast %cst_44 : bf16 to vector<2x32xbf16>
    %143 = vector.extract_strided_slice %141 {offsets = [0, 0], sizes = [126, 32], strides = [1, 1]} : vector<128x32xbf16> to vector<126x32xbf16>
    %144 = tpu.concatenate %142, %143 in 0 : vector<2x32xbf16>, vector<126x32xbf16> -> vector<128x32xbf16>
    %145 = vector.broadcast %23 : vector<128x1xbf16> to vector<128x32xbf16>
    %146 = arith.mulf %144, %145 : vector<128x32xbf16>
    %147 = vector.extract_strided_slice %76 {offsets = [0, 0, 0], sizes = [1, 32, 32], strides = [1, 1, 1]} : vector<5x32x32xbf16> to vector<1x32x32xbf16>
    %148 = vector.shape_cast %147 : vector<1x32x32xbf16> to vector<32x32xbf16>
    %cst_45 = arith.constant dense<0.000000e+00> : vector<128x32xf32>
    %149 = tpu.matmul %146, %148, %cst_45 {dimension_numbers = #tpu.dot_dimension_numbers<[1], [0], [0], [1], [0, 0, 1, 1], [], []>} : vector<128x32xbf16>, vector<32x32xbf16>, vector<128x32xf32> -> vector<128x32xf32>
    %cst_46 = arith.constant 0.000000e+00 : bf16
    %150 = vector.broadcast %cst_46 : bf16 to vector<1x32xbf16>
    %151 = vector.extract_strided_slice %141 {offsets = [0, 0], sizes = [127, 32], strides = [1, 1]} : vector<128x32xbf16> to vector<127x32xbf16>
    %152 = tpu.concatenate %150, %151 in 0 : vector<1x32xbf16>, vector<127x32xbf16> -> vector<128x32xbf16>
    %153 = vector.broadcast %35 : vector<128x1xbf16> to vector<128x32xbf16>
    %154 = arith.mulf %152, %153 : vector<128x32xbf16>
    %155 = vector.extract_strided_slice %76 {offsets = [1, 0, 0], sizes = [1, 32, 32], strides = [1, 1, 1]} : vector<5x32x32xbf16> to vector<1x32x32xbf16>
    %156 = vector.shape_cast %155 : vector<1x32x32xbf16> to vector<32x32xbf16>
    %cst_47 = arith.constant dense<0.000000e+00> : vector<128x32xf32>
    %157 = tpu.matmul %154, %156, %cst_47 {dimension_numbers = #tpu.dot_dimension_numbers<[1], [0], [0], [1], [0, 0, 1, 1], [], []>} : vector<128x32xbf16>, vector<32x32xbf16>, vector<128x32xf32> -> vector<128x32xf32>
    %158 = arith.addf %149, %157 : vector<128x32xf32>
    %159 = vector.extract_strided_slice %76 {offsets = [2, 0, 0], sizes = [1, 32, 32], strides = [1, 1, 1]} : vector<5x32x32xbf16> to vector<1x32x32xbf16>
    %160 = vector.shape_cast %159 : vector<1x32x32xbf16> to vector<32x32xbf16>
    %cst_48 = arith.constant dense<0.000000e+00> : vector<128x32xf32>
    %161 = tpu.matmul %141, %160, %cst_48 {dimension_numbers = #tpu.dot_dimension_numbers<[1], [0], [0], [1], [0, 0, 1, 1], [], []>} : vector<128x32xbf16>, vector<32x32xbf16>, vector<128x32xf32> -> vector<128x32xf32>
    %162 = arith.addf %158, %161 : vector<128x32xf32>
    %cst_49 = arith.constant 0.000000e+00 : bf16
    %163 = vector.broadcast %cst_49 : bf16 to vector<1x32xbf16>
    %164 = vector.extract_strided_slice %141 {offsets = [1, 0], sizes = [127, 32], strides = [1, 1]} : vector<128x32xbf16> to vector<127x32xbf16>
    %165 = tpu.concatenate %164, %163 in 0 : vector<127x32xbf16>, vector<1x32xbf16> -> vector<128x32xbf16>
    %166 = vector.broadcast %47 : vector<128x1xbf16> to vector<128x32xbf16>
    %167 = arith.mulf %165, %166 : vector<128x32xbf16>
    %168 = vector.extract_strided_slice %76 {offsets = [3, 0, 0], sizes = [1, 32, 32], strides = [1, 1, 1]} : vector<5x32x32xbf16> to vector<1x32x32xbf16>
    %169 = vector.shape_cast %168 : vector<1x32x32xbf16> to vector<32x32xbf16>
    %cst_50 = arith.constant dense<0.000000e+00> : vector<128x32xf32>
    %170 = tpu.matmul %167, %169, %cst_50 {dimension_numbers = #tpu.dot_dimension_numbers<[1], [0], [0], [1], [0, 0, 1, 1], [], []>} : vector<128x32xbf16>, vector<32x32xbf16>, vector<128x32xf32> -> vector<128x32xf32>
    %171 = arith.addf %162, %170 : vector<128x32xf32>
    %cst_51 = arith.constant 0.000000e+00 : bf16
    %172 = vector.broadcast %cst_51 : bf16 to vector<2x32xbf16>
    %173 = vector.extract_strided_slice %141 {offsets = [2, 0], sizes = [126, 32], strides = [1, 1]} : vector<128x32xbf16> to vector<126x32xbf16>
    %174 = tpu.concatenate %173, %172 in 0 : vector<126x32xbf16>, vector<2x32xbf16> -> vector<128x32xbf16>
    %175 = vector.broadcast %59 : vector<128x1xbf16> to vector<128x32xbf16>
    %176 = arith.mulf %174, %175 : vector<128x32xbf16>
    %177 = vector.extract_strided_slice %76 {offsets = [4, 0, 0], sizes = [1, 32, 32], strides = [1, 1, 1]} : vector<5x32x32xbf16> to vector<1x32x32xbf16>
    %178 = vector.shape_cast %177 : vector<1x32x32xbf16> to vector<32x32xbf16>
    %cst_52 = arith.constant dense<0.000000e+00> : vector<128x32xf32>
    %179 = tpu.matmul %176, %178, %cst_52 {dimension_numbers = #tpu.dot_dimension_numbers<[1], [0], [0], [1], [0, 0, 1, 1], [], []>} : vector<128x32xbf16>, vector<32x32xbf16>, vector<128x32xf32> -> vector<128x32xf32>
    %180 = arith.addf %171, %179 : vector<128x32xf32>
    %181 = vector.broadcast %78 : vector<1x32xf32> to vector<128x32xf32>
    %182 = arith.addf %180, %181 : vector<128x32xf32>
    %183 = arith.addf %182, %70 : vector<128x32xf32>
    %c2 = arith.constant 2 : index
    %c0_53 = arith.constant 0 : index
    %c0_54 = arith.constant 0 : index
    %c0_55 = arith.constant 0 : index
    %184 = vector.load %arg4[%c2, %c0_53, %c0_54, %c0_55] : memref<4x5x32x32xbf16, #tpu.memory_space<vmem>>, vector<1x5x32x32xbf16>
    %185 = vector.shape_cast %184 : vector<1x5x32x32xbf16> to vector<5x32x32xbf16>
    %c2_56 = arith.constant 2 : index
    %c0_57 = arith.constant 0 : index
    %c0_58 = arith.constant 0 : index
    %186 = vector.load %arg5[%c2_56, %c0_57, %c0_58] : memref<4x1x32xf32, #tpu.memory_space<vmem>>, vector<1x1x32xf32>
    %187 = vector.shape_cast %186 : vector<1x1x32xf32> to vector<1x32xf32>
    %c3 = arith.constant 3 : index
    %c0_59 = arith.constant 0 : index
    %c0_60 = arith.constant 0 : index
    %c0_61 = arith.constant 0 : index
    %188 = vector.load %arg4[%c3, %c0_59, %c0_60, %c0_61] : memref<4x5x32x32xbf16, #tpu.memory_space<vmem>>, vector<1x5x32x32xbf16>
    %189 = vector.shape_cast %188 : vector<1x5x32x32xbf16> to vector<5x32x32xbf16>
    %c3_62 = arith.constant 3 : index
    %c0_63 = arith.constant 0 : index
    %c0_64 = arith.constant 0 : index
    %190 = vector.load %arg5[%c3_62, %c0_63, %c0_64] : memref<4x1x32xf32, #tpu.memory_space<vmem>>, vector<1x1x32xf32>
    %191 = vector.shape_cast %190 : vector<1x1x32xf32> to vector<1x32xf32>
    %cst_65 = arith.constant 0.999994993 : f32
    %192 = vector.broadcast %cst_65 : f32 to vector<128x32xf32>
    %193 = arith.mulf %183, %192 : vector<128x32xf32>
    %194 = arith.negf %193 : vector<128x32xf32>
    %195 = math.exp %194 : vector<128x32xf32>
    %cst_66 = arith.constant 1.000000e+00 : f32
    %196 = vector.broadcast %cst_66 : f32 to vector<128x32xf32>
    %197 = arith.addf %196, %195 : vector<128x32xf32>
    %198 = arith.divf %196, %197 : vector<128x32xf32>
    %199 = arith.mulf %193, %198 : vector<128x32xf32>
    %200 = vector.broadcast %6 : vector<128x1xf32> to vector<128x32xf32>
    %201 = arith.mulf %199, %200 : vector<128x32xf32>
    %202 = arith.truncf %201 : vector<128x32xf32> to vector<128x32xbf16>
    %cst_67 = arith.constant 0.000000e+00 : bf16
    %203 = vector.broadcast %cst_67 : bf16 to vector<2x32xbf16>
    %204 = vector.extract_strided_slice %202 {offsets = [0, 0], sizes = [126, 32], strides = [1, 1]} : vector<128x32xbf16> to vector<126x32xbf16>
    %205 = tpu.concatenate %203, %204 in 0 : vector<2x32xbf16>, vector<126x32xbf16> -> vector<128x32xbf16>
    %206 = vector.broadcast %23 : vector<128x1xbf16> to vector<128x32xbf16>
    %207 = arith.mulf %205, %206 : vector<128x32xbf16>
    %208 = vector.extract_strided_slice %185 {offsets = [0, 0, 0], sizes = [1, 32, 32], strides = [1, 1, 1]} : vector<5x32x32xbf16> to vector<1x32x32xbf16>
    %209 = vector.shape_cast %208 : vector<1x32x32xbf16> to vector<32x32xbf16>
    %cst_68 = arith.constant dense<0.000000e+00> : vector<128x32xf32>
    %210 = tpu.matmul %207, %209, %cst_68 {dimension_numbers = #tpu.dot_dimension_numbers<[1], [0], [0], [1], [0, 0, 1, 1], [], []>} : vector<128x32xbf16>, vector<32x32xbf16>, vector<128x32xf32> -> vector<128x32xf32>
    %cst_69 = arith.constant 0.000000e+00 : bf16
    %211 = vector.broadcast %cst_69 : bf16 to vector<1x32xbf16>
    %212 = vector.extract_strided_slice %202 {offsets = [0, 0], sizes = [127, 32], strides = [1, 1]} : vector<128x32xbf16> to vector<127x32xbf16>
    %213 = tpu.concatenate %211, %212 in 0 : vector<1x32xbf16>, vector<127x32xbf16> -> vector<128x32xbf16>
    %214 = vector.broadcast %35 : vector<128x1xbf16> to vector<128x32xbf16>
    %215 = arith.mulf %213, %214 : vector<128x32xbf16>
    %216 = vector.extract_strided_slice %185 {offsets = [1, 0, 0], sizes = [1, 32, 32], strides = [1, 1, 1]} : vector<5x32x32xbf16> to vector<1x32x32xbf16>
    %217 = vector.shape_cast %216 : vector<1x32x32xbf16> to vector<32x32xbf16>
    %cst_70 = arith.constant dense<0.000000e+00> : vector<128x32xf32>
    %218 = tpu.matmul %215, %217, %cst_70 {dimension_numbers = #tpu.dot_dimension_numbers<[1], [0], [0], [1], [0, 0, 1, 1], [], []>} : vector<128x32xbf16>, vector<32x32xbf16>, vector<128x32xf32> -> vector<128x32xf32>
    %219 = arith.addf %210, %218 : vector<128x32xf32>
    %220 = vector.extract_strided_slice %185 {offsets = [2, 0, 0], sizes = [1, 32, 32], strides = [1, 1, 1]} : vector<5x32x32xbf16> to vector<1x32x32xbf16>
    %221 = vector.shape_cast %220 : vector<1x32x32xbf16> to vector<32x32xbf16>
    %cst_71 = arith.constant dense<0.000000e+00> : vector<128x32xf32>
    %222 = tpu.matmul %202, %221, %cst_71 {dimension_numbers = #tpu.dot_dimension_numbers<[1], [0], [0], [1], [0, 0, 1, 1], [], []>} : vector<128x32xbf16>, vector<32x32xbf16>, vector<128x32xf32> -> vector<128x32xf32>
    %223 = arith.addf %219, %222 : vector<128x32xf32>
    %cst_72 = arith.constant 0.000000e+00 : bf16
    %224 = vector.broadcast %cst_72 : bf16 to vector<1x32xbf16>
    %225 = vector.extract_strided_slice %202 {offsets = [1, 0], sizes = [127, 32], strides = [1, 1]} : vector<128x32xbf16> to vector<127x32xbf16>
    %226 = tpu.concatenate %225, %224 in 0 : vector<127x32xbf16>, vector<1x32xbf16> -> vector<128x32xbf16>
    %227 = vector.broadcast %47 : vector<128x1xbf16> to vector<128x32xbf16>
    %228 = arith.mulf %226, %227 : vector<128x32xbf16>
    %229 = vector.extract_strided_slice %185 {offsets = [3, 0, 0], sizes = [1, 32, 32], strides = [1, 1, 1]} : vector<5x32x32xbf16> to vector<1x32x32xbf16>
    %230 = vector.shape_cast %229 : vector<1x32x32xbf16> to vector<32x32xbf16>
    %cst_73 = arith.constant dense<0.000000e+00> : vector<128x32xf32>
    %231 = tpu.matmul %228, %230, %cst_73 {dimension_numbers = #tpu.dot_dimension_numbers<[1], [0], [0], [1], [0, 0, 1, 1], [], []>} : vector<128x32xbf16>, vector<32x32xbf16>, vector<128x32xf32> -> vector<128x32xf32>
    %232 = arith.addf %223, %231 : vector<128x32xf32>
    %cst_74 = arith.constant 0.000000e+00 : bf16
    %233 = vector.broadcast %cst_74 : bf16 to vector<2x32xbf16>
    %234 = vector.extract_strided_slice %202 {offsets = [2, 0], sizes = [126, 32], strides = [1, 1]} : vector<128x32xbf16> to vector<126x32xbf16>
    %235 = tpu.concatenate %234, %233 in 0 : vector<126x32xbf16>, vector<2x32xbf16> -> vector<128x32xbf16>
    %236 = vector.broadcast %59 : vector<128x1xbf16> to vector<128x32xbf16>
    %237 = arith.mulf %235, %236 : vector<128x32xbf16>
    %238 = vector.extract_strided_slice %185 {offsets = [4, 0, 0], sizes = [1, 32, 32], strides = [1, 1, 1]} : vector<5x32x32xbf16> to vector<1x32x32xbf16>
    %239 = vector.shape_cast %238 : vector<1x32x32xbf16> to vector<32x32xbf16>
    %cst_75 = arith.constant dense<0.000000e+00> : vector<128x32xf32>
    %240 = tpu.matmul %237, %239, %cst_75 {dimension_numbers = #tpu.dot_dimension_numbers<[1], [0], [0], [1], [0, 0, 1, 1], [], []>} : vector<128x32xbf16>, vector<32x32xbf16>, vector<128x32xf32> -> vector<128x32xf32>
    %241 = arith.addf %232, %240 : vector<128x32xf32>
    %242 = vector.broadcast %187 : vector<1x32xf32> to vector<128x32xf32>
    %243 = arith.addf %241, %242 : vector<128x32xf32>
    %cst_76 = arith.constant 0.999994993 : f32
    %244 = vector.broadcast %cst_76 : f32 to vector<128x32xf32>
    %245 = arith.mulf %243, %244 : vector<128x32xf32>
    %246 = arith.negf %245 : vector<128x32xf32>
    %247 = math.exp %246 : vector<128x32xf32>
    %cst_77 = arith.constant 1.000000e+00 : f32
    %248 = vector.broadcast %cst_77 : f32 to vector<128x32xf32>
    %249 = arith.addf %248, %247 : vector<128x32xf32>
    %250 = arith.divf %248, %249 : vector<128x32xf32>
    %251 = arith.mulf %245, %250 : vector<128x32xf32>
    %252 = vector.broadcast %6 : vector<128x1xf32> to vector<128x32xf32>
    %253 = arith.mulf %251, %252 : vector<128x32xf32>
    %254 = arith.truncf %253 : vector<128x32xf32> to vector<128x32xbf16>
    %cst_78 = arith.constant 0.000000e+00 : bf16
    %255 = vector.broadcast %cst_78 : bf16 to vector<2x32xbf16>
    %256 = vector.extract_strided_slice %254 {offsets = [0, 0], sizes = [126, 32], strides = [1, 1]} : vector<128x32xbf16> to vector<126x32xbf16>
    %257 = tpu.concatenate %255, %256 in 0 : vector<2x32xbf16>, vector<126x32xbf16> -> vector<128x32xbf16>
    %258 = vector.broadcast %23 : vector<128x1xbf16> to vector<128x32xbf16>
    %259 = arith.mulf %257, %258 : vector<128x32xbf16>
    %260 = vector.extract_strided_slice %189 {offsets = [0, 0, 0], sizes = [1, 32, 32], strides = [1, 1, 1]} : vector<5x32x32xbf16> to vector<1x32x32xbf16>
    %261 = vector.shape_cast %260 : vector<1x32x32xbf16> to vector<32x32xbf16>
    %cst_79 = arith.constant dense<0.000000e+00> : vector<128x32xf32>
    %262 = tpu.matmul %259, %261, %cst_79 {dimension_numbers = #tpu.dot_dimension_numbers<[1], [0], [0], [1], [0, 0, 1, 1], [], []>} : vector<128x32xbf16>, vector<32x32xbf16>, vector<128x32xf32> -> vector<128x32xf32>
    %cst_80 = arith.constant 0.000000e+00 : bf16
    %263 = vector.broadcast %cst_80 : bf16 to vector<1x32xbf16>
    %264 = vector.extract_strided_slice %254 {offsets = [0, 0], sizes = [127, 32], strides = [1, 1]} : vector<128x32xbf16> to vector<127x32xbf16>
    %265 = tpu.concatenate %263, %264 in 0 : vector<1x32xbf16>, vector<127x32xbf16> -> vector<128x32xbf16>
    %266 = vector.broadcast %35 : vector<128x1xbf16> to vector<128x32xbf16>
    %267 = arith.mulf %265, %266 : vector<128x32xbf16>
    %268 = vector.extract_strided_slice %189 {offsets = [1, 0, 0], sizes = [1, 32, 32], strides = [1, 1, 1]} : vector<5x32x32xbf16> to vector<1x32x32xbf16>
    %269 = vector.shape_cast %268 : vector<1x32x32xbf16> to vector<32x32xbf16>
    %cst_81 = arith.constant dense<0.000000e+00> : vector<128x32xf32>
    %270 = tpu.matmul %267, %269, %cst_81 {dimension_numbers = #tpu.dot_dimension_numbers<[1], [0], [0], [1], [0, 0, 1, 1], [], []>} : vector<128x32xbf16>, vector<32x32xbf16>, vector<128x32xf32> -> vector<128x32xf32>
    %271 = arith.addf %262, %270 : vector<128x32xf32>
    %272 = vector.extract_strided_slice %189 {offsets = [2, 0, 0], sizes = [1, 32, 32], strides = [1, 1, 1]} : vector<5x32x32xbf16> to vector<1x32x32xbf16>
    %273 = vector.shape_cast %272 : vector<1x32x32xbf16> to vector<32x32xbf16>
    %cst_82 = arith.constant dense<0.000000e+00> : vector<128x32xf32>
    %274 = tpu.matmul %254, %273, %cst_82 {dimension_numbers = #tpu.dot_dimension_numbers<[1], [0], [0], [1], [0, 0, 1, 1], [], []>} : vector<128x32xbf16>, vector<32x32xbf16>, vector<128x32xf32> -> vector<128x32xf32>
    %275 = arith.addf %271, %274 : vector<128x32xf32>
    %cst_83 = arith.constant 0.000000e+00 : bf16
    %276 = vector.broadcast %cst_83 : bf16 to vector<1x32xbf16>
    %277 = vector.extract_strided_slice %254 {offsets = [1, 0], sizes = [127, 32], strides = [1, 1]} : vector<128x32xbf16> to vector<127x32xbf16>
    %278 = tpu.concatenate %277, %276 in 0 : vector<127x32xbf16>, vector<1x32xbf16> -> vector<128x32xbf16>
    %279 = vector.broadcast %47 : vector<128x1xbf16> to vector<128x32xbf16>
    %280 = arith.mulf %278, %279 : vector<128x32xbf16>
    %281 = vector.extract_strided_slice %189 {offsets = [3, 0, 0], sizes = [1, 32, 32], strides = [1, 1, 1]} : vector<5x32x32xbf16> to vector<1x32x32xbf16>
    %282 = vector.shape_cast %281 : vector<1x32x32xbf16> to vector<32x32xbf16>
    %cst_84 = arith.constant dense<0.000000e+00> : vector<128x32xf32>
    %283 = tpu.matmul %280, %282, %cst_84 {dimension_numbers = #tpu.dot_dimension_numbers<[1], [0], [0], [1], [0, 0, 1, 1], [], []>} : vector<128x32xbf16>, vector<32x32xbf16>, vector<128x32xf32> -> vector<128x32xf32>
    %284 = arith.addf %275, %283 : vector<128x32xf32>
    %cst_85 = arith.constant 0.000000e+00 : bf16
    %285 = vector.broadcast %cst_85 : bf16 to vector<2x32xbf16>
    %286 = vector.extract_strided_slice %254 {offsets = [2, 0], sizes = [126, 32], strides = [1, 1]} : vector<128x32xbf16> to vector<126x32xbf16>
    %287 = tpu.concatenate %286, %285 in 0 : vector<126x32xbf16>, vector<2x32xbf16> -> vector<128x32xbf16>
    %288 = vector.broadcast %59 : vector<128x1xbf16> to vector<128x32xbf16>
    %289 = arith.mulf %287, %288 : vector<128x32xbf16>
    %290 = vector.extract_strided_slice %189 {offsets = [4, 0, 0], sizes = [1, 32, 32], strides = [1, 1, 1]} : vector<5x32x32xbf16> to vector<1x32x32xbf16>
    %291 = vector.shape_cast %290 : vector<1x32x32xbf16> to vector<32x32xbf16>
    %cst_86 = arith.constant dense<0.000000e+00> : vector<128x32xf32>
    %292 = tpu.matmul %289, %291, %cst_86 {dimension_numbers = #tpu.dot_dimension_numbers<[1], [0], [0], [1], [0, 0, 1, 1], [], []>} : vector<128x32xbf16>, vector<32x32xbf16>, vector<128x32xf32> -> vector<128x32xf32>
    %293 = arith.addf %284, %292 : vector<128x32xf32>
    %294 = vector.broadcast %191 : vector<1x32xf32> to vector<128x32xf32>
    %295 = arith.addf %293, %294 : vector<128x32xf32>
    %296 = arith.addf %295, %183 : vector<128x32xf32>
    %c0_87 = arith.constant 0 : index
    %c0_88 = arith.constant 0 : index
    %c0_89 = arith.constant 0 : index
    %297 = vector.load %arg6[%c0_87, %c0_88, %c0_89] : memref<5x32x8xbf16, #tpu.memory_space<vmem>>, vector<5x32x8xbf16>
    %c0_90 = arith.constant 0 : index
    %c0_91 = arith.constant 0 : index
    %298 = vector.load %arg7[%c0_90, %c0_91] : memref<1x8xf32, #tpu.memory_space<vmem>>, vector<1x8xf32>
    %c0_92 = arith.constant 0 : index
    %c0_93 = arith.constant 0 : index
    %c0_94 = arith.constant 0 : index
    %c0_95 = arith.constant 0 : index
    %299 = vector.load %arg8[%c0_92, %c0_93, %c0_94, %c0_95] : memref<3x5x8x8xbf16, #tpu.memory_space<vmem>>, vector<1x5x8x8xbf16>
    %300 = vector.shape_cast %299 : vector<1x5x8x8xbf16> to vector<5x8x8xbf16>
    %c0_96 = arith.constant 0 : index
    %c0_97 = arith.constant 0 : index
    %c0_98 = arith.constant 0 : index
    %301 = vector.load %arg9[%c0_96, %c0_97, %c0_98] : memref<3x1x8xf32, #tpu.memory_space<vmem>>, vector<1x1x8xf32>
    %302 = vector.shape_cast %301 : vector<1x1x8xf32> to vector<1x8xf32>
    %c0_99 = arith.constant 0 : index
    %c0_100 = arith.constant 0 : index
    %303 = vector.load %arg10[%c0_99, %c0_100] : memref<32x8xbf16, #tpu.memory_space<vmem>>, vector<32x8xbf16>
    %c0_101 = arith.constant 0 : index
    %c0_102 = arith.constant 0 : index
    %304 = vector.load %arg11[%c0_101, %c0_102] : memref<1x8xf32, #tpu.memory_space<vmem>>, vector<1x8xf32>
    %cst_103 = arith.constant 0.999994993 : f32
    %305 = vector.broadcast %cst_103 : f32 to vector<128x32xf32>
    %306 = arith.mulf %296, %305 : vector<128x32xf32>
    %307 = arith.negf %306 : vector<128x32xf32>
    %308 = math.exp %307 : vector<128x32xf32>
    %cst_104 = arith.constant 1.000000e+00 : f32
    %309 = vector.broadcast %cst_104 : f32 to vector<128x32xf32>
    %310 = arith.addf %309, %308 : vector<128x32xf32>
    %311 = arith.divf %309, %310 : vector<128x32xf32>
    %312 = arith.mulf %306, %311 : vector<128x32xf32>
    %313 = vector.broadcast %6 : vector<128x1xf32> to vector<128x32xf32>
    %314 = arith.mulf %312, %313 : vector<128x32xf32>
    %315 = arith.truncf %314 : vector<128x32xf32> to vector<128x32xbf16>
    %cst_105 = arith.constant 0.000000e+00 : bf16
    %316 = vector.broadcast %cst_105 : bf16 to vector<2x32xbf16>
    %317 = vector.extract_strided_slice %315 {offsets = [0, 0], sizes = [126, 32], strides = [1, 1]} : vector<128x32xbf16> to vector<126x32xbf16>
    %318 = tpu.concatenate %316, %317 in 0 : vector<2x32xbf16>, vector<126x32xbf16> -> vector<128x32xbf16>
    %319 = vector.broadcast %23 : vector<128x1xbf16> to vector<128x32xbf16>
    %320 = arith.mulf %318, %319 : vector<128x32xbf16>
    %321 = vector.extract_strided_slice %297 {offsets = [0, 0, 0], sizes = [1, 32, 8], strides = [1, 1, 1]} : vector<5x32x8xbf16> to vector<1x32x8xbf16>
    %322 = vector.shape_cast %321 : vector<1x32x8xbf16> to vector<32x8xbf16>
    %cst_106 = arith.constant dense<0.000000e+00> : vector<128x8xf32>
    %323 = tpu.matmul %320, %322, %cst_106 {dimension_numbers = #tpu.dot_dimension_numbers<[1], [0], [0], [1], [0, 0, 1, 1], [], []>} : vector<128x32xbf16>, vector<32x8xbf16>, vector<128x8xf32> -> vector<128x8xf32>
    %cst_107 = arith.constant 0.000000e+00 : bf16
    %324 = vector.broadcast %cst_107 : bf16 to vector<1x32xbf16>
    %325 = vector.extract_strided_slice %315 {offsets = [0, 0], sizes = [127, 32], strides = [1, 1]} : vector<128x32xbf16> to vector<127x32xbf16>
    %326 = tpu.concatenate %324, %325 in 0 : vector<1x32xbf16>, vector<127x32xbf16> -> vector<128x32xbf16>
    %327 = vector.broadcast %35 : vector<128x1xbf16> to vector<128x32xbf16>
    %328 = arith.mulf %326, %327 : vector<128x32xbf16>
    %329 = vector.extract_strided_slice %297 {offsets = [1, 0, 0], sizes = [1, 32, 8], strides = [1, 1, 1]} : vector<5x32x8xbf16> to vector<1x32x8xbf16>
    %330 = vector.shape_cast %329 : vector<1x32x8xbf16> to vector<32x8xbf16>
    %cst_108 = arith.constant dense<0.000000e+00> : vector<128x8xf32>
    %331 = tpu.matmul %328, %330, %cst_108 {dimension_numbers = #tpu.dot_dimension_numbers<[1], [0], [0], [1], [0, 0, 1, 1], [], []>} : vector<128x32xbf16>, vector<32x8xbf16>, vector<128x8xf32> -> vector<128x8xf32>
    %332 = arith.addf %323, %331 : vector<128x8xf32>
    %333 = vector.extract_strided_slice %297 {offsets = [2, 0, 0], sizes = [1, 32, 8], strides = [1, 1, 1]} : vector<5x32x8xbf16> to vector<1x32x8xbf16>
    %334 = vector.shape_cast %333 : vector<1x32x8xbf16> to vector<32x8xbf16>
    %cst_109 = arith.constant dense<0.000000e+00> : vector<128x8xf32>
    %335 = tpu.matmul %315, %334, %cst_109 {dimension_numbers = #tpu.dot_dimension_numbers<[1], [0], [0], [1], [0, 0, 1, 1], [], []>} : vector<128x32xbf16>, vector<32x8xbf16>, vector<128x8xf32> -> vector<128x8xf32>
    %336 = arith.addf %332, %335 : vector<128x8xf32>
    %cst_110 = arith.constant 0.000000e+00 : bf16
    %337 = vector.broadcast %cst_110 : bf16 to vector<1x32xbf16>
    %338 = vector.extract_strided_slice %315 {offsets = [1, 0], sizes = [127, 32], strides = [1, 1]} : vector<128x32xbf16> to vector<127x32xbf16>
    %339 = tpu.concatenate %338, %337 in 0 : vector<127x32xbf16>, vector<1x32xbf16> -> vector<128x32xbf16>
    %340 = vector.broadcast %47 : vector<128x1xbf16> to vector<128x32xbf16>
    %341 = arith.mulf %339, %340 : vector<128x32xbf16>
    %342 = vector.extract_strided_slice %297 {offsets = [3, 0, 0], sizes = [1, 32, 8], strides = [1, 1, 1]} : vector<5x32x8xbf16> to vector<1x32x8xbf16>
    %343 = vector.shape_cast %342 : vector<1x32x8xbf16> to vector<32x8xbf16>
    %cst_111 = arith.constant dense<0.000000e+00> : vector<128x8xf32>
    %344 = tpu.matmul %341, %343, %cst_111 {dimension_numbers = #tpu.dot_dimension_numbers<[1], [0], [0], [1], [0, 0, 1, 1], [], []>} : vector<128x32xbf16>, vector<32x8xbf16>, vector<128x8xf32> -> vector<128x8xf32>
    %345 = arith.addf %336, %344 : vector<128x8xf32>
    %cst_112 = arith.constant 0.000000e+00 : bf16
    %346 = vector.broadcast %cst_112 : bf16 to vector<2x32xbf16>
    %347 = vector.extract_strided_slice %315 {offsets = [2, 0], sizes = [126, 32], strides = [1, 1]} : vector<128x32xbf16> to vector<126x32xbf16>
    %348 = tpu.concatenate %347, %346 in 0 : vector<126x32xbf16>, vector<2x32xbf16> -> vector<128x32xbf16>
    %349 = vector.broadcast %59 : vector<128x1xbf16> to vector<128x32xbf16>
    %350 = arith.mulf %348, %349 : vector<128x32xbf16>
    %351 = vector.extract_strided_slice %297 {offsets = [4, 0, 0], sizes = [1, 32, 8], strides = [1, 1, 1]} : vector<5x32x8xbf16> to vector<1x32x8xbf16>
    %352 = vector.shape_cast %351 : vector<1x32x8xbf16> to vector<32x8xbf16>
    %cst_113 = arith.constant dense<0.000000e+00> : vector<128x8xf32>
    %353 = tpu.matmul %350, %352, %cst_113 {dimension_numbers = #tpu.dot_dimension_numbers<[1], [0], [0], [1], [0, 0, 1, 1], [], []>} : vector<128x32xbf16>, vector<32x8xbf16>, vector<128x8xf32> -> vector<128x8xf32>
    %354 = arith.addf %345, %353 : vector<128x8xf32>
    %355 = vector.broadcast %298 : vector<1x8xf32> to vector<128x8xf32>
    %356 = arith.addf %354, %355 : vector<128x8xf32>
    %cst_114 = arith.constant 0.999994993 : f32
    %357 = vector.broadcast %cst_114 : f32 to vector<128x8xf32>
    %358 = arith.mulf %356, %357 : vector<128x8xf32>
    %359 = arith.negf %358 : vector<128x8xf32>
    %360 = math.exp %359 : vector<128x8xf32>
    %cst_115 = arith.constant 1.000000e+00 : f32
    %361 = vector.broadcast %cst_115 : f32 to vector<128x8xf32>
    %362 = arith.addf %361, %360 : vector<128x8xf32>
    %363 = arith.divf %361, %362 : vector<128x8xf32>
    %364 = arith.mulf %358, %363 : vector<128x8xf32>
    %365 = vector.broadcast %6 : vector<128x1xf32> to vector<128x8xf32>
    %366 = arith.mulf %364, %365 : vector<128x8xf32>
    %367 = arith.truncf %366 : vector<128x8xf32> to vector<128x8xbf16>
    %cst_116 = arith.constant 0.000000e+00 : bf16
    %368 = vector.broadcast %cst_116 : bf16 to vector<2x8xbf16>
    %369 = vector.extract_strided_slice %367 {offsets = [0, 0], sizes = [126, 8], strides = [1, 1]} : vector<128x8xbf16> to vector<126x8xbf16>
    %370 = tpu.concatenate %368, %369 in 0 : vector<2x8xbf16>, vector<126x8xbf16> -> vector<128x8xbf16>
    %371 = vector.broadcast %23 : vector<128x1xbf16> to vector<128x8xbf16>
    %372 = arith.mulf %370, %371 : vector<128x8xbf16>
    %373 = vector.extract_strided_slice %300 {offsets = [0, 0, 0], sizes = [1, 8, 8], strides = [1, 1, 1]} : vector<5x8x8xbf16> to vector<1x8x8xbf16>
    %374 = vector.shape_cast %373 : vector<1x8x8xbf16> to vector<8x8xbf16>
    %cst_117 = arith.constant dense<0.000000e+00> : vector<128x8xf32>
    %375 = tpu.matmul %372, %374, %cst_117 {dimension_numbers = #tpu.dot_dimension_numbers<[1], [0], [0], [1], [0, 0, 1, 1], [], []>} : vector<128x8xbf16>, vector<8x8xbf16>, vector<128x8xf32> -> vector<128x8xf32>
    %cst_118 = arith.constant 0.000000e+00 : bf16
    %376 = vector.broadcast %cst_118 : bf16 to vector<1x8xbf16>
    %377 = vector.extract_strided_slice %367 {offsets = [0, 0], sizes = [127, 8], strides = [1, 1]} : vector<128x8xbf16> to vector<127x8xbf16>
    %378 = tpu.concatenate %376, %377 in 0 : vector<1x8xbf16>, vector<127x8xbf16> -> vector<128x8xbf16>
    %379 = vector.broadcast %35 : vector<128x1xbf16> to vector<128x8xbf16>
    %380 = arith.mulf %378, %379 : vector<128x8xbf16>
    %381 = vector.extract_strided_slice %300 {offsets = [1, 0, 0], sizes = [1, 8, 8], strides = [1, 1, 1]} : vector<5x8x8xbf16> to vector<1x8x8xbf16>
    %382 = vector.shape_cast %381 : vector<1x8x8xbf16> to vector<8x8xbf16>
    %cst_119 = arith.constant dense<0.000000e+00> : vector<128x8xf32>
    %383 = tpu.matmul %380, %382, %cst_119 {dimension_numbers = #tpu.dot_dimension_numbers<[1], [0], [0], [1], [0, 0, 1, 1], [], []>} : vector<128x8xbf16>, vector<8x8xbf16>, vector<128x8xf32> -> vector<128x8xf32>
    %384 = arith.addf %375, %383 : vector<128x8xf32>
    %385 = vector.extract_strided_slice %300 {offsets = [2, 0, 0], sizes = [1, 8, 8], strides = [1, 1, 1]} : vector<5x8x8xbf16> to vector<1x8x8xbf16>
    %386 = vector.shape_cast %385 : vector<1x8x8xbf16> to vector<8x8xbf16>
    %cst_120 = arith.constant dense<0.000000e+00> : vector<128x8xf32>
    %387 = tpu.matmul %367, %386, %cst_120 {dimension_numbers = #tpu.dot_dimension_numbers<[1], [0], [0], [1], [0, 0, 1, 1], [], []>} : vector<128x8xbf16>, vector<8x8xbf16>, vector<128x8xf32> -> vector<128x8xf32>
    %388 = arith.addf %384, %387 : vector<128x8xf32>
    %cst_121 = arith.constant 0.000000e+00 : bf16
    %389 = vector.broadcast %cst_121 : bf16 to vector<1x8xbf16>
    %390 = vector.extract_strided_slice %367 {offsets = [1, 0], sizes = [127, 8], strides = [1, 1]} : vector<128x8xbf16> to vector<127x8xbf16>
    %391 = tpu.concatenate %390, %389 in 0 : vector<127x8xbf16>, vector<1x8xbf16> -> vector<128x8xbf16>
    %392 = vector.broadcast %47 : vector<128x1xbf16> to vector<128x8xbf16>
    %393 = arith.mulf %391, %392 : vector<128x8xbf16>
    %394 = vector.extract_strided_slice %300 {offsets = [3, 0, 0], sizes = [1, 8, 8], strides = [1, 1, 1]} : vector<5x8x8xbf16> to vector<1x8x8xbf16>
    %395 = vector.shape_cast %394 : vector<1x8x8xbf16> to vector<8x8xbf16>
    %cst_122 = arith.constant dense<0.000000e+00> : vector<128x8xf32>
    %396 = tpu.matmul %393, %395, %cst_122 {dimension_numbers = #tpu.dot_dimension_numbers<[1], [0], [0], [1], [0, 0, 1, 1], [], []>} : vector<128x8xbf16>, vector<8x8xbf16>, vector<128x8xf32> -> vector<128x8xf32>
    %397 = arith.addf %388, %396 : vector<128x8xf32>
    %cst_123 = arith.constant 0.000000e+00 : bf16
    %398 = vector.broadcast %cst_123 : bf16 to vector<2x8xbf16>
    %399 = vector.extract_strided_slice %367 {offsets = [2, 0], sizes = [126, 8], strides = [1, 1]} : vector<128x8xbf16> to vector<126x8xbf16>
    %400 = tpu.concatenate %399, %398 in 0 : vector<126x8xbf16>, vector<2x8xbf16> -> vector<128x8xbf16>
    %401 = vector.broadcast %59 : vector<128x1xbf16> to vector<128x8xbf16>
    %402 = arith.mulf %400, %401 : vector<128x8xbf16>
    %403 = vector.extract_strided_slice %300 {offsets = [4, 0, 0], sizes = [1, 8, 8], strides = [1, 1, 1]} : vector<5x8x8xbf16> to vector<1x8x8xbf16>
    %404 = vector.shape_cast %403 : vector<1x8x8xbf16> to vector<8x8xbf16>
    %cst_124 = arith.constant dense<0.000000e+00> : vector<128x8xf32>
    %405 = tpu.matmul %402, %404, %cst_124 {dimension_numbers = #tpu.dot_dimension_numbers<[1], [0], [0], [1], [0, 0, 1, 1], [], []>} : vector<128x8xbf16>, vector<8x8xbf16>, vector<128x8xf32> -> vector<128x8xf32>
    %406 = arith.addf %397, %405 : vector<128x8xf32>
    %407 = vector.broadcast %302 : vector<1x8xf32> to vector<128x8xf32>
    %408 = arith.addf %406, %407 : vector<128x8xf32>
    %409 = vector.broadcast %6 : vector<128x1xf32> to vector<128x32xf32>
    %410 = arith.mulf %296, %409 : vector<128x32xf32>
    %411 = arith.truncf %410 : vector<128x32xf32> to vector<128x32xbf16>
    %cst_125 = arith.constant dense<0.000000e+00> : vector<128x8xf32>
    %412 = tpu.matmul %411, %303, %cst_125 {dimension_numbers = #tpu.dot_dimension_numbers<[1], [0], [0], [1], [0, 0, 1, 1], [], []>} : vector<128x32xbf16>, vector<32x8xbf16>, vector<128x8xf32> -> vector<128x8xf32>
    %413 = vector.broadcast %304 : vector<1x8xf32> to vector<128x8xf32>
    %414 = arith.addf %412, %413 : vector<128x8xf32>
    %415 = arith.addf %408, %414 : vector<128x8xf32>
    %c1_126 = arith.constant 1 : index
    %c0_127 = arith.constant 0 : index
    %c0_128 = arith.constant 0 : index
    %c0_129 = arith.constant 0 : index
    %416 = vector.load %arg8[%c1_126, %c0_127, %c0_128, %c0_129] : memref<3x5x8x8xbf16, #tpu.memory_space<vmem>>, vector<1x5x8x8xbf16>
    %417 = vector.shape_cast %416 : vector<1x5x8x8xbf16> to vector<5x8x8xbf16>
    %c1_130 = arith.constant 1 : index
    %c0_131 = arith.constant 0 : index
    %c0_132 = arith.constant 0 : index
    %418 = vector.load %arg9[%c1_130, %c0_131, %c0_132] : memref<3x1x8xf32, #tpu.memory_space<vmem>>, vector<1x1x8xf32>
    %419 = vector.shape_cast %418 : vector<1x1x8xf32> to vector<1x8xf32>
    %c2_133 = arith.constant 2 : index
    %c0_134 = arith.constant 0 : index
    %c0_135 = arith.constant 0 : index
    %c0_136 = arith.constant 0 : index
    %420 = vector.load %arg8[%c2_133, %c0_134, %c0_135, %c0_136] : memref<3x5x8x8xbf16, #tpu.memory_space<vmem>>, vector<1x5x8x8xbf16>
    %421 = vector.shape_cast %420 : vector<1x5x8x8xbf16> to vector<5x8x8xbf16>
    %c2_137 = arith.constant 2 : index
    %c0_138 = arith.constant 0 : index
    %c0_139 = arith.constant 0 : index
    %422 = vector.load %arg9[%c2_137, %c0_138, %c0_139] : memref<3x1x8xf32, #tpu.memory_space<vmem>>, vector<1x1x8xf32>
    %423 = vector.shape_cast %422 : vector<1x1x8xf32> to vector<1x8xf32>
    %cst_140 = arith.constant 0.999994993 : f32
    %424 = vector.broadcast %cst_140 : f32 to vector<128x8xf32>
    %425 = arith.mulf %415, %424 : vector<128x8xf32>
    %426 = arith.negf %425 : vector<128x8xf32>
    %427 = math.exp %426 : vector<128x8xf32>
    %cst_141 = arith.constant 1.000000e+00 : f32
    %428 = vector.broadcast %cst_141 : f32 to vector<128x8xf32>
    %429 = arith.addf %428, %427 : vector<128x8xf32>
    %430 = arith.divf %428, %429 : vector<128x8xf32>
    %431 = arith.mulf %425, %430 : vector<128x8xf32>
    %432 = vector.broadcast %6 : vector<128x1xf32> to vector<128x8xf32>
    %433 = arith.mulf %431, %432 : vector<128x8xf32>
    %434 = arith.truncf %433 : vector<128x8xf32> to vector<128x8xbf16>
    %cst_142 = arith.constant 0.000000e+00 : bf16
    %435 = vector.broadcast %cst_142 : bf16 to vector<2x8xbf16>
    %436 = vector.extract_strided_slice %434 {offsets = [0, 0], sizes = [126, 8], strides = [1, 1]} : vector<128x8xbf16> to vector<126x8xbf16>
    %437 = tpu.concatenate %435, %436 in 0 : vector<2x8xbf16>, vector<126x8xbf16> -> vector<128x8xbf16>
    %438 = vector.broadcast %23 : vector<128x1xbf16> to vector<128x8xbf16>
    %439 = arith.mulf %437, %438 : vector<128x8xbf16>
    %440 = vector.extract_strided_slice %417 {offsets = [0, 0, 0], sizes = [1, 8, 8], strides = [1, 1, 1]} : vector<5x8x8xbf16> to vector<1x8x8xbf16>
    %441 = vector.shape_cast %440 : vector<1x8x8xbf16> to vector<8x8xbf16>
    %cst_143 = arith.constant dense<0.000000e+00> : vector<128x8xf32>
    %442 = tpu.matmul %439, %441, %cst_143 {dimension_numbers = #tpu.dot_dimension_numbers<[1], [0], [0], [1], [0, 0, 1, 1], [], []>} : vector<128x8xbf16>, vector<8x8xbf16>, vector<128x8xf32> -> vector<128x8xf32>
    %cst_144 = arith.constant 0.000000e+00 : bf16
    %443 = vector.broadcast %cst_144 : bf16 to vector<1x8xbf16>
    %444 = vector.extract_strided_slice %434 {offsets = [0, 0], sizes = [127, 8], strides = [1, 1]} : vector<128x8xbf16> to vector<127x8xbf16>
    %445 = tpu.concatenate %443, %444 in 0 : vector<1x8xbf16>, vector<127x8xbf16> -> vector<128x8xbf16>
    %446 = vector.broadcast %35 : vector<128x1xbf16> to vector<128x8xbf16>
    %447 = arith.mulf %445, %446 : vector<128x8xbf16>
    %448 = vector.extract_strided_slice %417 {offsets = [1, 0, 0], sizes = [1, 8, 8], strides = [1, 1, 1]} : vector<5x8x8xbf16> to vector<1x8x8xbf16>
    %449 = vector.shape_cast %448 : vector<1x8x8xbf16> to vector<8x8xbf16>
    %cst_145 = arith.constant dense<0.000000e+00> : vector<128x8xf32>
    %450 = tpu.matmul %447, %449, %cst_145 {dimension_numbers = #tpu.dot_dimension_numbers<[1], [0], [0], [1], [0, 0, 1, 1], [], []>} : vector<128x8xbf16>, vector<8x8xbf16>, vector<128x8xf32> -> vector<128x8xf32>
    %451 = arith.addf %442, %450 : vector<128x8xf32>
    %452 = vector.extract_strided_slice %417 {offsets = [2, 0, 0], sizes = [1, 8, 8], strides = [1, 1, 1]} : vector<5x8x8xbf16> to vector<1x8x8xbf16>
    %453 = vector.shape_cast %452 : vector<1x8x8xbf16> to vector<8x8xbf16>
    %cst_146 = arith.constant dense<0.000000e+00> : vector<128x8xf32>
    %454 = tpu.matmul %434, %453, %cst_146 {dimension_numbers = #tpu.dot_dimension_numbers<[1], [0], [0], [1], [0, 0, 1, 1], [], []>} : vector<128x8xbf16>, vector<8x8xbf16>, vector<128x8xf32> -> vector<128x8xf32>
    %455 = arith.addf %451, %454 : vector<128x8xf32>
    %cst_147 = arith.constant 0.000000e+00 : bf16
    %456 = vector.broadcast %cst_147 : bf16 to vector<1x8xbf16>
    %457 = vector.extract_strided_slice %434 {offsets = [1, 0], sizes = [127, 8], strides = [1, 1]} : vector<128x8xbf16> to vector<127x8xbf16>
    %458 = tpu.concatenate %457, %456 in 0 : vector<127x8xbf16>, vector<1x8xbf16> -> vector<128x8xbf16>
    %459 = vector.broadcast %47 : vector<128x1xbf16> to vector<128x8xbf16>
    %460 = arith.mulf %458, %459 : vector<128x8xbf16>
    %461 = vector.extract_strided_slice %417 {offsets = [3, 0, 0], sizes = [1, 8, 8], strides = [1, 1, 1]} : vector<5x8x8xbf16> to vector<1x8x8xbf16>
    %462 = vector.shape_cast %461 : vector<1x8x8xbf16> to vector<8x8xbf16>
    %cst_148 = arith.constant dense<0.000000e+00> : vector<128x8xf32>
    %463 = tpu.matmul %460, %462, %cst_148 {dimension_numbers = #tpu.dot_dimension_numbers<[1], [0], [0], [1], [0, 0, 1, 1], [], []>} : vector<128x8xbf16>, vector<8x8xbf16>, vector<128x8xf32> -> vector<128x8xf32>
    %464 = arith.addf %455, %463 : vector<128x8xf32>
    %cst_149 = arith.constant 0.000000e+00 : bf16
    %465 = vector.broadcast %cst_149 : bf16 to vector<2x8xbf16>
    %466 = vector.extract_strided_slice %434 {offsets = [2, 0], sizes = [126, 8], strides = [1, 1]} : vector<128x8xbf16> to vector<126x8xbf16>
    %467 = tpu.concatenate %466, %465 in 0 : vector<126x8xbf16>, vector<2x8xbf16> -> vector<128x8xbf16>
    %468 = vector.broadcast %59 : vector<128x1xbf16> to vector<128x8xbf16>
    %469 = arith.mulf %467, %468 : vector<128x8xbf16>
    %470 = vector.extract_strided_slice %417 {offsets = [4, 0, 0], sizes = [1, 8, 8], strides = [1, 1, 1]} : vector<5x8x8xbf16> to vector<1x8x8xbf16>
    %471 = vector.shape_cast %470 : vector<1x8x8xbf16> to vector<8x8xbf16>
    %cst_150 = arith.constant dense<0.000000e+00> : vector<128x8xf32>
    %472 = tpu.matmul %469, %471, %cst_150 {dimension_numbers = #tpu.dot_dimension_numbers<[1], [0], [0], [1], [0, 0, 1, 1], [], []>} : vector<128x8xbf16>, vector<8x8xbf16>, vector<128x8xf32> -> vector<128x8xf32>
    %473 = arith.addf %464, %472 : vector<128x8xf32>
    %474 = vector.broadcast %419 : vector<1x8xf32> to vector<128x8xf32>
    %475 = arith.addf %473, %474 : vector<128x8xf32>
    %cst_151 = arith.constant 0.999994993 : f32
    %476 = vector.broadcast %cst_151 : f32 to vector<128x8xf32>
    %477 = arith.mulf %475, %476 : vector<128x8xf32>
    %478 = arith.negf %477 : vector<128x8xf32>
    %479 = math.exp %478 : vector<128x8xf32>
    %cst_152 = arith.constant 1.000000e+00 : f32
    %480 = vector.broadcast %cst_152 : f32 to vector<128x8xf32>
    %481 = arith.addf %480, %479 : vector<128x8xf32>
    %482 = arith.divf %480, %481 : vector<128x8xf32>
    %483 = arith.mulf %477, %482 : vector<128x8xf32>
    %484 = vector.broadcast %6 : vector<128x1xf32> to vector<128x8xf32>
    %485 = arith.mulf %483, %484 : vector<128x8xf32>
    %486 = arith.truncf %485 : vector<128x8xf32> to vector<128x8xbf16>
    %cst_153 = arith.constant 0.000000e+00 : bf16
    %487 = vector.broadcast %cst_153 : bf16 to vector<2x8xbf16>
    %488 = vector.extract_strided_slice %486 {offsets = [0, 0], sizes = [126, 8], strides = [1, 1]} : vector<128x8xbf16> to vector<126x8xbf16>
    %489 = tpu.concatenate %487, %488 in 0 : vector<2x8xbf16>, vector<126x8xbf16> -> vector<128x8xbf16>
    %490 = vector.broadcast %23 : vector<128x1xbf16> to vector<128x8xbf16>
    %491 = arith.mulf %489, %490 : vector<128x8xbf16>
    %492 = vector.extract_strided_slice %421 {offsets = [0, 0, 0], sizes = [1, 8, 8], strides = [1, 1, 1]} : vector<5x8x8xbf16> to vector<1x8x8xbf16>
    %493 = vector.shape_cast %492 : vector<1x8x8xbf16> to vector<8x8xbf16>
    %cst_154 = arith.constant dense<0.000000e+00> : vector<128x8xf32>
    %494 = tpu.matmul %491, %493, %cst_154 {dimension_numbers = #tpu.dot_dimension_numbers<[1], [0], [0], [1], [0, 0, 1, 1], [], []>} : vector<128x8xbf16>, vector<8x8xbf16>, vector<128x8xf32> -> vector<128x8xf32>
    %cst_155 = arith.constant 0.000000e+00 : bf16
    %495 = vector.broadcast %cst_155 : bf16 to vector<1x8xbf16>
    %496 = vector.extract_strided_slice %486 {offsets = [0, 0], sizes = [127, 8], strides = [1, 1]} : vector<128x8xbf16> to vector<127x8xbf16>
    %497 = tpu.concatenate %495, %496 in 0 : vector<1x8xbf16>, vector<127x8xbf16> -> vector<128x8xbf16>
    %498 = vector.broadcast %35 : vector<128x1xbf16> to vector<128x8xbf16>
    %499 = arith.mulf %497, %498 : vector<128x8xbf16>
    %500 = vector.extract_strided_slice %421 {offsets = [1, 0, 0], sizes = [1, 8, 8], strides = [1, 1, 1]} : vector<5x8x8xbf16> to vector<1x8x8xbf16>
    %501 = vector.shape_cast %500 : vector<1x8x8xbf16> to vector<8x8xbf16>
    %cst_156 = arith.constant dense<0.000000e+00> : vector<128x8xf32>
    %502 = tpu.matmul %499, %501, %cst_156 {dimension_numbers = #tpu.dot_dimension_numbers<[1], [0], [0], [1], [0, 0, 1, 1], [], []>} : vector<128x8xbf16>, vector<8x8xbf16>, vector<128x8xf32> -> vector<128x8xf32>
    %503 = arith.addf %494, %502 : vector<128x8xf32>
    %504 = vector.extract_strided_slice %421 {offsets = [2, 0, 0], sizes = [1, 8, 8], strides = [1, 1, 1]} : vector<5x8x8xbf16> to vector<1x8x8xbf16>
    %505 = vector.shape_cast %504 : vector<1x8x8xbf16> to vector<8x8xbf16>
    %cst_157 = arith.constant dense<0.000000e+00> : vector<128x8xf32>
    %506 = tpu.matmul %486, %505, %cst_157 {dimension_numbers = #tpu.dot_dimension_numbers<[1], [0], [0], [1], [0, 0, 1, 1], [], []>} : vector<128x8xbf16>, vector<8x8xbf16>, vector<128x8xf32> -> vector<128x8xf32>
    %507 = arith.addf %503, %506 : vector<128x8xf32>
    %cst_158 = arith.constant 0.000000e+00 : bf16
    %508 = vector.broadcast %cst_158 : bf16 to vector<1x8xbf16>
    %509 = vector.extract_strided_slice %486 {offsets = [1, 0], sizes = [127, 8], strides = [1, 1]} : vector<128x8xbf16> to vector<127x8xbf16>
    %510 = tpu.concatenate %509, %508 in 0 : vector<127x8xbf16>, vector<1x8xbf16> -> vector<128x8xbf16>
    %511 = vector.broadcast %47 : vector<128x1xbf16> to vector<128x8xbf16>
    %512 = arith.mulf %510, %511 : vector<128x8xbf16>
    %513 = vector.extract_strided_slice %421 {offsets = [3, 0, 0], sizes = [1, 8, 8], strides = [1, 1, 1]} : vector<5x8x8xbf16> to vector<1x8x8xbf16>
    %514 = vector.shape_cast %513 : vector<1x8x8xbf16> to vector<8x8xbf16>
    %cst_159 = arith.constant dense<0.000000e+00> : vector<128x8xf32>
    %515 = tpu.matmul %512, %514, %cst_159 {dimension_numbers = #tpu.dot_dimension_numbers<[1], [0], [0], [1], [0, 0, 1, 1], [], []>} : vector<128x8xbf16>, vector<8x8xbf16>, vector<128x8xf32> -> vector<128x8xf32>
    %516 = arith.addf %507, %515 : vector<128x8xf32>
    %cst_160 = arith.constant 0.000000e+00 : bf16
    %517 = vector.broadcast %cst_160 : bf16 to vector<2x8xbf16>
    %518 = vector.extract_strided_slice %486 {offsets = [2, 0], sizes = [126, 8], strides = [1, 1]} : vector<128x8xbf16> to vector<126x8xbf16>
    %519 = tpu.concatenate %518, %517 in 0 : vector<126x8xbf16>, vector<2x8xbf16> -> vector<128x8xbf16>
    %520 = vector.broadcast %59 : vector<128x1xbf16> to vector<128x8xbf16>
    %521 = arith.mulf %519, %520 : vector<128x8xbf16>
    %522 = vector.extract_strided_slice %421 {offsets = [4, 0, 0], sizes = [1, 8, 8], strides = [1, 1, 1]} : vector<5x8x8xbf16> to vector<1x8x8xbf16>
    %523 = vector.shape_cast %522 : vector<1x8x8xbf16> to vector<8x8xbf16>
    %cst_161 = arith.constant dense<0.000000e+00> : vector<128x8xf32>
    %524 = tpu.matmul %521, %523, %cst_161 {dimension_numbers = #tpu.dot_dimension_numbers<[1], [0], [0], [1], [0, 0, 1, 1], [], []>} : vector<128x8xbf16>, vector<8x8xbf16>, vector<128x8xf32> -> vector<128x8xf32>
    %525 = arith.addf %516, %524 : vector<128x8xf32>
    %526 = vector.broadcast %423 : vector<1x8xf32> to vector<128x8xf32>
    %527 = arith.addf %525, %526 : vector<128x8xf32>
    %528 = arith.addf %527, %415 : vector<128x8xf32>
    %529 = vector.broadcast %11 : vector<128x1xf32> to vector<128x8xf32>
    %530 = arith.mulf %529, %528 : vector<128x8xf32>
    %531 = vector.shape_cast %530 : vector<128x8xf32> to vector<8x16x8xf32>
    %cst_162 = arith.constant dense<0.000000e+00> : vector<8x8xf32>
    %532 = vector.multi_reduction <add>, %531, %cst_162 [1] : vector<8x16x8xf32> to vector<8x8xf32>
    %533 = vector.shape_cast %11 : vector<128x1xf32> to vector<8x16x1xf32>
    %cst_163 = arith.constant dense<0.000000e+00> : vector<8x1xf32>
    %534 = vector.multi_reduction <add>, %533, %cst_163 [1] : vector<8x16x1xf32> to vector<8x1xf32>
    %cst_164 = arith.constant 9.99999997E-7 : f32
    %535 = vector.broadcast %cst_164 : f32 to vector<8x1xf32>
    %536 = arith.addf %534, %535 : vector<8x1xf32>
    %537 = tpu.reciprocal %536 {approx = true} : vector<8x1xf32> -> vector<8x1xf32>
    %538 = vector.broadcast %537 : vector<8x1xf32> to vector<8x8xf32>
    %539 = arith.mulf %532, %538 : vector<8x8xf32>
    %540 = arith.truncf %539 : vector<8x8xf32> to vector<8x8xbf16>
    %c0_165 = arith.constant 0 : index
    %c0_166 = arith.constant 0 : index
    %541 = vector.load %arg12[%c0_165, %c0_166] : memref<8x1xbf16, #tpu.memory_space<vmem>>, vector<8x1xbf16>
    %cst_167 = arith.constant dense<0.000000e+00> : vector<8x1xf32>
    %542 = tpu.matmul %540, %541, %cst_167 {dimension_numbers = #tpu.dot_dimension_numbers<[1], [0], [0], [1], [0, 0, 1, 1], [], []>} : vector<8x8xbf16>, vector<8x1xbf16>, vector<8x1xf32> -> vector<8x1xf32>
    %c0_168 = arith.constant 0 : index
    %c0_169 = arith.constant 0 : index
    %543 = vector.load %arg13[%c0_168, %c0_169] : memref<1x1xf32, #tpu.memory_space<vmem>>, vector<1x1xf32>
    %544 = vector.broadcast %543 : vector<1x1xf32> to vector<8x1xf32>
    %545 = arith.addf %542, %544 : vector<8x1xf32>
    %c0_170 = arith.constant 0 : index
    %c0_171 = arith.constant 0 : index
    %546 = vector.load %arg14[%c0_170, %c0_171] : memref<8x1xf32, #tpu.memory_space<vmem>>, vector<8x1xf32>
    tpu.vector_store %arg14[%c0_170, %c0_171], %545 {strides = array<i32>} : memref<8x1xf32, #tpu.memory_space<vmem>>, vector<8x1xf32>,
    return
  }
  func.func @transform_0(%arg0: i32) -> (i32, i32) {
    %c0_i32 = arith.constant 0 : i32
    %c0_i32_0 = arith.constant 0 : i32
    return %arg0, %c0_i32 : i32, i32
  }
  func.func @transform_1(%arg0: i32) -> (i32, i32) {
    %c0_i32 = arith.constant 0 : i32
    %c0_i32_0 = arith.constant 0 : i32
    %c0_i32_1 = arith.constant 0 : i32
    return %c0_i32, %c0_i32_0 : i32, i32
  }
  func.func @transform_2(%arg0: i32) -> (i32, i32) {
    %c0_i32 = arith.constant 0 : i32
    %c0_i32_0 = arith.constant 0 : i32
    %c0_i32_1 = arith.constant 0 : i32
    return %c0_i32, %c0_i32_0 : i32, i32
  }
  func.func @transform_3(%arg0: i32) -> (i32, i32, i32, i32) {
    %c0_i32 = arith.constant 0 : i32
    %c0_i32_0 = arith.constant 0 : i32
    %c0_i32_1 = arith.constant 0 : i32
    %c0_i32_2 = arith.constant 0 : i32
    %c0_i32_3 = arith.constant 0 : i32
    return %c0_i32, %c0_i32_0, %c0_i32_1, %c0_i32_2 : i32, i32, i32, i32
  }
  func.func @transform_4(%arg0: i32) -> (i32, i32, i32) {
    %c0_i32 = arith.constant 0 : i32
    %c0_i32_0 = arith.constant 0 : i32
    %c0_i32_1 = arith.constant 0 : i32
    %c0_i32_2 = arith.constant 0 : i32
    return %c0_i32, %c0_i32_0, %c0_i32_1 : i32, i32, i32
  }
  func.func @transform_5(%arg0: i32) -> (i32, i32, i32) {
    %c0_i32 = arith.constant 0 : i32
    %c0_i32_0 = arith.constant 0 : i32
    %c0_i32_1 = arith.constant 0 : i32
    %c0_i32_2 = arith.constant 0 : i32
    return %c0_i32, %c0_i32_0, %c0_i32_1 : i32, i32, i32
  }
  func.func @transform_6(%arg0: i32) -> (i32, i32) {
    %c0_i32 = arith.constant 0 : i32
    %c0_i32_0 = arith.constant 0 : i32
    %c0_i32_1 = arith.constant 0 : i32
    return %c0_i32, %c0_i32_0 : i32, i32
  }
  func.func @transform_7(%arg0: i32) -> (i32, i32, i32, i32) {
    %c0_i32 = arith.constant 0 : i32
    %c0_i32_0 = arith.constant 0 : i32
    %c0_i32_1 = arith.constant 0 : i32
    %c0_i32_2 = arith.constant 0 : i32
    %c0_i32_3 = arith.constant 0 : i32
    return %c0_i32, %c0_i32_0, %c0_i32_1, %c0_i32_2 : i32, i32, i32, i32
  }
  func.func @transform_8(%arg0: i32) -> (i32, i32, i32) {
    %c0_i32 = arith.constant 0 : i32
    %c0_i32_0 = arith.constant 0 : i32
    %c0_i32_1 = arith.constant 0 : i32
    %c0_i32_2 = arith.constant 0 : i32
    return %c0_i32, %c0_i32_0, %c0_i32_1 : i32, i32, i32
  }
  func.func @transform_9(%arg0: i32) -> (i32, i32) {
    %c0_i32 = arith.constant 0 : i32
    %c0_i32_0 = arith.constant 0 : i32
    %c0_i32_1 = arith.constant 0 : i32
    return %c0_i32, %c0_i32_0 : i32, i32
  }
  func.func @transform_10(%arg0: i32) -> (i32, i32) {
    %c0_i32 = arith.constant 0 : i32
    %c0_i32_0 = arith.constant 0 : i32
    %c0_i32_1 = arith.constant 0 : i32
    return %c0_i32, %c0_i32_0 : i32, i32
  }
  func.func @transform_11(%arg0: i32) -> (i32, i32) {
    %c0_i32 = arith.constant 0 : i32
    %c0_i32_0 = arith.constant 0 : i32
    %c0_i32_1 = arith.constant 0 : i32
    return %c0_i32, %c0_i32_0 : i32, i32
  }
  func.func @transform_12(%arg0: i32) -> (i32, i32) {
    %c0_i32 = arith.constant 0 : i32
    %c0_i32_0 = arith.constant 0 : i32
    %c0_i32_1 = arith.constant 0 : i32
    return %c0_i32, %c0_i32_0 : i32, i32
  }
  func.func @transform_13(%arg0: i32) -> (i32, i32) {
    %c0_i32 = arith.constant 0 : i32
    %c0_i32_0 = arith.constant 0 : i32
    return %arg0, %c0_i32 : i32, i32
  }
}

</mosaic_0001>

<bundles_post_ra>
// kernel: tpu_custom_call.1
= control target key start
LH: loop header
LB: loop body
LE: loop exit
PB: predicated region body
PF: predicated region fallthrough
CT: control target
= control target key end

     0   :  { %v13599_v0 = vmov 0   ;;  %v17429_v21 = vmov 0.0   ;;  %v13601_v40 = vmov 1   ;;  %s17415_s0 = inlined_call_operand.vmem [shape: s32[128,2], index: 0, kind: input, shape index: {}]   ;;  %s17416_s1 = inlined_call_operand.vmem [shape: f32[24,32], index: 1, kind: input, shape index: {}]   ;;  %s17417_s3 = inlined_call_operand.vmem [shape: bf16[4,5,32,32], index: 3, kind: input, shape index: {}]   ;;  %s17418_s2 = inlined_call_operand.vmem [shape: f32[128,32], index: 2, kind: input, shape index: {}]   ;;  %s17419_s4 = inlined_call_operand.vmem [shape: f32[4,1,32], index: 4, kind: input, shape index: {}]   ;;  %s17420_s5 = inlined_call_operand.vmem [shape: bf16[5,32,8], index: 5, kind: input, shape index: {}]   ;;  %s17421_s7 = inlined_call_operand.vmem [shape: bf16[3,5,8,8], index: 7, kind: input, shape index: {}]   ;;  %s17422_s6 = inlined_call_operand.vmem [shape: f32[1,8], index: 6, kind: input, shape index: {}]   ;;  %s17423_s9 = inlined_call_operand.vmem [shape: bf16[32,8], index: 9, kind: input, shape index: {}]   ;;  %s17424_s8 = inlined_call_operand.vmem [shape: f32[3,1,8], index: 8, kind: input, shape index: {}]   ;;  %s17425_s10 = inlined_call_operand.vmem [shape: f32[1,8], index: 10, kind: input, shape index: {}]   ;;  %s17426_s11 = inlined_call_operand.vmem [shape: bf16[8,1], index: 11, kind: input, shape index: {}]   ;;  %s17427_s12 = inlined_call_operand.<no memory space> [shape: f32[1,1], index: 12, kind: input, shape index: {}]   ;;  %s17428_s13 = inlined_call_operand.vmem [shape: f32[8,1], index: 13, kind: output, shape index: {}]  }
   0x1   :  { %12952 = vset.pattern.permute.xlu1 %v13599_v0  ;;  %12951 = vset.pattern.permute.xlu0 %v13599_v0  ;;  %v13678_v1 = vld [vmem:[%s17415_s0 + $0x10] sm:$0xff]  ;;  %v13683_v2 = vld [vmem:[%s17415_s0] sm:$0xff]  ;;  %v13690_v3 = vld [vmem:[%s17415_s0 + $0x18] sm:$0xff] }
   0x2   :  { %600 = vperm.xlu1 %12952, %v13678_v1   ;;  %594 = vperm.xlu0 %12951, %v13683_v2   ;;  %v13695_v4 = vld [vmem:[%s17415_s0 + $0x8] sm:$0xff]  ;;  %v689_v5 = vld [vmem:[%s17416_s1] sm:$0xff]  ;;  %v691_v10 = vld [vmem:[%s17416_s1 + $0x10] sm:$0xff]  ;;  %vm65_vm0 = vcmp.ne.s32.totalorder %v13678_v1, 0  ;;  %vm66_vm1 = vcmp.ne.s32.totalorder %v13690_v3, 0  ;;  %vm63_vm2 = vcmp.ne.s32.totalorder %v13683_v2, 0 }
   0x3   :  { %v13705_v6 = vld [vmem:[%s17415_s0 + $0x28] sm:$0xff]  ;;  %v13710_v7 = vld [vmem:[%s17415_s0 + $0x20] sm:$0xff]  ;;  %v13723_v11 = vld [vmem:[%s17415_s0 + $0x38] sm:$0xff]  ;;  %vm64_vm3 = vcmp.ne.s32.totalorder %v13695_v4, 0  ;;  %v13783_v22 = vsel %vm65_vm0, 1.0, %v17429_v21  ;;  %v13786_v23 = vsel %vm66_vm1, 1.0, %v17429_v21 }
   0x4   :  { %v690_v8 = vld [vmem:[%s17416_s1 + $0x8] sm:$0xff]  ;;  %v13728_v12 = vld [vmem:[%s17415_s0 + $0x30] sm:$0xff]  ;;  %v13740_v14 = vld [vmem:[%s17415_s0 + $0x40] sm:$0xff]  ;;  %17605 = vst [vmem:[#allocation3_spill] sm:$0xff] %v13783_v22  ;;  %v13789_v24 = vsel %vm63_vm2, 1.0, %v17429_v21  ;;  %v13792_v25 = vsel %vm64_vm3, 1.0, %v17429_v21  ;;  %v12958_v26 = vpack.i.bf16 %v13786_v23, %v13783_v22 }
   0x5   :  { %v12368_v9 = vpack.c.bf16 %v690_v8, %v689_v5  ;;  %v13735_v13 = vld [vmem:[%s17415_s0 + $0x48] sm:$0xff]  ;;  %v13747_v15 = vld [vmem:[%s17415_s0 + $0x58] sm:$0xff]  ;;  %v13752_v16 = vld [vmem:[%s17415_s0 + $0x50] sm:$0xff]  ;;  %17606 = vst [vmem:[#allocation4_spill] sm:$0xff] %v13786_v23  ;;  %vm69_vm4 = vcmp.ne.s32.totalorder %v13728_v12, 0  ;;  %vm70_vm5 = vcmp.ne.s32.totalorder %v13723_v11, 0  ;;  %v12953_v27 = vpack.i.bf16 %v13792_v25, %v13789_v24 }
   0x6   :  { %603 = vperm.xlu1 %12952, %v13690_v3   ;;  %597 = vperm.xlu0 %12951, %v13695_v4   ;;  %v13759_v17 = vld [vmem:[%s17415_s0 + $0x68] sm:$0xff]  ;;  %v13764_v18 = vld [vmem:[%s17415_s0 + $0x60] sm:$0xff]  ;;  %v13775_v19 = vld [vmem:[%s17415_s0 + $0x78] sm:$0xff]  ;;  %17607 = vst [vmem:[#allocation5_spill] sm:$0xff] %v13789_v24  ;;  %vm67_vm6 = vcmp.ne.s32.totalorder %v13710_v7, 0  ;;  %vm68_vm7 = vcmp.ne.s32.totalorder %v13705_v6, 0 }
   0x7   :  { %12369 = vmatprep.subr.bf16.mxu1 %v12368_v9  ;;  %v13780_v20 = vld [vmem:[%s17415_s0 + $0x70] sm:$0xff]  ;;  %17608 = vst [vmem:[#allocation6_spill] sm:$0xff] %v13792_v25  ;;  %v13805_v28 = vsel %vm69_vm4, 1.0, %v17429_v21  ;;  %v13808_v29 = vsel %vm70_vm5, 1.0, %v17429_v21  ;;  %v13811_v30 = vsel %vm67_vm6, 1.0, %v17429_v21  ;;  %v13814_v31 = vsel %vm68_vm7, 1.0, %v17429_v21 }
   0x8   :  { %12371 = vmatpush3.bf16.msra.mxu1 %v12368_v9  ;;  %17609 = vst [vmem:[#allocation7_spill] sm:$0xff] %v13805_v28  ;;  %17610 = vst [vmem:[#allocation8_spill] sm:$0xff] %v13808_v29  ;;  %v12968_v32 = vpack.i.bf16 %v13808_v29, %v13805_v28  ;;  %v12963_v33 = vpack.i.bf16 %v13814_v31, %v13811_v30  ;;  %v281_v34 = vadd.s32 4294967295, %v13678_v1  ;;  %v282_v35 = vadd.s32 4294967295, %v13690_v3 }
   0x9   :  { %11546 = vmatprep.subr.mxu1 %v691_v10  ;;  %17611 = vst [vmem:[#allocation9_spill] sm:$0xff] %v13811_v30  ;;  %17612 = vst [vmem:[#allocation10_spill] sm:$0xff] %v13814_v31  ;;  %vm71_vm8 = vcmp.ne.s32.totalorder %v13740_v14, 0  ;;  %vm72_vm9 = vcmp.ne.s32.totalorder %v13735_v13, 0  ;;  %v283_v37 = vadd.s32 4294967295, %v13710_v7  ;;  %v284_v38 = vadd.s32 4294967295, %v13705_v6 }
   0xa   :  { %609 = vperm.xlu1 %12952, %v13705_v6   ;;  %606 = vperm.xlu0 %12951, %v13710_v7   ;;  %v13825_v36 = vsel %vm71_vm8, 1.0, %v17429_v21  ;;  %vm297_vm10 = vcmp.ge.s32.totalorder %v281_v34, 0  ;;  %vm298_vm11 = vcmp.ge.s32.totalorder %v282_v35, 0  ;;  %vm313_vm12 = vcmp.lt.s32.totalorder %v281_v34, 16 }
   0xb   :  { %17613 = vst [vmem:[#allocation11_spill] sm:$0xff] %v13825_v36  ;;  %vm314_vm13 = vcmp.lt.s32.totalorder %v282_v35, 16  ;;  %vm329_vm14 = vmand %vm297_vm10, %vm313_vm12  ;;  %v13830_v39 = vsel %vm72_vm9, 1.0, %v17429_v21  ;;  %vm299_vm15 = vcmp.ge.s32.totalorder %v283_v37, 0  ;;  %vm300_vm0 = vcmp.ge.s32.totalorder %v284_v38, 0 }
   0xc   :  { %11547 = vmatpush3.msra.mxu1 %v691_v10  ;;  %17614 = vst [vmem:[#allocation12_spill] sm:$0xff] %v13830_v39  ;;  %vm315_vm1 = vcmp.lt.s32.totalorder %v283_v37, 16  ;;  %vm330_vm2 = vmand %vm298_vm11, %vm314_vm13  ;;  %v10454_v41 = vsel %vm329_vm14, 1.0, %v17429_v21  ;;  %v12976_v42 = vpack.i.bf16 %v13830_v39, %v13825_v36  ;;  %vm316_vm3 = vcmp.lt.s32.totalorder %v284_v38, 16 }
   0xd   :  { %v285_v43 = vadd.s32 4294967295, %v13728_v12  ;;  %v10455_v44 = vsel %vm330_vm2, 1.0, %v17429_v21  ;;  %vm331_vm4 = vmand %vm299_vm15, %vm315_vm1  ;;  %v286_v45 = vadd.s32 4294967295, %v13723_v11  ;;  %v279_v46 = vadd.s32 4294967295, %v13683_v2 }
   0xe   :  { %615 = vperm.xlu1 %12952, %v13723_v11   ;;  %612 = vperm.xlu0 %12951, %v13728_v12   ;;  %v280_v47 = vadd.s32 4294967295, %v13695_v4  ;;  %v376_v48 = vpack.c.bf16 %v10455_v44, %v10454_v41  ;;  %vm332_vm5 = vmand %vm300_vm0, %vm316_vm3  ;;  %v10456_v49 = vsel %vm331_vm4, 1.0, %v17429_v21  ;;  %vm77_vm1 = vcmp.ne.s32.totalorder %v13780_v20, 0 }
   0xf   :  { %vm301_vm6 = vcmp.ge.s32.totalorder %v285_v43, 0  ;;  %vm317_vm7 = vcmp.lt.s32.totalorder %v285_v43, 16  ;;  %v10457_v50 = vsel %vm332_vm5, 1.0, %v17429_v21  ;;  %vm302_vm8 = vcmp.ge.s32.totalorder %v286_v45, 0 }
  0x10   :  { %vm318_vm9 = vcmp.lt.s32.totalorder %v286_v45, 16  ;;  %vm333_vm10 = vmand %vm301_vm6, %vm317_vm7  ;;  %vm295_vm11 = vcmp.ge.s32.totalorder %v279_v46, 0  ;;  %v377_v51 = vpack.c.bf16 %v10457_v50, %v10456_v49  ;;  %vm296_vm13 = vcmp.ge.s32.totalorder %v280_v47, 0 }
  0x11   :  { %vm334_vm12 = vmand %vm302_vm8, %vm318_vm9  ;;  %v13846_v52 = vsel %vm333_vm10, 1.0, %v17429_v21  ;;  %vm311_vm14 = vcmp.lt.s32.totalorder %v279_v46, 16  ;;  %vm312_vm15 = vcmp.lt.s32.totalorder %v280_v47, 16  ;;  %vm78_vm2 = vcmp.ne.s32.totalorder %v13775_v19, 0 }
  0x12   :  { %621 = vperm.xlu1 %12952, %v13735_v13   ;;  %618 = vperm.xlu0 %12951, %v13740_v14   ;;  %v13849_v53 = vsel %vm334_vm12, 1.0, %v17429_v21  ;;  %vm327_vm0 = vmand %vm295_vm11, %vm311_vm14  ;;  %v13857_v56 = vsel %vm77_vm1, 1.0, %v17429_v21  ;;  %v13860_v57 = vsel %vm78_vm2, 1.0, %v17429_v21  ;;  %vm73_vm4 = vcmp.ne.s32.totalorder %v13752_v16, 0 }
  0x13   :  { %v378_v54 = vpack.c.bf16 %v13849_v53, %v13846_v52  ;;  %vm328_vm3 = vmand %vm296_vm13, %vm312_vm15  ;;  %v10452_v55 = vsel %vm327_vm0, 1.0, %v17429_v21  ;;  %17615 = vst [vmem:[#allocation13_spill] sm:$0xff] %v13857_v56  ;;  %v12994_v59 = vpack.i.bf16 %v13860_v57, %v13857_v56  ;;  %vm74_vm5 = vcmp.ne.s32.totalorder %v13747_v15, 0 }
  0x14   :  { %17616 = vst [vmem:[#allocation14_spill] sm:$0xff] %v13860_v57  ;;  %v10453_v58 = vsel %vm328_vm3, 1.0, %v17429_v21  ;;  %v13869_v61 = vsel %vm73_vm4, 1.0, %v17429_v21  ;;  %v13872_v62 = vsel %vm74_vm5, 1.0, %v17429_v21  ;;  %vm75_vm6 = vcmp.ne.s32.totalorder %v13764_v18, 0 }
  0x15   :  { %v375_v60 = vpack.c.bf16 %v10453_v58, %v10452_v55  ;;  %17617 = vst [vmem:[#allocation15_spill] sm:$0xff] %v13869_v61  ;;  %17618 = vst [vmem:[#allocation16_spill] sm:$0xff] %v13872_v62  ;;  %v12982_v63 = vpack.i.bf16 %v13872_v62, %v13869_v61  ;;  %vm76_vm7 = vcmp.ne.s32.totalorder %v13759_v17, 0  ;;  %v13879_v5 = vsel %vm75_vm6, 1.0, %v17429_v21 }
  0x16   :  { %627 = vperm.xlu1 %12952, %v13747_v15   ;;  %624 = vperm.xlu0 %12951, %v13752_v16   ;;  %17619 = vst [vmem:[#allocation17_spill] sm:$0xff] %v13879_v5  ;;  %v289_v8 = vadd.s32 4294967295, %v13752_v16  ;;  %v13883_v9 = vsel %vm76_vm7, 1.0, %v17429_v21  ;;  %v290_v10 = vadd.s32 4294967295, %v13747_v15  ;;  %v288_v35 = vadd.s32 4294967295, %v13735_v13 }
  0x17   :  { %17620 = vst [vmem:[#allocation18_spill] sm:$0xff] %v13883_v9  ;;  %v175_v38 = vadd.s32 4294967294, %v13683_v2  ;;  %v176_v44 = vadd.s32 4294967294, %v13695_v4  ;;  %v293_v47 = vadd.s32 4294967295, %v13780_v20  ;;  %v179_v50 = vadd.s32 4294967294, %v13710_v7 }
  0x18   :  { %vm305_vm8 = vcmp.ge.s32.totalorder %v289_v8, 0  ;;  %vm321_vm9 = vcmp.lt.s32.totalorder %v289_v8, 16  ;;  %vm306_vm10 = vcmp.ge.s32.totalorder %v290_v10, 0  ;;  %vm322_vm11 = vcmp.lt.s32.totalorder %v290_v10, 16 }
  0x19   :  { %vm337_vm12 = vmand %vm305_vm8, %vm321_vm9  ;;  %vm304_vm6 = vcmp.ge.s32.totalorder %v288_v35, 0  ;;  %vm320_vm7 = vcmp.lt.s32.totalorder %v288_v35, 16  ;;  %vm191_vm9 = vcmp.ge.s32.totalorder %v175_v38, 0  ;;  %v177_v58 = vadd.s32 4294967294, %v13678_v1 }
  0x1a   :  { %633 = vperm.xlu1 %12952, %v13759_v17   ;;  %630 = vperm.xlu0 %12951, %v13764_v18   ;;  %vm338_vm15 = vmand %vm306_vm10, %vm322_vm11  ;;  %v13893_v34 = vsel %vm337_vm12, 1.0, %v17429_v21  ;;  %vm207_vm10 = vcmp.lt.s32.totalorder %v175_v38, 16  ;;  %vm192_vm12 = vcmp.ge.s32.totalorder %v176_v44, 0  ;;  %v183_v10 = vadd.s32 4294967294, %v13740_v14 }
  0x1b   :  { %v13898_v37 = vsel %vm338_vm15, 1.0, %v17429_v21  ;;  %vm336_vm11 = vmand %vm304_vm6, %vm320_vm7  ;;  %vm211_vm6 = vcmp.lt.s32.totalorder %v179_v50, 16  ;;  %v181_v38 = vadd.s32 4294967294, %v13728_v12 }
  0x1c   :  { %v380_v41 = vpack.c.bf16 %v13898_v37, %v13893_v34  ;;  %v10461_v49 = vsel %vm336_vm11, 1.0, %v17429_v21  ;;  %vm193_vm11 = vcmp.ge.s32.totalorder %v177_v58, 0  ;;  %v185_v34 = vadd.s32 4294967294, %v13752_v16 }
  0x1e   :  { %639 = vperm.xlu1 %12952, %v13775_v19   ;;  %636 = vperm.xlu0 %12951, %v13780_v20  }
  0x22   :  { %12959 = vperm.xlu1 %12952, %v12958_v26   ;;  %12954 = vperm.xlu0 %12951, %v12953_v27   ;;  %v291_v26 = vadd.s32 4294967295, %v13764_v18  ;;  %v292_v27 = vadd.s32 4294967295, %v13759_v17 }
  0x24   :  { %vm307_vm13 = vcmp.ge.s32.totalorder %v291_v26, 0  ;;  %vm308_vm14 = vcmp.ge.s32.totalorder %v292_v27, 0  ;;  %vm323_vm0 = vcmp.lt.s32.totalorder %v291_v26, 16  ;;  %vm324_vm1 = vcmp.lt.s32.totalorder %v292_v27, 16 }
  0x25   :  { %vm339_vm2 = vmand %vm307_vm13, %vm323_vm0  ;;  %vm208_vm13 = vcmp.lt.s32.totalorder %v176_v44, 16  ;;  %vm309_vm0 = vcmp.ge.s32.totalorder %v293_v47, 0  ;;  %v182_v44 = vadd.s32 4294967294, %v13723_v11 }
  0x26   :  { %12969 = vperm.xlu1 %12952, %v12968_v32   ;;  %12964 = vperm.xlu0 %12951, %v12963_v33   ;;  %v12988_v32 = vpack.i.bf16 %v13883_v9, %v13879_v5  ;;  %v287_v33 = vadd.s32 4294967295, %v13740_v14  ;;  %vm340_vm5 = vmand %vm308_vm14, %vm324_vm1 }
  0x27   :  { %v13908_v43 = vsel %vm340_vm5, 1.0, %v17429_v21  ;;  %vm223_vm14 = vmand %vm191_vm9, %vm207_vm10  ;;  %vm195_vm5 = vcmp.ge.s32.totalorder %v179_v50, 0  ;;  %v188_v50 = vadd.s32 4294967294, %v13759_v17 }
  0x28   :  { %vm303_vm3 = vcmp.ge.s32.totalorder %v287_v33, 0  ;;  %vm319_vm4 = vcmp.lt.s32.totalorder %v287_v33, 16  ;;  %vm224_vm15 = vmand %vm192_vm12, %vm208_vm13  ;;  %v13919_v52 = vsel %vm223_vm14, 1.0, %v17429_v21  ;;  %vm209_vm12 = vcmp.lt.s32.totalorder %v177_v58, 16 }
  0x29   :  { %vm335_vm8 = vmand %vm303_vm3, %vm319_vm4  ;;  %v13922_v53 = vsel %vm224_vm15, 1.0, %v17429_v21  ;;  %v383_v58 = vadd.s32 1, %v13683_v2 }
  0x2a   :  { %12974 = vset.pattern.permute.xlu1 %v13601_v40  ;;  %12973 = vset.pattern.permute.xlu0 %v13601_v40  ;;  %v10460_v46 = vsel %vm335_vm8, 1.0, %v17429_v21  ;;  %v271_v55 = vpack.c.bf16 %v13922_v53, %v13919_v52  ;;  %vm227_vm10 = vmand %vm195_vm5, %vm211_vm6  ;;  %v388_v52 = vadd.s32 1, %v13705_v6 }
  0x2b   :  { %1375 = vperm.xlu1 %12974, %v376_v48   ;;  %1370 = vperm.xlu0 %12973, %v375_v60   ;;  %v294_v48 = vadd.s32 4294967295, %v13775_v19  ;;  %v13938_v27 = vsel %vm227_vm10, 1.0, %v17429_v21  ;;  %vm213_vm10 = vcmp.lt.s32.totalorder %v181_v38, 16 }
  0x2d   :  { %vm310_vm1 = vcmp.ge.s32.totalorder %v294_v48, 0  ;;  %vm326_vm3 = vcmp.lt.s32.totalorder %v294_v48, 16 }
  0x2e   :  { %vm342_vm7 = vmand %vm310_vm1, %vm326_vm3  ;;  %vm199_vm1 = vcmp.ge.s32.totalorder %v183_v10, 0 }
  0x2f   :  { %12975 = vset.pattern.permute.xlu1 %v13599_v0  ;;  %12981 = vset.pattern.permute.xlu0 %v13599_v0  ;;  %v10467_v8 = vsel %vm342_vm7, 1.0, %v17429_v21 }
  0x30   :  { %12977 = vperm.xlu1 %12975, %v12976_v42   ;;  %12983 = vperm.xlu0 %12981, %v12982_v63   ;;  %v13905_v42 = vsel %vm339_vm2, 1.0, %v17429_v21  ;;  %vm325_vm2 = vcmp.lt.s32.totalorder %v293_v47, 16  ;;  %v178_v63 = vadd.s32 4294967294, %v13690_v3  ;;  %v187_v47 = vadd.s32 4294967294, %v13764_v18 }
  0x31   :  { %v381_v45 = vpack.c.bf16 %v13908_v43, %v13905_v42  ;;  %vm341_vm4 = vmand %vm309_vm0, %vm325_vm2  ;;  %vm215_vm2 = vcmp.lt.s32.totalorder %v183_v10, 16  ;;  %v384_v42 = vadd.s32 1, %v13695_v4  ;;  %v189_v10 = vadd.s32 4294967294, %v13780_v20 }
  0x32   :  { %v10466_v60 = vsel %vm341_vm4, 1.0, %v17429_v21  ;;  %vm194_vm14 = vcmp.ge.s32.totalorder %v178_v63, 0  ;;  %vm210_vm15 = vcmp.lt.s32.totalorder %v178_v63, 16  ;;  %vm225_vm0 = vmand %vm193_vm11, %vm209_vm12  ;;  %vm214_vm11 = vcmp.lt.s32.totalorder %v182_v44, 16 }
  0x33   :  { %v382_v26 = vpack.c.bf16 %v10467_v8, %v10466_v60  ;;  %vm226_vm3 = vmand %vm194_vm14, %vm210_vm15  ;;  %v10438_v35 = vsel %vm225_vm0, 1.0, %v17429_v21  ;;  %vm219_vm14 = vcmp.lt.s32.totalorder %v187_v47, 16  ;;  %vm204_vm0 = vcmp.ge.s32.totalorder %v188_v50, 0 }
  0x34   :  { %12987 = vset.pattern.permute.xlu1 %v13601_v40  ;;  %12989 = vperm.xlu0 %12981, %v12988_v32   ;;  %vm231_vm6 = vmand %vm199_vm1, %vm215_vm2  ;;  %vm220_vm1 = vcmp.lt.s32.totalorder %v188_v50, 16 }
  0x35   :  { %1380 = vperm.xlu1 %12987, %v377_v51   ;;  %v379_v51 = vpack.c.bf16 %v10461_v49, %v10460_v46  ;;  %v10439_v46 = vsel %vm226_vm3, 1.0, %v17429_v21  ;;  %v13956_v49 = vsel %vm231_vm6, 1.0, %v17429_v21  ;;  %vm201_vm3 = vcmp.ge.s32.totalorder %v185_v34, 0 }
  0x36   :  { %v272_v48 = vpack.c.bf16 %v10439_v46, %v10438_v35  ;;  %v387_v35 = vadd.s32 1, %v13710_v7 }
  0x38   :  { %12999 = vset.pattern.permute.xlu0 %v13601_v40 }
  0x39   :  { %1385 = vperm.xlu1 %12987, %v378_v54   ;;  %v180_v54 = vadd.s32 4294967294, %v13705_v6  ;;  %1390 = vperm.xlu0 %12999, %v379_v51  }
  0x3b   :  { %vm196_vm8 = vcmp.ge.s32.totalorder %v180_v54, 0  ;;  %vm212_vm9 = vcmp.lt.s32.totalorder %v180_v54, 16 }
  0x3c   :  { %vm228_vm13 = vmand %vm196_vm8, %vm212_vm9  ;;  %vm197_vm8 = vcmp.ge.s32.totalorder %v181_v38, 0  ;;  %vm198_vm9 = vcmp.ge.s32.totalorder %v182_v44, 0 }
  0x3d   :  { %12993 = vset.pattern.permute.xlu1 %v13599_v0  ;;  %v13941_v32 = vsel %vm228_vm13, 1.0, %v17429_v21  ;;  %1405 = vperm.xlu0 %12999, %v382_v26   ;;  %vm229_vm12 = vmand %vm197_vm8, %vm213_vm10  ;;  %vm203_vm13 = vcmp.ge.s32.totalorder %v187_v47, 0  ;;  %vm415_vm10 = vcmp.lt.s32.totalorder %v383_v58, 16  ;;  %v190_v26 = vadd.s32 4294967294, %v13775_v19 }
  0x3e   :  { %12995 = vperm.xlu1 %12993, %v12994_v59   ;;  %v184_v59 = vadd.s32 4294967294, %v13735_v13  ;;  %v273_v33 = vpack.c.bf16 %v13941_v32, %v13938_v27  ;;  %vm230_vm15 = vmand %vm198_vm9, %vm214_vm11  ;;  %v10442_v37 = vsel %vm229_vm12, 1.0, %v17429_v21  ;;  %vm399_vm9 = vcmp.ge.s32.totalorder %v383_v58, 0 }
  0x3f   :  { %v10443_v54 = vsel %vm230_vm15, 1.0, %v17429_v21  ;;  %vm235_vm2 = vmand %vm203_vm13, %vm219_vm14  ;;  %vm400_vm12 = vcmp.ge.s32.totalorder %v384_v42, 0  ;;  %vm416_vm13 = vcmp.lt.s32.totalorder %v384_v42, 16  ;;  %v389_v58 = vadd.s32 1, %v13728_v12 }
  0x40   :  { %vm200_vm4 = vcmp.ge.s32.totalorder %v184_v59, 0  ;;  %vm216_vm5 = vcmp.lt.s32.totalorder %v184_v59, 16  ;;  %v274_v60 = vpack.c.bf16 %v10443_v54, %v10442_v37  ;;  %v13973_v63 = vsel %vm235_vm2, 1.0, %v17429_v21  ;;  %vm431_vm14 = vmand %vm399_vm9, %vm415_vm10 }
  0x41   :  { %vm232_vm7 = vmand %vm200_vm4, %vm216_vm5  ;;  %1253 = vperm.xlu0 %12999, %v272_v48   ;;  %vm217_vm4 = vcmp.lt.s32.totalorder %v185_v34, 16  ;;  %v13990_v44 = vsel %vm431_vm14, 1.0, %v17429_v21  ;;  %vm221_vm2 = vcmp.lt.s32.totalorder %v189_v10, 16  ;;  %vm420_vm9 = vcmp.lt.s32.totalorder %v388_v52, 16 }
  0x42   :  { %13000 = vset.pattern.permute.xlu1 %v13601_v40  ;;  %v13959_v40 = vsel %vm232_vm7, 1.0, %v17429_v21  ;;  %vm236_vm5 = vmand %vm204_vm0, %vm220_vm1  ;;  %vm205_vm0 = vcmp.ge.s32.totalorder %v189_v10, 0  ;;  %vm206_vm1 = vcmp.ge.s32.totalorder %v190_v26, 0  ;;  %v386_v48 = vadd.s32 1, %v13690_v3 }
  0x43   :  { %1395 = vperm.xlu1 %13000, %v380_v41   ;;  %v275_v51 = vpack.c.bf16 %v13959_v40, %v13956_v49  ;;  %v186_v41 = vadd.s32 4294967294, %v13747_v15  ;;  %v13976_v8 = vsel %vm236_vm5, 1.0, %v17429_v21  ;;  %vm233_vm8 = vmand %vm201_vm3, %vm217_vm4  ;;  %vm222_vm3 = vcmp.lt.s32.totalorder %v190_v26, 16 }
  0x44   :  { %v277_v43 = vpack.c.bf16 %v13976_v8, %v13973_v63  ;;  %vm432_vm15 = vmand %vm400_vm12, %vm416_vm13  ;;  %vm403_vm5 = vcmp.ge.s32.totalorder %v387_v35, 0  ;;  %v391_v34 = vadd.s32 1, %v13740_v14  ;;  %vm402_vm14 = vcmp.ge.s32.totalorder %v386_v48, 0 }
  0x45   :  { %vm202_vm6 = vcmp.ge.s32.totalorder %v186_v41, 0  ;;  %vm218_vm7 = vcmp.lt.s32.totalorder %v186_v41, 16  ;;  %1263 = vperm.xlu0 %12999, %v274_v60   ;;  %v13993_v46 = vsel %vm432_vm15, 1.0, %v17429_v21  ;;  %vm237_vm4 = vmand %vm205_vm0, %vm221_vm2  ;;  %vm418_vm15 = vcmp.lt.s32.totalorder %v386_v48, 16 }
  0x46   :  { %vm234_vm11 = vmand %vm202_vm6, %vm218_vm7  ;;  %v479_v53 = vpack.c.bf16 %v13993_v46, %v13990_v44  ;;  %vm419_vm6 = vcmp.lt.s32.totalorder %v387_v35, 16  ;;  %v10450_v47 = vsel %vm237_vm4, 1.0, %v17429_v21  ;;  %vm423_vm2 = vcmp.lt.s32.totalorder %v391_v34, 16 }
  0x47   :  { %1400 = vperm.xlu1 %13000, %v381_v45   ;;  %v10446_v45 = vsel %vm233_vm8, 1.0, %v17429_v21  ;;  %v10447_v59 = vsel %vm234_vm11, 1.0, %v17429_v21  ;;  %vm238_vm7 = vmand %vm206_vm1, %vm222_vm3  ;;  %vm404_vm8 = vcmp.ge.s32.totalorder %v388_v52, 0  ;;  %vm407_vm1 = vcmp.ge.s32.totalorder %v391_v34, 0 }
  0x48   :  { %v276_v38 = vpack.c.bf16 %v10447_v59, %v10446_v45  ;;  %v10451_v50 = vsel %vm238_vm7, 1.0, %v17429_v21  ;;  %vm435_vm10 = vmand %vm403_vm5, %vm419_vm6  ;;  %v390_v60 = vadd.s32 1, %v13723_v11  ;;  %v395_v45 = vadd.s32 1, %v13764_v18 }
  0x49   :  { %v278_v37 = vpack.c.bf16 %v10451_v50, %v10450_v47  ;;  %vm436_vm13 = vmand %vm404_vm8, %vm420_vm9  ;;  %v14007_v27 = vsel %vm435_vm10, 1.0, %v17429_v21  ;;  %vm405_vm8 = vcmp.ge.s32.totalorder %v389_v58, 0  ;;  %vm421_vm10 = vcmp.lt.s32.totalorder %v389_v58, 16 }
  0x4a   :  { %1273 = vperm.xlu0 %12999, %v276_v38   ;;  %v14010_v32 = vsel %vm436_vm13, 1.0, %v17429_v21  ;;  %vm434_vm3 = vmand %vm402_vm14, %vm418_vm15  ;;  %vm406_vm9 = vcmp.ge.s32.totalorder %v390_v60, 0  ;;  %v396_v10 = vadd.s32 1, %v13759_v17  ;;  %vm411_vm13 = vcmp.ge.s32.totalorder %v395_v45, 0 }
  0x4b   :  { %1248 = vperm.xlu1 %13000, %v271_v55   ;;  %v385_v55 = vadd.s32 1, %v13678_v1  ;;  %v481_v41 = vpack.c.bf16 %v14010_v32, %v14007_v27  ;;  %v10471_v42 = vsel %vm434_vm3, 1.0, %v17429_v21  ;;  %vm439_vm6 = vmand %vm407_vm1, %vm423_vm2  ;;  %vm427_vm14 = vcmp.lt.s32.totalorder %v395_v45, 16 }
  0x4c   :  { %v14024_v40 = vsel %vm439_vm6, 1.0, %v17429_v21  ;;  %v393_v59 = vadd.s32 1, %v13752_v16  ;;  %vm428_vm1 = vcmp.lt.s32.totalorder %v396_v10, 16  ;;  %v394_v38 = vadd.s32 1, %v13747_v15  ;;  %vm443_vm2 = vmand %vm411_vm13, %vm427_vm14 }
  0x4d   :  { %vm401_vm11 = vcmp.ge.s32.totalorder %v385_v55, 0  ;;  %vm417_vm12 = vcmp.lt.s32.totalorder %v385_v55, 16  ;;  %v487_v63 = vadd.s32 2, %v13683_v2  ;;  %v488_v47 = vadd.s32 2, %v13695_v4 }
  0x4e   :  { %vm433_vm0 = vmand %vm401_vm11, %vm417_vm12  ;;  %1283 = vperm.xlu0 %12999, %v278_v37   ;;  %vm422_vm11 = vcmp.lt.s32.totalorder %v390_v60, 16  ;;  %vm409_vm3 = vcmp.ge.s32.totalorder %v393_v59, 0  ;;  %vm410_vm6 = vcmp.ge.s32.totalorder %v394_v38, 0  ;;  %v397_v50 = vadd.s32 1, %v13780_v20 }
  0x4f   :  { %1258 = vperm.xlu1 %13000, %v273_v33   ;;  %v392_v33 = vadd.s32 1, %v13735_v13  ;;  %v10470_v54 = vsel %vm433_vm0, 1.0, %v17429_v21  ;;  %vm437_vm12 = vmand %vm405_vm8, %vm421_vm10  ;;  %vm412_vm0 = vcmp.ge.s32.totalorder %v396_v10, 0  ;;  %vm519_vm10 = vcmp.lt.s32.totalorder %v487_v63, 16 }
  0x50   :  { %v480_v49 = vpack.c.bf16 %v10471_v42, %v10470_v54  ;;  %vm438_vm15 = vmand %vm406_vm9, %vm422_vm11  ;;  %v10474_v35 = vsel %vm437_vm12, 1.0, %v17429_v21  ;;  %vm503_vm9 = vcmp.ge.s32.totalorder %v487_v63, 0  ;;  %v398_v44 = vadd.s32 1, %v13775_v19 }
  0x51   :  { %vm408_vm4 = vcmp.ge.s32.totalorder %v392_v33, 0  ;;  %vm424_vm5 = vcmp.lt.s32.totalorder %v392_v33, 16  ;;  %v10475_v52 = vsel %vm438_vm15, 1.0, %v17429_v21  ;;  %vm504_vm12 = vcmp.ge.s32.totalorder %v488_v47, 0  ;;  %vm535_vm14 = vmand %vm503_vm9, %vm519_vm10 }
  0x52   :  { %vm440_vm7 = vmand %vm408_vm4, %vm424_vm5  ;;  %1866 = vperm.xlu0 %12999, %v480_v49   ;;  %vm425_vm4 = vcmp.lt.s32.totalorder %v393_v59, 16  ;;  %v482_v8 = vpack.c.bf16 %v10475_v52, %v10474_v35  ;;  %vm520_vm13 = vcmp.lt.s32.totalorder %v488_v47, 16  ;;  %v489_v4 = vadd.s32 2, %v13678_v1 }
  0x53   :  { %1268 = vperm.xlu1 %13000, %v275_v51   ;;  %v14027_v51 = vsel %vm440_vm7, 1.0, %v17429_v21  ;;  %vm444_vm5 = vmand %vm412_vm0, %vm428_vm1  ;;  %vm426_vm7 = vcmp.lt.s32.totalorder %v394_v38, 16  ;;  %v14058_v34 = vsel %vm535_vm14, 1.0, %v17429_v21  ;;  %vm413_vm0 = vcmp.ge.s32.totalorder %v397_v50, 0 }
  0x54   :  { %v483_v26 = vpack.c.bf16 %v14027_v51, %v14024_v40  ;;  %v14047_v55 = vsel %vm444_vm5, 1.0, %v17429_v21  ;;  %vm441_vm8 = vmand %vm409_vm3, %vm425_vm4  ;;  %vm414_vm1 = vcmp.ge.s32.totalorder %v398_v44, 0  ;;  %vm430_vm3 = vcmp.lt.s32.totalorder %v398_v44, 16 }
  0x55   :  { %vm442_vm11 = vmand %vm410_vm6, %vm426_vm7  ;;  %v10478_v48 = vsel %vm441_vm8, 1.0, %v17429_v21  ;;  %v490_v27 = vadd.s32 2, %v13690_v3  ;;  %vm505_vm5 = vcmp.ge.s32.totalorder %v489_v4, 0  ;;  %vm521_vm6 = vcmp.lt.s32.totalorder %v489_v4, 16 }
  0x56   :  { %1876 = vperm.xlu0 %12999, %v482_v8   ;;  %v10479_v46 = vsel %vm442_vm11, 1.0, %v17429_v21  ;;  %vm536_vm15 = vmand %vm504_vm12, %vm520_vm13  ;;  %v491_v1 = vadd.s32 2, %v13710_v7  ;;  %v493_v3 = vadd.s32 2, %v13728_v12  ;;  %v494_v42 = vadd.s32 2, %v13723_v11 }
  0x57   :  { %1278 = vperm.xlu1 %13000, %v277_v43   ;;  %v14041_v43 = vsel %vm443_vm2, 1.0, %v17429_v21  ;;  %v14061_v37 = vsel %vm536_vm15, 1.0, %v17429_v21  ;;  %vm429_vm2 = vcmp.lt.s32.totalorder %v397_v50, 16  ;;  %vm446_vm7 = vmand %vm414_vm1, %vm430_vm3  ;;  %vm506_vm8 = vcmp.ge.s32.totalorder %v490_v27, 0 }
  0x58   :  { %v485_v2 = vpack.c.bf16 %v14047_v55, %v14041_v43  ;;  %v583_v32 = vpack.c.bf16 %v14061_v37, %v14058_v34  ;;  %vm445_vm4 = vmand %vm413_vm0, %vm429_vm2  ;;  %vm522_vm9 = vcmp.lt.s32.totalorder %v490_v27, 16  ;;  %v10483_v54 = vsel %vm446_vm7, 1.0, %v17429_v21 }
  0x59   :  { %v10482_v33 = vsel %vm445_vm4, 1.0, %v17429_v21  ;;  %vm537_vm10 = vmand %vm505_vm5, %vm521_vm6  ;;  %vm507_vm11 = vcmp.ge.s32.totalorder %v491_v1, 0  ;;  %vm523_vm12 = vcmp.lt.s32.totalorder %v491_v1, 16  ;;  %vm509_vm1 = vcmp.ge.s32.totalorder %v493_v3, 0 }
  0x5a   :  { %v486_v58 = vpack.c.bf16 %v10483_v54, %v10482_v33  ;;  %vm538_vm13 = vmand %vm506_vm8, %vm522_vm9  ;;  %v10486_v60 = vsel %vm537_vm10, 1.0, %v17429_v21  ;;  %vm525_vm2 = vcmp.lt.s32.totalorder %v493_v3, 16  ;;  %v497_v12 = vadd.s32 2, %v13752_v16 }
  0x5b   :  { %1861 = vperm.xlu1 %13000, %v479_v53   ;;  %v484_v53 = vpack.c.bf16 %v10479_v46, %v10478_v48  ;;  %v10487_v7 = vsel %vm538_vm13, 1.0, %v17429_v21  ;;  %vm539_vm0 = vmand %vm507_vm11, %vm523_vm12  ;;  %v498_v49 = vadd.s32 2, %v13747_v15  ;;  %vm510_vm4 = vcmp.ge.s32.totalorder %v494_v42, 0 }
  0x5c   :  { %v10488_v45 = vsel %vm539_vm0, 1.0, %v17429_v21  ;;  %vm526_vm5 = vcmp.lt.s32.totalorder %v494_v42, 16  ;;  %vm541_vm6 = vmand %vm509_vm1, %vm525_vm2  ;;  %v495_v51 = vadd.s32 2, %v13740_v14  ;;  %vm513_vm8 = vcmp.ge.s32.totalorder %v497_v12, 0 }
  0x5d   :  { %1886 = vperm.xlu0 %12999, %v484_v53   ;;  %vm542_vm7 = vmand %vm510_vm4, %vm526_vm5  ;;  %v10490_v10 = vsel %vm541_vm6, 1.0, %v17429_v21  ;;  %vm514_vm9 = vcmp.ge.s32.totalorder %v498_v49, 0  ;;  %vm529_vm10 = vcmp.lt.s32.totalorder %v497_v12, 16  ;;  %vm530_vm11 = vcmp.lt.s32.totalorder %v498_v49, 16 }
  0x5e   :  { %v496_v15 = vadd.s32 2, %v13735_v13  ;;  %vm545_vm12 = vmand %vm513_vm8, %vm529_vm10  ;;  %vm511_vm13 = vcmp.ge.s32.totalorder %v495_v51, 0  ;;  %v501_v14 = vadd.s32 2, %v13780_v20  ;;  %v502_v35 = vadd.s32 2, %v13775_v19 }
  0x5f   :  { %1871 = vperm.xlu1 %13000, %v481_v41   ;;  %v492_v41 = vadd.s32 2, %v13705_v6  ;;  %v584_v6 = vpack.c.bf16 %v10487_v7, %v10486_v60  ;;  %v10494_v59 = vsel %vm545_vm12, 1.0, %v17429_v21  ;;  %v499_v13 = vadd.s32 2, %v13764_v18 }
  0x60   :  { %vm512_vm0 = vcmp.ge.s32.totalorder %v496_v15, 0  ;;  %vm528_vm1 = vcmp.lt.s32.totalorder %v496_v15, 16  ;;  %vm533_vm4 = vcmp.lt.s32.totalorder %v501_v14, 16  ;;  %vm518_vm6 = vcmp.ge.s32.totalorder %v502_v35, 0 }
  0x61   :  { %vm508_vm14 = vcmp.ge.s32.totalorder %v492_v41, 0  ;;  %vm524_vm15 = vcmp.lt.s32.totalorder %v492_v41, 16  ;;  %1896 = vperm.xlu0 %12999, %v486_v58   ;;  %vm544_vm5 = vmand %vm512_vm0, %vm528_vm1  ;;  %v500_v19 = vadd.s32 2, %v13759_v17  ;;  %vm531_vm10 = vcmp.lt.s32.totalorder %v499_v13, 16 }
  0x62   :  { %vm540_vm3 = vmand %vm508_vm14, %vm524_vm15  ;;  %vm527_vm14 = vcmp.lt.s32.totalorder %v495_v51, 16  ;;  %v10493_v20 = vsel %vm544_vm5, 1.0, %v17429_v21  ;;  %v591_v48 = vlaneseq  ;;  %vm692_vm0 = vcmask 195584  }
  0x63   :  { %1881 = vperm.xlu1 %13000, %v483_v26   ;;  %v10489_v40 = vsel %vm540_vm3, 1.0, %v17429_v21  ;;  %v10491_v26 = vsel %vm542_vm7, 1.0, %v17429_v21  ;;  %vm546_vm15 = vmand %vm514_vm9, %vm530_vm11  ;;  %vm517_vm3 = vcmp.ge.s32.totalorder %v501_v14, 0  ;;  %vm534_vm7 = vcmp.lt.s32.totalorder %v502_v35, 16 }
  0x64   :  { %v585_v11 = vpack.c.bf16 %v10489_v40, %v10488_v45  ;;  %v586_v16 = vpack.c.bf16 %v10491_v26, %v10490_v10  ;;  %v10495_v38 = vsel %vm546_vm15, 1.0, %v17429_v21  ;;  %vm543_vm2 = vmand %vm511_vm13, %vm527_vm14  ;;  %vm515_vm9 = vcmp.ge.s32.totalorder %v499_v13, 0  ;;  %v13004_v13 = vld [vmem:[%s17417_s3 + $0x18] sm:$0xff]  }
  0x65   :  { %2090 = vperm.xlu0 %12999, %v584_v6   ;;  %v588_v52 = vpack.c.bf16 %v10495_v38, %v10494_v59  ;;  %v10492_v63 = vsel %vm543_vm2, 1.0, %v17429_v21  ;;  %vm549_vm8 = vmand %vm517_vm3, %vm533_vm4  ;;  %vm516_vm12 = vcmp.ge.s32.totalorder %v500_v19, 0  ;;  %vm532_vm13 = vcmp.lt.s32.totalorder %v500_v19, 16  ;;  %v13003_v38 = vld [vmem:[%s17417_s3 + $0x10] sm:$0xff]  }
  0x66   :  { %vm550_vm11 = vmand %vm518_vm6, %vm534_vm7  ;;  %v10498_v8 = vsel %vm549_vm8, 1.0, %v17429_v21  ;;  %v587_v43 = vpack.c.bf16 %v10493_v20, %v10492_v63  ;;  %v14095_v50 = vand.u32 127, %v591_v48  ;;  %11572 = vmatprep.subr.bf16.mxu1 %v13003_v38  ;;  %v903_v20 = vld [vmem:[%s17418_s2 + $0x8] sm:$0xff] }
  0x67   :  { %1891 = vperm.xlu1 %13000, %v485_v2   ;;  %v10499_v18 = vsel %vm550_vm11, 1.0, %v17429_v21  ;;  %vm547_vm14 = vmand %vm515_vm9, %vm531_vm10 }
  0x68   :  { %vm548_vm15 = vmand %vm516_vm12, %vm532_vm13  ;;  %v10496_v55 = vsel %vm547_vm14, 1.0, %v17429_v21  ;;  %v590_v47 = vpack.c.bf16 %v10499_v18, %v10498_v8 }
  0x69   :  { %2100 = vperm.xlu0 %12999, %v586_v16   ;;  %v10497_v2 = vsel %vm548_vm15, 1.0, %v17429_v21 }
  0x6a   :  { %v589_v17 = vpack.c.bf16 %v10497_v2, %v10496_v55 }
  0x6b   :  { %2085 = vperm.xlu1 %13000, %v583_v32  }
  0x6d   :  { %2110 = vperm.xlu0 %12999, %v588_v52   ;;  %v14155_v52 = vld [vmem:[%s17417_s3] sm:$0xff]  }
  0x6f   :  { %2095 = vperm.xlu1 %13000, %v585_v11  }
  0x71   :  { %2120 = vperm.xlu0 %12999, %v590_v47  }
  0x73   :  { %2105 = vperm.xlu1 %13000, %v587_v43   ;;  %v902_v43 = vld [vmem:[%s17418_s2] sm:$0xff] }
  0x75   :  { %13002 = vset.pattern.permute.xlu0 %v13599_v0 }
  0x77   :  { %2115 = vperm.xlu1 %13000, %v589_v17   ;;  %v905_v17 = vld [vmem:[%s17418_s2 + $0x18] sm:$0xff] }
  0x7b   :  { %13001 = vset.pattern.permute.xlu1 %v13599_v0 }
  0x81   :  { %v601_v44 = vpop.permute.xlu1 %600  ;;  %v595_v46 = vpop.permute.xlu0 %594 }
  0x82   :  { %vm641_vm1 = vcmp.eq.s32.totalorder %v595_v46, %v14095_v50  ;;  %vm643_vm2 = vcmp.eq.s32.totalorder %v601_v44, %v14095_v50 }
  0x83   :  { %v10500_v4 = vsel %vm641_vm1, 1.0, %v17429_v21  ;;  %v10502_v37 = vsel %vm643_vm2, 1.0, %v17429_v21  ;;  %vm1294_vm2 = vsmask.f32 256 }
  0x84   :  { %11548 = vmatprep.mubr.msk.f32.mxu1 %vm692_vm0, %v10500_v4  ;;  %v904_v4 = vld [vmem:[%s17418_s2 + $0x10] sm:$0xff] }
  0x85   :  { %v604_v53 = vpop.permute.xlu1 %603  ;;  %v598_v34 = vpop.permute.xlu0 %597 }
  0x86   :  { %vm642_vm3 = vcmp.eq.s32.totalorder %v598_v34, %v14095_v50  ;;  %vm644_vm4 = vcmp.eq.s32.totalorder %v604_v53, %v14095_v50 }
  0x87   :  { %v10501_v27 = vsel %vm642_vm3, 1.0, %v17429_v21  ;;  %v10503_v1 = vsel %vm644_vm4, 1.0, %v17429_v21  ;;  %vm1428_vm4 = vcmask 261120  }
  0x88   :  { %11549 = vmatmul.mubr.msk.f32.vlgmr.msra.gmra.mrb[0].mxu1 %vm692_vm0, %v10501_v27 }
  0x89   :  { %v610_v0 = vpop.permute.xlu1 %609  ;;  %11551 = vmatprep.mubr.msk.f32.mxu1 %vm692_vm0, %v10502_v37  ;;  %v607_v32 = vpop.permute.xlu0 %606  ;;  %11573 = vmatpush3.bf16.msra.mxu1 %v13003_v38 }
  0x8a   :  { %vm645_vm5 = vcmp.eq.s32.totalorder %v607_v32, %v14095_v50  ;;  %vm646_vm6 = vcmp.eq.s32.totalorder %v610_v0, %v14095_v50  ;;  %11574 = vmatprep.subr.bf16.mxu1 %v13004_v13 }
  0x8b   :  { %v10504_v33 = vsel %vm645_vm5, 1.0, %v17429_v21  ;;  %v10505_v3 = vsel %vm646_vm6, 1.0, %v17429_v21  ;;  %vm1824_vm5 = vsmask.f32 7424  ;;  %vm1856_vm6 = vcmask 1047552  }
  0x8c   :  { %11552 = vmatmul.mubr.msk.f32.gmra.mrb[2].mxu1 %vm692_vm0, %v10503_v1 }
  0x8d   :  { %v616_v41 = vpop.permute.xlu1 %615  ;;  %11554 = vmatprep.mubr.msk.f32.mxu1 %vm692_vm0, %v10504_v33  ;;  %v613_v54 = vpop.permute.xlu0 %612  ;;  %11575 = vmatpush3.bf16.msra.mxu1 %v13004_v13 }
  0x8e   :  { %vm647_vm7 = vcmp.eq.s32.totalorder %v613_v54, %v14095_v50  ;;  %vm648_vm8 = vcmp.eq.s32.totalorder %v616_v41, %v14095_v50  ;;  %11592 = vmatprep.subr.bf16.mxu1 %v14155_v52  ;;  %v907_v41 = vld [vmem:[%s17418_s2 + $0x28] sm:$0xff] }
  0x8f   :  { %v10506_v58 = vsel %vm647_vm7, 1.0, %v17429_v21  ;;  %v10507_v42 = vsel %vm648_vm8, 1.0, %v17429_v21  ;;  %vm14557_vm7 = vmand %vm1856_vm6, %vm1824_vm5  ;;  %vm2056_vm8 = vcmask 1046528  }
  0x90   :  { %11555 = vmatmul.mubr.msk.f32.gmra.mrb[4].mxu1 %vm692_vm0, %v10505_v3  ;;  %v906_v3 = vld [vmem:[%s17418_s2 + $0x20] sm:$0xff] }
  0x91   :  { %v622_v60 = vpop.permute.xlu1 %621  ;;  %11557 = vmatprep.mubr.msk.f32.mxu1 %vm692_vm0, %v10506_v58  ;;  %v619_v7 = vpop.permute.xlu0 %618 }
  0x92   :  { %vm649_vm9 = vcmp.eq.s32.totalorder %v619_v7, %v14095_v50  ;;  %vm650_vm10 = vcmp.eq.s32.totalorder %v622_v60, %v14095_v50 }
  0x93   :  { %v10508_v6 = vsel %vm649_vm9, 1.0, %v17429_v21  ;;  %v10509_v49 = vsel %vm650_vm10, 1.0, %v17429_v21  ;;  %vm7002_vm9 = vcmask 1043456   ;;  %vm6977_vm10 = vcmask 64512  }
  0x94   :  { %11558 = vmatmul.mubr.msk.f32.gmra.mrb[6].mxu1 %vm692_vm0, %v10507_v42 }
  0x95   :  { %v628_v45 = vpop.permute.xlu1 %627  ;;  %11560 = vmatprep.mubr.msk.f32.mxu1 %vm692_vm0, %v10508_v6  ;;  %v625_v12 = vpop.permute.xlu0 %624 }
  0x96   :  { %vm651_vm11 = vcmp.eq.s32.totalorder %v625_v12, %v14095_v50  ;;  %vm652_vm12 = vcmp.eq.s32.totalorder %v628_v45, %v14095_v50 }
  0x97   :  { %v10510_v40 = vsel %vm651_vm11, 1.0, %v17429_v21  ;;  %v10511_v10 = vsel %vm652_vm12, 1.0, %v17429_v21  ;;  %vm10169_vm12 = vcmask 7168  }
  0x98   :  { %11561 = vmatmul.mubr.msk.f32.gmra.mrb[8].mxu1 %vm692_vm0, %v10509_v49 }
  0x99   :  { %v634_v51 = vpop.permute.xlu1 %633  ;;  %11563 = vmatprep.mubr.msk.f32.mxu1 %vm692_vm0, %v10510_v40  ;;  %v631_v11 = vpop.permute.xlu0 %630  ;;  %v909_v40 = vld [vmem:[%s17418_s2 + $0x38] sm:$0xff] }
  0x9a   :  { %vm653_vm13 = vcmp.eq.s32.totalorder %v631_v11, %v14095_v50  ;;  %vm654_vm14 = vcmp.eq.s32.totalorder %v634_v51, %v14095_v50 }
  0x9b   :  { %v10512_v26 = vsel %vm653_vm13, 1.0, %v17429_v21  ;;  %v10513_v14 = vsel %vm654_vm14, 1.0, %v17429_v21 }
  0x9c   :  { %11564 = vmatmul.mubr.msk.f32.gmra.mrb[10].mxu1 %vm692_vm0, %v10511_v10 }
  0x9d   :  { %v640_v15 = vpop.permute.xlu1 %639  ;;  %11566 = vmatprep.mubr.msk.f32.mxu1 %vm692_vm0, %v10512_v26  ;;  %v637_v16 = vpop.permute.xlu0 %636 }
  0x9e   :  { %vm655_vm15 = vcmp.eq.s32.totalorder %v637_v16, %v14095_v50  ;;  %vm656_vm1 = vcmp.eq.s32.totalorder %v640_v15, %v14095_v50  ;;  %v908_v15 = vld [vmem:[%s17418_s2 + $0x30] sm:$0xff] }
  0x9f   :  { %v10514_v59 = vsel %vm655_vm15, 1.0, %v17429_v21  ;;  %v10515_v35 = vsel %vm656_vm1, 1.0, %v17429_v21 }
  0xa0   :  { %11567 = vmatmul.mubr.msk.f32.gmra.mrb[12].mxu1 %vm692_vm0, %v10513_v14 }
  0xa1   :  { %11569 = vmatprep.mubr.msk.f32.mxu1 %vm692_vm0, %v10514_v59  ;;  %v12960_v32 = vpop.permute.xlu1 %12959  ;;  %v12955_v6 = vpop.permute.xlu0 %12954 }
  0xa4   :  { %11570 = vmatmul.mubr.msk.f32.gmra.mrb[14].mxu1 %vm692_vm0, %v10515_v35  ;;  %vm1218_vm0 = vcmask 1040384  }
  0xa5   :  { %v12970_v16 = vpop.permute.xlu1 %12969  ;;  %vm14303_vm3 = vmand %vm1218_vm0, %vm1294_vm2 }
 0x15b   :  { %v11550_v63 = vpop.f32.mrb[0].mxu1 }
 0x15c   :  { %v887_v19 = vmul.f32 5.656854, %v11550_v63  ;;  %v807_v8 = vpop.f32.mrb[1].mxu1 }
 0x15d   :  { %v886_v18 = vmul.f32 5.656854, %v807_v8  ;;  %v911_v8 = vld [vmem:[%s17418_s2 + $0x48] sm:$0xff] }
 0x15e   :  { %v14164_v55 = vadd.f32 %v903_v20, %v887_v19 }
 0x15f   :  { %v14166_v47 = vadd.f32 %v902_v43, %v886_v18  ;;  %v11553_v2 = vpop.f32.mrb[2].mxu1  ;;  %v14208_v43 = vunpack.i.h.bf16 %v12960_v32  ;;  %v14210_v18 = vunpack.i.l.bf16 %v12960_v32 }
 0x160   :  { %17621 = vst [vmem:[#allocation19_spill] sm:$0xff] %v14164_v55  ;;  %v10554_v48 = vmul.f32 -0.999995, %v14164_v55  ;;  %v889_v50 = vmul.f32 5.656854, %v11553_v2  ;;  %v817_v46 = vpop.f32.mrb[3].mxu1  ;;  %v12965_v2 = vpop.permute.xlu0 %12964 }
 0x161   :  { %17622 = vst [vmem:[#allocation20_spill] sm:$0xff] %v14166_v47  ;;  %v10553_v44 = vmul.f32 -0.999995, %v14166_v47  ;;  %v888_v37 = vmul.f32 5.656854, %v817_v46  ;;  %v14214_v46 = vpop.permute.xlu1 %1375 }
 0x162   :  { %v1012_v53 = vmul.f32 1.442695, %v10554_v48  ;;  %v14176_v34 = vadd.f32 %v905_v17, %v889_v50  ;;  %17629 = vst [vmem:[#allocation27_spill] sm:$0xff] %v14214_v46  ;;  %v978_v56 = vmul.f32 0.999995, %v14166_v47 }
 0x163   :  { %v1010_v27 = vmul.f32 1.442695, %v10553_v44  ;;  %v11556_v0 = vpop.f32.mrb[4].mxu1  ;;  %v14179_v33 = vadd.f32 %v904_v4, %v888_v37  ;;  %v14212_v44 = vunpack.i.h.bf16 %v12955_v6  ;;  %v910_v37 = vld [vmem:[%s17418_s2 + $0x40] sm:$0xff] }
 0x164   :  { %17623 = vst [vmem:[#allocation21_spill] sm:$0xff] %v14176_v34  ;;  %13055 = vpow2.f32 %v1012_v53  ;;  %v10556_v1 = vmul.f32 -0.999995, %v14176_v34  ;;  %v827_v54 = vpop.f32.mrb[5].mxu1  ;;  %v891_v58 = vmul.f32 5.656854, %v11556_v0  ;;  %v14220_v0 = vunpack.i.l.bf16 %v12955_v6 }
 0x165   :  { %17624 = vst [vmem:[#allocation22_spill] sm:$0xff] %v14179_v33  ;;  %13057 = vpow2.f32 %v1010_v27  ;;  %v890_v60 = vmul.f32 5.656854, %v827_v54  ;;  %v10555_v42 = vmul.f32 -0.999995, %v14179_v33 }
 0x166   :  { %v1016_v7 = vmul.f32 1.442695, %v10556_v1  ;;  %v14188_v45 = vadd.f32 %v907_v41, %v891_v58 }
 0x167   :  { %v14190_v12 = vadd.f32 %v906_v3, %v890_v60  ;;  %v11559_v49 = vpop.f32.mrb[6].mxu1  ;;  %v1014_v51 = vmul.f32 1.442695, %v10555_v42  ;;  %v913_v3 = vld [vmem:[%s17418_s2 + $0x58] sm:$0xff] }
 0x168   :  { %17625 = vst [vmem:[#allocation23_spill] sm:$0xff] %v14188_v45  ;;  %13059 = vpow2.f32 %v1016_v7  ;;  %v893_v11 = vmul.f32 5.656854, %v11559_v49  ;;  %v837_v10 = vpop.f32.mrb[7].mxu1  ;;  %v10558_v26 = vmul.f32 -0.999995, %v14188_v45  ;;  %v14227_v49 = vunpack.i.h.bf16 %v12970_v16 }
 0x169   :  { %17626 = vst [vmem:[#allocation24_spill] sm:$0xff] %v14190_v12  ;;  %13061 = vpow2.f32 %v1014_v51  ;;  %v10557_v14 = vmul.f32 -0.999995, %v14190_v12  ;;  %v892_v35 = vmul.f32 5.656854, %v837_v10 }
 0x16a   :  { %v14200_v59 = vadd.f32 %v909_v40, %v893_v11  ;;  %v1020_v38 = vmul.f32 1.442695, %v10558_v26  ;;  %17631 = vst [vmem:[#allocation29_spill] sm:$0xff] %v14227_v49  ;;  %v14229_v40 = vpop.permute.xlu0 %1370  ;;  %v912_v11 = vld [vmem:[%s17418_s2 + $0x50] sm:$0xff]  ;;  %v14237_v26 = vunpack.i.l.bf16 %v12970_v16 }
 0x16b   :  { %v11562_v13 = vpop.f32.mrb[8].mxu1  ;;  %v1018_v63 = vmul.f32 1.442695, %v10557_v14  ;;  %v14203_v19 = vadd.f32 %v908_v15, %v892_v35  ;;  %17632 = vst [vmem:[#allocation30_spill] sm:$0xff] %v14229_v40  ;;  %v14241_v35 = vunpack.i.h.bf16 %v12965_v2 }
 0x16c   :  { %17627 = vst [vmem:[#allocation25_spill] sm:$0xff] %v14200_v59  ;;  %v10560_v20 = vmul.f32 -0.999995, %v14200_v59  ;;  %13063 = vpow2.f32 %v1020_v38  ;;  %v895_v17 = vmul.f32 5.656854, %v11562_v13  ;;  %v847_v48 = vpop.f32.mrb[9].mxu1 }
 0x16d   :  { %17628 = vst [vmem:[#allocation26_spill] sm:$0xff] %v14203_v19  ;;  %13065 = vpow2.f32 %v1018_v63  ;;  %v10559_v53 = vmul.f32 -0.999995, %v14203_v19  ;;  %v894_v41 = vmul.f32 5.656854, %v847_v48  ;;  %17635 = vst [vmem:[#allocation33_spill] sm:$0xff] %v14241_v35 }
 0x16e   :  { %v13056_v50 = vpop.eup %13055  ;;  %v1024_v4 = vmul.f32 1.442695, %v10560_v20  ;;  %v14222_v1 = vadd.f32 %v911_v8, %v895_v17  ;;  %v14243_v8 = vunpack.i.l.bf16 %v12965_v2  ;;  %v12978_v17 = vpop.permute.xlu1 %12977  ;;  %v985_v61 = vmul.f32 0.999995, %v14200_v59 }
 0x16f   :  { %v13058_v27 = vpop.eup %13057  ;;  %v1043_v32 = vadd.f32 1.0, %v13056_v50  ;;  %v11565_v54 = vpop.f32.mrb[10].mxu1  ;;  %v1022_v60 = vmul.f32 1.442695, %v10559_v53  ;;  %v14232_v51 = vadd.f32 %v910_v37, %v894_v41  ;;  %v14252_v53 = vunpack.i.h.bf16 %v12978_v17 }
 0x170   :  { %17630 = vst [vmem:[#allocation28_spill] sm:$0xff] %v14222_v1  ;;  %v1042_v58 = vadd.f32 1.0, %v13058_v27  ;;  %13067 = vpow2.f32 %v1024_v4  ;;  %v897_v7 = vmul.f32 5.656854, %v11565_v54  ;;  %v857_v42 = vpop.f32.mrb[11].mxu1  ;;  %17636 = vst [vmem:[#allocation34_spill] sm:$0xff] %v14243_v8  ;;  %v14254_v41 = vunpack.i.l.bf16 %v12978_v17 }
 0x171   :  { %13069 = vrcp.f32 %v1043_v32  ;;  %v10562_v6 = vmul.f32 -0.999995, %v14222_v1  ;;  %17633 = vst [vmem:[#allocation31_spill] sm:$0xff] %v14232_v51  ;;  %v896_v14 = vmul.f32 5.656854, %v857_v42  ;;  %v915_v4 = vld [vmem:[%s17418_s2 + $0x68] sm:$0xff] }
 0x172   :  { %v13060_v10 = vpop.eup %13059  ;;  %13071 = vrcp.f32 %v1042_v58  ;;  %v14239_v15 = vadd.f32 %v913_v3, %v897_v7  ;;  %v10561_v48 = vmul.f32 -0.999995, %v14232_v51  ;;  %17638 = vst [vmem:[#allocation36_spill] sm:$0xff] %v14252_v53  ;;  %17639 = vst [vmem:[#allocation37_spill] sm:$0xff] %v14254_v41  ;;  %v914_v3 = vld [vmem:[%s17418_s2 + $0x60] sm:$0xff]  ;;  %v14324_v28 = vpop.permute.xlu1 %1380 }
 0x173   :  { %v1045_v38 = vadd.f32 1.0, %v13060_v10  ;;  %13073 = vpow2.f32 %v1022_v60  ;;  %v1028_v13 = vmul.f32 1.442695, %v10562_v6  ;;  %v11568_v63 = vpop.f32.mrb[12].mxu1  ;;  %v13062_v20 = vpop.eup %13061  ;;  %v14247_v16 = vadd.f32 %v912_v11, %v896_v14  ;;  %v917_v10 = vld [vmem:[%s17418_s2 + $0x78] sm:$0xff]  ;;  %17649 = vst [vmem:[#allocation45_spill] sm:$0xff] %v14324_v28 }
 0x174   :  { %17634 = vst [vmem:[#allocation32_spill] sm:$0xff] %v14239_v15  ;;  %v10564_v50 = vmul.f32 -0.999995, %v14239_v15  ;;  %v1044_v37 = vadd.f32 1.0, %v13062_v20  ;;  %v899_v27 = vmul.f32 5.656854, %v11568_v63  ;;  %v12984_v60 = vpop.permute.xlu0 %12983 }
 0x175   :  { %17637 = vst [vmem:[#allocation35_spill] sm:$0xff] %v14247_v16  ;;  %13075 = vrcp.f32 %v1045_v38  ;;  %v867_v32 = vpop.f32.mrb[13].mxu1  ;;  %v1026_v2 = vmul.f32 1.442695, %v10561_v48  ;;  %v10563_v7 = vmul.f32 -0.999995, %v14247_v16  ;;  %v14265_v38 = vunpack.i.h.bf16 %v12984_v60 }
 0x176   :  { %13077 = vpow2.f32 %v1028_v13  ;;  %v1032_v54 = vmul.f32 1.442695, %v10564_v50  ;;  %v13064_v58 = vpop.eup %13063  ;;  %v14260_v42 = vadd.f32 %v915_v4, %v899_v27  ;;  %v898_v6 = vmul.f32 5.656854, %v867_v32 }
 0x177   :  { %13079 = vrcp.f32 %v1044_v37  ;;  %v11571_v11 = vpop.f32.mrb[14].mxu1  ;;  %v13066_v14 = vpop.eup %13065  ;;  %17641 = vst [vmem:[#allocation39_spill] sm:$0xff] %v14265_v38  ;;  %v1047_v13 = vadd.f32 1.0, %v13064_v58  ;;  %v979_v17 = vmul.f32 0.999995, %v14164_v55  ;;  %v14274_v57 = vunpack.i.l.bf16 %v12984_v60 }
 0x178   :  { %17640 = vst [vmem:[#allocation38_spill] sm:$0xff] %v14260_v42  ;;  %13081 = vpow2.f32 %v1026_v2  ;;  %v901_v63 = vmul.f32 5.656854, %v11571_v11  ;;  %v877_v20 = vpop.f32.mrb[15].mxu1  ;;  %v1046_v48 = vadd.f32 1.0, %v13066_v14  ;;  %v14269_v27 = vadd.f32 %v914_v3, %v898_v6 }
 0x179   :  { %13083 = vpow2.f32 %v1032_v54  ;;  %v1030_v50 = vmul.f32 1.442695, %v10563_v7  ;;  %v10566_v37 = vmul.f32 -0.999995, %v14260_v42  ;;  %v900_v58 = vmul.f32 5.656854, %v877_v20 }
 0x17a   :  { %v13068_v4 = vpop.eup %13067  ;;  %13085 = vrcp.f32 %v1047_v13  ;;  %17642 = vst [vmem:[#allocation40_spill] sm:$0xff] %v14269_v27  ;;  %v14271_v32 = vadd.f32 %v917_v10, %v901_v63  ;;  %17644 = vst [vmem:[#allocation42_spill] sm:$0xff] %v14274_v57  ;;  %v916_v7 = vld [vmem:[%s17418_s2 + $0x70] sm:$0xff]  ;;  %v981_v10 = vmul.f32 0.999995, %v14176_v34 }
 0x17b   :  { %v13070_v21 = vpop.eup %13069  ;;  %13087 = vrcp.f32 %v1046_v48  ;;  %v1049_v2 = vadd.f32 1.0, %v13068_v4  ;;  %v1036_v54 = vmul.f32 1.442695, %v10566_v37  ;;  %v10565_v14 = vmul.f32 -0.999995, %v14269_v27 }
 0x17c   :  { %17643 = vst [vmem:[#allocation41_spill] sm:$0xff] %v14271_v32  ;;  %v13072_v11 = vpop.eup %13071  ;;  %v1091_v5 = vmul.f32 %v13070_v21, %v979_v17  ;;  %13089 = vpow2.f32 %v1030_v50  ;;  %v10568_v21 = vmul.f32 -0.999995, %v14271_v32  ;;  %v14284_v48 = vadd.f32 %v916_v7, %v900_v58 }
 0x17d   :  { %v13074_v3 = vpop.eup %13073  ;;  %v1090_v6 = vmul.f32 %v13072_v11, %v978_v56  ;;  %13091 = vrcp.f32 %v1049_v2  ;;  %v1034_v17 = vmul.f32 1.442695, %v10565_v14  ;;  %v980_v4 = vmul.f32 0.999995, %v14179_v33 }
 0x17e   :  { %v1187_v13 = vmul.f32 %v14212_v44, %v1091_v5  ;;  %v1048_v63 = vadd.f32 1.0, %v13074_v3  ;;  %13093 = vpow2.f32 %v1036_v54  ;;  %17645 = vst [vmem:[#allocation43_spill] sm:$0xff] %v14284_v48  ;;  %v1040_v37 = vmul.f32 1.442695, %v10568_v21 }
 0x17f   :  { %v13076_v60 = vpop.eup %13075  ;;  %v1186_v20 = vmul.f32 %v14220_v0, %v1090_v6  ;;  %v10567_v58 = vmul.f32 -0.999995, %v14284_v48 }
 0x180   :  { %v13078_v50 = vpop.eup %13077  ;;  %v1093_v56 = vmul.f32 %v13076_v60, %v981_v10  ;;  %13095 = vrcp.f32 %v1048_v63  ;;  %v983_v10 = vmul.f32 0.999995, %v14188_v45  ;;  %v982_v60 = vmul.f32 0.999995, %v14190_v12 }
 0x181   :  { %v13080_v2 = vpop.eup %13079  ;;  %v14287_v11 = vpack.c.bf16 %v1187_v13, %v1186_v20  ;;  %v1051_v5 = vadd.f32 1.0, %v13078_v50  ;;  %13097 = vpow2.f32 %v1034_v17  ;;  %v1038_v17 = vmul.f32 1.442695, %v10567_v58 }
 0x182   :  { %v13082_v54 = vpop.eup %13081  ;;  %v1189_v3 = vmul.f32 %v14208_v43, %v1093_v56  ;;  %v1092_v6 = vmul.f32 %v13080_v2, %v980_v4  ;;  %13099 = vpow2.f32 %v1040_v37 }
 0x183   :  { %v13084_v7 = vpop.eup %13083  ;;  %13101 = vrcp.f32 %v1051_v5  ;;  %v1050_v14 = vadd.f32 1.0, %v13082_v54  ;;  %v17435_v63 = vshrl.u32 %v14287_v11, 16  ;;  %v1299_v37 = vshll.u32 %v14287_v11, 16 }
 0x184   :  { %v13086_v21 = vpop.eup %13085  ;;  %v1188_v13 = vmul.f32 %v14210_v18, %v1092_v6  ;;  %v1053_v20 = vadd.f32 1.0, %v13084_v7  ;;  %v17646_v6 = vmov 0 }
 0x185   :  { %v13088_v50 = vpop.eup %13087  ;;  %v1095_v56 = vmul.f32 %v13086_v21, %v983_v10  ;;  %13103 = vrcp.f32 %v1050_v14  ;;  %v1298_v4 = vrot.slane %v17435_v63, 7  ;;  %v17647_v6 = vsel %vm14303_vm3, 4294967295, %v17646_v6 }
 0x186   :  { %v13090_v2 = vpop.eup %13089  ;;  %v14298_v5 = vpack.c.bf16 %v1189_v3, %v1188_v13  ;;  %v1094_v54 = vmul.f32 %v13088_v50, %v982_v60  ;;  %13105 = vrcp.f32 %v1053_v20  ;;  %17648 = vst [vmem:[#allocation44_spill] sm:$0xff] %v17647_v6  ;;  %v984_v20 = vmul.f32 0.999995, %v14203_v19 }
 0x187   :  { %v13092_v58 = vpop.eup %13091  ;;  %v1191_v7 = vmul.f32 %v14241_v35, %v1095_v56  ;;  %v1052_v10 = vadd.f32 1.0, %v13090_v2  ;;  %13107 = vpow2.f32 %v1038_v17  ;;  %v1301_v14 = vor.u32 %v1299_v37, %v1298_v4 }
 0x188   :  { %v13094_v21 = vpop.eup %13093  ;;  %v1190_v3 = vmul.f32 %v14243_v8, %v1094_v54  ;;  %v1097_v13 = vmul.f32 %v13092_v58, %v985_v61  ;;  %v17439_v60 = vshrl.u32 %v14298_v5, 16  ;;  %v1306_v56 = vshll.u32 %v14298_v5, 16 }
 0x189   :  { %13109 = vrcp.f32 %v1052_v10  ;;  %v1055_v50 = vadd.f32 1.0, %v13094_v21  ;;  %v1367_v63 = vsel %vm14303_vm3, 0, %v1301_v14  ;;  %v987_v10 = vmul.f32 0.999995, %v14222_v1 }
 0x18a   :  { %v13096_v9 = vpop.eup %13095  ;;  %v14313_v36 = vpack.c.bf16 %v1191_v7, %v1190_v3  ;;  %v1305_v17 = vrot.slane %v17439_v60, 7  ;;  %v1408_v61 = vmul.bf16 %v14229_v40, %v1367_v63  ;;  %v1193_v54 = vmul.f32 %v14227_v49, %v1097_v13 }
 0x18b   :  { %v13098_v2 = vpop.eup %13097  ;;  %v1096_v58 = vmul.f32 %v13096_v9, %v984_v20  ;;  %13111 = vrcp.f32 %v1055_v50  ;;  %v986_v14 = vmul.f32 0.999995, %v14232_v51  ;;  %v989_v13 = vmul.f32 0.999995, %v14239_v15 }
 0x18c   :  { %v13100_v21 = vpop.eup %13099  ;;  %v1054_v62 = vadd.f32 1.0, %v13098_v2  ;;  %v1308_v7 = vor.u32 %v1306_v56, %v1305_v17  ;;  %11576 = vmatprep.mubr.msk.bf16.mxu1 %vm1428_vm4, %v1408_v61  ;;  %v1311_v3 = vshrl.u32 %v14313_v36, 16  ;;  %v1314_v20 = vshll.u32 %v14313_v36, 16 }
 0x18d   :  { %v13102_v60 = vpop.eup %13101  ;;  %v1192_v63 = vmul.f32 %v14237_v26, %v1096_v58  ;;  %v1057_v9 = vadd.f32 1.0, %v13100_v21  ;;  %v1825_v61 = vrot.slane %v1299_v37, 1  ;;  %v13006_v58 = vld [vmem:[%s17417_s3 + $0x8] sm:$0xff]   ;;  %v1827_v24 = vrot.slane %v1306_v56, 1 }
 0x18e   :  { %v1099_v50 = vmul.f32 %v13102_v60, %v987_v10  ;;  %13113 = vrcp.f32 %v1054_v62  ;;  %v1309_v39 = vsel %vm1294_vm2, %v1298_v4, %v1308_v7  ;;  %v1313_v2 = vrot.slane %v1311_v3, 7 }
 0x18f   :  { %v13104_v30 = vpop.eup %13103  ;;  %v14330_v29 = vpack.c.bf16 %v1193_v54, %v1192_v63  ;;  %13115 = vrcp.f32 %v1057_v9  ;;  %v1409_v25 = vmul.bf16 %v14214_v46, %v1309_v39  ;;  %v988_v10 = vmul.f32 0.999995, %v14247_v16  ;;  %v14344_v9 = vpop.permute.xlu1 %1385 }
 0x190   :  { %v13106_v31 = vpop.eup %13105  ;;  %v1195_v21 = vmul.f32 %v14252_v53, %v1099_v50  ;;  %v1098_v23 = vmul.f32 %v13104_v30, %v986_v14  ;;  %v1316_v60 = vor.u32 %v1314_v20, %v1313_v2  ;;  %v1830_v54 = vrot.slane %v1314_v20, 1  ;;  %17650 = vst [vmem:[#allocation46_spill] sm:$0xff] %v14344_v9 }
 0x191   :  { %v13108_v62 = vpop.eup %13107  ;;  %v1101_v4 = vmul.f32 %v13106_v31, %v989_v13  ;;  %11577 = vmatmul.mubr.msk.bf16.vlgmr.msra.gmra.mrb[16].mxu1 %vm1428_vm4, %v1409_v25  ;;  %v17447_v37 = vshrl.u32 %v14330_v29, 16  ;;  %v991_v7 = vmul.f32 0.999995, %v14260_v42  ;;  %v1322_v13 = vshll.u32 %v14330_v29, 16 }
 0x192   :  { %v1194_v39 = vmul.f32 %v14254_v41, %v1098_v23  ;;  %v1056_v63 = vadd.f32 1.0, %v13108_v62  ;;  %11593 = vmatpush3.bf16.msra.mxu1 %v14155_v52  ;;  %v1317_v30 = vsel %vm1294_vm2, %v1305_v17, %v1316_v60  ;;  %v14353_v23 = vld [vmem:[%s17417_s3 + $0x20] sm:$0xff]   ;;  %v17651_v52 = vshrl.u32 %v14287_v11, 16  ;;  %v12990_v17 = vpop.permute.xlu0 %12989 }
 0x193   :  { %v13110_v14 = vpop.eup %13109  ;;  %v1410_v31 = vmul.bf16 %v14324_v28, %v1317_v30  ;;  %v1321_v25 = vrot.slane %v17447_v37, 7  ;;  %11594 = vmatprep.subr.bf16.mxu1 %v13006_v58  ;;  %v1197_v60 = vmul.f32 %v14265_v38, %v1101_v4  ;;  %v14360_v37 = vunpack.i.h.bf16 %v12990_v17 }
 0x194   :  { %v1826_v20 = vor.u32 %v1825_v61, %v17651_v52  ;;  %v14357_v50 = vpack.c.bf16 %v1195_v21, %v1194_v39  ;;  %v1100_v62 = vmul.f32 %v13110_v14, %v988_v10  ;;  %13117 = vrcp.f32 %v1056_v63 }
 0x195   :  { %v13112_v30 = vpop.eup %13111  ;;  %11580 = vmatprep.mubr.msk.bf16.mxu1 %vm1428_vm4, %v1410_v31  ;;  %v1324_v22 = vor.u32 %v1322_v13, %v1321_v25  ;;  %v1832_v42 = vor.u32 %v1830_v54, %v1311_v3  ;;  %v14363_v1 = vunpack.i.l.bf16 %v12990_v17  ;;  %v990_v4 = vmul.f32 0.999995, %v14269_v27  ;;  %v12996_v17 = vpop.permute.xlu1 %12995 }
 0x196   :  { %v1196_v15 = vmul.f32 %v14274_v57, %v1100_v62  ;;  %v1103_v61 = vmul.f32 %v13112_v30, %v991_v7  ;;  %v1327_v21 = vshrl.u32 %v14357_v50, 16  ;;  %11595 = vmatpush3.bf16.msra.mxu1 %v13006_v58  ;;  %v14371_v39 = vsel %vm1824_vm5, %v1826_v20, %v1827_v24  ;;  %v14391_v27 = vpop.permute.xlu0 %1390 }
 0x197   :  { %v1325_v10 = vsel %vm1294_vm2, %v1313_v2, %v1324_v22  ;;  %11612 = vmatprep.subr.bf16.mxu1 %v14353_v23  ;;  %v17652_v56 = vshrl.u32 %v14298_v5, 16  ;;  %v1330_v58 = vshll.u32 %v14357_v50, 16  ;;  %v993_v62 = vmul.f32 0.999995, %v14271_v32  ;;  %17653 = vst [vmem:[#allocation47_spill] sm:$0xff] %v14391_v27 }
 0x198   :  { %v13114_v63 = vpop.eup %13113  ;;  %v14375_v14 = vpack.c.bf16 %v1197_v60, %v1196_v15  ;;  %v1411_v7 = vmul.bf16 %v14344_v9, %v1325_v10  ;;  %v1329_v31 = vrot.slane %v1327_v21, 7  ;;  %v1199_v22 = vmul.f32 %v14360_v37, %v1103_v61 }
 0x199   :  { %v1829_v3 = vor.u32 %v1827_v24, %v17652_v56  ;;  %v13116_v52 = vpop.eup %13115  ;;  %v1102_v2 = vmul.f32 %v13114_v63, %v990_v4  ;;  %v14386_v60 = vunpack.i.h.bf16 %v12996_v17  ;;  %v14388_v30 = vunpack.i.l.bf16 %v12996_v17 }
 0x19a   :  { %11581 = vmatmul.mubr.msk.bf16.gmra.mrb[20].mxu1 %vm1428_vm4, %v1411_v7  ;;  %v1332_v24 = vor.u32 %v1330_v58, %v1329_v31  ;;  %v1335_v15 = vshrl.u32 %v14375_v14, 16  ;;  %v1105_v56 = vmul.f32 %v13116_v52, %v993_v62  ;;  %v992_v7 = vmul.f32 0.999995, %v14284_v48 }
 0x19b   :  { %v14382_v20 = vsel %vm1824_vm5, %v1829_v3, %v1830_v54  ;;  %v1198_v10 = vmul.f32 %v14363_v1, %v1102_v2  ;;  %v1338_v54 = vshll.u32 %v14375_v14, 16  ;;  %v1833_v3 = vrot.slane %v1322_v13, 1 }
 0x19c   :  { %v1333_v61 = vsel %vm1294_vm2, %v1321_v25, %v1332_v24  ;;  %v1337_v4 = vrot.slane %v1335_v15, 7  ;;  %v1836_v51 = vrot.slane %v1330_v58, 1  ;;  %v17654_v52 = vshrl.u32 %v14330_v29, 16  ;;  %v14404_v25 = vpop.permute.xlu1 %1395 }
 0x19d   :  { %v14395_v63 = vpack.c.bf16 %v1199_v22, %v1198_v10  ;;  %v1412_v32 = vmul.bf16 %v14391_v27, %v1333_v61  ;;  %v14400_v2 = vsel %vm1824_vm5, %v1832_v42, %v1833_v3  ;;  %17655 = vst [vmem:[#allocation48_spill] sm:$0xff] %v14404_v25  ;;  %v1201_v24 = vmul.f32 %v14386_v60, %v1105_v56 }
 0x19e   :  { %v13118_v17 = vpop.eup %13117  ;;  %v1340_v16 = vor.u32 %v1338_v54, %v1337_v4  ;;  %v1835_v62 = vor.u32 %v1833_v3, %v17654_v52  ;;  %v1838_v42 = vor.u32 %v1836_v51, %v1327_v21  ;;  %v1839_v45 = vrot.slane %v1338_v54, 1 }
 0x19f   :  { %v1104_v13 = vmul.f32 %v13118_v17, %v992_v7  ;;  %11584 = vmatprep.mubr.msk.bf16.mxu1 %vm1428_vm4, %v1412_v32  ;;  %v1343_v22 = vshrl.u32 %v14395_v63, 16  ;;  %v1346_v10 = vshll.u32 %v14395_v63, 16 }
 0x1a0   :  { %v1341_v58 = vsel %vm1294_vm2, %v1329_v31, %v1340_v16  ;;  %v14412_v61 = vsel %vm1824_vm5, %v1835_v62, %v1836_v51  ;;  %v14420_v17 = vsel %vm1824_vm5, %v1838_v42, %v1839_v45  ;;  %v1841_v16 = vor.u32 %v1839_v45, %v1335_v15  ;;  %v14422_v62 = vpop.permute.xlu1 %1400  ;;  %v14439_v42 = vpop.permute.xlu0 %1405 }
 0x1a1   :  { %v1200_v48 = vmul.f32 %v14388_v30, %v1104_v13  ;;  %v1413_v3 = vmul.bf16 %v14404_v25, %v1341_v58  ;;  %v1345_v52 = vrot.slane %v1343_v22, 7  ;;  %v1842_v56 = vrot.slane %v1346_v10, 1 }
 0x1a3   :  { %v14416_v7 = vpack.c.bf16 %v1201_v24, %v1200_v48  ;;  %11585 = vmatmul.mubr.msk.bf16.gmra.mrb[24].mxu1 %vm1428_vm4, %v1413_v3  ;;  %v1348_v32 = vor.u32 %v1346_v10, %v1345_v52  ;;  %v1844_v31 = vor.u32 %v1842_v56, %v1343_v22  ;;  %v1219_v48 = vrot.slane %v14287_v11, 7 }
 0x1a4   :  { %v14430_v24 = vsel %vm1824_vm5, %v1841_v16, %v1842_v56  ;;  %v1220_v16 = vrot.slane %v14298_v5, 7 }
 0x1a5   :  { %v1349_v51 = vsel %vm1294_vm2, %v1337_v4, %v1348_v32  ;;  %v1351_v21 = vshrl.u32 %v14416_v7, 16  ;;  %v1354_v13 = vshll.u32 %v14416_v7, 16  ;;  %v1244_v22 = vsel %vm1218_vm0, 0, %v1219_v48  ;;  %v14442_v32 = vpop.permute.xlu1 %1248 }
 0x1a6   :  { %v1414_v54 = vmul.bf16 %v14422_v62, %v1349_v51  ;;  %v1286_v51 = vmul.bf16 %v14442_v32, %v1244_v22  ;;  %v1224_v22 = vrot.slane %v14330_v29, 7  ;;  %v1232_v12 = vrot.slane %v14416_v7, 7 }
 0x1a7   :  { %v1353_v10 = vrot.slane %v1351_v21, 7  ;;  %v1845_v58 = vrot.slane %v1354_v13, 1 }
 0x1a8   :  { %11588 = vmatprep.mubr.msk.bf16.mxu1 %vm1428_vm4, %v1414_v54  ;;  %v14452_v54 = vpop.permute.xlu0 %1253 }
 0x1a9   :  { %v1356_v45 = vor.u32 %v1354_v13, %v1353_v10  ;;  %v14434_v15 = vsel %vm1824_vm5, %v1844_v31, %v1845_v58  ;;  %v14436_v4 = vor.u32 %v1845_v58, %v1351_v21  ;;  %v1222_v31 = vrot.slane %v14313_v36, 7  ;;  %v13008_v58 = vld [vmem:[%s17417_s3 + $0x28] sm:$0xff]  }
 0x1aa   :  { %v1221_v21 = vsel %vm1218_vm0, %v1219_v48, %v1220_v16  ;;  %v1226_v48 = vrot.slane %v14357_v50, 7 }
 0x1ab   :  { %v1357_v3 = vsel %vm1294_vm2, %v1345_v52, %v1356_v45  ;;  %v1223_v13 = vsel %vm1218_vm0, %v1220_v16, %v1222_v31  ;;  %v14454_v52 = vpop.permute.xlu1 %1258  ;;  %v1287_v10 = vmul.bf16 %v14452_v54, %v1221_v21 }
 0x1ac   :  { %v1415_v56 = vmul.bf16 %v14439_v42, %v1357_v3  ;;  %17656 = vst [vmem:[#allocation49_spill] sm:$0xff] %v14454_v52  ;;  %v1288_v45 = vmul.bf16 %v14454_v52, %v1223_v13  ;;  %v13009_v3 = vld [vmem:[%s17417_s3 + $0x30] sm:$0xff]   ;;  %v1227_v16 = vsel %vm1218_vm0, %v1224_v22, %v1226_v48 }
 0x1ae   :  { %11589 = vmatmul.mubr.msk.bf16.gmra.mrb[28].mxu1 %vm1428_vm4, %v1415_v56  ;;  %v1225_v56 = vsel %vm1218_vm0, %v1222_v31, %v1224_v22 }
 0x1af   :  { %11596 = vmatprep.mubr.msk.bf16.mxu1 %vm1428_vm4, %v1286_v51  ;;  %v14471_v51 = vpop.permute.xlu0 %1263  ;;  %v14473_v21 = vpop.permute.xlu1 %1268 }
 0x1b0   :  { %17657 = vst [vmem:[#allocation50_spill] sm:$0xff] %v14471_v51  ;;  %17658 = vst [vmem:[#allocation51_spill] sm:$0xff] %v14473_v21  ;;  %v1289_v13 = vmul.bf16 %v14471_v51, %v1225_v56 }
 0x1b3   :  { %v14485_v59 = vpop.permute.xlu1 %1278 }
 0x1b4   :  { %17660 = vst [vmem:[#allocation53_spill] sm:$0xff] %v14485_v59 }
 0x1b6   :  { %11597 = vmatmul.mubr.msk.bf16.vlgmr.msra.gmra.mrb[16].mxu1 %vm1428_vm4, %v1287_v10  ;;  %v1228_v10 = vrot.slane %v14375_v14, 7 }
 0x1b7   :  { %11613 = vmatpush3.bf16.msra.mxu1 %v14353_v23  ;;  %11600 = vmatprep.mubr.msk.bf16.mxu1 %vm1428_vm4, %v1288_v45  ;;  %v1290_v23 = vmul.bf16 %v14473_v21, %v1227_v16  ;;  %v1230_v45 = vrot.slane %v14395_v63, 7 }
 0x1b8   :  { %11614 = vmatprep.subr.bf16.mxu1 %v13008_v58  ;;  %v1229_v31 = vsel %vm1218_vm0, %v1226_v48, %v1228_v10 }
 0x1b9   :  { %v1231_v22 = vsel %vm1218_vm0, %v1228_v10, %v1230_v45  ;;  %v13010_v10 = vld [vmem:[%s17417_s3 + $0x38] sm:$0xff]  }
 0x1ba   :  { %v1292_v16 = vmul.bf16 %v14485_v59, %v1231_v22 }
 0x1bb   :  { %11615 = vmatpush3.bf16.msra.mxu1 %v13008_v58  ;;  %v14483_v58 = vpop.permute.xlu0 %1273 }
 0x1bc   :  { %11632 = vmatprep.subr.bf16.mxu1 %v13009_v3  ;;  %17659 = vst [vmem:[#allocation52_spill] sm:$0xff] %v14483_v58  ;;  %v1291_v56 = vmul.bf16 %v14483_v58, %v1229_v31 }
 0x1be   :  { %11601 = vmatmul.mubr.msk.bf16.gmra.mrb[20].mxu1 %vm1428_vm4, %v1289_v13  ;;  %v1233_v13 = vsel %vm1218_vm0, %v1230_v45, %v1232_v12  ;;  %v13011_v12 = vld [vmem:[%s17417_s3 + $0x40] sm:$0xff]  }
 0x1bf   :  { %11604 = vmatprep.mubr.msk.bf16.mxu1 %vm1428_vm4, %v1290_v23  ;;  %v14493_v23 = vpop.permute.xlu0 %1283 }
 0x1c0   :  { %17661 = vst [vmem:[#allocation54_spill] sm:$0xff] %v14493_v23  ;;  %v1293_v48 = vmul.bf16 %v14493_v23, %v1233_v13 }
 0x1c3   :  { %v14524_v31 = vpop.permute.xlu0 %1866 }
 0x1c4   :  { %17663 = vst [vmem:[#allocation56_spill] sm:$0xff] %v14524_v31 }
 0x1c6   :  { %11605 = vmatmul.mubr.msk.bf16.gmra.mrb[24].mxu1 %vm1428_vm4, %v1291_v56  ;;  %v1900_v56 = vmul.bf16 %v14524_v31, %v14382_v20 }
 0x1c7   :  { %11608 = vmatprep.mubr.msk.bf16.mxu1 %vm1428_vm4, %v1292_v16  ;;  %v13012_v16 = vld [vmem:[%s17417_s3 + $0x48] sm:$0xff]  }
 0x1ce   :  { %11609 = vmatmul.mubr.msk.bf16.gmra.mrb[28].mxu1 %vm1428_vm4, %v1293_v48 }
 0x1cf   :  { %11616 = vmatprep.mubr.msk.bf16.mxu1 %vm1428_vm4, %v14287_v11 }
 0x1d6   :  { %11617 = vmatmul.mubr.msk.bf16.vlgmr.msra.gmra.mrb[16].mxu1 %vm1428_vm4, %v14298_v5 }
 0x1d7   :  { %11633 = vmatpush3.bf16.msra.mxu1 %v13009_v3  ;;  %11620 = vmatprep.mubr.msk.bf16.mxu1 %vm1428_vm4, %v14313_v36  ;;  %v14517_v3 = vpop.permute.xlu1 %1861 }
 0x1d8   :  { %11634 = vmatprep.subr.bf16.mxu1 %v13010_v10  ;;  %17662 = vst [vmem:[#allocation55_spill] sm:$0xff] %v14517_v3  ;;  %v1899_v45 = vmul.bf16 %v14517_v3, %v14371_v39  ;;  %v14537_v39 = vpop.permute.xlu0 %1876 }
 0x1d9   :  { %17665 = vst [vmem:[#allocation58_spill] sm:$0xff] %v14537_v39  ;;  %v1902_v20 = vmul.bf16 %v14537_v39, %v14412_v61  ;;  %v17669_v61 = vmov 0 }
 0x1da   :  { %v17670_v61 = vsel %vm14557_vm7, 4294967295, %v17669_v61 }
 0x1db   :  { %11635 = vmatpush3.bf16.msra.mxu1 %v13010_v10  ;;  %v14526_v22 = vpop.permute.xlu1 %1871  ;;  %17671 = vst [vmem:[#allocation62_spill] sm:$0xff] %v17670_v61 }
 0x1dc   :  { %11652 = vmatprep.subr.bf16.mxu1 %v13011_v12  ;;  %17664 = vst [vmem:[#allocation57_spill] sm:$0xff] %v14526_v22  ;;  %v1901_v13 = vmul.bf16 %v14526_v22, %v14400_v2  ;;  %v14547_v2 = vpop.permute.xlu0 %1886 }
 0x1dd   :  { %17667 = vst [vmem:[#allocation60_spill] sm:$0xff] %v14547_v2 }
 0x1de   :  { %11621 = vmatmul.mubr.msk.bf16.gmra.mrb[20].mxu1 %vm1428_vm4, %v14330_v29 }
 0x1df   :  { %11624 = vmatprep.mubr.msk.bf16.mxu1 %vm1428_vm4, %v14357_v50  ;;  %v14539_v48 = vpop.permute.xlu1 %1881 }
 0x1e0   :  { %17666 = vst [vmem:[#allocation59_spill] sm:$0xff] %v14539_v48  ;;  %v1903_v10 = vmul.bf16 %v14539_v48, %v14420_v17  ;;  %v2058_v17 = vrot.slane %v14298_v5, 1 }
 0x1e6   :  { %11625 = vmatmul.mubr.msk.bf16.gmra.mrb[24].mxu1 %vm1428_vm4, %v14375_v14 }
 0x1e7   :  { %11628 = vmatprep.mubr.msk.bf16.mxu1 %vm1428_vm4, %v14395_v63 }
 0x1ee   :  { %11629 = vmatmul.mubr.msk.bf16.gmra.mrb[28].mxu1 %vm1428_vm4, %v14416_v7 }
 0x1ef   :  { %11636 = vmatprep.mubr.msk.bf16.mxu1 %vm1428_vm4, %v1899_v45  ;;  %v1904_v45 = vmul.bf16 %v14547_v2, %v14430_v24  ;;  %v1858_v24 = vsel %vm14557_vm7, %v14436_v4, 0 }
 0x1f6   :  { %11637 = vmatmul.mubr.msk.bf16.vlgmr.msra.gmra.mrb[16].mxu1 %vm1428_vm4, %v1900_v56 }
 0x1f7   :  { %11653 = vmatpush3.bf16.msra.mxu1 %v13011_v12  ;;  %11640 = vmatprep.mubr.msk.bf16.mxu1 %vm1428_vm4, %v1901_v13  ;;  %v14549_v12 = vpop.permute.xlu1 %1891 }
 0x1f8   :  { %11654 = vmatprep.subr.bf16.mxu1 %v13012_v16  ;;  %17668 = vst [vmem:[#allocation61_spill] sm:$0xff] %v14549_v12  ;;  %v1905_v56 = vmul.bf16 %v14549_v12, %v14434_v15 }
 0x1fb   :  { %11655 = vmatpush3.bf16.msra.mxu1 %v13012_v16  ;;  %v2057_v16 = vrot.slane %v14287_v11, 1  ;;  %v14567_v13 = vpop.permute.xlu1 %2085  ;;  %v2062_v11 = vrot.slane %v14330_v29, 1  ;;  %v2066_v29 = vrot.slane %v14375_v14, 1  ;;  %v2070_v14 = vrot.slane %v14416_v7, 1 }
 0x1fc   :  { %17672 = vst [vmem:[#allocation63_spill] sm:$0xff] %v14567_v13 }
 0x1fd   :  { %v2059_v15 = vsel %vm2056_vm8, %v2057_v16, %v2058_v17 }
 0x1fe   :  { %11641 = vmatmul.mubr.msk.bf16.gmra.mrb[20].mxu1 %vm1428_vm4, %v1902_v20  ;;  %v14570_v20 = vpop.permute.xlu0 %1896  ;;  %v2123_v5 = vmul.bf16 %v14567_v13, %v2059_v15  ;;  %v2064_v15 = vrot.slane %v14357_v50, 1  ;;  %v2068_v50 = vrot.slane %v14395_v63, 1  ;;  %v2081_v63 = vsel %vm2056_vm8, %v2070_v14, 0 }
 0x1ff   :  { %11644 = vmatprep.mubr.msk.bf16.mxu1 %vm1428_vm4, %v1903_v10  ;;  %17673 = vst [vmem:[#allocation64_spill] sm:$0xff] %v14570_v20  ;;  %v1906_v10 = vmul.bf16 %v14570_v20, %v1858_v24  ;;  %v14581_v19 = vpop.permute.xlu1 %2095 }
 0x200   :  { %17675 = vst [vmem:[#allocation66_spill] sm:$0xff] %v14581_v19 }
 0x206   :  { %11645 = vmatmul.mubr.msk.bf16.gmra.mrb[24].mxu1 %vm1428_vm4, %v1904_v45  ;;  %v2060_v45 = vrot.slane %v14313_v36, 1 }
 0x207   :  { %11648 = vmatprep.mubr.msk.bf16.mxu1 %vm1428_vm4, %v1905_v56  ;;  %v14578_v56 = vpop.permute.xlu0 %2090 }
 0x208   :  { %17674 = vst [vmem:[#allocation65_spill] sm:$0xff] %v14578_v56  ;;  %v2061_v4 = vsel %vm2056_vm8, %v2058_v17, %v2060_v45  ;;  %v2063_v16 = vsel %vm2056_vm8, %v2060_v45, %v2062_v11  ;;  %v2065_v17 = vsel %vm2056_vm8, %v2062_v11, %v2064_v15  ;;  %v2067_v45 = vsel %vm2056_vm8, %v2064_v15, %v2066_v29 }
 0x209   :  { %v2124_v24 = vmul.bf16 %v14578_v56, %v2061_v4  ;;  %v2125_v36 = vmul.bf16 %v14581_v19, %v2063_v16  ;;  %v2071_v11 = vsel %vm2056_vm8, %v2068_v50, %v2070_v14 }
 0x20e   :  { %11649 = vmatmul.mubr.msk.bf16.gmra.mrb[28].mxu1 %vm1428_vm4, %v1906_v10  ;;  %v14590_v10 = vpop.permute.xlu0 %2100 }
 0x20f   :  { %11656 = vmatprep.mubr.msk.bf16.mxu1 %vm1428_vm4, %v2123_v5  ;;  %17676 = vst [vmem:[#allocation67_spill] sm:$0xff] %v14590_v10  ;;  %v14593_v5 = vpop.permute.xlu1 %2105  ;;  %v2126_v4 = vmul.bf16 %v14590_v10, %v2065_v17 }
 0x210   :  { %17677 = vst [vmem:[#allocation68_spill] sm:$0xff] %v14593_v5  ;;  %v2127_v16 = vmul.bf16 %v14593_v5, %v2067_v45  ;;  %v13013_v45 = vld [vmem:[%s17417_s3 + $0x60] sm:$0xff]  }
 0x211   :  { %11672 = vmatprep.subr.bf16.mxu0 %v13013_v45 }
 0x212   :  { %11673 = vmatpush3.bf16.msra.mxu0 %v13013_v45 }
 0x213   :  { %v14606_v55 = vpop.permute.xlu1 %2115 }
 0x214   :  { %17679 = vst [vmem:[#allocation70_spill] sm:$0xff] %v14606_v55  ;;  %v2129_v17 = vmul.bf16 %v14606_v55, %v2071_v11 }
 0x216   :  { %11657 = vmatmul.mubr.msk.bf16.vlgmr.msra.gmra.mrb[16].mxu1 %vm1428_vm4, %v2124_v24  ;;  %v2069_v24 = vsel %vm2056_vm8, %v2066_v29, %v2068_v50  ;;  %v14632_v50 = vld [vmem:[%s17419_s4] ss:$0 sm:$0xff] }
 0x217   :  { %11660 = vmatprep.mubr.msk.bf16.mxu1 %vm1428_vm4, %v2125_v36  ;;  %v14604_v36 = vpop.permute.xlu0 %2110 }
 0x218   :  { %17678 = vst [vmem:[#allocation69_spill] sm:$0xff] %v14604_v36  ;;  %v2128_v15 = vmul.bf16 %v14604_v36, %v2069_v24 }
 0x21b   :  { %v14613_v7 = vpop.permute.xlu0 %2120 }
 0x21c   :  { %17680 = vst [vmem:[#allocation71_spill] sm:$0xff] %v14613_v7  ;;  %v2130_v29 = vmul.bf16 %v14613_v7, %v2081_v63 }
 0x21e   :  { %11661 = vmatmul.mubr.msk.bf16.gmra.mrb[20].mxu1 %vm1428_vm4, %v2126_v4  ;;  %v13014_v4 = vld [vmem:[%s17417_s3 + $0x68] sm:$0xff]  }
 0x21f   :  { %11664 = vmatprep.mubr.msk.bf16.mxu1 %vm1428_vm4, %v2127_v16  ;;  %11674 = vmatprep.subr.bf16.mxu0 %v13014_v4  ;;  %v14626_v16 = vld [vmem:[%s17417_s3 + $0x50] sm:$0xff]  }
 0x220   :  { %11675 = vmatpush3.bf16.msra.mxu0 %v13014_v4 }
 0x221   :  { %11692 = vmatprep.subr.bf16.mxu0 %v14626_v16 }
 0x226   :  { %11665 = vmatmul.mubr.msk.bf16.gmra.mrb[24].mxu1 %vm1428_vm4, %v2128_v15 }
 0x227   :  { %11668 = vmatprep.mubr.msk.bf16.mxu1 %vm1428_vm4, %v2129_v17 }
 0x22e   :  { %11669 = vmatmul.mubr.msk.bf16.gmra.mrb[28].mxu1 %vm1428_vm4, %v2130_v29 }
 0x2e9   :  { %v11658_v14 = vpop.f32.mrb[16].mxu1 }
 0x2ea   :  { %v14635_v24 = vadd.f32 %v11658_v14, %v14632_v50  ;;  %v2201_v11 = vpop.f32.mrb[17].mxu1 }
 0x2eb   :  { %v14638_v15 = vadd.f32 %v14632_v50, %v2201_v11  ;;  %v11659_v17 = vpop.f32.mrb[18].mxu1 }
 0x2ec   :  { %v10622_v63 = vmul.f32 -0.999995, %v14635_v24  ;;  %v14642_v29 = vadd.f32 %v11659_v17, %v14632_v50  ;;  %v2204_v45 = vpop.f32.mrb[19].mxu1 }
 0x2ed   :  { %v10620_v4 = vmul.f32 -0.999995, %v14638_v15  ;;  %v14646_v34 = vadd.f32 %v14632_v50, %v2204_v45 }
 0x2ee   :  { %v2338_v47 = vmul.f32 1.442695, %v10622_v63  ;;  %v10623_v14 = vmul.f32 -0.999995, %v14642_v29 }
 0x2ef   :  { %v2334_v33 = vmul.f32 1.442695, %v10620_v4  ;;  %v10621_v7 = vmul.f32 -0.999995, %v14646_v34 }
 0x2f0   :  { %13119 = vpow2.f32 %v2338_v47  ;;  %v2340_v11 = vmul.f32 1.442695, %v10623_v14 }
 0x2f1   :  { %13121 = vpow2.f32 %v2334_v33  ;;  %v2336_v55 = vmul.f32 1.442695, %v10621_v7  ;;  %v11662_v36 = vpop.f32.mrb[20].mxu1 }
 0x2f2   :  { %13123 = vpow2.f32 %v2340_v11  ;;  %v14651_v17 = vadd.f32 %v11662_v36, %v14632_v50  ;;  %v2217_v5 = vpop.f32.mrb[21].mxu1 }
 0x2f3   :  { %13125 = vpow2.f32 %v2336_v55  ;;  %v14654_v45 = vadd.f32 %v14632_v50, %v2217_v5  ;;  %v11663_v63 = vpop.f32.mrb[22].mxu1 }
 0x2f4   :  { %v10626_v10 = vmul.f32 -0.999995, %v14651_v17  ;;  %v14658_v4 = vadd.f32 %v11663_v63, %v14632_v50  ;;  %v2220_v47 = vpop.f32.mrb[23].mxu1  ;;  %v2308_v51 = vmul.f32 0.999995, %v14651_v17 }
 0x2f5   :  { %v10624_v33 = vmul.f32 -0.999995, %v14654_v45  ;;  %v14662_v7 = vadd.f32 %v14632_v50, %v2220_v47 }
 0x2f6   :  { %v2346_v14 = vmul.f32 1.442695, %v10626_v10  ;;  %v10627_v36 = vmul.f32 -0.999995, %v14658_v4 }
 0x2f7   :  { %v2342_v11 = vmul.f32 1.442695, %v10624_v33  ;;  %v10625_v55 = vmul.f32 -0.999995, %v14662_v7 }
 0x2f8   :  { %13127 = vpow2.f32 %v2346_v14  ;;  %v2348_v5 = vmul.f32 1.442695, %v10627_v36 }
 0x2f9   :  { %13129 = vpow2.f32 %v2342_v11  ;;  %v2344_v19 = vmul.f32 1.442695, %v10625_v55  ;;  %v11666_v56 = vpop.f32.mrb[24].mxu1 }
 0x2fa   :  { %v13120_v13 = vpop.eup %13119  ;;  %13131 = vpow2.f32 %v2348_v5  ;;  %v14667_v63 = vadd.f32 %v11666_v56, %v14632_v50  ;;  %v2233_v20 = vpop.f32.mrb[25].mxu1 }
 0x2fb   :  { %v13122_v61 = vpop.eup %13121  ;;  %v2368_v47 = vadd.f32 1.0, %v13120_v13  ;;  %13133 = vpow2.f32 %v2344_v19  ;;  %v14670_v10 = vadd.f32 %v14632_v50, %v2233_v20  ;;  %v11667_v33 = vpop.f32.mrb[26].mxu1 }
 0x2fc   :  { %v13124_v12 = vpop.eup %13123  ;;  %v2366_v2 = vadd.f32 1.0, %v13122_v61  ;;  %v10630_v14 = vmul.f32 -0.999995, %v14667_v63  ;;  %v14674_v36 = vadd.f32 %v11667_v33, %v14632_v50  ;;  %v2236_v11 = vpop.f32.mrb[27].mxu1 }
 0x2fd   :  { %v13126_v55 = vpop.eup %13125  ;;  %13135 = vrcp.f32 %v2368_v47  ;;  %v2369_v56 = vadd.f32 1.0, %v13124_v12  ;;  %v10628_v5 = vmul.f32 -0.999995, %v14670_v10  ;;  %v14679_v61 = vadd.f32 %v14632_v50, %v2236_v11 }
 0x2fe   :  { %13137 = vrcp.f32 %v2366_v2  ;;  %v2367_v13 = vadd.f32 1.0, %v13126_v55  ;;  %v2354_v19 = vmul.f32 1.442695, %v10630_v14  ;;  %v10631_v48 = vmul.f32 -0.999995, %v14674_v36 }
 0x2ff   :  { %13139 = vrcp.f32 %v2369_v56  ;;  %v2350_v20 = vmul.f32 1.442695, %v10628_v5  ;;  %v10629_v39 = vmul.f32 -0.999995, %v14679_v61  ;;  %v2304_v56 = vmul.f32 0.999995, %v14635_v24 }
 0x300   :  { %13141 = vrcp.f32 %v2367_v13  ;;  %v2356_v33 = vmul.f32 1.442695, %v10631_v48  ;;  %v2305_v24 = vmul.f32 0.999995, %v14642_v29 }
 0x301   :  { %13143 = vpow2.f32 %v2354_v19  ;;  %v11670_v12 = vpop.f32.mrb[28].mxu1 }
 0x302   :  { %v13128_v22 = vpop.eup %13127  ;;  %13145 = vpow2.f32 %v2350_v20  ;;  %v14683_v2 = vadd.f32 %v11670_v12, %v14632_v50  ;;  %v2249_v14 = vpop.f32.mrb[29].mxu1  ;;  %v2352_v20 = vmul.f32 1.442695, %v10629_v39 }
 0x303   :  { %v13130_v47 = vpop.eup %13129  ;;  %v2372_v31 = vadd.f32 1.0, %v13128_v22  ;;  %13147 = vpow2.f32 %v2356_v33  ;;  %v14687_v5 = vadd.f32 %v14632_v50, %v2249_v14  ;;  %v11671_v48 = vpop.f32.mrb[30].mxu1  ;;  %v2302_v33 = vmul.f32 0.999995, %v14638_v15 }
 0x304   :  { %v13132_v55 = vpop.eup %13131  ;;  %v2370_v11 = vadd.f32 1.0, %v13130_v47  ;;  %v10634_v3 = vmul.f32 -0.999995, %v14683_v2  ;;  %v2252_v22 = vpop.f32.mrb[31].mxu1  ;;  %v14694_v14 = vadd.f32 %v11671_v48, %v14632_v50 }
 0x305   :  { %v13134_v13 = vpop.eup %13133  ;;  %13149 = vrcp.f32 %v2372_v31  ;;  %v2373_v19 = vadd.f32 1.0, %v13132_v55  ;;  %v10632_v23 = vmul.f32 -0.999995, %v14687_v5  ;;  %v14697_v58 = vadd.f32 %v14632_v50, %v2252_v22 }
 0x306   :  { %13151 = vrcp.f32 %v2370_v11  ;;  %v2371_v12 = vadd.f32 1.0, %v13134_v13  ;;  %v2362_v47 = vmul.f32 1.442695, %v10634_v3  ;;  %v2303_v13 = vmul.f32 0.999995, %v14646_v34 }
 0x307   :  { %v13136_v59 = vpop.eup %13135  ;;  %13153 = vrcp.f32 %v2373_v19  ;;  %v2358_v39 = vmul.f32 1.442695, %v10632_v23  ;;  %v10635_v21 = vmul.f32 -0.999995, %v14694_v14  ;;  %v10633_v34 = vmul.f32 -0.999995, %v14697_v58 }
 0x308   :  { %v13138_v31 = vpop.eup %13137  ;;  %v2416_v55 = vmul.f32 %v13136_v59, %v2304_v56  ;;  %13155 = vrcp.f32 %v2371_v12 }
 0x309   :  { %v13140_v15 = vpop.eup %13139  ;;  %v2414_v11 = vmul.f32 %v13138_v31, %v2302_v33  ;;  %13157 = vpow2.f32 %v2352_v20  ;;  %v2364_v59 = vmul.f32 1.442695, %v10635_v21  ;;  %v2360_v21 = vmul.f32 1.442695, %v10633_v34 }
 0x30a   :  { %v13142_v29 = vpop.eup %13141  ;;  %v2417_v19 = vmul.f32 %v13140_v15, %v2305_v24  ;;  %13159 = vpow2.f32 %v2362_v47  ;;  %v2432_v50 = vmul.f32 %v14210_v18, %v2416_v55  ;;  %v2306_v55 = vmul.f32 0.999995, %v14654_v45 }
 0x30b   :  { %v13144_v3 = vpop.eup %13143  ;;  %v2415_v48 = vmul.f32 %v13142_v29, %v2303_v13  ;;  %13161 = vpow2.f32 %v2358_v39  ;;  %v2430_v33 = vmul.f32 %v14220_v0, %v2414_v11  ;;  %v2309_v15 = vmul.f32 0.999995, %v14658_v4 }
 0x30c   :  { %v13146_v23 = vpop.eup %13145  ;;  %v2433_v56 = vmul.f32 %v14208_v43, %v2417_v19  ;;  %v2376_v22 = vadd.f32 1.0, %v13144_v3  ;;  %13163 = vpow2.f32 %v2364_v59  ;;  %v2307_v13 = vmul.f32 0.999995, %v14662_v7 }
 0x30d   :  { %v13148_v20 = vpop.eup %13147  ;;  %v2431_v12 = vmul.f32 %v14212_v44, %v2415_v48  ;;  %v2374_v24 = vadd.f32 1.0, %v13146_v23  ;;  %v2312_v19 = vmul.f32 0.999995, %v14667_v63 }
 0x30e   :  { %v14707_v47 = vpack.c.bf16 %v2433_v56, %v2432_v50  ;;  %13165 = vrcp.f32 %v2376_v22  ;;  %v2377_v17 = vadd.f32 1.0, %v13148_v20 }
 0x30f   :  { %v13150_v31 = vpop.eup %13149  ;;  %v14709_v39 = vpack.c.bf16 %v2431_v12, %v2430_v33 }
 0x310   :  { %v13152_v29 = vpop.eup %13151  ;;  %v2420_v11 = vmul.f32 %v13150_v31, %v2308_v51  ;;  %13167 = vrcp.f32 %v2377_v17  ;;  %v17510_v3 = vshrl.u32 %v14707_v47, 16  ;;  %v17511_v51 = vshll.u32 %v14707_v47, 16 }
 0x311   :  { %v13154_v48 = vpop.eup %13153  ;;  %v2418_v59 = vmul.f32 %v13152_v29, %v2306_v55  ;;  %13169 = vpow2.f32 %v2360_v21  ;;  %v2496_v23 = vshrl.u32 %v14709_v39, 16  ;;  %v2499_v50 = vshll.u32 %v14709_v39, 16 }
 0x312   :  { %v13156_v56 = vpop.eup %13155  ;;  %v2421_v45 = vmul.f32 %v13154_v48, %v2309_v15  ;;  %13171 = vrcp.f32 %v2374_v24  ;;  %v2505_v4 = vrot.slane %v17510_v3, 7  ;;  %v2436_v63 = vmul.f32 %v14237_v26, %v2420_v11 }
 0x313   :  { %v13158_v7 = vpop.eup %13157  ;;  %v2419_v22 = vmul.f32 %v13156_v56, %v2307_v13  ;;  %v2498_v34 = vrot.slane %v2496_v23, 7  ;;  %v2982_v20 = vrot.slane %v2499_v50, 1  ;;  %v2434_v12 = vmul.f32 %v14243_v8, %v2418_v59 }
 0x314   :  { %v13160_v33 = vpop.eup %13159  ;;  %v2437_v17 = vmul.f32 %v14227_v49, %v2421_v45  ;;  %v2375_v21 = vadd.f32 1.0, %v13158_v7  ;;  %v2508_v24 = vor.u32 %v17511_v51, %v2505_v4  ;;  %v2313_v45 = vmul.f32 0.999995, %v14674_v36  ;;  %v13016_v36 = vld [vmem:[%s17417_s3 + $0x58] sm:$0xff]  }
 0x315   :  { %v13162_v31 = vpop.eup %13161  ;;  %v2435_v55 = vmul.f32 %v14241_v35, %v2419_v22  ;;  %v2380_v15 = vadd.f32 1.0, %v13160_v33  ;;  %v2501_v29 = vor.u32 %v2499_v50, %v2498_v34  ;;  %v2983_v48 = vor.u32 %v2982_v20, %v2496_v23 }
 0x316   :  { %v14727_v3 = vpack.c.bf16 %v2437_v17, %v2436_v63  ;;  %13173 = vrcp.f32 %v2375_v21  ;;  %v2378_v13 = vadd.f32 1.0, %v13162_v31  ;;  %v2509_v11 = vsel %vm1294_vm2, %v2498_v34, %v2508_v24  ;;  %v13164_v56 = vpop.eup %13163 }
 0x317   :  { %v14730_v59 = vpack.c.bf16 %v2435_v55, %v2434_v12  ;;  %13175 = vrcp.f32 %v2380_v15  ;;  %v2566_v7 = vsel %vm14303_vm3, 0, %v2501_v29  ;;  %v2381_v22 = vadd.f32 1.0, %v13164_v56 }
 0x318   :  { %v13166_v51 = vpop.eup %13165  ;;  %13177 = vrcp.f32 %v2378_v13  ;;  %v2567_v23 = vmul.bf16 %v2566_v7, %v14229_v40  ;;  %v17512_v50 = vshrl.u32 %v14727_v3, 16  ;;  %v2568_v20 = vmul.bf16 %v2509_v11, %v14214_v46 }
 0x319   :  { %v2424_v63 = vmul.f32 %v13166_v51, %v2312_v19  ;;  %v2511_v34 = vshrl.u32 %v14730_v59, 16  ;;  %v2514_v33 = vshll.u32 %v14730_v59, 16  ;;  %13179 = vrcp.f32 %v2381_v22 }
 0x31a   :  { %v13168_v12 = vpop.eup %13167  ;;  %11676 = vmatprep.mubr.msk.bf16.mxu0 %vm1428_vm4, %v2567_v23  ;;  %v14746_v17 = vrot.slane %v17512_v50, 7  ;;  %v2522_v19 = vshll.u32 %v14727_v3, 16  ;;  %v2310_v11 = vmul.f32 0.999995, %v14670_v10 }
 0x31b   :  { %v13170_v51 = vpop.eup %13169  ;;  %v2425_v21 = vmul.f32 %v13168_v12, %v2313_v45  ;;  %11677 = vmatmul.mubr.msk.bf16.vlgmr.msra.gmra.mrb[0].mxu0 %vm1428_vm4, %v2568_v20  ;;  %v2513_v24 = vrot.slane %v2511_v34, 7  ;;  %v2987_v15 = vrot.slane %v2514_v33, 1  ;;  %v2440_v13 = vmul.f32 %v14274_v57, %v2424_v63  ;;  %v14758_v45 = vld [vmem:[%s17417_s3 + $0x70] sm:$0xff]  }
 0x31c   :  { %v13172_v31 = vpop.eup %13171  ;;  %v2379_v55 = vadd.f32 1.0, %v13170_v51  ;;  %11693 = vmatpush3.bf16.msra.mxu0 %v14626_v16  ;;  %v2524_v29 = vor.u32 %v2522_v19, %v14746_v17  ;;  %v2311_v20 = vmul.f32 0.999995, %v14679_v61 }
 0x31d   :  { %v2441_v56 = vmul.f32 %v14265_v38, %v2425_v21  ;;  %v2516_v7 = vor.u32 %v2514_v33, %v2513_v24  ;;  %11694 = vmatprep.subr.bf16.mxu0 %v13016_v36  ;;  %v2422_v16 = vmul.f32 %v13172_v31, %v2310_v11  ;;  %v17681_v33 = vshll.u32 %v14707_v47, 16 }
 0x31e   :  { %13181 = vrcp.f32 %v2379_v55  ;;  %v2525_v22 = vsel %vm1294_vm2, %v2513_v24, %v2524_v29  ;;  %v2989_v21 = vor.u32 %v2987_v15, %v2511_v34  ;;  %v2316_v55 = vmul.f32 0.999995, %v14683_v2 }
 0x31f   :  { %v14761_v23 = vpack.c.bf16 %v2441_v56, %v2440_v13  ;;  %v2517_v63 = vsel %vm1294_vm2, %v2505_v4, %v2516_v7  ;;  %v2984_v51 = vrot.slane %v17681_v33, 1  ;;  %v2570_v24 = vmul.bf16 %v2525_v22, %v14344_v9 }
 0x320   :  { %v13174_v10 = vpop.eup %13173  ;;  %v2569_v12 = vmul.bf16 %v2517_v63, %v14324_v28  ;;  %11695 = vmatpush3.bf16.msra.mxu0 %v13016_v36  ;;  %v2314_v4 = vmul.f32 0.999995, %v14687_v5  ;;  %v2438_v34 = vmul.f32 %v14254_v41, %v2422_v16  ;;  %v2317_v11 = vmul.f32 0.999995, %v14694_v14 }
 0x321   :  { %v13176_v50 = vpop.eup %13175  ;;  %v2423_v38 = vmul.f32 %v13174_v10, %v2311_v20  ;;  %v2535_v31 = vshrl.u32 %v14761_v23, 16  ;;  %11712 = vmatprep.subr.bf16.mxu0 %v14758_v45  ;;  %v2538_v36 = vshll.u32 %v14761_v23, 16  ;;  %v14776_v29 = vsel %vm1824_vm5, %v2983_v48, %v2984_v51 }
 0x322   :  { %v13178_v61 = vpop.eup %13177  ;;  %11680 = vmatprep.mubr.msk.bf16.mxu0 %vm1428_vm4, %v2569_v12  ;;  %v2428_v13 = vmul.f32 %v13176_v50, %v2316_v55  ;;  %v17682_v5 = vshrl.u32 %v14707_v47, 16  ;;  %v2990_v20 = vrot.slane %v2522_v19, 1  ;;  %v2315_v12 = vmul.f32 0.999995, %v14697_v58 }
 0x323   :  { %v2439_v2 = vmul.f32 %v14252_v53, %v2423_v38  ;;  %11681 = vmatmul.mubr.msk.bf16.gmra.mrb[4].mxu0 %vm1428_vm4, %v2570_v24  ;;  %v13180_v56 = vpop.eup %13179  ;;  %v2537_v7 = vrot.slane %v2535_v31, 7  ;;  %v2426_v10 = vmul.f32 %v13178_v61, %v2314_v4  ;;  %v17683_v14 = vshrl.u32 %v14727_v3, 16 }
 0x324   :  { %v2986_v22 = vor.u32 %v2984_v51, %v17682_v5  ;;  %v2429_v48 = vmul.f32 %v13180_v56, %v2317_v11  ;;  %v14791_v38 = vsel %vm1824_vm5, %v2989_v21, %v2990_v20  ;;  %v2996_v33 = vrot.slane %v2538_v36, 1 }
 0x325   :  { %v14784_v63 = vpack.c.bf16 %v2439_v2, %v2438_v34  ;;  %v2992_v50 = vor.u32 %v2990_v20, %v17683_v14  ;;  %v2444_v55 = vmul.f32 %v14388_v30, %v2428_v13  ;;  %v2540_v58 = vor.u32 %v2538_v36, %v2537_v7 }
 0x326   :  { %v14788_v16 = vsel %vm1824_vm5, %v2986_v22, %v2987_v15  ;;  %v2445_v19 = vmul.f32 %v14386_v60, %v2429_v48  ;;  %v2998_v4 = vor.u32 %v2996_v33, %v2535_v31  ;;  %v2442_v11 = vmul.f32 %v14363_v1, %v2426_v10 }
 0x327   :  { %v2527_v51 = vshrl.u32 %v14784_v63, 16  ;;  %v2530_v24 = vshll.u32 %v14784_v63, 16 }
 0x328   :  { %v13182_v61 = vpop.eup %13181  ;;  %v14799_v15 = vpack.c.bf16 %v2445_v19, %v2444_v55 }
 0x329   :  { %v2427_v34 = vmul.f32 %v13182_v61, %v2315_v12  ;;  %v2529_v21 = vrot.slane %v2527_v51, 7  ;;  %v2993_v2 = vrot.slane %v2530_v24, 1 }
 0x32a   :  { %v2551_v13 = vshrl.u32 %v14799_v15, 16  ;;  %v2554_v20 = vshll.u32 %v14799_v15, 16 }
 0x32b   :  { %v2443_v56 = vmul.f32 %v14360_v37, %v2427_v34  ;;  %v2532_v5 = vor.u32 %v2530_v24, %v2529_v21  ;;  %v2541_v22 = vsel %vm1294_vm2, %v2529_v21, %v2540_v58  ;;  %v14811_v12 = vsel %vm1824_vm5, %v2992_v50, %v2993_v2 }
 0x32c   :  { %v2553_v36 = vrot.slane %v2551_v13, 7  ;;  %v2995_v14 = vor.u32 %v2993_v2, %v2527_v51  ;;  %v3002_v55 = vrot.slane %v2554_v20, 1  ;;  %v2572_v19 = vmul.bf16 %v2541_v22, %v14404_v25 }
 0x32d   :  { %v14806_v48 = vpack.c.bf16 %v2443_v56, %v2442_v11  ;;  %v2533_v31 = vsel %vm1294_vm2, %v14746_v17, %v2532_v5  ;;  %v2462_v51 = vrot.slane %v14709_v39, 7 }
 0x32e   :  { %v2571_v10 = vmul.bf16 %v2533_v31, %v14391_v27  ;;  %v2556_v58 = vor.u32 %v2554_v20, %v2553_v36  ;;  %v14819_v34 = vsel %vm1824_vm5, %v2995_v14, %v2996_v33  ;;  %v14821_v17 = vor.u32 %v3002_v55, %v2551_v13 }
 0x32f   :  { %v2543_v24 = vshrl.u32 %v14806_v48, 16  ;;  %v2546_v61 = vshll.u32 %v14806_v48, 16  ;;  %v2485_v33 = vsel %vm1218_vm0, 0, %v2462_v51  ;;  %v2463_v36 = vrot.slane %v14707_v47, 7 }
 0x330   :  { %11684 = vmatprep.mubr.msk.bf16.mxu0 %vm1428_vm4, %v2571_v10  ;;  %v2487_v10 = vmul.bf16 %v2485_v33, %v14442_v32  ;;  %v2471_v33 = vrot.slane %v14761_v23, 7 }
 0x331   :  { %11685 = vmatmul.mubr.msk.bf16.gmra.mrb[8].mxu0 %vm1428_vm4, %v2572_v19  ;;  %v2545_v50 = vrot.slane %v2543_v24, 7  ;;  %v2999_v21 = vrot.slane %v2546_v61, 1  ;;  %v13018_v19 = vld [vmem:[%s17417_s3 + $0x78] sm:$0xff]  }
 0x333   :  { %v2548_v2 = vor.u32 %v2546_v61, %v2545_v50  ;;  %v2557_v11 = vsel %vm1294_vm2, %v2545_v50, %v2556_v58  ;;  %v14827_v56 = vsel %vm1824_vm5, %v2998_v4, %v2999_v21  ;;  %v3001_v5 = vor.u32 %v2999_v21, %v2543_v24  ;;  %v13019_v50 = vld [vmem:[%s17417_s3 + $0x80] sm:$0xff]  }
 0x334   :  { %v2574_v31 = vmul.bf16 %v2557_v11, %v14439_v42  ;;  %v2465_v4 = vrot.slane %v14730_v59, 7  ;;  %v2467_v61 = vrot.slane %v14727_v3, 7  ;;  %v2469_v58 = vrot.slane %v14784_v63, 7 }
 0x335   :  { %v2549_v22 = vsel %vm1294_vm2, %v2537_v7, %v2548_v2  ;;  %v14833_v20 = vsel %vm1824_vm5, %v3001_v5, %v3002_v55  ;;  %v2464_v7 = vsel %vm1218_vm0, %v2462_v51, %v2463_v36  ;;  %v17684_v2 = vld [vmem:[#allocation50_spill] sm:$0xff]  ;;  %v17685_v5 = vld [vmem:[#allocation51_spill] sm:$0xff] }
 0x336   :  { %v2573_v13 = vmul.bf16 %v2549_v22, %v14422_v62  ;;  %v2466_v14 = vsel %vm1218_vm0, %v2463_v36, %v2465_v4  ;;  %v2488_v55 = vmul.bf16 %v2464_v7, %v14452_v54  ;;  %v2468_v51 = vsel %vm1218_vm0, %v2465_v4, %v2467_v61  ;;  %v17686_v36 = vld [vmem:[#allocation52_spill] sm:$0xff]  ;;  %v17687_v4 = vld [vmem:[#allocation53_spill] sm:$0xff] }
 0x337   :  { %v2489_v24 = vmul.bf16 %v2466_v14, %v14454_v52  ;;  %v2470_v21 = vsel %vm1218_vm0, %v2467_v61, %v2469_v58  ;;  %v2490_v11 = vmul.bf16 %v2468_v51, %v17684_v2  ;;  %v2475_v14 = vrot.slane %v14799_v15, 7  ;;  %v13020_v61 = vld [vmem:[%s17417_s3 + $0x88] sm:$0xff]  }
 0x338   :  { %11688 = vmatprep.mubr.msk.bf16.mxu0 %vm1428_vm4, %v2573_v13  ;;  %v2491_v22 = vmul.bf16 %v2470_v21, %v17685_v5  ;;  %v2472_v13 = vsel %vm1218_vm0, %v2469_v58, %v2471_v33  ;;  %v13021_v58 = vld [vmem:[%s17417_s3 + $0x90] sm:$0xff]   ;;  %v17736_v5 = vld [vmem:[#allocation38_spill] sm:$0xff] }
 0x339   :  { %11689 = vmatmul.mubr.msk.bf16.gmra.mrb[12].mxu0 %vm1428_vm4, %v2574_v31  ;;  %v17690_v21 = vld [vmem:[#allocation56_spill] sm:$0xff] }
 0x33a   :  { %11696 = vmatprep.mubr.msk.bf16.mxu0 %vm1428_vm4, %v2487_v10  ;;  %v2492_v10 = vmul.bf16 %v2472_v13, %v17686_v36 }
 0x341   :  { %11697 = vmatmul.mubr.msk.bf16.vlgmr.msra.gmra.mrb[0].mxu0 %vm1428_vm4, %v2488_v55 }
 0x342   :  { %11713 = vmatpush3.bf16.msra.mxu0 %v14758_v45  ;;  %11700 = vmatprep.mubr.msk.bf16.mxu0 %vm1428_vm4, %v2489_v24  ;;  %v2473_v45 = vrot.slane %v14806_v48, 7 }
 0x343   :  { %11714 = vmatprep.subr.bf16.mxu0 %v13018_v19 }
 0x344   :  { %v2474_v31 = vsel %vm1218_vm0, %v2471_v33, %v2473_v45  ;;  %v2476_v55 = vsel %vm1218_vm0, %v2473_v45, %v2475_v14  ;;  %v17691_v33 = vld [vmem:[#allocation57_spill] sm:$0xff] }
 0x345   :  { %v2493_v7 = vmul.bf16 %v2474_v31, %v17687_v4  ;;  %v3016_v45 = vmul.bf16 %v14791_v38, %v17691_v33  ;;  %v17693_v31 = vld [vmem:[#allocation59_spill] sm:$0xff] }
 0x346   :  { %11715 = vmatpush3.bf16.msra.mxu0 %v13018_v19  ;;  %v17688_v19 = vld [vmem:[#allocation54_spill] sm:$0xff]  ;;  %v17730_v33 = vld [vmem:[#allocation43_spill] sm:$0xff] }
 0x347   :  { %11732 = vmatprep.subr.bf16.mxu0 %v13019_v50  ;;  %v2494_v24 = vmul.bf16 %v2476_v55, %v17688_v19  ;;  %v3171_v55 = vrot.slane %v14709_v39, 1 }
 0x349   :  { %11701 = vmatmul.mubr.msk.bf16.gmra.mrb[4].mxu0 %vm1428_vm4, %v2490_v11  ;;  %v3015_v11 = vmul.bf16 %v14788_v16, %v17690_v21  ;;  %v3018_v16 = vmul.bf16 %v14819_v34, %v17693_v31  ;;  %v3013_v34 = vsel %vm14557_vm7, %v14821_v17, 0 }
 0x34a   :  { %11704 = vmatprep.mubr.msk.bf16.mxu0 %vm1428_vm4, %v2491_v22  ;;  %v13022_v22 = vld [vmem:[%s17417_s3 + $0x98] sm:$0xff]  }
 0x351   :  { %11705 = vmatmul.mubr.msk.bf16.gmra.mrb[8].mxu0 %vm1428_vm4, %v2492_v10  ;;  %v17694_v10 = vld [vmem:[#allocation60_spill] sm:$0xff] }
 0x352   :  { %11708 = vmatprep.mubr.msk.bf16.mxu0 %vm1428_vm4, %v2493_v7  ;;  %v3019_v38 = vmul.bf16 %v14827_v56, %v17694_v10  ;;  %v17695_v7 = vld [vmem:[#allocation61_spill] sm:$0xff]  ;;  %v3174_v56 = vrot.slane %v14730_v59, 1 }
 0x353   :  { %v3020_v14 = vmul.bf16 %v14833_v20, %v17695_v7 }
 0x359   :  { %11709 = vmatmul.mubr.msk.bf16.gmra.mrb[12].mxu0 %vm1428_vm4, %v2494_v24  ;;  %v3172_v24 = vrot.slane %v14707_v47, 1 }
 0x35a   :  { %11716 = vmatprep.mubr.msk.bf16.mxu0 %vm1428_vm4, %v14709_v39  ;;  %v3176_v39 = vrot.slane %v14727_v3, 1 }
 0x361   :  { %11717 = vmatmul.mubr.msk.bf16.vlgmr.msra.gmra.mrb[0].mxu0 %vm1428_vm4, %v14707_v47  ;;  %v3175_v47 = vsel %vm2056_vm8, %v3172_v24, %v3174_v56 }
 0x362   :  { %11733 = vmatpush3.bf16.msra.mxu0 %v13019_v50  ;;  %11720 = vmatprep.mubr.msk.bf16.mxu0 %vm1428_vm4, %v14730_v59  ;;  %v17689_v50 = vld [vmem:[#allocation55_spill] sm:$0xff]  ;;  %v3180_v59 = vrot.slane %v14761_v23, 1 }
 0x363   :  { %11734 = vmatprep.subr.bf16.mxu0 %v13020_v61  ;;  %v3014_v51 = vmul.bf16 %v14776_v29, %v17689_v50  ;;  %v17692_v29 = vld [vmem:[#allocation58_spill] sm:$0xff] }
 0x364   :  { %v3017_v13 = vmul.bf16 %v14811_v12, %v17692_v29 }
 0x366   :  { %11735 = vmatpush3.bf16.msra.mxu0 %v13020_v61  ;;  %v3173_v61 = vsel %vm2056_vm8, %v3171_v55, %v3172_v24  ;;  %v17701_v55 = vld [vmem:[#allocation67_spill] sm:$0xff] }
 0x367   :  { %11752 = vmatprep.subr.bf16.mxu0 %v13021_v58 }
 0x369   :  { %11721 = vmatmul.mubr.msk.bf16.gmra.mrb[4].mxu0 %vm1428_vm4, %v14727_v3 }
 0x36a   :  { %11724 = vmatprep.mubr.msk.bf16.mxu0 %vm1428_vm4, %v14784_v63 }
 0x371   :  { %11725 = vmatmul.mubr.msk.bf16.gmra.mrb[8].mxu0 %vm1428_vm4, %v14761_v23 }
 0x372   :  { %11728 = vmatprep.mubr.msk.bf16.mxu0 %vm1428_vm4, %v14806_v48 }
 0x379   :  { %11729 = vmatmul.mubr.msk.bf16.gmra.mrb[12].mxu0 %vm1428_vm4, %v14799_v15 }
 0x37a   :  { %11736 = vmatprep.mubr.msk.bf16.mxu0 %vm1428_vm4, %v3014_v51 }
 0x381   :  { %11737 = vmatmul.mubr.msk.bf16.vlgmr.msra.gmra.mrb[0].mxu0 %vm1428_vm4, %v3015_v11  ;;  %v17698_v11 = vld [vmem:[#allocation63_spill] sm:$0xff] }
 0x382   :  { %11753 = vmatpush3.bf16.msra.mxu0 %v13021_v58  ;;  %11740 = vmatprep.mubr.msk.bf16.mxu0 %vm1428_vm4, %v3016_v45  ;;  %v17697_v58 = vld [vmem:[#allocation64_spill] sm:$0xff]  ;;  %v3196_v20 = vmul.bf16 %v3173_v61, %v17698_v11  ;;  %v17699_v45 = vld [vmem:[#allocation65_spill] sm:$0xff] }
 0x383   :  { %11754 = vmatprep.subr.bf16.mxu0 %v13022_v22  ;;  %v3021_v51 = vmul.bf16 %v3013_v34, %v17697_v58  ;;  %v3197_v17 = vmul.bf16 %v3175_v47, %v17699_v45  ;;  %v17702_v34 = vld [vmem:[#allocation68_spill] sm:$0xff]  ;;  %v17704_v47 = vld [vmem:[#allocation70_spill] sm:$0xff] }
 0x384   :  { %v17716_v45 = vld [vmem:[#allocation24_spill] sm:$0xff] }
 0x386   :  { %11755 = vmatpush3.bf16.msra.mxu0 %v13022_v22  ;;  %v3177_v22 = vsel %vm2056_vm8, %v3174_v56, %v3176_v39 }
 0x389   :  { %11741 = vmatmul.mubr.msk.bf16.gmra.mrb[4].mxu0 %vm1428_vm4, %v3017_v13  ;;  %v17700_v13 = vld [vmem:[#allocation66_spill] sm:$0xff] }
 0x38a   :  { %11744 = vmatprep.mubr.msk.bf16.mxu0 %vm1428_vm4, %v3018_v16  ;;  %v3198_v16 = vmul.bf16 %v3177_v22, %v17700_v13 }
 0x391   :  { %11745 = vmatmul.mubr.msk.bf16.gmra.mrb[8].mxu0 %vm1428_vm4, %v3019_v38  ;;  %v3178_v38 = vrot.slane %v14784_v63, 1  ;;  %v3184_v63 = vrot.slane %v14799_v15, 1  ;;  %v13023_v15 = vld [vmem:[%s17417_s3 + $0xb0] sm:$0xff]  }
 0x392   :  { %11748 = vmatprep.mubr.msk.bf16.mxu0 %vm1428_vm4, %v3020_v14  ;;  %11772 = vmatprep.subr.bf16.mxu1 %v13023_v15 }
 0x393   :  { %v3179_v3 = vsel %vm2056_vm8, %v3176_v39, %v3178_v38  ;;  %v3181_v14 = vsel %vm2056_vm8, %v3178_v38, %v3180_v59  ;;  %11773 = vmatpush3.bf16.msra.mxu1 %v13023_v15  ;;  %v13024_v38 = vld [vmem:[%s17417_s3 + $0xb8] sm:$0xff]  }
 0x394   :  { %v3199_v24 = vmul.bf16 %v3179_v3, %v17701_v55  ;;  %v3200_v61 = vmul.bf16 %v3181_v14, %v17702_v34  ;;  %11774 = vmatprep.subr.bf16.mxu1 %v13024_v38  ;;  %v14973_v3 = vld [vmem:[%s17419_s4 + $0x1] ss:$0 sm:$0xff] }
 0x397   :  { %11775 = vmatpush3.bf16.msra.mxu1 %v13024_v38 }
 0x399   :  { %11749 = vmatmul.mubr.msk.bf16.gmra.mrb[12].mxu0 %vm1428_vm4, %v3021_v51  ;;  %v3182_v51 = vrot.slane %v14806_v48, 1  ;;  %v3194_v48 = vsel %vm2056_vm8, %v3184_v63, 0 }
 0x39a   :  { %11756 = vmatprep.mubr.msk.bf16.mxu0 %vm1428_vm4, %v3196_v20  ;;  %v17703_v20 = vld [vmem:[#allocation69_spill] sm:$0xff] }
 0x39b   :  { %v3183_v23 = vsel %vm2056_vm8, %v3180_v59, %v3182_v51  ;;  %v3185_v56 = vsel %vm2056_vm8, %v3182_v51, %v3184_v63  ;;  %v14967_v59 = vld [vmem:[%s17417_s3 + $0xa0] sm:$0xff]  }
 0x39c   :  { %v3201_v39 = vmul.bf16 %v3183_v23, %v17703_v20  ;;  %v3202_v22 = vmul.bf16 %v3185_v56, %v17704_v47  ;;  %11792 = vmatprep.subr.bf16.mxu1 %v14967_v59  ;;  %v17706_v23 = vld [vmem:[#allocation22_spill] sm:$0xff] }
 0x3a1   :  { %11757 = vmatmul.mubr.msk.bf16.vlgmr.msra.gmra.mrb[0].mxu0 %vm1428_vm4, %v3197_v17  ;;  %v17705_v17 = vld [vmem:[#allocation71_spill] sm:$0xff] }
 0x3a2   :  { %11760 = vmatprep.mubr.msk.bf16.mxu0 %vm1428_vm4, %v3198_v16  ;;  %v3203_v16 = vmul.bf16 %v3194_v48, %v17705_v17  ;;  %v17708_v48 = vld [vmem:[#allocation20_spill] sm:$0xff]  ;;  %v17710_v17 = vld [vmem:[#allocation21_spill] sm:$0xff] }
 0x3a9   :  { %11761 = vmatmul.mubr.msk.bf16.gmra.mrb[4].mxu0 %vm1428_vm4, %v3199_v24 }
 0x3aa   :  { %11764 = vmatprep.mubr.msk.bf16.mxu0 %vm1428_vm4, %v3200_v61 }
 0x3b1   :  { %11765 = vmatmul.mubr.msk.bf16.gmra.mrb[8].mxu0 %vm1428_vm4, %v3201_v39 }
 0x3b2   :  { %11768 = vmatprep.mubr.msk.bf16.mxu0 %vm1428_vm4, %v3202_v22 }
 0x3b9   :  { %11769 = vmatmul.mubr.msk.bf16.gmra.mrb[12].mxu0 %vm1428_vm4, %v3203_v16 }
 0x474   :  { %v11758_v14 = vpop.f32.mrb[0].mxu0 }
 0x475   :  { %v3361_v24 = vadd.f32 %v11758_v14, %v14973_v3  ;;  %v3274_v61 = vpop.f32.mrb[1].mxu0 }
 0x476   :  { %v3359_v51 = vadd.f32 %v14973_v3, %v3274_v61  ;;  %v11759_v63 = vpop.f32.mrb[2].mxu0  ;;  %v17712_v61 = vld [vmem:[#allocation19_spill] sm:$0xff] }
 0x477   :  { %v14978_v56 = vadd.f32 %v3361_v24, %v17706_v23  ;;  %v3362_v39 = vadd.f32 %v11759_v63, %v14973_v3  ;;  %v3277_v22 = vpop.f32.mrb[3].mxu0 }
 0x478   :  { %v14982_v16 = vadd.f32 %v3359_v51, %v17708_v48  ;;  %v3360_v15 = vadd.f32 %v14973_v3, %v3277_v22 }
 0x479   :  { %17707 = vst [vmem:[#allocation22_spill] sm:$0xff] %v14978_v56  ;;  %v10731_v38 = vmul.f32 -0.999995, %v14978_v56  ;;  %v14987_v47 = vadd.f32 %v3362_v39, %v17710_v17  ;;  %v3439_v50 = vmul.f32 0.999995, %v14978_v56 }
 0x47a   :  { %17709 = vst [vmem:[#allocation20_spill] sm:$0xff] %v14982_v16  ;;  %v10729_v14 = vmul.f32 -0.999995, %v14982_v16  ;;  %v14991_v20 = vadd.f32 %v3360_v15, %v17712_v61  ;;  %v17714_v15 = vld [vmem:[#allocation26_spill] sm:$0xff] }
 0x47b   :  { %17711 = vst [vmem:[#allocation21_spill] sm:$0xff] %v14987_v47  ;;  %v3473_v24 = vmul.f32 1.442695, %v10731_v38  ;;  %v10732_v23 = vmul.f32 -0.999995, %v14987_v47 }
 0x47c   :  { %17713 = vst [vmem:[#allocation19_spill] sm:$0xff] %v14991_v20  ;;  %v3469_v63 = vmul.f32 1.442695, %v10729_v14  ;;  %v10730_v34 = vmul.f32 -0.999995, %v14991_v20  ;;  %v11762_v48 = vpop.f32.mrb[4].mxu0 }
 0x47d   :  { %13183 = vpow2.f32 %v3473_v24  ;;  %v3475_v51 = vmul.f32 1.442695, %v10732_v23  ;;  %v3365_v55 = vadd.f32 %v11762_v48, %v14973_v3  ;;  %v3290_v17 = vpop.f32.mrb[5].mxu0  ;;  %v3438_v2 = vmul.f32 0.999995, %v14991_v20 }
 0x47e   :  { %13185 = vpow2.f32 %v3469_v63  ;;  %v3471_v22 = vmul.f32 1.442695, %v10730_v34  ;;  %v3363_v39 = vadd.f32 %v14973_v3, %v3290_v17  ;;  %v11763_v13 = vpop.f32.mrb[6].mxu0  ;;  %v17718_v63 = vld [vmem:[#allocation25_spill] sm:$0xff]  ;;  %v17720_v17 = vld [vmem:[#allocation23_spill] sm:$0xff] }
 0x47f   :  { %13187 = vpow2.f32 %v3475_v51  ;;  %v14998_v38 = vadd.f32 %v3365_v55, %v17714_v15  ;;  %v3366_v14 = vadd.f32 %v11763_v13, %v14973_v3  ;;  %v3293_v61 = vpop.f32.mrb[7].mxu0 }
 0x480   :  { %13189 = vpow2.f32 %v3471_v22  ;;  %v15002_v24 = vadd.f32 %v3363_v39, %v17716_v45  ;;  %v3364_v23 = vadd.f32 %v14973_v3, %v3293_v61 }
 0x481   :  { %17715 = vst [vmem:[#allocation26_spill] sm:$0xff] %v14998_v38  ;;  %v10735_v34 = vmul.f32 -0.999995, %v14998_v38  ;;  %v15007_v48 = vadd.f32 %v3366_v14, %v17718_v63 }
 0x482   :  { %17717 = vst [vmem:[#allocation24_spill] sm:$0xff] %v15002_v24  ;;  %v10733_v51 = vmul.f32 -0.999995, %v15002_v24  ;;  %v15011_v22 = vadd.f32 %v3364_v23, %v17720_v17 }
 0x483   :  { %17719 = vst [vmem:[#allocation25_spill] sm:$0xff] %v15007_v48  ;;  %v3481_v55 = vmul.f32 1.442695, %v10735_v34  ;;  %v10736_v15 = vmul.f32 -0.999995, %v15007_v48 }
 0x484   :  { %17721 = vst [vmem:[#allocation23_spill] sm:$0xff] %v15011_v22  ;;  %v3477_v13 = vmul.f32 1.442695, %v10733_v51  ;;  %v10734_v11 = vmul.f32 -0.999995, %v15011_v22  ;;  %v11766_v39 = vpop.f32.mrb[8].mxu0 }
 0x485   :  { %13191 = vpow2.f32 %v3481_v55  ;;  %v3483_v45 = vmul.f32 1.442695, %v10736_v15  ;;  %v3369_v14 = vadd.f32 %v11766_v39, %v14973_v3  ;;  %v3306_v63 = vpop.f32.mrb[9].mxu0  ;;  %v17722_v51 = vld [vmem:[#allocation35_spill] sm:$0xff] }
 0x486   :  { %13193 = vpow2.f32 %v3477_v13  ;;  %v3479_v58 = vmul.f32 1.442695, %v10734_v11  ;;  %v3367_v23 = vadd.f32 %v14973_v3, %v3306_v63  ;;  %v11767_v34 = vpop.f32.mrb[10].mxu0  ;;  %v17724_v39 = vld [vmem:[#allocation31_spill] sm:$0xff] }
 0x487   :  { %v13184_v61 = vpop.eup %13183  ;;  %13195 = vpow2.f32 %v3483_v45  ;;  %v15018_v31 = vadd.f32 %v3369_v14, %v17722_v51  ;;  %v3370_v55 = vadd.f32 %v11767_v34, %v14973_v3  ;;  %v3309_v15 = vpop.f32.mrb[11].mxu0 }
 0x488   :  { %v13186_v12 = vpop.eup %13185  ;;  %v3503_v7 = vadd.f32 1.0, %v13184_v61  ;;  %13197 = vpow2.f32 %v3479_v58  ;;  %v15022_v29 = vadd.f32 %v3367_v23, %v17724_v39  ;;  %v3368_v45 = vadd.f32 %v14973_v3, %v3309_v15  ;;  %v17726_v58 = vld [vmem:[#allocation32_spill] sm:$0xff] }
 0x489   :  { %v13188_v17 = vpop.eup %13187  ;;  %v3501_v10 = vadd.f32 1.0, %v13186_v12  ;;  %17723 = vst [vmem:[#allocation35_spill] sm:$0xff] %v15018_v31  ;;  %v10739_v63 = vmul.f32 -0.999995, %v15018_v31  ;;  %v15028_v14 = vadd.f32 %v3370_v55, %v17726_v58 }
 0x48a   :  { %v13190_v13 = vpop.eup %13189  ;;  %13199 = vrcp.f32 %v3503_v7  ;;  %v3504_v11 = vadd.f32 1.0, %v13188_v17  ;;  %17725 = vst [vmem:[#allocation31_spill] sm:$0xff] %v15022_v29  ;;  %v10737_v12 = vmul.f32 -0.999995, %v15022_v29  ;;  %v17728_v7 = vld [vmem:[#allocation28_spill] sm:$0xff] }
 0x48b   :  { %13201 = vrcp.f32 %v3501_v10  ;;  %v3502_v61 = vadd.f32 1.0, %v13190_v13  ;;  %17727 = vst [vmem:[#allocation32_spill] sm:$0xff] %v15028_v14  ;;  %v3489_v51 = vmul.f32 1.442695, %v10739_v63  ;;  %v15031_v17 = vadd.f32 %v3368_v45, %v17728_v7  ;;  %v17732_v45 = vld [vmem:[#allocation40_spill] sm:$0xff] }
 0x48c   :  { %13203 = vrcp.f32 %v3504_v11  ;;  %v11770_v34 = vpop.f32.mrb[12].mxu0  ;;  %v3485_v15 = vmul.f32 1.442695, %v10737_v12  ;;  %v10740_v10 = vmul.f32 -0.999995, %v15028_v14 }
 0x48d   :  { %13205 = vrcp.f32 %v3502_v61  ;;  %17729 = vst [vmem:[#allocation28_spill] sm:$0xff] %v15031_v17  ;;  %v3373_v23 = vadd.f32 %v11770_v34, %v14973_v3  ;;  %v3322_v39 = vpop.f32.mrb[13].mxu0  ;;  %v10738_v11 = vmul.f32 -0.999995, %v15031_v17 }
 0x48e   :  { %v3371_v13 = vadd.f32 %v14973_v3, %v3322_v39  ;;  %13207 = vpow2.f32 %v3489_v51  ;;  %v11771_v58 = vpop.f32.mrb[14].mxu0  ;;  %v3491_v63 = vmul.f32 1.442695, %v10740_v10  ;;  %v3437_v51 = vmul.f32 0.999995, %v14982_v16 }
 0x48f   :  { %v15038_v55 = vadd.f32 %v3373_v23, %v17730_v33  ;;  %v13192_v61 = vpop.eup %13191  ;;  %13209 = vpow2.f32 %v3485_v15  ;;  %v3374_v34 = vadd.f32 %v11771_v58, %v14973_v3  ;;  %v3325_v12 = vpop.f32.mrb[15].mxu0  ;;  %v3487_v4 = vmul.f32 1.442695, %v10738_v11 }
 0x490   :  { %v15041_v7 = vadd.f32 %v3371_v13, %v17732_v45  ;;  %v13194_v21 = vpop.eup %13193  ;;  %v3507_v39 = vadd.f32 1.0, %v13192_v61  ;;  %v3372_v19 = vadd.f32 %v14973_v3, %v3325_v12  ;;  %13211 = vpow2.f32 %v3491_v63  ;;  %v17734_v45 = vld [vmem:[#allocation41_spill] sm:$0xff] }
 0x491   :  { %17731 = vst [vmem:[#allocation43_spill] sm:$0xff] %v15038_v55  ;;  %v13196_v33 = vpop.eup %13195  ;;  %v3505_v23 = vadd.f32 1.0, %v13194_v21  ;;  %v10743_v15 = vmul.f32 -0.999995, %v15038_v55  ;;  %v15050_v36 = vadd.f32 %v3374_v34, %v17734_v45  ;;  %v3440_v11 = vmul.f32 0.999995, %v14987_v47 }
 0x492   :  { %17733 = vst [vmem:[#allocation40_spill] sm:$0xff] %v15041_v7  ;;  %v13198_v10 = vpop.eup %13197  ;;  %13213 = vrcp.f32 %v3507_v39  ;;  %v3508_v13 = vadd.f32 1.0, %v13196_v33  ;;  %v10741_v58 = vmul.f32 -0.999995, %v15041_v7  ;;  %v15053_v3 = vadd.f32 %v3372_v19, %v17736_v5 }
 0x493   :  { %17735 = vst [vmem:[#allocation41_spill] sm:$0xff] %v15050_v36  ;;  %13215 = vrcp.f32 %v3505_v23  ;;  %v3506_v16 = vadd.f32 1.0, %v13198_v10  ;;  %v3497_v61 = vmul.f32 1.442695, %v10743_v15  ;;  %v10744_v34 = vmul.f32 -0.999995, %v15050_v36 }
 0x494   :  { %v13200_v56 = vpop.eup %13199  ;;  %17737 = vst [vmem:[#allocation38_spill] sm:$0xff] %v15053_v3  ;;  %13217 = vrcp.f32 %v3508_v13  ;;  %v3493_v12 = vmul.f32 1.442695, %v10741_v58  ;;  %v10742_v15 = vmul.f32 -0.999995, %v15053_v3 }
 0x495   :  { %v13202_v21 = vpop.eup %13201  ;;  %v3551_v63 = vmul.f32 %v13200_v56, %v3439_v50  ;;  %13219 = vrcp.f32 %v3506_v16  ;;  %v3499_v19 = vmul.f32 1.442695, %v10744_v34  ;;  %v3444_v34 = vmul.f32 0.999995, %v15007_v48 }
 0x496   :  { %v13204_v39 = vpop.eup %13203  ;;  %v3549_v33 = vmul.f32 %v13202_v21, %v3437_v51  ;;  %13221 = vpow2.f32 %v3487_v4  ;;  %v3495_v51 = vmul.f32 1.442695, %v10742_v15  ;;  %v3449_v47 = vmul.f32 0.999995, %v15041_v7 }
 0x497   :  { %v13206_v45 = vpop.eup %13205  ;;  %v3552_v23 = vmul.f32 %v13204_v39, %v3440_v11  ;;  %13223 = vpow2.f32 %v3497_v61  ;;  %v3567_v56 = vmul.f32 %v14210_v18, %v3551_v63  ;;  %v3443_v63 = vmul.f32 0.999995, %v14998_v38 }
 0x498   :  { %v3550_v5 = vmul.f32 %v13206_v45, %v3438_v2  ;;  %v13208_v50 = vpop.eup %13207  ;;  %13225 = vpow2.f32 %v3493_v12  ;;  %v3565_v16 = vmul.f32 %v14220_v0, %v3549_v33  ;;  %v3441_v12 = vmul.f32 0.999995, %v15002_v24 }
 0x499   :  { %v3568_v10 = vmul.f32 %v14208_v43, %v3552_v23  ;;  %v13210_v13 = vpop.eup %13209  ;;  %v3511_v21 = vadd.f32 1.0, %v13208_v50  ;;  %13227 = vpow2.f32 %v3499_v19 }
 0x49a   :  { %v3566_v58 = vmul.f32 %v14212_v44, %v3550_v5  ;;  %v3509_v11 = vadd.f32 1.0, %v13210_v13  ;;  %13229 = vpow2.f32 %v3495_v51  ;;  %v13212_v2 = vpop.eup %13211  ;;  %v3442_v5 = vmul.f32 0.999995, %v15011_v22 }
 0x49b   :  { %v15063_v4 = vpack.c.bf16 %v3568_v10, %v3567_v56  ;;  %13231 = vrcp.f32 %v3511_v21  ;;  %v3512_v33 = vadd.f32 1.0, %v13212_v2 }
 0x49c   :  { %v15065_v61 = vpack.c.bf16 %v3566_v58, %v3565_v16  ;;  %v13214_v39 = vpop.eup %13213  ;;  %13233 = vrcp.f32 %v3509_v11 }
 0x49d   :  { %v17517_v45 = vshrl.u32 %v15063_v4, 16  ;;  %v13216_v23 = vpop.eup %13215  ;;  %v3555_v15 = vmul.f32 %v13214_v39, %v3443_v63  ;;  %13235 = vrcp.f32 %v3512_v33  ;;  %v3641_v51 = vshll.u32 %v15063_v4, 16 }
 0x49e   :  { %v17519_v19 = vshrl.u32 %v15065_v61, 16  ;;  %v13218_v50 = vpop.eup %13217  ;;  %v3553_v56 = vmul.f32 %v13216_v23, %v3441_v12  ;;  %v3634_v21 = vshll.u32 %v15065_v61, 16  ;;  %v3447_v63 = vmul.f32 0.999995, %v15018_v31 }
 0x49f   :  { %v15075_v10 = vrot.slane %v17517_v45, 7  ;;  %v13220_v13 = vpop.eup %13219  ;;  %v3556_v16 = vmul.f32 %v13218_v50, %v3444_v34  ;;  %v3448_v39 = vmul.f32 0.999995, %v15028_v14  ;;  %v3571_v23 = vmul.f32 %v14237_v26, %v3555_v15 }
 0x4a0   :  { %v3633_v58 = vrot.slane %v17519_v19, 7  ;;  %v13222_v2 = vpop.eup %13221  ;;  %v3554_v11 = vmul.f32 %v13220_v13, %v3442_v5  ;;  %v3569_v19 = vmul.f32 %v14243_v8, %v3553_v56 }
 0x4a1   :  { %v3643_v12 = vor.u32 %v3641_v51, %v15075_v10  ;;  %v13224_v33 = vpop.eup %13223  ;;  %v3572_v45 = vmul.f32 %v14227_v49, %v3556_v16  ;;  %v3510_v22 = vadd.f32 1.0, %v13222_v2 }
 0x4a2   :  { %v3636_v34 = vor.u32 %v3634_v21, %v3633_v58  ;;  %v13226_v50 = vpop.eup %13225  ;;  %v3570_v48 = vmul.f32 %v14241_v35, %v3554_v11  ;;  %v3515_v24 = vadd.f32 1.0, %v13224_v33 }
 0x4a3   :  { %v3644_v5 = vsel %vm1294_vm2, %v3633_v58, %v3643_v12  ;;  %v13228_v13 = vpop.eup %13227  ;;  %v15089_v31 = vpack.c.bf16 %v3572_v45, %v3571_v23  ;;  %13237 = vrcp.f32 %v3510_v22  ;;  %v3513_v14 = vadd.f32 1.0, %v13226_v50  ;;  %v13026_v22 = vld [vmem:[%s17417_s3 + $0xa8] sm:$0xff]  }
 0x4a4   :  { %v3701_v15 = vsel %vm14303_vm3, 0, %v3636_v34  ;;  %v13230_v38 = vpop.eup %13229  ;;  %v15093_v16 = vpack.c.bf16 %v3570_v48, %v3569_v19  ;;  %13239 = vrcp.f32 %v3515_v24  ;;  %v3516_v2 = vadd.f32 1.0, %v13228_v13 }
 0x4a5   :  { %v3702_v56 = vmul.bf16 %v3701_v15, %v14229_v40  ;;  %v13232_v20 = vpop.eup %13231  ;;  %13241 = vrcp.f32 %v3513_v14  ;;  %v3514_v11 = vadd.f32 1.0, %v13230_v38  ;;  %v3703_v58 = vmul.bf16 %v3644_v5, %v14214_v46 }
 0x4a6   :  { %v17526_v45 = vshrl.u32 %v15089_v31, 16  ;;  %13243 = vrcp.f32 %v3516_v2  ;;  %v4117_v48 = vrot.slane %v3634_v21, 1  ;;  %v3646_v24 = vshrl.u32 %v15093_v16, 16  ;;  %v13234_v12 = vpop.eup %13233 }
 0x4a7   :  { %11776 = vmatprep.mubr.msk.bf16.mxu1 %vm1428_vm4, %v3702_v56  ;;  %v3649_v19 = vshll.u32 %v15093_v16, 16  ;;  %v3559_v33 = vmul.f32 %v13232_v20, %v3447_v63  ;;  %13245 = vrcp.f32 %v3514_v11  ;;  %v3657_v14 = vshll.u32 %v15089_v31, 16  ;;  %v13236_v23 = vpop.eup %13235  ;;  %v15117_v63 = vld [vmem:[%s17417_s3 + $0xc0] sm:$0xff]  }
 0x4a8   :  { %11777 = vmatmul.mubr.msk.bf16.vlgmr.msra.gmra.mrb[32].mxu1 %vm1428_vm4, %v3703_v58  ;;  %v15107_v38 = vrot.slane %v17526_v45, 7  ;;  %v3445_v34 = vmul.f32 0.999995, %v15022_v29  ;;  %v3648_v21 = vrot.slane %v3646_v24, 7  ;;  %v3560_v5 = vmul.f32 %v13236_v23, %v3448_v39  ;;  %v17739_v45 = vld [vmem:[#allocation39_spill] sm:$0xff] }
 0x4a9   :  { %11793 = vmatpush3.bf16.msra.mxu1 %v14967_v59  ;;  %v4122_v50 = vrot.slane %v3649_v19, 1  ;;  %v3446_v13 = vmul.f32 0.999995, %v15031_v17  ;;  %v17738_v56 = vshrl.u32 %v15065_v61, 16  ;;  %v4119_v58 = vrot.slane %v3641_v51, 1 }
 0x4aa   :  { %v3659_v20 = vor.u32 %v3657_v14, %v15107_v38  ;;  %11794 = vmatprep.subr.bf16.mxu1 %v13026_v22  ;;  %v3557_v15 = vmul.f32 %v13234_v12, %v3445_v34  ;;  %v3651_v2 = vor.u32 %v3649_v19, %v3648_v21  ;;  %v3575_v59 = vmul.f32 %v14274_v57, %v3559_v33 }
 0x4ab   :  { %v4118_v11 = vor.u32 %v4117_v48, %v17738_v56  ;;  %v3576_v39 = vmul.f32 %v17739_v45, %v3560_v5  ;;  %v4124_v17 = vor.u32 %v4122_v50, %v3646_v24  ;;  %v3451_v29 = vmul.f32 0.999995, %v15038_v55 }
 0x4ac   :  { %v3660_v23 = vsel %vm1294_vm2, %v3648_v21, %v3659_v20  ;;  %v3452_v46 = vmul.f32 0.999995, %v15050_v36  ;;  %v3652_v19 = vsel %vm1294_vm2, %v15075_v10, %v3651_v2  ;;  %v3450_v51 = vmul.f32 0.999995, %v15053_v3 }
 0x4ad   :  { %11795 = vmatpush3.bf16.msra.mxu1 %v13026_v22  ;;  %v13238_v12 = vpop.eup %13237  ;;  %v15129_v48 = vpack.c.bf16 %v3576_v39, %v3575_v59  ;;  %v3704_v33 = vmul.bf16 %v3652_v19, %v14324_v28  ;;  %v15135_v24 = vsel %vm1824_vm5, %v4118_v11, %v4119_v58  ;;  %v3705_v5 = vmul.bf16 %v3660_v23, %v14344_v9 }
 0x4ae   :  { %11812 = vmatprep.subr.bf16.mxu1 %v15117_v63  ;;  %v13240_v34 = vpop.eup %13239  ;;  %v3558_v21 = vmul.f32 %v13238_v12, %v3446_v13  ;;  %v17740_v20 = vshrl.u32 %v15063_v4, 16  ;;  %v4125_v22 = vrot.slane %v3657_v14, 1  ;;  %v3573_v56 = vmul.f32 %v14254_v41, %v3557_v15 }
 0x4af   :  { %v13242_v2 = vpop.eup %13241  ;;  %v3563_v59 = vmul.f32 %v13240_v34, %v3451_v29  ;;  %11780 = vmatprep.mubr.msk.bf16.mxu1 %vm1428_vm4, %v3704_v33  ;;  %v3670_v39 = vshrl.u32 %v15129_v48, 16  ;;  %v3673_v19 = vshll.u32 %v15129_v48, 16 }
 0x4b0   :  { %v4121_v10 = vor.u32 %v4119_v58, %v17740_v20  ;;  %v13244_v11 = vpop.eup %13243  ;;  %v3574_v3 = vmul.f32 %v14252_v53, %v3558_v21  ;;  %v3561_v13 = vmul.f32 %v13242_v2, %v3449_v47  ;;  %11781 = vmatmul.mubr.msk.bf16.gmra.mrb[36].mxu1 %vm1428_vm4, %v3705_v5  ;;  %v15150_v14 = vsel %vm1824_vm5, %v4124_v17, %v4125_v22 }
 0x4b1   :  { %v13246_v15 = vpop.eup %13245  ;;  %v3564_v29 = vmul.f32 %v13244_v11, %v3452_v46  ;;  %v3672_v58 = vrot.slane %v3670_v39, 7  ;;  %v3579_v34 = vmul.f32 %v14388_v30, %v3563_v59  ;;  %v17741_v47 = vshrl.u32 %v15089_v31, 16 }
 0x4b2   :  { %v15147_v23 = vsel %vm1824_vm5, %v4121_v10, %v4122_v50  ;;  %v15152_v12 = vpack.c.bf16 %v3574_v3, %v3573_v56  ;;  %v3562_v33 = vmul.f32 %v13246_v15, %v3450_v51  ;;  %v4131_v5 = vrot.slane %v3673_v19, 1 }
 0x4b3   :  { %v3580_v20 = vmul.f32 %v14386_v60, %v3564_v29  ;;  %v4127_v21 = vor.u32 %v4125_v22, %v17741_v47  ;;  %v3577_v50 = vmul.f32 %v14363_v1, %v3561_v13  ;;  %v3675_v46 = vor.u32 %v3673_v19, %v3672_v58 }
 0x4b4   :  { %v3578_v10 = vmul.f32 %v14360_v37, %v3562_v33  ;;  %v3662_v17 = vshrl.u32 %v15152_v12, 16  ;;  %v4133_v3 = vor.u32 %v4131_v5, %v3670_v39  ;;  %v3665_v59 = vshll.u32 %v15152_v12, 16 }
 0x4b5   :  { %v15161_v2 = vpack.c.bf16 %v3580_v20, %v3579_v34 }
 0x4b6   :  { %v15163_v56 = vpack.c.bf16 %v3578_v10, %v3577_v50  ;;  %v3664_v51 = vrot.slane %v3662_v17, 7  ;;  %v4128_v39 = vrot.slane %v3665_v59, 1 }
 0x4b7   :  { %v3686_v11 = vshrl.u32 %v15161_v2, 16  ;;  %v3689_v50 = vshll.u32 %v15161_v2, 16 }
 0x4b8   :  { %v3667_v15 = vor.u32 %v3665_v59, %v3664_v51  ;;  %v3678_v22 = vshrl.u32 %v15163_v56, 16  ;;  %v3681_v13 = vshll.u32 %v15163_v56, 16  ;;  %v3676_v29 = vsel %vm1294_vm2, %v3664_v51, %v3675_v46 }
 0x4b9   :  { %v3688_v33 = vrot.slane %v3686_v11, 7  ;;  %v3707_v10 = vmul.bf16 %v3676_v29, %v14404_v25  ;;  %v15176_v7 = vsel %vm1824_vm5, %v4127_v21, %v4128_v39  ;;  %v4130_v51 = vor.u32 %v4128_v39, %v3662_v17 }
 0x4ba   :  { %v3668_v34 = vsel %vm1294_vm2, %v15107_v38, %v3667_v15  ;;  %v3680_v19 = vrot.slane %v3678_v22, 7  ;;  %v4134_v20 = vrot.slane %v3681_v13, 1  ;;  %v3597_v59 = vrot.slane %v15065_v61, 7 }
 0x4bb   :  { %v3706_v47 = vmul.bf16 %v3668_v34, %v14391_v27  ;;  %v3691_v46 = vor.u32 %v3689_v50, %v3688_v33  ;;  %v4137_v21 = vrot.slane %v3689_v50, 1  ;;  %v3602_v50 = vrot.slane %v15089_v31, 7 }
 0x4bc   :  { %v3683_v36 = vor.u32 %v3681_v13, %v3680_v19  ;;  %v15180_v55 = vsel %vm1824_vm5, %v4133_v3, %v4134_v20  ;;  %v4136_v15 = vor.u32 %v4134_v20, %v3678_v22  ;;  %v15187_v13 = vsel %vm1824_vm5, %v4130_v51, %v4131_v5  ;;  %v13028_v20 = vld [vmem:[%s17417_s3 + $0xc8] sm:$0xff]  }
 0x4bd   :  { %11784 = vmatprep.mubr.msk.bf16.mxu1 %vm1428_vm4, %v3706_v47  ;;  %v3692_v17 = vsel %vm1294_vm2, %v3680_v19, %v3691_v46  ;;  %v15194_v33 = vor.u32 %v4137_v21, %v3686_v11  ;;  %v3598_v22 = vrot.slane %v15063_v4, 7  ;;  %v3600_v5 = vrot.slane %v15093_v16, 7  ;;  %v13029_v46 = vld [vmem:[%s17417_s3 + $0xd0] sm:$0xff]  }
 0x4be   :  { %11785 = vmatmul.mubr.msk.bf16.gmra.mrb[40].mxu1 %vm1428_vm4, %v3707_v10  ;;  %v3684_v38 = vsel %vm1294_vm2, %v3672_v58, %v3683_v36  ;;  %v15192_v3 = vsel %vm1824_vm5, %v4136_v15, %v4137_v21  ;;  %v3620_v36 = vsel %vm1218_vm0, 0, %v3597_v59  ;;  %v3709_v58 = vmul.bf16 %v3692_v17, %v14439_v42 }
 0x4bf   :  { %v3708_v29 = vmul.bf16 %v3684_v38, %v14422_v62  ;;  %v3622_v34 = vmul.bf16 %v3620_v36, %v14442_v32  ;;  %v3599_v19 = vsel %vm1218_vm0, %v3597_v59, %v3598_v22  ;;  %v3601_v39 = vsel %vm1218_vm0, %v3598_v22, %v3600_v5  ;;  %v17742_v59 = vld [vmem:[#allocation50_spill] sm:$0xff]  ;;  %v17744_v22 = vld [vmem:[#allocation52_spill] sm:$0xff] }
 0x4c0   :  { %v3623_v11 = vmul.bf16 %v3599_v19, %v14452_v54  ;;  %v3624_v47 = vmul.bf16 %v3601_v39, %v14454_v52  ;;  %v3604_v10 = vrot.slane %v15152_v12, 7  ;;  %v3603_v51 = vsel %vm1218_vm0, %v3600_v5, %v3602_v50  ;;  %v17745_v5 = vld [vmem:[#allocation53_spill] sm:$0xff] }
 0x4c1   :  { %11788 = vmatprep.mubr.msk.bf16.mxu1 %vm1428_vm4, %v3708_v29  ;;  %v3625_v15 = vmul.bf16 %v3603_v51, %v17742_v59  ;;  %v17743_v29 = vld [vmem:[#allocation51_spill] sm:$0xff]  ;;  %v3606_v17 = vrot.slane %v15129_v48, 7  ;;  %v3610_v39 = vrot.slane %v15161_v2, 7 }
 0x4c2   :  { %v3605_v38 = vsel %vm1218_vm0, %v3602_v50, %v3604_v10  ;;  %v13030_v50 = vld [vmem:[%s17417_s3 + $0xd8] sm:$0xff]  }
 0x4c3   :  { %v3626_v21 = vmul.bf16 %v3605_v38, %v17743_v29  ;;  %v3607_v36 = vsel %vm1218_vm0, %v3604_v10, %v3606_v17  ;;  %v13031_v10 = vld [vmem:[%s17417_s3 + $0xe0] sm:$0xff]   ;;  %v17748_v38 = vld [vmem:[#allocation56_spill] sm:$0xff] }
 0x4c6   :  { %11789 = vmatmul.mubr.msk.bf16.gmra.mrb[44].mxu1 %vm1428_vm4, %v3709_v58 }
 0x4c7   :  { %11796 = vmatprep.mubr.msk.bf16.mxu1 %vm1428_vm4, %v3622_v34  ;;  %v3627_v34 = vmul.bf16 %v3607_v36, %v17744_v22 }
 0x4ce   :  { %11797 = vmatmul.mubr.msk.bf16.vlgmr.msra.gmra.mrb[32].mxu1 %vm1428_vm4, %v3623_v11 }
 0x4cf   :  { %11813 = vmatpush3.bf16.msra.mxu1 %v15117_v63  ;;  %11800 = vmatprep.mubr.msk.bf16.mxu1 %vm1428_vm4, %v3624_v47  ;;  %v3608_v63 = vrot.slane %v15163_v56, 7 }
 0x4d0   :  { %11814 = vmatprep.subr.bf16.mxu1 %v13028_v20 }
 0x4d1   :  { %v3609_v58 = vsel %vm1218_vm0, %v3606_v17, %v3608_v63  ;;  %v3611_v11 = vsel %vm1218_vm0, %v3608_v63, %v3610_v39  ;;  %v17749_v17 = vld [vmem:[#allocation57_spill] sm:$0xff] }
 0x4d2   :  { %v3628_v19 = vmul.bf16 %v3609_v58, %v17745_v5  ;;  %v4151_v63 = vmul.bf16 %v15150_v14, %v17749_v17  ;;  %v17751_v58 = vld [vmem:[#allocation59_spill] sm:$0xff] }
 0x4d3   :  { %11815 = vmatpush3.bf16.msra.mxu1 %v13028_v20  ;;  %v17746_v20 = vld [vmem:[#allocation54_spill] sm:$0xff] }
 0x4d4   :  { %11832 = vmatprep.subr.bf16.mxu1 %v13029_v46  ;;  %v3629_v47 = vmul.bf16 %v3611_v11, %v17746_v20  ;;  %v4306_v11 = vrot.slane %v15065_v61, 1 }
 0x4d6   :  { %11801 = vmatmul.mubr.msk.bf16.gmra.mrb[36].mxu1 %vm1428_vm4, %v3625_v15  ;;  %v4150_v15 = vmul.bf16 %v15147_v23, %v17748_v38  ;;  %v4153_v23 = vmul.bf16 %v15187_v13, %v17751_v58  ;;  %v4148_v13 = vsel %vm14557_vm7, %v15194_v33, 0 }
 0x4d7   :  { %11804 = vmatprep.mubr.msk.bf16.mxu1 %vm1428_vm4, %v3626_v21  ;;  %v13032_v21 = vld [vmem:[%s17417_s3 + $0xe8] sm:$0xff]  }
 0x4de   :  { %11805 = vmatmul.mubr.msk.bf16.gmra.mrb[40].mxu1 %vm1428_vm4, %v3627_v34  ;;  %v17752_v34 = vld [vmem:[#allocation60_spill] sm:$0xff] }
 0x4df   :  { %11808 = vmatprep.mubr.msk.bf16.mxu1 %vm1428_vm4, %v3628_v19  ;;  %v4154_v14 = vmul.bf16 %v15180_v55, %v17752_v34  ;;  %v17753_v19 = vld [vmem:[#allocation61_spill] sm:$0xff]  ;;  %v4309_v55 = vrot.slane %v15093_v16, 1 }
 0x4e0   :  { %v4155_v39 = vmul.bf16 %v15192_v3, %v17753_v19 }
 0x4e6   :  { %11809 = vmatmul.mubr.msk.bf16.gmra.mrb[44].mxu1 %vm1428_vm4, %v3629_v47  ;;  %v4307_v47 = vrot.slane %v15063_v4, 1 }
 0x4e7   :  { %11816 = vmatprep.mubr.msk.bf16.mxu1 %vm1428_vm4, %v15065_v61  ;;  %v4311_v61 = vrot.slane %v15089_v31, 1 }
 0x4ee   :  { %11817 = vmatmul.mubr.msk.bf16.vlgmr.msra.gmra.mrb[32].mxu1 %vm1428_vm4, %v15063_v4  ;;  %v4310_v4 = vsel %vm2056_vm8, %v4307_v47, %v4309_v55 }
 0x4ef   :  { %11833 = vmatpush3.bf16.msra.mxu1 %v13029_v46  ;;  %11820 = vmatprep.mubr.msk.bf16.mxu1 %vm1428_vm4, %v15093_v16  ;;  %v17747_v46 = vld [vmem:[#allocation55_spill] sm:$0xff]  ;;  %v4315_v16 = vrot.slane %v15129_v48, 1 }
 0x4f0   :  { %11834 = vmatprep.subr.bf16.mxu1 %v13030_v50  ;;  %v4149_v51 = vmul.bf16 %v15135_v24, %v17747_v46  ;;  %v17750_v24 = vld [vmem:[#allocation58_spill] sm:$0xff] }
 0x4f1   :  { %v4152_v36 = vmul.bf16 %v15176_v7, %v17750_v24 }
 0x4f3   :  { %11835 = vmatpush3.bf16.msra.mxu1 %v13030_v50  ;;  %v4308_v50 = vsel %vm2056_vm8, %v4306_v11, %v4307_v47  ;;  %v17759_v11 = vld [vmem:[#allocation67_spill] sm:$0xff] }
 0x4f4   :  { %11852 = vmatprep.subr.bf16.mxu1 %v13031_v10 }
 0x4f6   :  { %11821 = vmatmul.mubr.msk.bf16.gmra.mrb[36].mxu1 %vm1428_vm4, %v15089_v31 }
 0x4f7   :  { %11824 = vmatprep.mubr.msk.bf16.mxu1 %vm1428_vm4, %v15152_v12 }
 0x4fe   :  { %11825 = vmatmul.mubr.msk.bf16.gmra.mrb[40].mxu1 %vm1428_vm4, %v15129_v48 }
 0x4ff   :  { %11828 = vmatprep.mubr.msk.bf16.mxu1 %vm1428_vm4, %v15163_v56 }
 0x506   :  { %11829 = vmatmul.mubr.msk.bf16.gmra.mrb[44].mxu1 %vm1428_vm4, %v15161_v2 }
 0x507   :  { %11836 = vmatprep.mubr.msk.bf16.mxu1 %vm1428_vm4, %v4149_v51 }
 0x50e   :  { %11837 = vmatmul.mubr.msk.bf16.vlgmr.msra.gmra.mrb[32].mxu1 %vm1428_vm4, %v4150_v15  ;;  %v17756_v15 = vld [vmem:[#allocation63_spill] sm:$0xff] }
 0x50f   :  { %11853 = vmatpush3.bf16.msra.mxu1 %v13031_v10  ;;  %11840 = vmatprep.mubr.msk.bf16.mxu1 %vm1428_vm4, %v4151_v63  ;;  %v17755_v10 = vld [vmem:[#allocation64_spill] sm:$0xff]  ;;  %v4331_v3 = vmul.bf16 %v4308_v50, %v17756_v15  ;;  %v17757_v63 = vld [vmem:[#allocation65_spill] sm:$0xff] }
 0x510   :  { %11854 = vmatprep.subr.bf16.mxu1 %v13032_v21  ;;  %v4156_v51 = vmul.bf16 %v4148_v13, %v17755_v10  ;;  %v4332_v33 = vmul.bf16 %v4310_v4, %v17757_v63  ;;  %v17760_v13 = vld [vmem:[#allocation68_spill] sm:$0xff]  ;;  %v17762_v4 = vld [vmem:[#allocation70_spill] sm:$0xff] }
 0x513   :  { %11855 = vmatpush3.bf16.msra.mxu1 %v13032_v21  ;;  %v4312_v21 = vsel %vm2056_vm8, %v4309_v55, %v4311_v61 }
 0x516   :  { %11841 = vmatmul.mubr.msk.bf16.gmra.mrb[36].mxu1 %vm1428_vm4, %v4152_v36  ;;  %v17758_v36 = vld [vmem:[#allocation66_spill] sm:$0xff] }
 0x517   :  { %11844 = vmatprep.mubr.msk.bf16.mxu1 %vm1428_vm4, %v4153_v23  ;;  %v4333_v23 = vmul.bf16 %v4312_v21, %v17758_v36 }
 0x51e   :  { %11845 = vmatmul.mubr.msk.bf16.gmra.mrb[40].mxu1 %vm1428_vm4, %v4154_v14  ;;  %v4313_v14 = vrot.slane %v15152_v12, 1  ;;  %v4319_v12 = vrot.slane %v15161_v2, 1  ;;  %v13033_v2 = vld [vmem:[%s17417_s3 + $0x100] sm:$0xff]  }
 0x51f   :  { %11848 = vmatprep.mubr.msk.bf16.mxu1 %vm1428_vm4, %v4155_v39  ;;  %11872 = vmatprep.subr.bf16.mxu0 %v13033_v2 }
 0x520   :  { %v4314_v31 = vsel %vm2056_vm8, %v4311_v61, %v4313_v14  ;;  %v4316_v39 = vsel %vm2056_vm8, %v4313_v14, %v4315_v16  ;;  %11873 = vmatpush3.bf16.msra.mxu0 %v13033_v2  ;;  %v13034_v14 = vld [vmem:[%s17417_s3 + $0x108] sm:$0xff]  }
 0x521   :  { %v4334_v47 = vmul.bf16 %v4314_v31, %v17759_v11  ;;  %v4335_v50 = vmul.bf16 %v4316_v39, %v17760_v13  ;;  %11874 = vmatprep.subr.bf16.mxu0 %v13034_v14  ;;  %v15334_v31 = vld [vmem:[%s17419_s4 + $0x2] ss:$0 sm:$0xff] }
 0x524   :  { %11875 = vmatpush3.bf16.msra.mxu0 %v13034_v14 }
 0x526   :  { %11849 = vmatmul.mubr.msk.bf16.gmra.mrb[44].mxu1 %vm1428_vm4, %v4156_v51  ;;  %v4317_v51 = vrot.slane %v15163_v56, 1  ;;  %v4329_v56 = vsel %vm2056_vm8, %v4319_v12, 0 }
 0x527   :  { %11856 = vmatprep.mubr.msk.bf16.mxu1 %vm1428_vm4, %v4331_v3  ;;  %v17761_v3 = vld [vmem:[#allocation69_spill] sm:$0xff] }
 0x528   :  { %v4318_v48 = vsel %vm2056_vm8, %v4315_v16, %v4317_v51  ;;  %v4320_v55 = vsel %vm2056_vm8, %v4317_v51, %v4319_v12  ;;  %v15328_v16 = vld [vmem:[%s17417_s3 + $0xf0] sm:$0xff]  }
 0x529   :  { %v4336_v61 = vmul.bf16 %v4318_v48, %v17761_v3  ;;  %v4337_v21 = vmul.bf16 %v4320_v55, %v17762_v4  ;;  %11892 = vmatprep.subr.bf16.mxu0 %v15328_v16 }
 0x52e   :  { %11857 = vmatmul.mubr.msk.bf16.vlgmr.msra.gmra.mrb[32].mxu1 %vm1428_vm4, %v4332_v33  ;;  %v17763_v33 = vld [vmem:[#allocation71_spill] sm:$0xff] }
 0x52f   :  { %11860 = vmatprep.mubr.msk.bf16.mxu1 %vm1428_vm4, %v4333_v23  ;;  %v4338_v23 = vmul.bf16 %v4329_v56, %v17763_v33 }
 0x536   :  { %11861 = vmatmul.mubr.msk.bf16.gmra.mrb[36].mxu1 %vm1428_vm4, %v4334_v47 }
 0x537   :  { %11864 = vmatprep.mubr.msk.bf16.mxu1 %vm1428_vm4, %v4335_v50 }
 0x53e   :  { %11865 = vmatmul.mubr.msk.bf16.gmra.mrb[40].mxu1 %vm1428_vm4, %v4336_v61 }
 0x53f   :  { %11868 = vmatprep.mubr.msk.bf16.mxu1 %vm1428_vm4, %v4337_v21 }
 0x546   :  { %11869 = vmatmul.mubr.msk.bf16.gmra.mrb[44].mxu1 %vm1428_vm4, %v4338_v23 }
 0x601   :  { %v11858_v39 = vpop.f32.mrb[32].mxu1 }
 0x602   :  { %v15337_v47 = vadd.f32 %v11858_v39, %v15334_v31  ;;  %v4409_v50 = vpop.f32.mrb[33].mxu1 }
 0x603   :  { %v15340_v51 = vadd.f32 %v15334_v31, %v4409_v50  ;;  %v11859_v12 = vpop.f32.mrb[34].mxu1 }
 0x604   :  { %v10798_v48 = vmul.f32 -0.999995, %v15337_v47  ;;  %v15344_v55 = vadd.f32 %v11859_v12, %v15334_v31  ;;  %v4412_v61 = vpop.f32.mrb[35].mxu1 }
 0x605   :  { %v10796_v21 = vmul.f32 -0.999995, %v15340_v51  ;;  %v15348_v56 = vadd.f32 %v15334_v31, %v4412_v61 }
 0x606   :  { %v4546_v23 = vmul.f32 1.442695, %v10798_v48  ;;  %v10799_v2 = vmul.f32 -0.999995, %v15344_v55 }
 0x607   :  { %v4542_v14 = vmul.f32 1.442695, %v10796_v21  ;;  %v10797_v39 = vmul.f32 -0.999995, %v15348_v56 }
 0x608   :  { %13247 = vpow2.f32 %v4546_v23  ;;  %v4548_v50 = vmul.f32 1.442695, %v10799_v2 }
 0x609   :  { %13249 = vpow2.f32 %v4542_v14  ;;  %v4544_v33 = vmul.f32 1.442695, %v10797_v39  ;;  %v11862_v4 = vpop.f32.mrb[36].mxu1 }
 0x60a   :  { %13251 = vpow2.f32 %v4548_v50  ;;  %v15353_v12 = vadd.f32 %v11862_v4, %v15334_v31  ;;  %v4425_v3 = vpop.f32.mrb[37].mxu1 }
 0x60b   :  { %13253 = vpow2.f32 %v4544_v33  ;;  %v15356_v61 = vadd.f32 %v15334_v31, %v4425_v3  ;;  %v11863_v48 = vpop.f32.mrb[38].mxu1 }
 0x60c   :  { %v10802_v13 = vmul.f32 -0.999995, %v15353_v12  ;;  %v15360_v21 = vadd.f32 %v11863_v48, %v15334_v31  ;;  %v4428_v23 = vpop.f32.mrb[39].mxu1  ;;  %v4516_v29 = vmul.f32 0.999995, %v15353_v12 }
 0x60d   :  { %v10800_v2 = vmul.f32 -0.999995, %v15356_v61  ;;  %v15364_v14 = vadd.f32 %v15334_v31, %v4428_v23 }
 0x60e   :  { %v4554_v39 = vmul.f32 1.442695, %v10802_v13  ;;  %v10803_v4 = vmul.f32 -0.999995, %v15360_v21 }
 0x60f   :  { %v4550_v50 = vmul.f32 1.442695, %v10800_v2  ;;  %v10801_v33 = vmul.f32 -0.999995, %v15364_v14 }
 0x610   :  { %13255 = vpow2.f32 %v4554_v39  ;;  %v4556_v3 = vmul.f32 1.442695, %v10803_v4 }
 0x611   :  { %13257 = vpow2.f32 %v4550_v50  ;;  %v4552_v11 = vmul.f32 1.442695, %v10801_v33  ;;  %v11866_v36 = vpop.f32.mrb[40].mxu1 }
 0x612   :  { %v13248_v63 = vpop.eup %13247  ;;  %13259 = vpow2.f32 %v4556_v3  ;;  %v15369_v48 = vadd.f32 %v11866_v36, %v15334_v31  ;;  %v4441_v15 = vpop.f32.mrb[41].mxu1 }
 0x613   :  { %v13250_v10 = vpop.eup %13249  ;;  %v4576_v23 = vadd.f32 1.0, %v13248_v63  ;;  %13261 = vpow2.f32 %v4552_v11  ;;  %v15372_v13 = vadd.f32 %v15334_v31, %v4441_v15  ;;  %v11867_v2 = vpop.f32.mrb[42].mxu1 }
 0x614   :  { %v13252_v7 = vpop.eup %13251  ;;  %v4574_v19 = vadd.f32 1.0, %v13250_v10  ;;  %v10806_v39 = vmul.f32 -0.999995, %v15369_v48  ;;  %v15376_v4 = vadd.f32 %v11867_v2, %v15334_v31  ;;  %v4444_v50 = vpop.f32.mrb[43].mxu1 }
 0x615   :  { %v13254_v33 = vpop.eup %13253  ;;  %13263 = vrcp.f32 %v4576_v23  ;;  %v4577_v36 = vadd.f32 1.0, %v13252_v7  ;;  %v10804_v3 = vmul.f32 -0.999995, %v15372_v13  ;;  %v15381_v10 = vadd.f32 %v15334_v31, %v4444_v50 }
 0x616   :  { %13265 = vrcp.f32 %v4574_v19  ;;  %v4575_v63 = vadd.f32 1.0, %v13254_v33  ;;  %v4562_v11 = vmul.f32 1.442695, %v10806_v39  ;;  %v10807_v34 = vmul.f32 -0.999995, %v15376_v4 }
 0x617   :  { %13267 = vrcp.f32 %v4577_v36  ;;  %v4558_v15 = vmul.f32 1.442695, %v10804_v3  ;;  %v10805_v58 = vmul.f32 -0.999995, %v15381_v10  ;;  %v4512_v36 = vmul.f32 0.999995, %v15337_v47 }
 0x618   :  { %13269 = vrcp.f32 %v4575_v63  ;;  %v4564_v2 = vmul.f32 1.442695, %v10807_v34  ;;  %v4513_v47 = vmul.f32 0.999995, %v15344_v55 }
 0x619   :  { %13271 = vpow2.f32 %v4562_v11  ;;  %v11870_v7 = vpop.f32.mrb[44].mxu1 }
 0x61a   :  { %v13256_v24 = vpop.eup %13255  ;;  %13273 = vpow2.f32 %v4558_v15  ;;  %v15385_v19 = vadd.f32 %v11870_v7, %v15334_v31  ;;  %v4457_v39 = vpop.f32.mrb[45].mxu1  ;;  %v4560_v15 = vmul.f32 1.442695, %v10805_v58 }
 0x61b   :  { %v13258_v23 = vpop.eup %13257  ;;  %v4580_v17 = vadd.f32 1.0, %v13256_v24  ;;  %13275 = vpow2.f32 %v4564_v2  ;;  %v15389_v3 = vadd.f32 %v15334_v31, %v4457_v39  ;;  %v11871_v34 = vpop.f32.mrb[46].mxu1  ;;  %v4510_v2 = vmul.f32 0.999995, %v15340_v51 }
 0x61c   :  { %v13260_v33 = vpop.eup %13259  ;;  %v4578_v50 = vadd.f32 1.0, %v13258_v23  ;;  %v10810_v38 = vmul.f32 -0.999995, %v15385_v19  ;;  %v4460_v24 = vpop.f32.mrb[47].mxu1  ;;  %v15396_v39 = vadd.f32 %v11871_v34, %v15334_v31 }
 0x61d   :  { %v13262_v63 = vpop.eup %13261  ;;  %13277 = vrcp.f32 %v4580_v17  ;;  %v4581_v11 = vadd.f32 1.0, %v13260_v33  ;;  %v10808_v46 = vmul.f32 -0.999995, %v15389_v3  ;;  %v15399_v5 = vadd.f32 %v15334_v31, %v4460_v24 }
 0x61e   :  { %13279 = vrcp.f32 %v4578_v50  ;;  %v4579_v7 = vadd.f32 1.0, %v13262_v63  ;;  %v4570_v23 = vmul.f32 1.442695, %v10810_v38  ;;  %v4511_v63 = vmul.f32 0.999995, %v15348_v56 }
 0x61f   :  { %v13264_v20 = vpop.eup %13263  ;;  %13281 = vrcp.f32 %v4581_v11  ;;  %v4566_v58 = vmul.f32 1.442695, %v10808_v46  ;;  %v10811_v22 = vmul.f32 -0.999995, %v15396_v39  ;;  %v10809_v56 = vmul.f32 -0.999995, %v15399_v5 }
 0x620   :  { %v13266_v17 = vpop.eup %13265  ;;  %v4624_v33 = vmul.f32 %v13264_v20, %v4512_v36  ;;  %13283 = vrcp.f32 %v4579_v7 }
 0x621   :  { %v13268_v51 = vpop.eup %13267  ;;  %v4622_v50 = vmul.f32 %v13266_v17, %v4510_v2  ;;  %13285 = vpow2.f32 %v4560_v15  ;;  %v4572_v20 = vmul.f32 1.442695, %v10811_v22  ;;  %v4568_v22 = vmul.f32 1.442695, %v10809_v56 }
 0x622   :  { %v13270_v55 = vpop.eup %13269  ;;  %v4625_v11 = vmul.f32 %v13268_v51, %v4513_v47  ;;  %13287 = vpow2.f32 %v4570_v23  ;;  %v4640_v31 = vmul.f32 %v14210_v18, %v4624_v33  ;;  %v4514_v33 = vmul.f32 0.999995, %v15356_v61 }
 0x623   :  { %v13272_v38 = vpop.eup %13271  ;;  %v4623_v34 = vmul.f32 %v13270_v55, %v4511_v63  ;;  %13289 = vpow2.f32 %v4566_v58  ;;  %v4638_v2 = vmul.f32 %v14220_v0, %v4622_v50  ;;  %v4517_v50 = vmul.f32 0.999995, %v15360_v21 }
 0x624   :  { %v13274_v46 = vpop.eup %13273  ;;  %v4641_v36 = vmul.f32 %v14208_v43, %v4625_v11  ;;  %v4584_v24 = vadd.f32 1.0, %v13272_v38  ;;  %13291 = vpow2.f32 %v4572_v20 }
 0x625   :  { %v13276_v15 = vpop.eup %13275  ;;  %v4639_v7 = vmul.f32 %v14212_v44, %v4623_v34  ;;  %v4582_v47 = vadd.f32 1.0, %v13274_v46  ;;  %v4515_v34 = vmul.f32 0.999995, %v15364_v14 }
 0x626   :  { %v15409_v23 = vpack.c.bf16 %v4641_v36, %v4640_v31  ;;  %13293 = vrcp.f32 %v4584_v24  ;;  %v4585_v12 = vadd.f32 1.0, %v13276_v15 }
 0x627   :  { %v13278_v17 = vpop.eup %13277  ;;  %v15411_v58 = vpack.c.bf16 %v4639_v7, %v4638_v2 }
 0x628   :  { %v13280_v51 = vpop.eup %13279  ;;  %v17537_v63 = vshrl.u32 %v15409_v23, 16  ;;  %v4628_v55 = vmul.f32 %v13278_v17, %v4516_v29  ;;  %13295 = vrcp.f32 %v4585_v12  ;;  %v17538_v61 = vshll.u32 %v15409_v23, 16 }
 0x629   :  { %v13282_v11 = vpop.eup %13281  ;;  %v4626_v38 = vmul.f32 %v13280_v51, %v4514_v33  ;;  %13297 = vpow2.f32 %v4568_v22  ;;  %v4704_v20 = vshrl.u32 %v15411_v58, 16  ;;  %v4707_v56 = vshll.u32 %v15411_v58, 16 }
 0x62a   :  { %v13284_v46 = vpop.eup %13283  ;;  %v15420_v31 = vrot.slane %v17537_v63, 7  ;;  %v4629_v36 = vmul.f32 %v13282_v11, %v4517_v50  ;;  %13299 = vrcp.f32 %v4582_v47  ;;  %v4644_v15 = vmul.f32 %v14237_v26, %v4628_v55 }
 0x62b   :  { %v13286_v29 = vpop.eup %13285  ;;  %v4627_v24 = vmul.f32 %v13284_v46, %v4515_v34  ;;  %v4706_v21 = vrot.slane %v4704_v20, 7  ;;  %v4642_v47 = vmul.f32 %v14243_v8, %v4626_v38 }
 0x62c   :  { %v13288_v14 = vpop.eup %13287  ;;  %v4645_v2 = vmul.f32 %v14227_v49, %v4629_v36  ;;  %v4583_v7 = vadd.f32 1.0, %v13286_v29  ;;  %v4716_v12 = vor.u32 %v17538_v61, %v15420_v31  ;;  %v4520_v36 = vmul.f32 0.999995, %v15369_v48  ;;  %v13036_v48 = vld [vmem:[%s17417_s3 + $0xf8] sm:$0xff]  }
 0x62d   :  { %v13290_v22 = vpop.eup %13289  ;;  %v4643_v17 = vmul.f32 %v14241_v35, %v4627_v24  ;;  %v4588_v33 = vadd.f32 1.0, %v13288_v14  ;;  %v4709_v51 = vor.u32 %v4707_v56, %v4706_v21 }
 0x62e   :  { %v15433_v50 = vpack.c.bf16 %v4645_v2, %v4644_v15  ;;  %13301 = vrcp.f32 %v4583_v7  ;;  %v4586_v11 = vadd.f32 1.0, %v13290_v22  ;;  %v4717_v55 = vsel %vm1294_vm2, %v4706_v21, %v4716_v12  ;;  %v13292_v34 = vpop.eup %13291  ;;  %v17764_v21 = vld [vmem:[#allocation27_spill] sm:$0xff] }
 0x62f   :  { %v15436_v46 = vpack.c.bf16 %v4643_v17, %v4642_v47  ;;  %13303 = vrcp.f32 %v4588_v33  ;;  %v4774_v29 = vsel %vm14303_vm3, 0, %v4709_v51  ;;  %v4589_v24 = vadd.f32 1.0, %v13292_v34 }
 0x630   :  { %v13294_v38 = vpop.eup %13293  ;;  %13305 = vrcp.f32 %v4586_v11  ;;  %v4775_v14 = vmul.bf16 %v4774_v29, %v14229_v40  ;;  %v17536_v15 = vshrl.u32 %v15433_v50, 16  ;;  %v4521_v7 = vmul.f32 0.999995, %v15376_v4 }
 0x631   :  { %v4632_v2 = vmul.f32 %v13294_v38, %v4520_v36  ;;  %v4776_v12 = vmul.bf16 %v4717_v55, %v17764_v21  ;;  %v4719_v22 = vshrl.u32 %v15436_v46, 16  ;;  %13307 = vrcp.f32 %v4589_v24 }
 0x632   :  { %v13296_v47 = vpop.eup %13295  ;;  %11876 = vmatprep.mubr.msk.bf16.mxu0 %vm1428_vm4, %v4775_v14  ;;  %v15452_v17 = vrot.slane %v17536_v15, 7  ;;  %v4730_v33 = vshll.u32 %v15433_v50, 16  ;;  %v5190_v11 = vrot.slane %v4707_v56, 1  ;;  %v4722_v34 = vshll.u32 %v15436_v46, 16  ;;  %v15465_v56 = vld [vmem:[%s17417_s3 + $0x110] sm:$0xff]  }
 0x633   :  { %v13298_v51 = vpop.eup %13297  ;;  %v4633_v4 = vmul.f32 %v13296_v47, %v4521_v7  ;;  %11877 = vmatmul.mubr.msk.bf16.vlgmr.msra.gmra.mrb[16].mxu0 %vm1428_vm4, %v4776_v12  ;;  %v4721_v55 = vrot.slane %v4719_v22, 7  ;;  %v4648_v24 = vmul.f32 %v14274_v57, %v4632_v2  ;;  %v4518_v14 = vmul.f32 0.999995, %v15372_v13 }
 0x634   :  { %v13300_v36 = vpop.eup %13299  ;;  %v4587_v29 = vadd.f32 1.0, %v13298_v51  ;;  %11893 = vmatpush3.bf16.msra.mxu0 %v15328_v16  ;;  %v4732_v38 = vor.u32 %v4730_v33, %v15452_v17  ;;  %v4519_v7 = vmul.f32 0.999995, %v15381_v10  ;;  %v5191_v2 = vor.u32 %v5190_v11, %v4704_v20 }
 0x635   :  { %v4649_v15 = vmul.f32 %v17739_v45, %v4633_v4  ;;  %v4724_v63 = vor.u32 %v4722_v34, %v4721_v55  ;;  %11894 = vmatprep.subr.bf16.mxu0 %v13036_v48  ;;  %v4630_v12 = vmul.f32 %v13300_v36, %v4518_v14  ;;  %v5195_v61 = vrot.slane %v4722_v34, 1 }
 0x636   :  { %13309 = vrcp.f32 %v4587_v29  ;;  %v4733_v16 = vsel %vm1294_vm2, %v4721_v55, %v4732_v38  ;;  %v17765_v45 = vshll.u32 %v15409_v23, 16  ;;  %v4524_v55 = vmul.f32 0.999995, %v15385_v19 }
 0x637   :  { %v15469_v47 = vpack.c.bf16 %v4649_v15, %v4648_v24  ;;  %v4725_v13 = vsel %vm1294_vm2, %v15420_v31, %v4724_v63  ;;  %v4778_v15 = vmul.bf16 %v4733_v16, %v14344_v9  ;;  %v4522_v20 = vmul.f32 0.999995, %v15389_v3 }
 0x638   :  { %v13302_v51 = vpop.eup %13301  ;;  %v4777_v4 = vmul.bf16 %v4725_v13, %v14324_v28  ;;  %11895 = vmatpush3.bf16.msra.mxu0 %v13036_v48  ;;  %v5192_v10 = vrot.slane %v17765_v45, 1  ;;  %v4525_v31 = vmul.f32 0.999995, %v15396_v39  ;;  %v4646_v19 = vmul.f32 %v14254_v41, %v4630_v12 }
 0x639   :  { %v13304_v29 = vpop.eup %13303  ;;  %v4631_v57 = vmul.f32 %v13302_v51, %v4519_v7  ;;  %v4743_v36 = vshrl.u32 %v15469_v47, 16  ;;  %11912 = vmatprep.subr.bf16.mxu0 %v15465_v56  ;;  %v4746_v48 = vshll.u32 %v15469_v47, 16  ;;  %v17766_v38 = vshrl.u32 %v15409_v23, 16 }
 0x63a   :  { %v13306_v63 = vpop.eup %13305  ;;  %11880 = vmatprep.mubr.msk.bf16.mxu0 %vm1428_vm4, %v4777_v4  ;;  %v15487_v45 = vsel %vm1824_vm5, %v5191_v2, %v5192_v10  ;;  %v4636_v34 = vmul.f32 %v13304_v29, %v4524_v55  ;;  %v5197_v39 = vor.u32 %v5195_v61, %v4719_v22  ;;  %v5198_v7 = vrot.slane %v4730_v33, 1 }
 0x63b   :  { %v4647_v11 = vmul.f32 %v14252_v53, %v4631_v57  ;;  %11881 = vmatmul.mubr.msk.bf16.gmra.mrb[20].mxu0 %vm1428_vm4, %v4778_v15  ;;  %v5194_v24 = vor.u32 %v5192_v10, %v17766_v38  ;;  %v13308_v3 = vpop.eup %13307  ;;  %v4745_v14 = vrot.slane %v4743_v36, 7  ;;  %v4634_v13 = vmul.f32 %v13306_v63, %v4522_v20 }
 0x63c   :  { %v4637_v51 = vmul.f32 %v13308_v3, %v4525_v31  ;;  %v4523_v2 = vmul.f32 0.999995, %v15399_v5  ;;  %v15501_v57 = vsel %vm1824_vm5, %v5197_v39, %v5198_v7  ;;  %v17767_v4 = vshrl.u32 %v15433_v50, 16 }
 0x63d   :  { %v15494_v16 = vpack.c.bf16 %v4647_v11, %v4646_v19  ;;  %v15498_v12 = vsel %vm1824_vm5, %v5194_v24, %v5195_v61  ;;  %v5204_v10 = vrot.slane %v4746_v48, 1  ;;  %v4652_v55 = vmul.f32 %v14388_v30, %v4636_v34 }
 0x63e   :  { %v5200_v29 = vor.u32 %v5198_v7, %v17767_v4  ;;  %v4653_v22 = vmul.f32 %v14386_v60, %v4637_v51  ;;  %v4748_v5 = vor.u32 %v4746_v48, %v4745_v14  ;;  %v4650_v38 = vmul.f32 %v14363_v1, %v4634_v13 }
 0x63f   :  { %v4735_v33 = vshrl.u32 %v15494_v16, 16  ;;  %v4738_v15 = vshll.u32 %v15494_v16, 16  ;;  %v5206_v20 = vor.u32 %v5204_v10, %v4743_v36 }
 0x640   :  { %v13310_v63 = vpop.eup %13309  ;;  %v15509_v61 = vpack.c.bf16 %v4653_v22, %v4652_v55 }
 0x641   :  { %v4635_v31 = vmul.f32 %v13310_v63, %v4523_v2  ;;  %v4737_v19 = vrot.slane %v4735_v33, 7  ;;  %v5201_v11 = vrot.slane %v4738_v15, 1 }
 0x642   :  { %v4759_v34 = vshrl.u32 %v15509_v61, 16  ;;  %v4762_v7 = vshll.u32 %v15509_v61, 16 }
 0x643   :  { %v4651_v24 = vmul.f32 %v14360_v37, %v4635_v31  ;;  %v4740_v3 = vor.u32 %v4738_v15, %v4737_v19  ;;  %v4749_v39 = vsel %vm1294_vm2, %v4737_v19, %v4748_v5  ;;  %v15521_v2 = vsel %vm1824_vm5, %v5200_v29, %v5201_v11 }
 0x644   :  { %v4761_v48 = vrot.slane %v4759_v34, 7  ;;  %v5203_v4 = vor.u32 %v5201_v11, %v4735_v33  ;;  %v5210_v55 = vrot.slane %v4762_v7, 1  ;;  %v4780_v22 = vmul.bf16 %v4749_v39, %v14404_v25 }
 0x645   :  { %v15516_v51 = vpack.c.bf16 %v4651_v24, %v4650_v38  ;;  %v4741_v36 = vsel %vm1294_vm2, %v15452_v17, %v4740_v3  ;;  %v4670_v33 = vrot.slane %v15411_v58, 7 }
 0x646   :  { %v4779_v13 = vmul.bf16 %v4741_v36, %v14391_v27  ;;  %v4764_v5 = vor.u32 %v4762_v7, %v4761_v48  ;;  %v15529_v31 = vsel %vm1824_vm5, %v5203_v4, %v5204_v10  ;;  %v15531_v17 = vor.u32 %v5210_v55, %v4759_v34 }
 0x647   :  { %v4751_v15 = vshrl.u32 %v15516_v51, 16  ;;  %v4754_v63 = vshll.u32 %v15516_v51, 16  ;;  %v4693_v10 = vsel %vm1218_vm0, 0, %v4670_v33  ;;  %v4671_v48 = vrot.slane %v15409_v23, 7 }
 0x648   :  { %11884 = vmatprep.mubr.msk.bf16.mxu0 %vm1428_vm4, %v4779_v13  ;;  %v4695_v13 = vmul.bf16 %v4693_v10, %v14442_v32 }
 0x649   :  { %11885 = vmatmul.mubr.msk.bf16.gmra.mrb[24].mxu0 %vm1428_vm4, %v4780_v22  ;;  %v4753_v29 = vrot.slane %v4751_v15, 7  ;;  %v5207_v19 = vrot.slane %v4754_v63, 1  ;;  %v13038_v22 = vld [vmem:[%s17417_s3 + $0x118] sm:$0xff]  }
 0x64b   :  { %v4756_v11 = vor.u32 %v4754_v63, %v4753_v29  ;;  %v4765_v38 = vsel %vm1294_vm2, %v4753_v29, %v4764_v5  ;;  %v15537_v24 = vsel %vm1824_vm5, %v5206_v20, %v5207_v19  ;;  %v5209_v3 = vor.u32 %v5207_v19, %v4751_v15  ;;  %v13039_v29 = vld [vmem:[%s17417_s3 + $0x120] sm:$0xff]  }
 0x64c   :  { %v4782_v36 = vmul.bf16 %v4765_v38, %v14439_v42  ;;  %v4673_v20 = vrot.slane %v15436_v46, 7  ;;  %v4675_v63 = vrot.slane %v15433_v50, 7  ;;  %v4677_v5 = vrot.slane %v15494_v16, 7  ;;  %v17768_v38 = vld [vmem:[#allocation51_spill] sm:$0xff] }
 0x64d   :  { %v4757_v39 = vsel %vm1294_vm2, %v4745_v14, %v4756_v11  ;;  %v15543_v7 = vsel %vm1824_vm5, %v5209_v3, %v5210_v55  ;;  %v4672_v14 = vsel %vm1218_vm0, %v4670_v33, %v4671_v48 }
 0x64e   :  { %v4781_v34 = vmul.bf16 %v4757_v39, %v14422_v62  ;;  %v4674_v4 = vsel %vm1218_vm0, %v4671_v48, %v4673_v20  ;;  %v4696_v55 = vmul.bf16 %v4672_v14, %v14452_v54  ;;  %v4676_v33 = vsel %vm1218_vm0, %v4673_v20, %v4675_v63 }
 0x64f   :  { %v4697_v15 = vmul.bf16 %v4674_v4, %v14454_v52  ;;  %v4678_v19 = vsel %vm1218_vm0, %v4675_v63, %v4677_v5  ;;  %v4698_v11 = vmul.bf16 %v4676_v33, %v17742_v59  ;;  %v4679_v39 = vrot.slane %v15469_v47, 7  ;;  %v13041_v63 = vld [vmem:[%s17417_s3 + $0x130] sm:$0xff]  }
 0x650   :  { %11888 = vmatprep.mubr.msk.bf16.mxu0 %vm1428_vm4, %v4781_v34  ;;  %v4699_v3 = vmul.bf16 %v4678_v19, %v17768_v38  ;;  %v4683_v14 = vrot.slane %v15509_v61, 7  ;;  %v17773_v33 = vld [vmem:[#allocation56_spill] sm:$0xff] }
 0x651   :  { %11889 = vmatmul.mubr.msk.bf16.gmra.mrb[28].mxu0 %vm1428_vm4, %v4782_v36  ;;  %v4680_v10 = vsel %vm1218_vm0, %v4677_v5, %v4679_v39  ;;  %v17769_v36 = vld [vmem:[#allocation52_spill] sm:$0xff]  ;;  %v17772_v5 = vld [vmem:[#allocation55_spill] sm:$0xff]  ;;  %v5223_v19 = vmul.bf16 %v15498_v12, %v17773_v33 }
 0x652   :  { %11896 = vmatprep.mubr.msk.bf16.mxu0 %vm1428_vm4, %v4695_v13  ;;  %v4700_v48 = vmul.bf16 %v4680_v10, %v17769_v36  ;;  %v17770_v13 = vld [vmem:[#allocation53_spill] sm:$0xff]  ;;  %v17776_v10 = vld [vmem:[#allocation59_spill] sm:$0xff] }
 0x653   :  { %v5226_v12 = vmul.bf16 %v15529_v31, %v17776_v10  ;;  %v5221_v31 = vsel %vm14557_vm7, %v15531_v17, 0 }
 0x659   :  { %11897 = vmatmul.mubr.msk.bf16.vlgmr.msra.gmra.mrb[16].mxu0 %vm1428_vm4, %v4696_v55  ;;  %v17771_v55 = vld [vmem:[#allocation54_spill] sm:$0xff] }
 0x65a   :  { %11913 = vmatpush3.bf16.msra.mxu0 %v15465_v56  ;;  %11900 = vmatprep.mubr.msk.bf16.mxu0 %vm1428_vm4, %v4697_v15  ;;  %v4681_v56 = vrot.slane %v15516_v51, 7  ;;  %v13040_v15 = vld [vmem:[%s17417_s3 + $0x128] sm:$0xff]  }
 0x65b   :  { %11914 = vmatprep.subr.bf16.mxu0 %v13038_v22 }
 0x65c   :  { %v4682_v34 = vsel %vm1218_vm0, %v4679_v39, %v4681_v56  ;;  %v4684_v4 = vsel %vm1218_vm0, %v4681_v56, %v4683_v14  ;;  %v5379_v14 = vrot.slane %v15411_v58, 1 }
 0x65d   :  { %v4701_v20 = vmul.bf16 %v4682_v34, %v17770_v13  ;;  %v17777_v34 = vld [vmem:[#allocation60_spill] sm:$0xff] }
 0x65e   :  { %11915 = vmatpush3.bf16.msra.mxu0 %v13038_v22  ;;  %v4702_v22 = vmul.bf16 %v4684_v4, %v17771_v55  ;;  %v5380_v4 = vrot.slane %v15409_v23, 1 }
 0x65f   :  { %11932 = vmatprep.subr.bf16.mxu0 %v13039_v29 }
 0x661   :  { %11901 = vmatmul.mubr.msk.bf16.gmra.mrb[20].mxu0 %vm1428_vm4, %v4698_v11  ;;  %v13042_v11 = vld [vmem:[%s17417_s3 + $0x138] sm:$0xff]  }
 0x662   :  { %11904 = vmatprep.mubr.msk.bf16.mxu0 %vm1428_vm4, %v4699_v3  ;;  %v17774_v3 = vld [vmem:[#allocation57_spill] sm:$0xff] }
 0x663   :  { %v5224_v39 = vmul.bf16 %v15501_v57, %v17774_v3  ;;  %v5227_v57 = vmul.bf16 %v15537_v24, %v17777_v34  ;;  %v5382_v24 = vrot.slane %v15436_v46, 1  ;;  %v17805_v3 = vld [vmem:[#allocation35_spill] sm:$0xff] }
 0x669   :  { %11905 = vmatmul.mubr.msk.bf16.gmra.mrb[24].mxu0 %vm1428_vm4, %v4700_v48  ;;  %v17778_v48 = vld [vmem:[#allocation61_spill] sm:$0xff] }
 0x66a   :  { %11908 = vmatprep.mubr.msk.bf16.mxu0 %vm1428_vm4, %v4701_v20  ;;  %v5228_v20 = vmul.bf16 %v15543_v7, %v17778_v48 }
 0x671   :  { %11909 = vmatmul.mubr.msk.bf16.gmra.mrb[28].mxu0 %vm1428_vm4, %v4702_v22  ;;  %v5381_v22 = vsel %vm2056_vm8, %v5379_v14, %v5380_v4 }
 0x672   :  { %11916 = vmatprep.mubr.msk.bf16.mxu0 %vm1428_vm4, %v15411_v58  ;;  %v5384_v58 = vrot.slane %v15433_v50, 1 }
 0x679   :  { %11917 = vmatmul.mubr.msk.bf16.vlgmr.msra.gmra.mrb[16].mxu0 %vm1428_vm4, %v15409_v23  ;;  %v5383_v23 = vsel %vm2056_vm8, %v5380_v4, %v5382_v24  ;;  %v17785_v4 = vld [vmem:[#allocation68_spill] sm:$0xff] }
 0x67a   :  { %11933 = vmatpush3.bf16.msra.mxu0 %v13039_v29  ;;  %11920 = vmatprep.mubr.msk.bf16.mxu0 %vm1428_vm4, %v15436_v46  ;;  %v5222_v29 = vmul.bf16 %v15487_v45, %v17772_v5  ;;  %v17775_v45 = vld [vmem:[#allocation58_spill] sm:$0xff]  ;;  %v5388_v46 = vrot.slane %v15469_v47, 1 }
 0x67b   :  { %11934 = vmatprep.subr.bf16.mxu0 %v13040_v15  ;;  %v5225_v56 = vmul.bf16 %v15521_v2, %v17775_v45 }
 0x67e   :  { %11935 = vmatpush3.bf16.msra.mxu0 %v13040_v15  ;;  %v17780_v15 = vld [vmem:[#allocation64_spill] sm:$0xff] }
 0x67f   :  { %11952 = vmatprep.subr.bf16.mxu0 %v13041_v63 }
 0x681   :  { %11921 = vmatmul.mubr.msk.bf16.gmra.mrb[20].mxu0 %vm1428_vm4, %v15433_v50 }
 0x682   :  { %11924 = vmatprep.mubr.msk.bf16.mxu0 %vm1428_vm4, %v15494_v16 }
 0x689   :  { %11925 = vmatmul.mubr.msk.bf16.gmra.mrb[24].mxu0 %vm1428_vm4, %v15469_v47 }
 0x68a   :  { %11928 = vmatprep.mubr.msk.bf16.mxu0 %vm1428_vm4, %v15516_v51 }
 0x691   :  { %11929 = vmatmul.mubr.msk.bf16.gmra.mrb[28].mxu0 %vm1428_vm4, %v15509_v61 }
 0x692   :  { %11936 = vmatprep.mubr.msk.bf16.mxu0 %vm1428_vm4, %v5222_v29  ;;  %v17781_v29 = vld [vmem:[#allocation63_spill] sm:$0xff] }
 0x693   :  { %v5404_v7 = vmul.bf16 %v5381_v22, %v17781_v29  ;;  %v5390_v22 = vrot.slane %v15516_v51, 1  ;;  %v17797_v29 = vld [vmem:[#allocation26_spill] sm:$0xff] }
 0x695   :  { %v5391_v47 = vsel %vm2056_vm8, %v5388_v46, %v5390_v22 }
 0x699   :  { %11937 = vmatmul.mubr.msk.bf16.vlgmr.msra.gmra.mrb[16].mxu0 %vm1428_vm4, %v5223_v19  ;;  %v5385_v19 = vsel %vm2056_vm8, %v5382_v24, %v5384_v58  ;;  %v17786_v24 = vld [vmem:[#allocation69_spill] sm:$0xff] }
 0x69a   :  { %11953 = vmatpush3.bf16.msra.mxu0 %v13041_v63  ;;  %11940 = vmatprep.mubr.msk.bf16.mxu0 %vm1428_vm4, %v5224_v39  ;;  %v5229_v63 = vmul.bf16 %v5221_v31, %v17780_v15  ;;  %v17783_v39 = vld [vmem:[#allocation66_spill] sm:$0xff] }
 0x69b   :  { %11954 = vmatprep.subr.bf16.mxu0 %v13042_v11 }
 0x69e   :  { %11955 = vmatpush3.bf16.msra.mxu0 %v13042_v11  ;;  %v17782_v11 = vld [vmem:[#allocation65_spill] sm:$0xff] }
 0x69f   :  { %v5405_v17 = vmul.bf16 %v5383_v23, %v17782_v11 }
 0x6a1   :  { %11941 = vmatmul.mubr.msk.bf16.gmra.mrb[20].mxu0 %vm1428_vm4, %v5225_v56  ;;  %v5406_v56 = vmul.bf16 %v5385_v19, %v17783_v39  ;;  %v17788_v19 = vld [vmem:[#allocation71_spill] sm:$0xff] }
 0x6a2   :  { %11944 = vmatprep.mubr.msk.bf16.mxu0 %vm1428_vm4, %v5226_v12  ;;  %v5386_v12 = vrot.slane %v15494_v16, 1  ;;  %v5392_v16 = vrot.slane %v15509_v61, 1  ;;  %v13043_v61 = vld [vmem:[%s17420_s5 + $0x10] sm:$0xff]  }
 0x6a3   :  { %11972 = vmatprep.subr.bf16.mxu1 %v13043_v61 }
 0x6a4   :  { %v5387_v50 = vsel %vm2056_vm8, %v5384_v58, %v5386_v12  ;;  %v17787_v58 = vld [vmem:[#allocation70_spill] sm:$0xff]  ;;  %v5402_v51 = vsel %vm2056_vm8, %v5392_v16, 0  ;;  %11973 = vmatpush3.bf16.msra.mxu1 %v13043_v61 }
 0x6a9   :  { %11945 = vmatmul.mubr.msk.bf16.gmra.mrb[24].mxu0 %vm1428_vm4, %v5227_v57  ;;  %v5389_v57 = vsel %vm2056_vm8, %v5386_v12, %v5388_v46  ;;  %v15677_v12 = vld [vmem:[%s17420_s5] sm:$0xff]  }
 0x6aa   :  { %11948 = vmatprep.mubr.msk.bf16.mxu0 %vm1428_vm4, %v5228_v20  ;;  %v17784_v20 = vld [vmem:[#allocation67_spill] sm:$0xff]  ;;  %v5408_v31 = vmul.bf16 %v5389_v57, %v17785_v4 }
 0x6ab   :  { %v5407_v14 = vmul.bf16 %v5387_v50, %v17784_v20  ;;  %v15683_v46 = vld [vmem:[%s17419_s4 + $0x3] ss:$0 sm:$0xff] }
 0x6b1   :  { %11949 = vmatmul.mubr.msk.bf16.gmra.mrb[28].mxu0 %vm1428_vm4, %v5229_v63  ;;  %v5393_v63 = vsel %vm2056_vm8, %v5390_v22, %v5392_v16  ;;  %v17789_v16 = vld [vmem:[#allocation22_spill] sm:$0xff] }
 0x6b2   :  { %11956 = vmatprep.mubr.msk.bf16.mxu0 %vm1428_vm4, %v5404_v7  ;;  %v5409_v7 = vmul.bf16 %v5391_v47, %v17786_v24  ;;  %v5410_v23 = vmul.bf16 %v5393_v63, %v17787_v58 }
 0x6b9   :  { %11957 = vmatmul.mubr.msk.bf16.vlgmr.msra.gmra.mrb[16].mxu0 %vm1428_vm4, %v5405_v17  ;;  %v5411_v17 = vmul.bf16 %v5402_v51, %v17788_v19 }
 0x6ba   :  { %11960 = vmatprep.mubr.msk.bf16.mxu0 %vm1428_vm4, %v5406_v56  ;;  %v13044_v56 = vld [vmem:[%s17420_s5 + $0x18] sm:$0xff]  }
 0x6bb   :  { %11974 = vmatprep.subr.bf16.mxu1 %v13044_v56 }
 0x6bc   :  { %11975 = vmatpush3.bf16.msra.mxu1 %v13044_v56  ;;  %v17791_v56 = vld [vmem:[#allocation21_spill] sm:$0xff] }
 0x6bd   :  { %11992 = vmatprep.subr.bf16.mxu1 %v15677_v12 }
 0x6c1   :  { %11961 = vmatmul.mubr.msk.bf16.gmra.mrb[20].mxu0 %vm1428_vm4, %v5407_v14 }
 0x6c2   :  { %11964 = vmatprep.mubr.msk.bf16.mxu0 %vm1428_vm4, %v5408_v31 }
 0x6c9   :  { %11965 = vmatmul.mubr.msk.bf16.gmra.mrb[24].mxu0 %vm1428_vm4, %v5409_v7 }
 0x6ca   :  { %11968 = vmatprep.mubr.msk.bf16.mxu0 %vm1428_vm4, %v5410_v23  ;;  %v17790_v23 = vld [vmem:[#allocation20_spill] sm:$0xff] }
 0x6d1   :  { %11969 = vmatmul.mubr.msk.bf16.gmra.mrb[28].mxu0 %vm1428_vm4, %v5411_v17 }
 0x78c   :  { %v11958_v50 = vpop.f32.mrb[16].mxu0 }
 0x78d   :  { %v5569_v57 = vadd.f32 %v11958_v50, %v15683_v46  ;;  %v5482_v14 = vpop.f32.mrb[17].mxu0 }
 0x78e   :  { %v5567_v31 = vadd.f32 %v15683_v46, %v5482_v14  ;;  %v11959_v22 = vpop.f32.mrb[18].mxu0  ;;  %v17792_v14 = vld [vmem:[#allocation19_spill] sm:$0xff] }
 0x78f   :  { %v15688_v47 = vadd.f32 %v5569_v57, %v17789_v16  ;;  %v5570_v63 = vadd.f32 %v11959_v22, %v15683_v46  ;;  %v5485_v7 = vpop.f32.mrb[19].mxu0 }
 0x790   :  { %v15692_v51 = vadd.f32 %v5567_v31, %v17790_v23  ;;  %v5568_v17 = vadd.f32 %v15683_v46, %v5485_v7 }
 0x791   :  { %v10865_v61 = vmul.f32 -0.999995, %v15688_v47  ;;  %v15697_v19 = vadd.f32 %v5570_v63, %v17791_v56  ;;  %v15705_v22 = vmul.f32 %v14210_v18, %v15688_v47 }
 0x792   :  { %v10863_v50 = vmul.f32 -0.999995, %v15692_v51  ;;  %v15701_v58 = vadd.f32 %v5568_v17, %v17792_v14  ;;  %v15714_v63 = vmul.f32 %v14220_v0, %v15692_v51 }
 0x793   :  { %v5667_v57 = vmul.f32 1.442695, %v10865_v61  ;;  %17793 = vst [vmem:[#allocation22_spill] sm:$0xff] %v15705_v22  ;;  %v10866_v31 = vmul.f32 -0.999995, %v15697_v19  ;;  %v15710_v16 = vmul.f32 %v14208_v43, %v15697_v19  ;;  %v17798_v22 = vld [vmem:[#allocation24_spill] sm:$0xff] }
 0x794   :  { %v5663_v7 = vmul.f32 1.442695, %v10863_v50  ;;  %17795 = vst [vmem:[#allocation21_spill] sm:$0xff] %v15714_v63  ;;  %v10864_v23 = vmul.f32 -0.999995, %v15701_v58  ;;  %v15719_v17 = vmul.f32 %v14212_v44, %v15701_v58  ;;  %v11962_v14 = vpop.f32.mrb[20].mxu0 }
 0x795   :  { %17794 = vst [vmem:[#allocation20_spill] sm:$0xff] %v15710_v16  ;;  %13311 = vpow2.f32 %v5667_v57  ;;  %v5669_v61 = vmul.f32 1.442695, %v10866_v31  ;;  %v5573_v50 = vadd.f32 %v11962_v14, %v15683_v46  ;;  %v5498_v4 = vpop.f32.mrb[21].mxu0  ;;  %v17799_v16 = vld [vmem:[#allocation25_spill] sm:$0xff] }
 0x796   :  { %17796 = vst [vmem:[#allocation19_spill] sm:$0xff] %v15719_v17  ;;  %13313 = vpow2.f32 %v5663_v7  ;;  %v5665_v24 = vmul.f32 1.442695, %v10864_v23  ;;  %v5571_v39 = vadd.f32 %v15683_v46, %v5498_v4  ;;  %v11963_v11 = vpop.f32.mrb[22].mxu0  ;;  %v5634_v33 = vmul.f32 0.999995, %v15697_v19 }
 0x797   :  { %13315 = vpow2.f32 %v5669_v61  ;;  %v15728_v57 = vadd.f32 %v5573_v50, %v17797_v29  ;;  %v5574_v31 = vadd.f32 %v11963_v11, %v15683_v46  ;;  %v5501_v56 = vpop.f32.mrb[23].mxu0  ;;  %v17800_v61 = vld [vmem:[#allocation23_spill] sm:$0xff] }
 0x798   :  { %13317 = vpow2.f32 %v5665_v24  ;;  %v15732_v7 = vadd.f32 %v5571_v39, %v17798_v22  ;;  %v5572_v23 = vadd.f32 %v15683_v46, %v5501_v56 }
 0x799   :  { %v10869_v14 = vmul.f32 -0.999995, %v15728_v57  ;;  %v15737_v20 = vadd.f32 %v5574_v31, %v17799_v16  ;;  %v15745_v11 = vmul.f32 %v14237_v26, %v15728_v57 }
 0x79a   :  { %v10867_v4 = vmul.f32 -0.999995, %v15732_v7  ;;  %v15741_v24 = vadd.f32 %v5572_v23, %v17800_v61  ;;  %v15754_v16 = vmul.f32 %v14243_v8, %v15732_v7 }
 0x79b   :  { %v5675_v29 = vmul.f32 1.442695, %v10869_v14  ;;  %17801 = vst [vmem:[#allocation26_spill] sm:$0xff] %v15745_v11  ;;  %v10870_v39 = vmul.f32 -0.999995, %v15737_v20  ;;  %v15750_v22 = vmul.f32 %v14227_v49, %v15737_v20 }
 0x79c   :  { %v5671_v56 = vmul.f32 1.442695, %v10867_v4  ;;  %17803 = vst [vmem:[#allocation25_spill] sm:$0xff] %v15754_v16  ;;  %v10868_v50 = vmul.f32 -0.999995, %v15741_v24  ;;  %v15759_v31 = vmul.f32 %v14241_v35, %v15741_v24  ;;  %v11966_v14 = vpop.f32.mrb[24].mxu0 }
 0x79d   :  { %17802 = vst [vmem:[#allocation24_spill] sm:$0xff] %v15750_v22  ;;  %13319 = vpow2.f32 %v5675_v29  ;;  %v5677_v23 = vmul.f32 1.442695, %v10870_v39  ;;  %v5577_v4 = vadd.f32 %v11966_v14, %v15683_v46  ;;  %v5514_v15 = vpop.f32.mrb[25].mxu0  ;;  %v17806_v22 = vld [vmem:[#allocation31_spill] sm:$0xff]  ;;  %v17808_v16 = vld [vmem:[#allocation28_spill] sm:$0xff] }
 0x79e   :  { %17804 = vst [vmem:[#allocation23_spill] sm:$0xff] %v15759_v31  ;;  %13321 = vpow2.f32 %v5671_v56  ;;  %v5673_v17 = vmul.f32 1.442695, %v10868_v50  ;;  %v5575_v10 = vadd.f32 %v15683_v46, %v5514_v15  ;;  %v11967_v29 = vpop.f32.mrb[26].mxu0 }
 0x79f   :  { %v13312_v63 = vpop.eup %13311  ;;  %13323 = vpow2.f32 %v5677_v23  ;;  %v15768_v61 = vadd.f32 %v5577_v4, %v17805_v3  ;;  %v5578_v56 = vadd.f32 %v11967_v29, %v15683_v46  ;;  %v5517_v50 = vpop.f32.mrb[27].mxu0  ;;  %v17807_v4 = vld [vmem:[#allocation32_spill] sm:$0xff] }
 0x7a0   :  { %v13314_v48 = vpop.eup %13313  ;;  %v5697_v34 = vadd.f32 1.0, %v13312_v63  ;;  %13325 = vpow2.f32 %v5673_v17  ;;  %v15772_v2 = vadd.f32 %v5575_v10, %v17806_v22  ;;  %v5576_v63 = vadd.f32 %v15683_v46, %v5517_v50 }
 0x7a1   :  { %v13316_v39 = vpop.eup %13315  ;;  %v5695_v45 = vadd.f32 1.0, %v13314_v48  ;;  %v10873_v23 = vmul.f32 -0.999995, %v15768_v61  ;;  %v15778_v29 = vadd.f32 %v5578_v56, %v17807_v4  ;;  %v17809_v4 = vld [vmem:[#allocation43_spill] sm:$0xff] }
 0x7a2   :  { %v13318_v14 = vpop.eup %13317  ;;  %13327 = vrcp.f32 %v5697_v34  ;;  %v5698_v11 = vadd.f32 1.0, %v13316_v39  ;;  %v10871_v48 = vmul.f32 -0.999995, %v15772_v2  ;;  %v15781_v10 = vadd.f32 %v5576_v63, %v17808_v16  ;;  %v17810_v63 = vld [vmem:[#allocation40_spill] sm:$0xff] }
 0x7a3   :  { %13329 = vrcp.f32 %v5695_v45  ;;  %v5696_v15 = vadd.f32 1.0, %v13318_v14  ;;  %v5683_v17 = vmul.f32 1.442695, %v10873_v23  ;;  %v5633_v23 = vmul.f32 0.999995, %v15688_v47 }
 0x7a4   :  { %13331 = vrcp.f32 %v5698_v11  ;;  %v11970_v3 = vpop.f32.mrb[28].mxu0  ;;  %v5679_v39 = vmul.f32 1.442695, %v10871_v48  ;;  %v10874_v11 = vmul.f32 -0.999995, %v15778_v29 }
 0x7a5   :  { %13333 = vrcp.f32 %v5696_v15  ;;  %v5530_v34 = vpop.f32.mrb[29].mxu0  ;;  %v5581_v22 = vadd.f32 %v11970_v3, %v15683_v46  ;;  %v10872_v15 = vmul.f32 -0.999995, %v15781_v10 }
 0x7a6   :  { %v5579_v45 = vadd.f32 %v15683_v46, %v5530_v34  ;;  %v11971_v50 = vpop.f32.mrb[30].mxu0  ;;  %13335 = vpow2.f32 %v5683_v17  ;;  %v5631_v17 = vmul.f32 0.999995, %v15692_v51  ;;  %v5685_v36 = vmul.f32 1.442695, %v10874_v11 }
 0x7a7   :  { %v5533_v14 = vpop.f32.mrb[31].mxu0  ;;  %v13320_v31 = vpop.eup %13319  ;;  %13337 = vpow2.f32 %v5679_v39  ;;  %v15789_v16 = vadd.f32 %v5581_v22, %v17809_v4  ;;  %v5582_v39 = vadd.f32 %v11971_v50, %v15683_v46  ;;  %v5632_v22 = vmul.f32 0.999995, %v15701_v58 }
 0x7a8   :  { %v13322_v56 = vpop.eup %13321  ;;  %v5701_v48 = vadd.f32 1.0, %v13320_v31  ;;  %v15792_v3 = vadd.f32 %v5579_v45, %v17810_v63  ;;  %v5681_v4 = vmul.f32 1.442695, %v10872_v15  ;;  %v5580_v11 = vadd.f32 %v15683_v46, %v5533_v14 }
 0x7a9   :  { %v13324_v34 = vpop.eup %13323  ;;  %v5699_v5 = vadd.f32 1.0, %v13322_v56  ;;  %v10877_v47 = vmul.f32 -0.999995, %v15789_v16  ;;  %v15810_v58 = vmul.f32 %v14254_v41, %v15772_v2 }
 0x7aa   :  { %v13326_v55 = vpop.eup %13325  ;;  %13339 = vrcp.f32 %v5701_v48  ;;  %v5702_v13 = vadd.f32 1.0, %v13324_v34  ;;  %v10875_v19 = vmul.f32 -0.999995, %v15792_v3  ;;  %v17811_v48 = vld [vmem:[#allocation41_spill] sm:$0xff] }
 0x7ab   :  { %13341 = vrcp.f32 %v5699_v5  ;;  %v5700_v45 = vadd.f32 1.0, %v13326_v55  ;;  %v5691_v51 = vmul.f32 1.442695, %v10877_v47  ;;  %v15801_v34 = vadd.f32 %v5582_v39, %v17811_v48  ;;  %17813 = vst [vmem:[#allocation31_spill] sm:$0xff] %v15810_v58 }
 0x7ac   :  { %v13328_v31 = vpop.eup %13327  ;;  %13343 = vrcp.f32 %v5702_v13  ;;  %v15806_v55 = vmul.f32 %v14252_v53, %v15781_v10  ;;  %v5687_v5 = vmul.f32 1.442695, %v10875_v19  ;;  %v5638_v19 = vmul.f32 0.999995, %v15737_v20 }
 0x7ad   :  { %v13330_v63 = vpop.eup %13329  ;;  %v5745_v38 = vmul.f32 %v13328_v31, %v5633_v23  ;;  %13345 = vrcp.f32 %v5700_v45  ;;  %v5637_v45 = vmul.f32 0.999995, %v15728_v57 }
 0x7ae   :  { %v13332_v56 = vpop.eup %13331  ;;  %v5743_v50 = vmul.f32 %v13330_v63, %v5631_v17  ;;  %13347 = vpow2.f32 %v5685_v36  ;;  %17812 = vst [vmem:[#allocation35_spill] sm:$0xff] %v15806_v55  ;;  %v5640_v55 = vmul.f32 0.999995, %v15781_v10 }
 0x7af   :  { %v13334_v59 = vpop.eup %13333  ;;  %v5746_v52 = vmul.f32 %v13332_v56, %v5634_v33  ;;  %13349 = vpow2.f32 %v5681_v4  ;;  %v5761_v23 = vmul.f32 %v14210_v18, %v5745_v38  ;;  %v10878_v33 = vmul.f32 -0.999995, %v15801_v34 }
 0x7b0   :  { %v5744_v13 = vmul.f32 %v13334_v59, %v5632_v22  ;;  %v13336_v15 = vpop.eup %13335  ;;  %13351 = vpow2.f32 %v5691_v51  ;;  %v5759_v46 = vmul.f32 %v14220_v0, %v5743_v50  ;;  %v17814_v59 = vld [vmem:[#allocation38_spill] sm:$0xff]  ;;  %v5635_v4 = vmul.f32 0.999995, %v15732_v7 }
 0x7b1   :  { %v5762_v17 = vmul.f32 %v14208_v43, %v5746_v52  ;;  %v13338_v36 = vpop.eup %13337  ;;  %13353 = vpow2.f32 %v5687_v5  ;;  %v15818_v39 = vadd.f32 %v5580_v11, %v17814_v59  ;;  %v5705_v31 = vadd.f32 1.0, %v13336_v15 }
 0x7b2   :  { %v5760_v14 = vmul.f32 %v14212_v44, %v5744_v13  ;;  %v5693_v22 = vmul.f32 1.442695, %v10878_v33  ;;  %v5636_v56 = vmul.f32 0.999995, %v15741_v24  ;;  %v5703_v50 = vadd.f32 1.0, %v13338_v36 }
 0x7b3   :  { %v15820_v47 = vpack.c.bf16 %v5762_v17, %v5761_v23  ;;  %v10876_v63 = vmul.f32 -0.999995, %v15818_v39 }
 0x7b4   :  { %v15824_v52 = vpack.c.bf16 %v5760_v14, %v5759_v46  ;;  %v13340_v51 = vpop.eup %13339  ;;  %13355 = vpow2.f32 %v5693_v22 }
 0x7b5   :  { %v17553_v48 = vshrl.u32 %v15820_v47, 16  ;;  %v13342_v11 = vpop.eup %13341  ;;  %v5749_v5 = vmul.f32 %v13340_v51, %v5637_v45  ;;  %v5689_v13 = vmul.f32 1.442695, %v10876_v63  ;;  %13357 = vrcp.f32 %v5705_v31 }
 0x7b6   :  { %v5825_v15 = vshrl.u32 %v15824_v52, 16  ;;  %v13344_v23 = vpop.eup %13343  ;;  %v5747_v57 = vmul.f32 %v13342_v11, %v5635_v4  ;;  %v5835_v20 = vshll.u32 %v15820_v47, 16  ;;  %v5828_v36 = vshll.u32 %v15824_v52, 16 }
 0x7b7   :  { %v15835_v7 = vrot.slane %v17553_v48, 7  ;;  %v13346_v17 = vpop.eup %13345  ;;  %v5750_v24 = vmul.f32 %v13344_v23, %v5638_v19  ;;  %13359 = vpow2.f32 %v5689_v13  ;;  %v5765_v22 = vmul.f32 %v14237_v26, %v5749_v5 }
 0x7b8   :  { %v5827_v33 = vrot.slane %v5825_v15, 7  ;;  %v13348_v46 = vpop.eup %13347  ;;  %v5748_v14 = vmul.f32 %v13346_v17, %v5636_v56  ;;  %13361 = vrcp.f32 %v5703_v50  ;;  %v5763_v19 = vmul.f32 %v14243_v8, %v5747_v57 }
 0x7b9   :  { %v5837_v59 = vor.u32 %v5835_v20, %v15835_v7  ;;  %v13350_v31 = vpop.eup %13349  ;;  %v5766_v45 = vmul.f32 %v14227_v49, %v5750_v24  ;;  %v5706_v4 = vadd.f32 1.0, %v13348_v46  ;;  %v6313_v48 = vrot.slane %v5835_v20, 1 }
 0x7ba   :  { %v5830_v63 = vor.u32 %v5828_v36, %v5827_v33  ;;  %v13352_v51 = vpop.eup %13351  ;;  %v5764_v11 = vmul.f32 %v14241_v35, %v5748_v14  ;;  %v5704_v13 = vadd.f32 1.0, %v13350_v31 }
 0x7bb   :  { %v5838_v23 = vsel %vm1294_vm2, %v5827_v33, %v5837_v59  ;;  %v13354_v38 = vpop.eup %13353  ;;  %v15847_v56 = vpack.c.bf16 %v5766_v45, %v5765_v22  ;;  %13363 = vrcp.f32 %v5706_v4  ;;  %v5709_v50 = vadd.f32 1.0, %v13352_v51  ;;  %v13046_v33 = vld [vmem:[%s17420_s5 + $0x8] sm:$0xff]  }
 0x7bc   :  { %v5895_v5 = vsel %vm14303_vm3, 0, %v5830_v63  ;;  %v15851_v17 = vpack.c.bf16 %v5764_v11, %v5763_v19  ;;  %13365 = vrcp.f32 %v5704_v13  ;;  %v5707_v24 = vadd.f32 1.0, %v13354_v38 }
 0x7bd   :  { %v5896_v46 = vmul.bf16 %v5895_v5, %v14229_v40  ;;  %v5897_v57 = vmul.bf16 %v5838_v23, %v17764_v21  ;;  %v5848_v14 = vshrl.u32 %v15847_v56, 16  ;;  %13367 = vrcp.f32 %v5709_v50 }
 0x7be   :  { %v5840_v59 = vshrl.u32 %v15851_v17, 16  ;;  %v5843_v31 = vshll.u32 %v15851_v17, 16  ;;  %v13356_v22 = vpop.eup %13355  ;;  %v6311_v45 = vrot.slane %v5828_v36, 1  ;;  %v5851_v4 = vshll.u32 %v15847_v56, 16  ;;  %v15873_v36 = vld [vmem:[%s17420_s5 + $0x20] sm:$0xff]  }
 0x7bf   :  { %11976 = vmatprep.mubr.msk.bf16.mxu1 %vm1428_vm4, %v5896_v46  ;;  %v15863_v38 = vrot.slane %v5848_v14, 7  ;;  %v13358_v63 = vpop.eup %13357  ;;  %13369 = vrcp.f32 %v5707_v24  ;;  %v5710_v51 = vadd.f32 1.0, %v13356_v22  ;;  %v5641_v13 = vmul.f32 0.999995, %v15768_v61 }
 0x7c0   :  { %11977 = vmatmul.mubr.msk.bf16.vlgmr.msra.gmra.mrb[48].mxu1 %vm1428_vm4, %v5897_v57  ;;  %v5842_v19 = vrot.slane %v5840_v59, 7  ;;  %v5639_v23 = vmul.f32 0.999995, %v15772_v2  ;;  %v6316_v57 = vrot.slane %v5843_v31, 1  ;;  %v6312_v2 = vor.u32 %v6311_v45, %v5825_v15 }
 0x7c1   :  { %11993 = vmatpush3.bf16.msra.mxu1 %v15677_v12  ;;  %v13360_v11 = vpop.eup %13359  ;;  %v5853_v50 = vor.u32 %v5851_v4, %v15863_v38  ;;  %13371 = vrcp.f32 %v5710_v51  ;;  %v5642_v12 = vmul.f32 0.999995, %v15778_v29  ;;  %v5753_v58 = vmul.f32 %v13358_v63, %v5641_v13 }
 0x7c2   :  { %11994 = vmatprep.subr.bf16.mxu1 %v13046_v33  ;;  %v13362_v5 = vpop.eup %13361  ;;  %v5708_v24 = vadd.f32 1.0, %v13360_v11  ;;  %v5845_v46 = vor.u32 %v5843_v31, %v5842_v19  ;;  %v17815_v15 = vshrl.u32 %v15820_v47, 16  ;;  %v6318_v13 = vor.u32 %v6316_v57, %v5840_v59 }
 0x7c3   :  { %v5854_v22 = vsel %vm1294_vm2, %v5842_v19, %v5853_v50  ;;  %v5751_v11 = vmul.f32 %v13362_v5, %v5639_v23  ;;  %v15885_v19 = vsel %vm1824_vm5, %v6312_v2, %v6313_v48  ;;  %v17816_v23 = vld [vmem:[#allocation42_spill] sm:$0xff]  ;;  %v5645_v2 = vmul.f32 0.999995, %v15789_v16 }
 0x7c4   :  { %13373 = vrcp.f32 %v5708_v24  ;;  %v5846_v21 = vsel %vm1294_vm2, %v15835_v7, %v5845_v46  ;;  %v6315_v20 = vor.u32 %v6313_v48, %v17815_v15  ;;  %v5899_v10 = vmul.bf16 %v5854_v22, %v14344_v9  ;;  %v17817_v24 = vld [vmem:[#allocation39_spill] sm:$0xff] }
 0x7c5   :  { %11995 = vmatpush3.bf16.msra.mxu1 %v13046_v33  ;;  %v13364_v51 = vpop.eup %13363  ;;  %v5898_v31 = vmul.bf16 %v5846_v21, %v14324_v28  ;;  %v6319_v21 = vrot.slane %v5851_v4, 1  ;;  %v5769_v5 = vmul.f32 %v17816_v23, %v5753_v58  ;;  %v5767_v48 = vmul.f32 %v14254_v41, %v5751_v11 }
 0x7c6   :  { %12012 = vmatprep.subr.bf16.mxu1 %v15873_v36  ;;  %v13366_v45 = vpop.eup %13365  ;;  %v5754_v63 = vmul.f32 %v13364_v51, %v5642_v12  ;;  %v15892_v7 = vsel %vm1824_vm5, %v6315_v20, %v6316_v57  ;;  %v5643_v51 = vmul.f32 0.999995, %v15792_v3  ;;  %v5644_v20 = vmul.f32 0.999995, %v15818_v39 }
 0x7c7   :  { %v5752_v50 = vmul.f32 %v13366_v45, %v5640_v55  ;;  %11980 = vmatprep.mubr.msk.bf16.mxu1 %vm1428_vm4, %v5898_v31  ;;  %v13368_v33 = vpop.eup %13367  ;;  %v15901_v55 = vsel %vm1824_vm5, %v6318_v13, %v6319_v21  ;;  %v6321_v12 = vor.u32 %v6319_v21, %v5848_v14  ;;  %v5646_v31 = vmul.f32 0.999995, %v15801_v34 }
 0x7c8   :  { %v5770_v46 = vmul.f32 %v17817_v24, %v5754_v63  ;;  %11981 = vmatmul.mubr.msk.bf16.gmra.mrb[52].mxu1 %vm1428_vm4, %v5899_v10  ;;  %v5757_v58 = vmul.f32 %v13368_v33, %v5645_v2 }
 0x7c9   :  { %v5768_v59 = vmul.f32 %v14252_v53, %v5752_v50  ;;  %v13370_v57 = vpop.eup %13369 }
 0x7ca   :  { %v15903_v22 = vpack.c.bf16 %v5770_v46, %v5769_v5  ;;  %v5755_v63 = vmul.f32 %v13370_v57, %v5643_v51  ;;  %v5773_v5 = vmul.f32 %v14388_v30, %v5757_v58 }
 0x7cb   :  { %v15905_v4 = vpack.c.bf16 %v5768_v59, %v5767_v48  ;;  %v13372_v15 = vpop.eup %13371 }
 0x7cc   :  { %v5864_v11 = vshrl.u32 %v15903_v22, 16  ;;  %v5867_v45 = vshll.u32 %v15903_v22, 16  ;;  %v5758_v10 = vmul.f32 %v13372_v15, %v5646_v31  ;;  %v5771_v41 = vmul.f32 %v14363_v1, %v5755_v63 }
 0x7cd   :  { %v5856_v14 = vshrl.u32 %v15905_v4, 16  ;;  %v5859_v13 = vshll.u32 %v15905_v4, 16 }
 0x7ce   :  { %v13374_v50 = vpop.eup %13373  ;;  %v5866_v21 = vrot.slane %v5864_v11, 7  ;;  %v6325_v33 = vrot.slane %v5867_v45, 1  ;;  %v5774_v46 = vmul.f32 %v14386_v60, %v5758_v10 }
 0x7cf   :  { %v5756_v2 = vmul.f32 %v13374_v50, %v5644_v20  ;;  %v5858_v48 = vrot.slane %v5856_v14, 7  ;;  %v6322_v53 = vrot.slane %v5859_v13, 1 }
 0x7d0   :  { %v5869_v59 = vor.u32 %v5867_v45, %v5866_v21  ;;  %v15917_v9 = vpack.c.bf16 %v5774_v46, %v5773_v5  ;;  %v6327_v58 = vor.u32 %v6325_v33, %v5864_v11 }
 0x7d1   :  { %v5772_v57 = vmul.f32 %v14360_v37, %v5756_v2  ;;  %v5861_v51 = vor.u32 %v5859_v13, %v5858_v48  ;;  %v15922_v15 = vsel %vm1824_vm5, %v6321_v12, %v6322_v53  ;;  %v6324_v28 = vor.u32 %v6322_v53, %v5856_v14 }
 0x7d2   :  { %v5870_v31 = vsel %vm1294_vm2, %v5858_v48, %v5869_v59  ;;  %v5880_v45 = vshrl.u32 %v15917_v9, 16  ;;  %v5883_v10 = vshll.u32 %v15917_v9, 16  ;;  %v5791_v14 = vrot.slane %v15824_v52, 7 }
 0x7d3   :  { %v15924_v40 = vpack.c.bf16 %v5772_v57, %v5771_v41  ;;  %v5862_v20 = vsel %vm1294_vm2, %v15863_v38, %v5861_v51  ;;  %v5901_v13 = vmul.bf16 %v5870_v31, %v14404_v25  ;;  %v15936_v53 = vsel %vm1824_vm5, %v6324_v28, %v6325_v33 }
 0x7d4   :  { %v5900_v63 = vmul.bf16 %v5862_v20, %v14391_v27  ;;  %v5882_v5 = vrot.slane %v5880_v45, 7  ;;  %v6331_v41 = vrot.slane %v5883_v10, 1  ;;  %v15942_v2 = vmul.f32 %v17817_v24, %v15778_v29 }
 0x7d5   :  { %v5872_v50 = vshrl.u32 %v15924_v40, 16  ;;  %v5875_v12 = vshll.u32 %v15924_v40, 16  ;;  %v15946_v48 = vmul.f32 %v14386_v60, %v15801_v34  ;;  %v15952_v28 = vmul.f32 %v14360_v37, %v15818_v39 }
 0x7d6   :  { %11984 = vmatprep.mubr.msk.bf16.mxu1 %vm1428_vm4, %v5900_v63  ;;  %v5885_v11 = vor.u32 %v5883_v10, %v5882_v5  ;;  %17818 = vst [vmem:[#allocation32_spill] sm:$0xff] %v15942_v2  ;;  %v15948_v57 = vor.u32 %v6331_v41, %v5880_v45  ;;  %v15960_v29 = vmul.f32 %v17816_v23, %v15768_v61  ;;  %v5814_v20 = vsel %vm1218_vm0, 0, %v5791_v14 }
 0x7d7   :  { %11985 = vmatmul.mubr.msk.bf16.gmra.mrb[56].mxu1 %vm1428_vm4, %v5901_v13  ;;  %v5874_v38 = vrot.slane %v5872_v50, 7  ;;  %v6328_v46 = vrot.slane %v5875_v12, 1  ;;  %17819 = vst [vmem:[#allocation28_spill] sm:$0xff] %v15946_v48  ;;  %17820 = vst [vmem:[#allocation43_spill] sm:$0xff] %v15952_v28  ;;  %v15966_v45 = vmul.f32 %v14388_v30, %v15789_v16  ;;  %v15970_v39 = vmul.f32 %v14363_v1, %v15792_v3  ;;  %v17841_v13 = vld [vmem:[#allocation66_spill] sm:$0xff] }
 0x7d8   :  { %17821 = vst [vmem:[#allocation40_spill] sm:$0xff] %v15960_v29  ;;  %v5792_v10 = vrot.slane %v15820_v47, 7 }
 0x7d9   :  { %v5877_v59 = vor.u32 %v5875_v12, %v5874_v38  ;;  %v5886_v33 = vsel %vm1294_vm2, %v5874_v38, %v5885_v11  ;;  %v15956_v51 = vsel %vm1824_vm5, %v6327_v58, %v6328_v46  ;;  %v6330_v31 = vor.u32 %v6328_v46, %v5872_v50  ;;  %17822 = vst [vmem:[#allocation41_spill] sm:$0xff] %v15966_v45  ;;  %v13048_v38 = vld [vmem:[%s17420_s5 + $0x28] sm:$0xff]   ;;  %v17824_v11 = vld [vmem:[#allocation49_spill] sm:$0xff] }
 0x7da   :  { %17823 = vst [vmem:[#allocation38_spill] sm:$0xff] %v15970_v39  ;;  %v5903_v61 = vmul.bf16 %v5886_v33, %v14439_v42  ;;  %v5794_v50 = vrot.slane %v15851_v17, 7  ;;  %v5793_v12 = vsel %vm1218_vm0, %v5791_v14, %v5792_v10  ;;  %v5798_v33 = vrot.slane %v15905_v4, 7  ;;  %v13049_v14 = vld [vmem:[%s17420_s5 + $0x30] sm:$0xff]  }
 0x7db   :  { %v5878_v34 = vsel %vm1294_vm2, %v5866_v21, %v5877_v59  ;;  %v15974_v63 = vsel %vm1824_vm5, %v6330_v31, %v6331_v41  ;;  %v5816_v21 = vmul.bf16 %v5814_v20, %v14442_v32  ;;  %v5817_v41 = vmul.bf16 %v5793_v12, %v14452_v54  ;;  %v17825_v20 = vld [vmem:[#allocation50_spill] sm:$0xff] }
 0x7dc   :  { %v5902_v58 = vmul.bf16 %v5878_v34, %v14422_v62  ;;  %v5795_v5 = vsel %vm1218_vm0, %v5792_v10, %v5794_v50  ;;  %v5796_v59 = vrot.slane %v15847_v56, 7 }
 0x7dd   :  { %v5818_v46 = vmul.bf16 %v5795_v5, %v17824_v11  ;;  %v17827_v5 = vld [vmem:[#allocation52_spill] sm:$0xff] }
 0x7de   :  { %11988 = vmatprep.mubr.msk.bf16.mxu1 %vm1428_vm4, %v5902_v58  ;;  %v5797_v31 = vsel %vm1218_vm0, %v5794_v50, %v5796_v59  ;;  %v5799_v34 = vsel %vm1218_vm0, %v5796_v59, %v5798_v33  ;;  %v5804_v59 = vrot.slane %v15917_v9, 7 }
 0x7df   :  { %11989 = vmatmul.mubr.msk.bf16.gmra.mrb[60].mxu1 %vm1428_vm4, %v5903_v61  ;;  %v5819_v58 = vmul.bf16 %v5797_v31, %v17825_v20  ;;  %v17826_v61 = vld [vmem:[#allocation51_spill] sm:$0xff] }
 0x7e0   :  { %11996 = vmatprep.mubr.msk.bf16.mxu1 %vm1428_vm4, %v5816_v21  ;;  %v5820_v10 = vmul.bf16 %v5799_v34, %v17826_v61  ;;  %v5800_v21 = vrot.slane %v15903_v22, 7  ;;  %v17829_v34 = vld [vmem:[#allocation54_spill] sm:$0xff] }
 0x7e2   :  { %v5801_v12 = vsel %vm1218_vm0, %v5798_v33, %v5800_v21  ;;  %v13050_v33 = vld [vmem:[%s17420_s5 + $0x38] sm:$0xff]  }
 0x7e7   :  { %11997 = vmatmul.mubr.msk.bf16.vlgmr.msra.gmra.mrb[48].mxu1 %vm1428_vm4, %v5817_v41  ;;  %v5821_v41 = vmul.bf16 %v5801_v12, %v17827_v5 }
 0x7e8   :  { %12013 = vmatpush3.bf16.msra.mxu1 %v15873_v36  ;;  %12000 = vmatprep.mubr.msk.bf16.mxu1 %vm1428_vm4, %v5818_v46  ;;  %v5802_v36 = vrot.slane %v15924_v40, 7 }
 0x7e9   :  { %12014 = vmatprep.subr.bf16.mxu1 %v13048_v38 }
 0x7ea   :  { %v5803_v50 = vsel %vm1218_vm0, %v5800_v21, %v5802_v36  ;;  %v5805_v31 = vsel %vm1218_vm0, %v5802_v36, %v5804_v59  ;;  %v17831_v36 = vld [vmem:[#allocation56_spill] sm:$0xff] }
 0x7eb   :  { %v6344_v12 = vmul.bf16 %v15892_v7, %v17831_v36 }
 0x7ec   :  { %12015 = vmatpush3.bf16.msra.mxu1 %v13048_v38  ;;  %v17828_v38 = vld [vmem:[#allocation53_spill] sm:$0xff] }
 0x7ed   :  { %12032 = vmatprep.subr.bf16.mxu1 %v13049_v14  ;;  %v5822_v46 = vmul.bf16 %v5803_v50, %v17828_v38  ;;  %v13052_v50 = vld [vmem:[%s17420_s5 + $0x48] sm:$0xff]  }
 0x7ef   :  { %12001 = vmatmul.mubr.msk.bf16.gmra.mrb[52].mxu1 %vm1428_vm4, %v5819_v58  ;;  %v5823_v58 = vmul.bf16 %v5805_v31, %v17829_v34  ;;  %v17834_v31 = vld [vmem:[#allocation59_spill] sm:$0xff] }
 0x7f0   :  { %12004 = vmatprep.mubr.msk.bf16.mxu1 %vm1428_vm4, %v5820_v10  ;;  %v13051_v10 = vld [vmem:[%s17420_s5 + $0x40] sm:$0xff]   ;;  %v6347_v7 = vmul.bf16 %v15936_v53, %v17834_v31  ;;  %v6342_v53 = vsel %vm14557_vm7, %v15948_v57, 0 }
 0x7f7   :  { %12005 = vmatmul.mubr.msk.bf16.gmra.mrb[56].mxu1 %vm1428_vm4, %v5821_v41  ;;  %v17832_v41 = vld [vmem:[#allocation57_spill] sm:$0xff] }
 0x7f8   :  { %12008 = vmatprep.mubr.msk.bf16.mxu1 %vm1428_vm4, %v5822_v46  ;;  %v6345_v46 = vmul.bf16 %v15901_v55, %v17832_v41 }
 0x7ff   :  { %12009 = vmatmul.mubr.msk.bf16.gmra.mrb[60].mxu1 %vm1428_vm4, %v5823_v58  ;;  %v17835_v58 = vld [vmem:[#allocation60_spill] sm:$0xff] }
 0x800   :  { %12016 = vmatprep.mubr.msk.bf16.mxu1 %vm1428_vm4, %v15824_v52  ;;  %v6348_v55 = vmul.bf16 %v15956_v51, %v17835_v58  ;;  %v6503_v51 = vrot.slane %v15851_v17, 1 }
 0x807   :  { %12017 = vmatmul.mubr.msk.bf16.vlgmr.msra.gmra.mrb[48].mxu1 %vm1428_vm4, %v15820_v47 }
 0x808   :  { %12033 = vmatpush3.bf16.msra.mxu1 %v13049_v14  ;;  %12020 = vmatprep.mubr.msk.bf16.mxu1 %vm1428_vm4, %v15851_v17  ;;  %v17830_v14 = vld [vmem:[#allocation55_spill] sm:$0xff]  ;;  %v6509_v17 = vrot.slane %v15903_v22, 1 }
 0x809   :  { %12034 = vmatprep.subr.bf16.mxu1 %v13050_v33  ;;  %v6343_v21 = vmul.bf16 %v15885_v19, %v17830_v14  ;;  %v17833_v19 = vld [vmem:[#allocation58_spill] sm:$0xff] }
 0x80a   :  { %v6346_v59 = vmul.bf16 %v15922_v15, %v17833_v19 }
 0x80c   :  { %12035 = vmatpush3.bf16.msra.mxu1 %v13050_v33  ;;  %v17836_v33 = vld [vmem:[#allocation61_spill] sm:$0xff] }
 0x80d   :  { %12052 = vmatprep.subr.bf16.mxu1 %v13051_v10 }
 0x80f   :  { %12021 = vmatmul.mubr.msk.bf16.gmra.mrb[52].mxu1 %vm1428_vm4, %v15847_v56 }
 0x810   :  { %12024 = vmatprep.mubr.msk.bf16.mxu1 %vm1428_vm4, %v15905_v4 }
 0x817   :  { %12025 = vmatmul.mubr.msk.bf16.gmra.mrb[56].mxu1 %vm1428_vm4, %v15903_v22 }
 0x818   :  { %12028 = vmatprep.mubr.msk.bf16.mxu1 %vm1428_vm4, %v15924_v40 }
 0x81f   :  { %12029 = vmatmul.mubr.msk.bf16.gmra.mrb[60].mxu1 %vm1428_vm4, %v15917_v9 }
 0x820   :  { %12036 = vmatprep.mubr.msk.bf16.mxu1 %vm1428_vm4, %v6343_v21  ;;  %v6500_v21 = vrot.slane %v15824_v52, 1  ;;  %v6505_v52 = vrot.slane %v15847_v56, 1 }
 0x827   :  { %12037 = vmatmul.mubr.msk.bf16.vlgmr.msra.gmra.mrb[48].mxu1 %vm1428_vm4, %v6344_v12  ;;  %v6501_v12 = vrot.slane %v15820_v47, 1 }
 0x828   :  { %12053 = vmatpush3.bf16.msra.mxu1 %v13051_v10  ;;  %12040 = vmatprep.mubr.msk.bf16.mxu1 %vm1428_vm4, %v6345_v46  ;;  %v6349_v10 = vmul.bf16 %v15974_v63, %v17836_v33  ;;  %v17838_v46 = vld [vmem:[#allocation64_spill] sm:$0xff] }
 0x829   :  { %12054 = vmatprep.subr.bf16.mxu1 %v13052_v50  ;;  %v6504_v47 = vsel %vm2056_vm8, %v6501_v12, %v6503_v51 }
 0x82c   :  { %12055 = vmatpush3.bf16.msra.mxu1 %v13052_v50  ;;  %v6502_v50 = vsel %vm2056_vm8, %v6500_v21, %v6501_v12 }
 0x82f   :  { %12041 = vmatmul.mubr.msk.bf16.gmra.mrb[52].mxu1 %vm1428_vm4, %v6346_v59  ;;  %v6350_v59 = vmul.bf16 %v6342_v53, %v17838_v46  ;;  %v6507_v53 = vrot.slane %v15905_v4, 1  ;;  %v6513_v4 = vrot.slane %v15917_v9, 1  ;;  %v5621_v9 = vld [vmem:[%s17421_s7 + $0x4] sm:$0xf] }
 0x830   :  { %12044 = vmatprep.mubr.msk.bf16.mxu1 %vm1428_vm4, %v6347_v7  ;;  %v17839_v7 = vld [vmem:[#allocation63_spill] sm:$0xff]  ;;  %12932 = vmatprep.subr.msk.bf16.mxu0 %vm7002_vm9, %v5621_v9 }
 0x831   :  { %v6525_v63 = vmul.bf16 %v6502_v50, %v17839_v7  ;;  %v6508_v56 = vsel %vm2056_vm8, %v6505_v52, %v6507_v53  ;;  %v6510_v50 = vsel %vm2056_vm8, %v6507_v53, %v6509_v17 }
 0x837   :  { %12045 = vmatmul.mubr.msk.bf16.gmra.mrb[56].mxu1 %vm1428_vm4, %v6348_v55  ;;  %v6506_v55 = vsel %vm2056_vm8, %v6503_v51, %v6505_v52 }
 0x838   :  { %12048 = vmatprep.mubr.msk.bf16.mxu1 %vm1428_vm4, %v6349_v10  ;;  %v17840_v10 = vld [vmem:[#allocation65_spill] sm:$0xff]  ;;  %v6527_v21 = vmul.bf16 %v6506_v55, %v17841_v13 }
 0x839   :  { %v6526_v57 = vmul.bf16 %v6504_v47, %v17840_v10  ;;  %v6511_v47 = vrot.slane %v15924_v40, 1  ;;  %v6523_v40 = vsel %vm2056_vm8, %v6513_v4, 0 }
 0x83b   :  { %v6512_v22 = vsel %vm2056_vm8, %v6509_v17, %v6511_v47  ;;  %v6514_v55 = vsel %vm2056_vm8, %v6511_v47, %v6513_v4  ;;  %v7004_v17 = vsel %vm7002_vm9, %v5621_v9, 0 }
 0x83c   :  { %12073 = vmatpush3.bf16.msra.mxu0 %v7004_v17 }
 0x83f   :  { %12049 = vmatmul.mubr.msk.bf16.gmra.mrb[60].mxu1 %vm1428_vm4, %v6350_v59  ;;  %v17842_v59 = vld [vmem:[#allocation67_spill] sm:$0xff] }
 0x840   :  { %12056 = vmatprep.mubr.msk.bf16.mxu1 %vm1428_vm4, %v6525_v63  ;;  %v6528_v12 = vmul.bf16 %v6508_v56, %v17842_v59  ;;  %v17843_v63 = vld [vmem:[#allocation68_spill] sm:$0xff]  ;;  %v17846_v56 = vld [vmem:[#allocation71_spill] sm:$0xff] }
 0x841   :  { %v6529_v51 = vmul.bf16 %v6510_v50, %v17843_v63  ;;  %v6532_v50 = vmul.bf16 %v6523_v40, %v17846_v56 }
 0x847   :  { %12057 = vmatmul.mubr.msk.bf16.vlgmr.msra.gmra.mrb[48].mxu1 %vm1428_vm4, %v6526_v57  ;;  %v17844_v57 = vld [vmem:[#allocation69_spill] sm:$0xff] }
 0x848   :  { %12060 = vmatprep.mubr.msk.bf16.mxu1 %vm1428_vm4, %v6527_v21  ;;  %v6530_v52 = vmul.bf16 %v6512_v22, %v17844_v57  ;;  %v17845_v21 = vld [vmem:[#allocation70_spill] sm:$0xff] }
 0x849   :  { %v6531_v53 = vmul.bf16 %v6514_v55, %v17845_v21 }
 0x84f   :  { %12061 = vmatmul.mubr.msk.bf16.gmra.mrb[52].mxu1 %vm1428_vm4, %v6528_v12  ;;  %v16113_v12 = vld [vmem:[%s17421_s7] sm:$0xf] }
 0x850   :  { %12064 = vmatprep.mubr.msk.bf16.mxu1 %vm1428_vm4, %v6529_v51  ;;  %12933 = vmatprep.subr.msk.bf16.mxu0 %vm7002_vm9, %v16113_v12  ;;  %v16120_v51 = vld [vmem:[%s17422_s6] ss:$0 sm:$0xff] }
 0x857   :  { %12065 = vmatmul.mubr.msk.bf16.gmra.mrb[56].mxu1 %vm1428_vm4, %v6530_v52 }
 0x858   :  { %12068 = vmatprep.mubr.msk.bf16.mxu1 %vm1428_vm4, %v6531_v53 }
 0x85f   :  { %12069 = vmatmul.mubr.msk.bf16.gmra.mrb[60].mxu1 %vm1428_vm4, %v6532_v50 }
 0x91a   :  { %v12058_v47 = vpop.f32.mrb[48].mxu1 }
 0x91b   :  { %v16123_v4 = vadd.f32 %v12058_v47, %v16120_v51  ;;  %v6603_v22 = vpop.f32.mrb[49].mxu1 }
 0x91c   :  { %v16126_v55 = vadd.f32 %v16120_v51, %v6603_v22  ;;  %v12059_v52 = vpop.f32.mrb[50].mxu1 }
 0x91d   :  { %v10932_v53 = vmul.f32 -0.999995, %v16123_v4  ;;  %v16130_v40 = vadd.f32 %v12059_v52, %v16120_v51  ;;  %v6606_v50 = vpop.f32.mrb[51].mxu1 }
 0x91e   :  { %v10930_v9 = vmul.f32 -0.999995, %v16126_v55  ;;  %v16134_v17 = vadd.f32 %v16120_v51, %v6606_v50 }
 0x91f   :  { %v6740_v3 = vmul.f32 1.442695, %v10932_v53  ;;  %v10933_v47 = vmul.f32 -0.999995, %v16130_v40 }
 0x920   :  { %v6736_v16 = vmul.f32 1.442695, %v10930_v9  ;;  %v10931_v45 = vmul.f32 -0.999995, %v16134_v17 }
 0x921   :  { %13375 = vpow2.f32 %v6740_v3  ;;  %v6742_v22 = vmul.f32 1.442695, %v10933_v47 }
 0x922   :  { %13377 = vpow2.f32 %v6736_v16  ;;  %v6738_v48 = vmul.f32 1.442695, %v10931_v45  ;;  %v12062_v39 = vpop.f32.mrb[52].mxu1 }
 0x923   :  { %13379 = vpow2.f32 %v6742_v22  ;;  %v16139_v52 = vadd.f32 %v12062_v39, %v16120_v51  ;;  %v6619_v28 = vpop.f32.mrb[53].mxu1 }
 0x924   :  { %13381 = vpow2.f32 %v6738_v48  ;;  %v16142_v50 = vadd.f32 %v16120_v51, %v6619_v28  ;;  %v12063_v53 = vpop.f32.mrb[54].mxu1 }
 0x925   :  { %v10936_v29 = vmul.f32 -0.999995, %v16139_v52  ;;  %v16146_v9 = vadd.f32 %v12063_v53, %v16120_v51  ;;  %v6622_v3 = vpop.f32.mrb[55].mxu1  ;;  %v6710_v36 = vmul.f32 0.999995, %v16139_v52 }
 0x926   :  { %v10934_v16 = vmul.f32 -0.999995, %v16142_v50  ;;  %v16150_v45 = vadd.f32 %v16120_v51, %v6622_v3 }
 0x927   :  { %v6748_v47 = vmul.f32 1.442695, %v10936_v29  ;;  %v10937_v39 = vmul.f32 -0.999995, %v16146_v9 }
 0x928   :  { %v6744_v22 = vmul.f32 1.442695, %v10934_v16  ;;  %v10935_v48 = vmul.f32 -0.999995, %v16150_v45 }
 0x929   :  { %13383 = vpow2.f32 %v6748_v47  ;;  %v6750_v28 = vmul.f32 1.442695, %v10937_v39 }
 0x92a   :  { %13385 = vpow2.f32 %v6744_v22  ;;  %v6746_v2 = vmul.f32 1.442695, %v10935_v48  ;;  %v12066_v56 = vpop.f32.mrb[56].mxu1 }
 0x92b   :  { %v13376_v21 = vpop.eup %13375  ;;  %13387 = vpow2.f32 %v6750_v28  ;;  %v16155_v53 = vadd.f32 %v12066_v56, %v16120_v51  ;;  %v6635_v57 = vpop.f32.mrb[57].mxu1 }
 0x92c   :  { %v13378_v63 = vpop.eup %13377  ;;  %v6770_v3 = vadd.f32 1.0, %v13376_v21  ;;  %13389 = vpow2.f32 %v6746_v2  ;;  %v16158_v29 = vadd.f32 %v16120_v51, %v6635_v57  ;;  %v12067_v16 = vpop.f32.mrb[58].mxu1 }
 0x92d   :  { %v13380_v59 = vpop.eup %13379  ;;  %v6768_v13 = vadd.f32 1.0, %v13378_v63  ;;  %v10940_v47 = vmul.f32 -0.999995, %v16155_v53  ;;  %v16162_v39 = vadd.f32 %v12067_v16, %v16120_v51  ;;  %v6638_v22 = vpop.f32.mrb[59].mxu1 }
 0x92e   :  { %v13382_v48 = vpop.eup %13381  ;;  %13391 = vrcp.f32 %v6770_v3  ;;  %v6771_v56 = vadd.f32 1.0, %v13380_v59  ;;  %v10938_v28 = vmul.f32 -0.999995, %v16158_v29  ;;  %v16167_v63 = vadd.f32 %v16120_v51, %v6638_v22 }
 0x92f   :  { %13393 = vrcp.f32 %v6768_v13  ;;  %v6769_v21 = vadd.f32 1.0, %v13382_v48  ;;  %v6756_v2 = vmul.f32 1.442695, %v10940_v47  ;;  %v10941_v10 = vmul.f32 -0.999995, %v16162_v39 }
 0x930   :  { %13395 = vrcp.f32 %v6771_v56  ;;  %v6752_v57 = vmul.f32 1.442695, %v10938_v28  ;;  %v10939_v7 = vmul.f32 -0.999995, %v16167_v63  ;;  %v6706_v56 = vmul.f32 0.999995, %v16123_v4 }
 0x931   :  { %13397 = vrcp.f32 %v6769_v21  ;;  %v6758_v16 = vmul.f32 1.442695, %v10941_v10  ;;  %v6707_v4 = vmul.f32 0.999995, %v16130_v40 }
 0x932   :  { %13399 = vpow2.f32 %v6756_v2  ;;  %v12070_v59 = vpop.f32.mrb[60].mxu1 }
 0x933   :  { %v13384_v46 = vpop.eup %13383  ;;  %13401 = vpow2.f32 %v6752_v57  ;;  %v16171_v13 = vadd.f32 %v12070_v59, %v16120_v51  ;;  %v6651_v47 = vpop.f32.mrb[61].mxu1  ;;  %v6754_v57 = vmul.f32 1.442695, %v10939_v7 }
 0x934   :  { %v13386_v3 = vpop.eup %13385  ;;  %v6774_v15 = vadd.f32 1.0, %v13384_v46  ;;  %13403 = vpow2.f32 %v6758_v16  ;;  %v16175_v28 = vadd.f32 %v16120_v51, %v6651_v47  ;;  %v12071_v10 = vpop.f32.mrb[62].mxu1  ;;  %v6704_v16 = vmul.f32 0.999995, %v16126_v55 }
 0x935   :  { %v13388_v48 = vpop.eup %13387  ;;  %v6772_v22 = vadd.f32 1.0, %v13386_v3  ;;  %v10944_v33 = vmul.f32 -0.999995, %v16171_v13  ;;  %v6654_v46 = vpop.f32.mrb[63].mxu1  ;;  %v16182_v47 = vadd.f32 %v12071_v10, %v16120_v51 }
 0x936   :  { %v13390_v21 = vpop.eup %13389  ;;  %13405 = vrcp.f32 %v6774_v15  ;;  %v6775_v2 = vadd.f32 1.0, %v13388_v48  ;;  %v10942_v58 = vmul.f32 -0.999995, %v16175_v28  ;;  %v16185_v19 = vadd.f32 %v16120_v51, %v6654_v46 }
 0x937   :  { %13407 = vrcp.f32 %v6772_v22  ;;  %v6773_v59 = vadd.f32 1.0, %v13390_v21  ;;  %v6764_v3 = vmul.f32 1.442695, %v10944_v33  ;;  %v6705_v21 = vmul.f32 0.999995, %v16134_v17 }
 0x938   :  { %v13392_v31 = vpop.eup %13391  ;;  %13409 = vrcp.f32 %v6775_v2  ;;  %v6760_v7 = vmul.f32 1.442695, %v10942_v58  ;;  %v10945_v41 = vmul.f32 -0.999995, %v16182_v47  ;;  %v10943_v17 = vmul.f32 -0.999995, %v16185_v19 }
 0x939   :  { %v13394_v15 = vpop.eup %13393  ;;  %v6818_v48 = vmul.f32 %v13392_v31, %v6706_v56  ;;  %13411 = vrcp.f32 %v6773_v59 }
 0x93a   :  { %v13396_v55 = vpop.eup %13395  ;;  %v6816_v22 = vmul.f32 %v13394_v15, %v6704_v16  ;;  %13413 = vpow2.f32 %v6754_v57  ;;  %v6766_v31 = vmul.f32 1.442695, %v10945_v41  ;;  %v6762_v41 = vmul.f32 1.442695, %v10943_v17 }
 0x93b   :  { %v13398_v40 = vpop.eup %13397  ;;  %v6819_v2 = vmul.f32 %v13396_v55, %v6707_v4  ;;  %13415 = vpow2.f32 %v6764_v3  ;;  %v6834_v51 = vmul.f32 %v14210_v18, %v6818_v48  ;;  %v6708_v48 = vmul.f32 0.999995, %v16142_v50 }
 0x93c   :  { %v13400_v33 = vpop.eup %13399  ;;  %v6817_v10 = vmul.f32 %v13398_v40, %v6705_v21  ;;  %13417 = vpow2.f32 %v6760_v7  ;;  %v6832_v16 = vmul.f32 %v14220_v0, %v6816_v22  ;;  %v6711_v22 = vmul.f32 0.999995, %v16146_v9 }
 0x93d   :  { %v13402_v58 = vpop.eup %13401  ;;  %v6835_v56 = vmul.f32 %v14208_v43, %v6819_v2  ;;  %v6778_v46 = vadd.f32 1.0, %v13400_v33  ;;  %13419 = vpow2.f32 %v6766_v31 }
 0x93e   :  { %v13404_v57 = vpop.eup %13403  ;;  %v6833_v59 = vmul.f32 %v14212_v44, %v6817_v10  ;;  %v6776_v4 = vadd.f32 1.0, %v13402_v58  ;;  %v6709_v10 = vmul.f32 0.999995, %v16150_v45  ;;  %v7128_v45 = vsel %vm7002_vm9, %v16113_v12, 0 }
 0x93f   :  { %v16195_v3 = vpack.c.bf16 %v6835_v56, %v6834_v51  ;;  %13421 = vrcp.f32 %v6778_v46  ;;  %v6779_v52 = vadd.f32 1.0, %v13404_v57 }
 0x940   :  { %v13406_v15 = vpop.eup %13405  ;;  %v16197_v7 = vpack.c.bf16 %v6833_v59, %v6832_v16 }
 0x941   :  { %v13408_v55 = vpop.eup %13407  ;;  %v17573_v21 = vshrl.u32 %v16195_v3, 16  ;;  %v6822_v40 = vmul.f32 %v13406_v15, %v6710_v36  ;;  %13423 = vrcp.f32 %v6779_v52  ;;  %v17575_v50 = vshll.u32 %v16195_v3, 16 }
 0x942   :  { %v13410_v2 = vpop.eup %13409  ;;  %v6820_v33 = vmul.f32 %v13408_v55, %v6708_v48  ;;  %13425 = vpow2.f32 %v6762_v41  ;;  %v6898_v31 = vshrl.u32 %v16197_v7, 16  ;;  %v6901_v17 = vshll.u32 %v16197_v7, 16 }
 0x943   :  { %v13412_v58 = vpop.eup %13411  ;;  %v16206_v51 = vrot.slane %v17573_v21, 7  ;;  %v6823_v56 = vmul.f32 %v13410_v2, %v6711_v22  ;;  %13427 = vrcp.f32 %v6776_v4  ;;  %v6838_v16 = vmul.f32 %v14237_v26, %v6822_v40 }
 0x944   :  { %v13414_v36 = vpop.eup %13413  ;;  %v6821_v46 = vmul.f32 %v13412_v58, %v6709_v10  ;;  %v6900_v9 = vrot.slane %v6898_v31, 7  ;;  %v6836_v15 = vmul.f32 %v14243_v8, %v6820_v33 }
 0x945   :  { %v13416_v57 = vpop.eup %13415  ;;  %v6839_v59 = vmul.f32 %v14227_v49, %v6823_v56  ;;  %v6777_v52 = vadd.f32 1.0, %v13414_v36  ;;  %v6910_v4 = vor.u32 %v17575_v50, %v16206_v51  ;;  %v6714_v56 = vmul.f32 0.999995, %v16155_v53 }
 0x946   :  { %v13418_v41 = vpop.eup %13417  ;;  %v6837_v48 = vmul.f32 %v14241_v35, %v6821_v46  ;;  %v6782_v55 = vadd.f32 1.0, %v13416_v57  ;;  %v6903_v22 = vor.u32 %v6901_v17, %v6900_v9  ;;  %v17847_v57 = vld [vmem:[#allocation30_spill] sm:$0xff]  ;;  %v7359_v53 = vrot.slane %v6901_v17, 1 }
 0x947   :  { %v16221_v2 = vpack.c.bf16 %v6839_v59, %v6838_v16  ;;  %13429 = vrcp.f32 %v6777_v52  ;;  %v6780_v12 = vadd.f32 1.0, %v13418_v41  ;;  %v6911_v40 = vsel %vm1294_vm2, %v6900_v9, %v6910_v4  ;;  %v13420_v10 = vpop.eup %13419  ;;  %v17848_v9 = vld [vmem:[#allocation27_spill] sm:$0xff] }
 0x948   :  { %v16224_v58 = vpack.c.bf16 %v6837_v48, %v6836_v15  ;;  %13431 = vrcp.f32 %v6782_v55  ;;  %v6968_v36 = vsel %vm14303_vm3, 0, %v6903_v22  ;;  %v6783_v46 = vadd.f32 1.0, %v13420_v10  ;;  %v16243_v22 = vld [vmem:[%s17421_s7 + $0x8] sm:$0xf] }
 0x949   :  { %v13422_v33 = vpop.eup %13421  ;;  %13433 = vrcp.f32 %v6780_v12  ;;  %v6969_v21 = vmul.bf16 %v6968_v36, %v17847_v57  ;;  %v17574_v16 = vshrl.u32 %v16221_v2, 16  ;;  %v6715_v52 = vmul.f32 0.999995, %v16162_v39 }
 0x94a   :  { %v6826_v59 = vmul.f32 %v13422_v33, %v6714_v56  ;;  %v6970_v4 = vmul.bf16 %v6911_v40, %v17848_v9  ;;  %v6913_v41 = vshrl.u32 %v16224_v58, 16  ;;  %13435 = vrcp.f32 %v6783_v46 }
 0x94b   :  { %v13424_v15 = vpop.eup %13423  ;;  %12074 = vmatprep.mubr.msk.bf16.mxu0 %vm6977_vm10, %v6969_v21  ;;  %v16237_v48 = vrot.slane %v17574_v16, 7  ;;  %v6924_v55 = vshll.u32 %v16221_v2, 16  ;;  %v6916_v10 = vshll.u32 %v16224_v58, 16  ;;  %v6712_v33 = vmul.f32 0.999995, %v16158_v29 }
 0x94c   :  { %v13426_v39 = vpop.eup %13425  ;;  %v6827_v12 = vmul.f32 %v13424_v15, %v6715_v52  ;;  %12075 = vmatmul.mubr.msk.bf16.vlgmr.msra.gmra.mrb[32].mxu0 %vm6977_vm10, %v6970_v4  ;;  %v6915_v40 = vrot.slane %v6913_v41, 7  ;;  %v6842_v36 = vmul.f32 %v17816_v23, %v6826_v59  ;;  %v6713_v52 = vmul.f32 0.999995, %v16167_v63 }
 0x94d   :  { %v13428_v21 = vpop.eup %13427  ;;  %v6781_v17 = vadd.f32 1.0, %v13426_v39  ;;  %12091 = vmatpush3.bf16.msra.mxu0 %v7128_v45  ;;  %v6926_v56 = vor.u32 %v6924_v55, %v16237_v48  ;;  %v7360_v29 = vor.u32 %v7359_v53, %v6898_v31  ;;  %v17850_v23 = vshll.u32 %v16195_v3, 16 }
 0x94e   :  { %v6843_v46 = vmul.f32 %v17817_v24, %v6827_v12  ;;  %v6918_v16 = vor.u32 %v6916_v10, %v6915_v40  ;;  %12934 = vmatprep.subr.msk.bf16.mxu0 %vm7002_vm9, %v16243_v22  ;;  %v6824_v15 = vmul.f32 %v13428_v21, %v6712_v33  ;;  %v17849_v12 = vld [vmem:[#allocation45_spill] sm:$0xff]  ;;  %v7364_v24 = vrot.slane %v6916_v10, 1  ;;  %v17851_v21 = vld [vmem:[#allocation46_spill] sm:$0xff] }
 0x94f   :  { %13437 = vrcp.f32 %v6781_v17  ;;  %v6927_v4 = vsel %vm1294_vm2, %v6915_v40, %v6926_v56  ;;  %v7361_v9 = vrot.slane %v17850_v23, 1  ;;  %v6718_v40 = vmul.f32 0.999995, %v16171_v13  ;;  %v17852_v23 = vld [vmem:[#allocation37_spill] sm:$0xff] }
 0x950   :  { %v16255_v39 = vpack.c.bf16 %v6843_v46, %v6842_v36  ;;  %v6919_v45 = vsel %vm1294_vm2, %v16206_v51, %v6918_v16  ;;  %v6972_v56 = vmul.bf16 %v6927_v4, %v17851_v21  ;;  %v6716_v51 = vmul.f32 0.999995, %v16175_v28  ;;  %v17853_v46 = vld [vmem:[#allocation36_spill] sm:$0xff] }
 0x951   :  { %v13430_v59 = vpop.eup %13429  ;;  %v6971_v50 = vmul.bf16 %v6919_v45, %v17849_v12  ;;  %v6719_v31 = vmul.f32 0.999995, %v16182_v47  ;;  %v16272_v53 = vsel %vm1824_vm5, %v7360_v29, %v7361_v9  ;;  %v6840_v10 = vmul.f32 %v17852_v23, %v6824_v15 }
 0x952   :  { %v13432_v63 = vpop.eup %13431  ;;  %v6825_v17 = vmul.f32 %v13430_v59, %v6713_v52  ;;  %v6937_v36 = vshrl.u32 %v16255_v39, 16  ;;  %v6940_v16 = vshll.u32 %v16255_v39, 16  ;;  %v17854_v4 = vshrl.u32 %v16195_v3, 16 }
 0x953   :  { %v13434_v33 = vpop.eup %13433  ;;  %12078 = vmatprep.mubr.msk.bf16.mxu0 %vm6977_vm10, %v6971_v50  ;;  %v6830_v52 = vmul.f32 %v13432_v63, %v6718_v40  ;;  %v7366_v47 = vor.u32 %v7364_v24, %v6913_v41  ;;  %v7367_v21 = vrot.slane %v6924_v55, 1  ;;  %v6717_v29 = vmul.f32 0.999995, %v16185_v19 }
 0x954   :  { %v6841_v13 = vmul.f32 %v17853_v46, %v6825_v17  ;;  %12079 = vmatmul.mubr.msk.bf16.gmra.mrb[36].mxu0 %vm6977_vm10, %v6972_v56  ;;  %v7363_v45 = vor.u32 %v7361_v9, %v17854_v4  ;;  %v13436_v28 = vpop.eup %13435  ;;  %v6939_v59 = vrot.slane %v6937_v36, 7  ;;  %v6828_v12 = vmul.f32 %v13434_v33, %v6716_v51 }
 0x955   :  { %v6831_v57 = vmul.f32 %v13436_v28, %v6719_v31  ;;  %v16286_v63 = vsel %vm1824_vm5, %v7366_v47, %v7367_v21  ;;  %v17855_v17 = vshrl.u32 %v16221_v2, 16  ;;  %v7373_v9 = vrot.slane %v6940_v16, 1 }
 0x956   :  { %v16279_v50 = vpack.c.bf16 %v6841_v13, %v6840_v10  ;;  %v16283_v15 = vsel %vm1824_vm5, %v7363_v45, %v7364_v24  ;;  %v6846_v56 = vmul.f32 %v14388_v30, %v6830_v52  ;;  %v6942_v19 = vor.u32 %v6940_v16, %v6939_v59 }
 0x957   :  { %v7369_v40 = vor.u32 %v7367_v21, %v17855_v17  ;;  %v6847_v41 = vmul.f32 %v14386_v60, %v6831_v57  ;;  %v7375_v31 = vor.u32 %v7373_v9, %v6937_v36  ;;  %v6844_v45 = vmul.f32 %v14363_v1, %v6828_v12 }
 0x958   :  { %v6929_v55 = vshrl.u32 %v16279_v50, 16  ;;  %v6932_v33 = vshll.u32 %v16279_v50, 16 }
 0x959   :  { %v13438_v51 = vpop.eup %13437  ;;  %v16294_v24 = vpack.c.bf16 %v6847_v41, %v6846_v56 }
 0x95a   :  { %v6829_v10 = vmul.f32 %v13438_v51, %v6717_v29  ;;  %v6931_v13 = vrot.slane %v6929_v55, 7  ;;  %v7370_v4 = vrot.slane %v6932_v33, 1 }
 0x95b   :  { %v6953_v52 = vshrl.u32 %v16294_v24, 16  ;;  %v6956_v47 = vshll.u32 %v16294_v24, 16 }
 0x95c   :  { %v6845_v21 = vmul.f32 %v14360_v37, %v6829_v10  ;;  %v6934_v28 = vor.u32 %v6932_v33, %v6931_v13  ;;  %v6943_v57 = vsel %vm1294_vm2, %v6931_v13, %v6942_v19  ;;  %v16306_v29 = vsel %vm1824_vm5, %v7369_v40, %v7370_v4 }
 0x95d   :  { %v6955_v16 = vrot.slane %v6953_v52, 7  ;;  %v7372_v56 = vor.u32 %v7370_v4, %v6929_v55  ;;  %v7379_v41 = vrot.slane %v6956_v47, 1  ;;  %v6974_v33 = vmul.bf16 %v6943_v57, %v14404_v25 }
 0x95e   :  { %v16301_v17 = vpack.c.bf16 %v6845_v21, %v6844_v45  ;;  %v6935_v36 = vsel %vm1294_vm2, %v16237_v48, %v6934_v28  ;;  %v6864_v55 = vrot.slane %v16197_v7, 7 }
 0x95f   :  { %v6973_v12 = vmul.bf16 %v6935_v36, %v14391_v27  ;;  %v6958_v10 = vor.u32 %v6956_v47, %v6955_v16  ;;  %v16314_v13 = vsel %vm1824_vm5, %v7372_v56, %v7373_v9  ;;  %v16316_v48 = vor.u32 %v7379_v41, %v6953_v52 }
 0x960   :  { %v6945_v51 = vshrl.u32 %v16301_v17, 16  ;;  %v6948_v19 = vshll.u32 %v16301_v17, 16  ;;  %v6887_v9 = vsel %vm1218_vm0, 0, %v6864_v55 }
 0x961   :  { %12082 = vmatprep.mubr.msk.bf16.mxu0 %vm6977_vm10, %v6973_v12  ;;  %v6865_v12 = vrot.slane %v16195_v3, 7  ;;  %v6889_v56 = vmul.bf16 %v6887_v9, %v14442_v32 }
 0x962   :  { %12083 = vmatmul.mubr.msk.bf16.gmra.mrb[40].mxu0 %vm6977_vm10, %v6974_v33  ;;  %v6947_v40 = vrot.slane %v6945_v51, 7  ;;  %v7376_v4 = vrot.slane %v6948_v19, 1 }
 0x964   :  { %v6950_v45 = vor.u32 %v6948_v19, %v6947_v40  ;;  %v6959_v21 = vsel %vm1294_vm2, %v6947_v40, %v6958_v10  ;;  %v16322_v28 = vsel %vm1824_vm5, %v7375_v31, %v7376_v4  ;;  %v7378_v57 = vor.u32 %v7376_v4, %v6945_v51  ;;  %v5623_v40 = vld [vmem:[%s17421_s7 + $0xc] sm:$0xf] }
 0x965   :  { %v6976_v16 = vmul.bf16 %v6959_v21, %v14439_v42  ;;  %v6867_v31 = vrot.slane %v16224_v58, 7  ;;  %v7244_v51 = vsel %vm7002_vm9, %v16243_v22, 0  ;;  %v6869_v10 = vrot.slane %v16221_v2, 7 }
 0x966   :  { %v6951_v47 = vsel %vm1294_vm2, %v6939_v59, %v6950_v45  ;;  %v16328_v36 = vsel %vm1824_vm5, %v7378_v57, %v7379_v41  ;;  %v6866_v59 = vsel %vm1218_vm0, %v6864_v55, %v6865_v12  ;;  %v6871_v4 = vrot.slane %v16279_v50, 7 }
 0x967   :  { %v6975_v52 = vmul.bf16 %v6951_v47, %v14422_v62  ;;  %v6868_v33 = vsel %vm1218_vm0, %v6865_v12, %v6867_v31  ;;  %v6890_v41 = vmul.bf16 %v6866_v59, %v14452_v54  ;;  %v6870_v55 = vsel %vm1218_vm0, %v6867_v31, %v6869_v10 }
 0x968   :  { %v6891_v19 = vmul.bf16 %v6868_v33, %v17824_v11  ;;  %v6872_v22 = vsel %vm1218_vm0, %v6869_v10, %v6871_v4  ;;  %v6892_v45 = vmul.bf16 %v6870_v55, %v17825_v20  ;;  %v6873_v57 = vrot.slane %v16255_v39, 7  ;;  %v17857_v55 = vld [vmem:[#allocation57_spill] sm:$0xff] }
 0x969   :  { %12086 = vmatprep.mubr.msk.bf16.mxu0 %vm6977_vm10, %v6975_v52  ;;  %v6893_v21 = vmul.bf16 %v6872_v22, %v17826_v61  ;;  %v6875_v47 = vrot.slane %v16301_v17, 7  ;;  %v7424_v33 = vsel %vm7002_vm9, %v5623_v40, 0  ;;  %v7393_v22 = vmul.bf16 %v16286_v63, %v17857_v55  ;;  %v17861_v63 = vld [vmem:[#allocation61_spill] sm:$0xff] }
 0x96a   :  { %12087 = vmatmul.mubr.msk.bf16.gmra.mrb[44].mxu0 %vm6977_vm10, %v6976_v16  ;;  %v6874_v9 = vsel %vm1218_vm0, %v6871_v4, %v6873_v57  ;;  %v13053_v4 = vld [vmem:[%s17423_s9] sm:$0xff]  }
 0x96b   :  { %12092 = vmatprep.mubr.msk.bf16.mxu0 %vm6977_vm10, %v6889_v56  ;;  %v6876_v52 = vsel %vm1218_vm0, %v6873_v57, %v6875_v47  ;;  %v6894_v16 = vmul.bf16 %v6874_v9, %v17827_v5  ;;  %v6877_v56 = vrot.slane %v16294_v24, 7  ;;  %v17860_v57 = vld [vmem:[#allocation60_spill] sm:$0xff]  ;;  %v7397_v9 = vmul.bf16 %v16328_v36, %v17861_v63 }
 0x96c   :  { %v6895_v12 = vmul.bf16 %v6876_v52, %v17828_v38  ;;  %v7539_v52 = vrot.slane %v16197_v7, 1 }
 0x96d   :  { %v6878_v31 = vsel %vm1218_vm0, %v6875_v47, %v6877_v56  ;;  %v7396_v47 = vmul.bf16 %v16322_v28, %v17860_v57  ;;  %v17863_v56 = vld [vmem:[#allocation64_spill] sm:$0xff]  ;;  %v7542_v28 = vrot.slane %v16224_v58, 1 }
 0x96e   :  { %v6896_v59 = vmul.bf16 %v6878_v31, %v17829_v34 }
 0x972   :  { %12093 = vmatmul.mubr.msk.bf16.vlgmr.msra.gmra.mrb[32].mxu0 %vm6977_vm10, %v6890_v41  ;;  %v5624_v41 = vld [vmem:[%s17421_s7 + $0x10] sm:$0xf] }
 0x973   :  { %12109 = vmatpush3.bf16.msra.mxu0 %v7244_v51  ;;  %12096 = vmatprep.mubr.msk.bf16.mxu0 %vm6977_vm10, %v6891_v19  ;;  %v7391_v51 = vmul.bf16 %v16272_v53, %v17830_v14  ;;  %v17856_v19 = vld [vmem:[#allocation56_spill] sm:$0xff]  ;;  %v17858_v53 = vld [vmem:[#allocation58_spill] sm:$0xff] }
 0x974   :  { %12935 = vmatprep.subr.msk.bf16.mxu0 %vm7002_vm9, %v5623_v40  ;;  %v7392_v10 = vmul.bf16 %v16283_v15, %v17856_v19  ;;  %v7597_v40 = vsel %vm7002_vm9, %v5624_v41, 0 }
 0x97a   :  { %12097 = vmatmul.mubr.msk.bf16.gmra.mrb[36].mxu0 %vm6977_vm10, %v6892_v45  ;;  %v7394_v45 = vmul.bf16 %v16306_v29, %v17858_v53 }
 0x97b   :  { %12100 = vmatprep.mubr.msk.bf16.mxu0 %vm6977_vm10, %v6893_v21  ;;  %v17859_v21 = vld [vmem:[#allocation59_spill] sm:$0xff] }
 0x97c   :  { %v7395_v15 = vmul.bf16 %v16314_v13, %v17859_v21  ;;  %v7390_v13 = vsel %vm14557_vm7, %v16316_v48, 0 }
 0x97d   :  { %v7398_v31 = vmul.bf16 %v7390_v13, %v17863_v56  ;;  %v17869_v13 = vld [vmem:[#allocation69_spill] sm:$0xff] }
 0x982   :  { %12101 = vmatmul.mubr.msk.bf16.gmra.mrb[40].mxu0 %vm6977_vm10, %v6894_v16  ;;  %v7540_v16 = vrot.slane %v16195_v3, 1 }
 0x983   :  { %12104 = vmatprep.mubr.msk.bf16.mxu0 %vm6977_vm10, %v6895_v12 }
 0x984   :  { %v7541_v12 = vsel %vm2056_vm8, %v7539_v52, %v7540_v16 }
 0x98a   :  { %12105 = vmatmul.mubr.msk.bf16.gmra.mrb[44].mxu0 %vm6977_vm10, %v6896_v59  ;;  %v17864_v59 = vld [vmem:[#allocation63_spill] sm:$0xff] }
 0x98b   :  { %12110 = vmatprep.mubr.msk.bf16.mxu0 %vm6977_vm10, %v16197_v7  ;;  %v7564_v36 = vmul.bf16 %v7541_v12, %v17864_v59  ;;  %v7544_v7 = vrot.slane %v16221_v2, 1 }
 0x992   :  { %12111 = vmatmul.mubr.msk.bf16.vlgmr.msra.gmra.mrb[32].mxu0 %vm6977_vm10, %v16195_v3  ;;  %v7543_v3 = vsel %vm2056_vm8, %v7540_v16, %v7542_v28  ;;  %v7550_v16 = vrot.slane %v16301_v17, 1 }
 0x993   :  { %12127 = vmatpush3.bf16.msra.mxu0 %v7424_v33  ;;  %12114 = vmatprep.mubr.msk.bf16.mxu0 %vm6977_vm10, %v16224_v58  ;;  %v7545_v33 = vsel %vm2056_vm8, %v7542_v28, %v7544_v7 }
 0x994   :  { %12936 = vmatprep.subr.msk.bf16.mxu0 %vm7002_vm9, %v5624_v41  ;;  %v17865_v41 = vld [vmem:[#allocation65_spill] sm:$0xff] }
 0x995   :  { %v7565_v48 = vmul.bf16 %v7543_v3, %v17865_v41  ;;  %v17873_v3 = vld [vmem:[#allocation21_spill] sm:$0xff] }
 0x99a   :  { %12115 = vmatmul.mubr.msk.bf16.gmra.mrb[36].mxu0 %vm6977_vm10, %v16221_v2  ;;  %v7548_v2 = vrot.slane %v16255_v39, 1 }
 0x99b   :  { %12118 = vmatprep.mubr.msk.bf16.mxu0 %vm6977_vm10, %v16279_v50 }
 0x9a2   :  { %12119 = vmatmul.mubr.msk.bf16.gmra.mrb[40].mxu0 %vm6977_vm10, %v16255_v39  ;;  %v7551_v39 = vsel %vm2056_vm8, %v7548_v2, %v7550_v16 }
 0x9a3   :  { %12122 = vmatprep.mubr.msk.bf16.mxu0 %vm6977_vm10, %v16301_v17  ;;  %v7569_v12 = vmul.bf16 %v7551_v39, %v17869_v13 }
 0x9aa   :  { %12123 = vmatmul.mubr.msk.bf16.gmra.mrb[44].mxu0 %vm6977_vm10, %v16294_v24 }
 0x9ab   :  { %12128 = vmatprep.mubr.msk.bf16.mxu0 %vm6977_vm10, %v7391_v51  ;;  %v13054_v51 = vld [vmem:[%s17423_s9 + $0x8] sm:$0xff]  }
 0x9b2   :  { %12129 = vmatmul.mubr.msk.bf16.vlgmr.msra.gmra.mrb[32].mxu0 %vm6977_vm10, %v7392_v10  ;;  %v17866_v10 = vld [vmem:[#allocation66_spill] sm:$0xff] }
 0x9b3   :  { %12145 = vmatpush3.bf16.msra.mxu0 %v7597_v40  ;;  %12132 = vmatprep.mubr.msk.bf16.mxu0 %vm6977_vm10, %v7393_v22  ;;  %v7566_v58 = vmul.bf16 %v7545_v33, %v17866_v10  ;;  %v7546_v40 = vrot.slane %v16279_v50, 1  ;;  %v7552_v50 = vrot.slane %v16294_v24, 1  ;;  %v17872_v24 = vld [vmem:[#allocation19_spill] sm:$0xff] }
 0x9b4   :  { %12162 = vmatprep.subr.bf16.mxu0 %v13053_v4  ;;  %v17874_v33 = vpack.c.bf16 %v17872_v24, %v17873_v3  ;;  %v17893_v3 = vld [vmem:[#allocation28_spill] sm:$0xff] }
 0x9b5   :  { %v7547_v22 = vsel %vm2056_vm8, %v7544_v7, %v7546_v40  ;;  %v7562_v17 = vsel %vm2056_vm8, %v7552_v50, 0 }
 0x9ba   :  { %12133 = vmatmul.mubr.msk.bf16.gmra.mrb[36].mxu0 %vm6977_vm10, %v7394_v45  ;;  %v7549_v45 = vsel %vm2056_vm8, %v7546_v40, %v7548_v2  ;;  %v17878_v40 = vld [vmem:[#allocation23_spill] sm:$0xff]  ;;  %v17879_v2 = vld [vmem:[#allocation25_spill] sm:$0xff] }
 0x9bb   :  { %12136 = vmatprep.mubr.msk.bf16.mxu0 %vm6977_vm10, %v7395_v15  ;;  %v17867_v15 = vld [vmem:[#allocation67_spill] sm:$0xff] }
 0x9c2   :  { %12137 = vmatmul.mubr.msk.bf16.gmra.mrb[40].mxu0 %vm6977_vm10, %v7396_v47  ;;  %v7567_v47 = vmul.bf16 %v7547_v22, %v17867_v15  ;;  %v17880_v22 = vpack.c.bf16 %v17878_v40, %v17879_v2  ;;  %v16495_v40 = vld [vmem:[%s17421_s7 + $0x14] sm:$0xf]  ;;  %v10986_v2 = vld [vmem:[%s17424_s8] ss:$0 sm:$0xff] }
 0x9c3   :  { %12140 = vmatprep.mubr.msk.bf16.mxu0 %vm6977_vm10, %v7397_v9  ;;  %v17868_v9 = vld [vmem:[#allocation68_spill] sm:$0xff] }
 0x9c4   :  { %v7568_v52 = vmul.bf16 %v7549_v45, %v17868_v9  ;;  %v17881_v45 = vld [vmem:[#allocation24_spill] sm:$0xff] }
 0x9ca   :  { %12141 = vmatmul.mubr.msk.bf16.gmra.mrb[44].mxu0 %vm6977_vm10, %v7398_v31  ;;  %v17870_v31 = vld [vmem:[#allocation70_spill] sm:$0xff] }
 0x9cb   :  { %12146 = vmatprep.mubr.msk.bf16.mxu0 %vm6977_vm10, %v7564_v36  ;;  %v17871_v36 = vld [vmem:[#allocation71_spill] sm:$0xff] }
 0x9cc   :  { %v7571_v7 = vmul.bf16 %v7562_v17, %v17871_v36  ;;  %v17890_v17 = vld [vmem:[#allocation43_spill] sm:$0xff] }
 0x9d2   :  { %12147 = vmatmul.mubr.msk.bf16.vlgmr.msra.gmra.mrb[32].mxu0 %vm6977_vm10, %v7565_v48  ;;  %v17875_v48 = vld [vmem:[#allocation20_spill] sm:$0xff] }
 0x9d3   :  { %12163 = vmatpush3.bf16.msra.mxu0 %v13053_v4  ;;  %12150 = vmatprep.mubr.msk.bf16.mxu0 %vm6977_vm10, %v7566_v58  ;;  %v7553_v4 = vsel %vm2056_vm8, %v7550_v16, %v7552_v50  ;;  %v17884_v16 = vld [vmem:[#allocation35_spill] sm:$0xff] }
 0x9d4   :  { %12164 = vmatprep.subr.bf16.mxu0 %v13054_v51  ;;  %v7570_v28 = vmul.bf16 %v7553_v4, %v17870_v31  ;;  %v17885_v50 = vld [vmem:[#allocation31_spill] sm:$0xff]  ;;  %v17887_v4 = vld [vmem:[#allocation32_spill] sm:$0xff] }
 0x9d5   :  { %v17886_v39 = vpack.c.bf16 %v17884_v16, %v17885_v50 }
 0x9d7   :  { %12165 = vmatpush3.bf16.msra.mxu0 %v13054_v51  ;;  %v17876_v51 = vld [vmem:[#allocation22_spill] sm:$0xff] }
 0x9d8   :  { %v17877_v58 = vpack.c.bf16 %v17875_v48, %v17876_v51  ;;  %v10999_v51 = vld [vmem:[%s17421_s7 + $0x18] sm:$0xf] }
 0x9d9   :  { %12937 = vmatprep.subr.msk.bf16.mxu1 %vm7002_vm9, %v10999_v51 }
 0x9da   :  { %12151 = vmatmul.mubr.msk.bf16.gmra.mrb[36].mxu0 %vm6977_vm10, %v7567_v47  ;;  %v17882_v47 = vld [vmem:[#allocation26_spill] sm:$0xff] }
 0x9db   :  { %12154 = vmatprep.mubr.msk.bf16.mxu0 %vm6977_vm10, %v7568_v52  ;;  %v17883_v52 = vpack.c.bf16 %v17881_v45, %v17882_v47 }
 0x9e2   :  { %12155 = vmatmul.mubr.msk.bf16.gmra.mrb[40].mxu0 %vm6977_vm10, %v7569_v12  ;;  %v17888_v12 = vld [vmem:[#allocation40_spill] sm:$0xff] }
 0x9e3   :  { %12158 = vmatprep.mubr.msk.bf16.mxu0 %vm6977_vm10, %v7570_v28  ;;  %v17889_v28 = vpack.c.bf16 %v17887_v4, %v17888_v12 }
 0x9ea   :  { %12159 = vmatmul.mubr.msk.bf16.gmra.mrb[44].mxu0 %vm6977_vm10, %v7571_v7  ;;  %v17891_v7 = vld [vmem:[#allocation38_spill] sm:$0xff] }
 0x9eb   :  { %12166 = vmatprep.mubr.msk.bf16.mxu0 %vm1428_vm4, %v17874_v33  ;;  %v17892_v24 = vpack.c.bf16 %v17890_v17, %v17891_v7  ;;  %v17894_v33 = vld [vmem:[#allocation41_spill] sm:$0xff] }
 0x9ec   :  { %v17895_v48 = vpack.c.bf16 %v17893_v3, %v17894_v33 }
 0x9f2   :  { %12167 = vmatmul.mubr.msk.bf16.vlgmr.msra.gmra.mrb[32].mxu0 %vm1428_vm4, %v17877_v58  ;;  %v8227_v58 = vsel %vm7002_vm9, %v10999_v51, 0 }
 0x9f3   :  { %12170 = vmatprep.mubr.msk.bf16.mxu0 %vm1428_vm4, %v17880_v22  ;;  %12183 = vmatpush3.bf16.msra.mxu1 %v8227_v58  ;;  %v10987_v22 = vld [vmem:[%s17425_s10] ss:$0 sm:$0xff] }
 0x9f4   :  { %12938 = vmatprep.subr.msk.bf16.mxu1 %vm7002_vm9, %v16495_v40  ;;  %v16505_v45 = vadd.f32 %v10987_v22, %v10986_v2 }
 0x9fa   :  { %12171 = vmatmul.mubr.msk.bf16.gmra.mrb[36].mxu0 %vm1428_vm4, %v17883_v52 }
 0x9fb   :  { %12174 = vmatprep.mubr.msk.bf16.mxu0 %vm1428_vm4, %v17886_v39 }
 0xa02   :  { %12175 = vmatmul.mubr.msk.bf16.gmra.mrb[40].mxu0 %vm1428_vm4, %v17889_v28 }
 0xa03   :  { %12178 = vmatprep.mubr.msk.bf16.mxu0 %vm1428_vm4, %v17892_v24 }
 0xa0a   :  { %12179 = vmatmul.mubr.msk.bf16.gmra.mrb[44].mxu0 %vm1428_vm4, %v17895_v48 }
 0xac5   :  { %v12168_v47 = vpop.f32.mrb[32].mxu0 }
 0xac6   :  { %v12372_v52 = vadd.f32 %v12168_v47, %v10986_v2  ;;  %v7834_v16 = vpop.f32.mrb[33].mxu0 }
 0xac7   :  { %v12374_v50 = vadd.f32 %v10986_v2, %v7834_v16  ;;  %v12169_v39 = vpop.f32.mrb[34].mxu0 }
 0xac8   :  { %v16507_v4 = vadd.f32 %v12372_v52, %v10987_v22  ;;  %v16510_v12 = vadd.f32 %v16505_v45, %v12169_v39  ;;  %v7837_v28 = vpop.f32.mrb[35].mxu0 }
 0xac9   :  { %v16512_v17 = vadd.f32 %v12374_v50, %v10987_v22  ;;  %v16515_v7 = vadd.f32 %v16505_v45, %v7837_v28 }
 0xaca   :  { %17896 = vst [vmem:[#allocation49_spill] sm:$0xff] %v16507_v4  ;;  %17897 = vst [vmem:[#allocation50_spill] sm:$0xff] %v16510_v12  ;;  %v11012_v24 = vmul.f32 -0.999995, %v16507_v4  ;;  %v11013_v33 = vmul.f32 -0.999995, %v16510_v12 }
 0xacb   :  { %17898 = vst [vmem:[#allocation51_spill] sm:$0xff] %v16512_v17  ;;  %17899 = vst [vmem:[#allocation52_spill] sm:$0xff] %v16515_v7  ;;  %v11010_v3 = vmul.f32 -0.999995, %v16512_v17  ;;  %v11011_v51 = vmul.f32 -0.999995, %v16515_v7 }
 0xacc   :  { %v7965_v48 = vmul.f32 1.442695, %v11012_v24  ;;  %v7967_v2 = vmul.f32 1.442695, %v11013_v33 }
 0xacd   :  { %v7961_v58 = vmul.f32 1.442695, %v11010_v3  ;;  %v12172_v47 = vpop.f32.mrb[36].mxu0  ;;  %v7963_v52 = vmul.f32 1.442695, %v11011_v51 }
 0xace   :  { %13439 = vpow2.f32 %v7965_v48  ;;  %v16522_v22 = vadd.f32 %v16505_v45, %v12172_v47  ;;  %v7850_v16 = vpop.f32.mrb[37].mxu0 }
 0xacf   :  { %13441 = vpow2.f32 %v7961_v58  ;;  %v16525_v50 = vadd.f32 %v16505_v45, %v7850_v16  ;;  %v12173_v39 = vpop.f32.mrb[38].mxu0 }
 0xad0   :  { %17900 = vst [vmem:[#allocation53_spill] sm:$0xff] %v16522_v22  ;;  %13443 = vpow2.f32 %v7967_v2  ;;  %v11016_v28 = vmul.f32 -0.999995, %v16522_v22  ;;  %v16529_v24 = vadd.f32 %v16505_v45, %v12173_v39  ;;  %v7853_v3 = vpop.f32.mrb[39].mxu0 }
 0xad1   :  { %17901 = vst [vmem:[#allocation54_spill] sm:$0xff] %v16525_v50  ;;  %13445 = vpow2.f32 %v7963_v52  ;;  %v11014_v33 = vmul.f32 -0.999995, %v16525_v50  ;;  %v16533_v48 = vadd.f32 %v16505_v45, %v7853_v3 }
 0xad2   :  { %17902 = vst [vmem:[#allocation37_spill] sm:$0xff] %v16529_v24  ;;  %v7973_v51 = vmul.f32 1.442695, %v11016_v28  ;;  %v11017_v58 = vmul.f32 -0.999995, %v16529_v24 }
 0xad3   :  { %17903 = vst [vmem:[#allocation36_spill] sm:$0xff] %v16533_v48  ;;  %v7969_v47 = vmul.f32 1.442695, %v11014_v33  ;;  %v11015_v16 = vmul.f32 -0.999995, %v16533_v48 }
 0xad4   :  { %13447 = vpow2.f32 %v7973_v51  ;;  %v7975_v2 = vmul.f32 1.442695, %v11017_v58 }
 0xad5   :  { %13449 = vpow2.f32 %v7969_v47  ;;  %v7971_v36 = vmul.f32 1.442695, %v11015_v16  ;;  %v12176_v31 = vpop.f32.mrb[40].mxu0 }
 0xad6   :  { %13451 = vpow2.f32 %v7975_v2  ;;  %v16538_v39 = vadd.f32 %v16505_v45, %v12176_v31  ;;  %v7866_v52 = vpop.f32.mrb[41].mxu0 }
 0xad7   :  { %13453 = vpow2.f32 %v7971_v36  ;;  %v16541_v3 = vadd.f32 %v16505_v45, %v7866_v52  ;;  %v12177_v28 = vpop.f32.mrb[42].mxu0 }
 0xad8   :  { %17904 = vst [vmem:[#allocation19_spill] sm:$0xff] %v16538_v39  ;;  %v13440_v13 = vpop.eup %13439  ;;  %v11020_v33 = vmul.f32 -0.999995, %v16538_v39  ;;  %v7869_v9 = vpop.f32.mrb[43].mxu0  ;;  %v16546_v47 = vadd.f32 %v16505_v45, %v12177_v28 }
 0xad9   :  { %17905 = vst [vmem:[#allocation21_spill] sm:$0xff] %v16541_v3  ;;  %v13442_v15 = vpop.eup %13441  ;;  %v7995_v51 = vadd.f32 1.0, %v13440_v13  ;;  %v11018_v58 = vmul.f32 -0.999995, %v16541_v3  ;;  %v16549_v2 = vadd.f32 %v16505_v45, %v7869_v9 }
 0xada   :  { %17906 = vst [vmem:[#allocation20_spill] sm:$0xff] %v16546_v47  ;;  %v13444_v16 = vpop.eup %13443  ;;  %v7993_v31 = vadd.f32 1.0, %v13442_v15  ;;  %v7981_v10 = vmul.f32 1.442695, %v11020_v33  ;;  %v11021_v13 = vmul.f32 -0.999995, %v16546_v47 }
 0xadb   :  { %17907 = vst [vmem:[#allocation22_spill] sm:$0xff] %v16549_v2  ;;  %v13446_v36 = vpop.eup %13445  ;;  %13455 = vrcp.f32 %v7995_v51  ;;  %v7996_v52 = vadd.f32 1.0, %v13444_v16  ;;  %v7977_v59 = vmul.f32 1.442695, %v11018_v58  ;;  %v11019_v28 = vmul.f32 -0.999995, %v16549_v2 }
 0xadc   :  { %13457 = vrcp.f32 %v7993_v31  ;;  %v7994_v41 = vadd.f32 1.0, %v13446_v36  ;;  %v7983_v21 = vmul.f32 1.442695, %v11021_v13 }
 0xadd   :  { %13459 = vrcp.f32 %v7996_v52  ;;  %v12180_v56 = vpop.f32.mrb[44].mxu0 }
 0xade   :  { %v13448_v29 = vpop.eup %13447  ;;  %13461 = vrcp.f32 %v7994_v41  ;;  %v16554_v15 = vadd.f32 %v16505_v45, %v12180_v56  ;;  %v7882_v9 = vpop.f32.mrb[45].mxu0 }
 0xadf   :  { %v13450_v63 = vpop.eup %13449  ;;  %v7999_v57 = vadd.f32 1.0, %v13448_v29  ;;  %13463 = vpow2.f32 %v7981_v10  ;;  %v16557_v33 = vadd.f32 %v16505_v45, %v7882_v9  ;;  %v12181_v51 = vpop.f32.mrb[46].mxu0  ;;  %v7979_v29 = vmul.f32 1.442695, %v11019_v28 }
 0xae0   :  { %17908 = vst [vmem:[#allocation23_spill] sm:$0xff] %v16554_v15  ;;  %v13452_v58 = vpop.eup %13451  ;;  %v7997_v16 = vadd.f32 1.0, %v13450_v63  ;;  %13465 = vpow2.f32 %v7977_v59  ;;  %v11024_v31 = vmul.f32 -0.999995, %v16554_v15  ;;  %v7885_v36 = vpop.f32.mrb[47].mxu0  ;;  %v16562_v10 = vadd.f32 %v16505_v45, %v12181_v51 }
 0xae1   :  { %17909 = vst [vmem:[#allocation25_spill] sm:$0xff] %v16557_v33  ;;  %v13454_v41 = vpop.eup %13453  ;;  %13467 = vrcp.f32 %v7999_v57  ;;  %v8000_v52 = vadd.f32 1.0, %v13452_v58  ;;  %v11022_v56 = vmul.f32 -0.999995, %v16557_v33  ;;  %v16565_v63 = vadd.f32 %v16505_v45, %v7885_v36 }
 0xae2   :  { %13469 = vrcp.f32 %v7997_v16  ;;  %v7998_v53 = vadd.f32 1.0, %v13454_v41  ;;  %17910 = vst [vmem:[#allocation24_spill] sm:$0xff] %v16562_v10  ;;  %v7989_v9 = vmul.f32 1.442695, %v11024_v31  ;;  %v7931_v59 = vmul.f32 0.999995, %v16507_v4 }
 0xae3   :  { %13471 = vrcp.f32 %v8000_v52  ;;  %17911 = vst [vmem:[#allocation26_spill] sm:$0xff] %v16565_v63  ;;  %v7985_v55 = vmul.f32 1.442695, %v11022_v56  ;;  %v11025_v57 = vmul.f32 -0.999995, %v16562_v10 }
 0xae4   :  { %13473 = vrcp.f32 %v7998_v53  ;;  %v7929_v58 = vmul.f32 0.999995, %v16512_v17  ;;  %v11023_v28 = vmul.f32 -0.999995, %v16565_v63  ;;  %v7932_v41 = vmul.f32 0.999995, %v16510_v12 }
 0xae5   :  { %v13456_v13 = vpop.eup %13455  ;;  %13475 = vpow2.f32 %v7983_v21  ;;  %v7991_v31 = vmul.f32 1.442695, %v11025_v57  ;;  %v7930_v52 = vmul.f32 0.999995, %v16515_v7  ;;  %v7935_v57 = vmul.f32 0.999995, %v16522_v22 }
 0xae6   :  { %v13458_v16 = vpop.eup %13457  ;;  %v8043_v51 = vmul.f32 %v13456_v13, %v7931_v59  ;;  %13477 = vpow2.f32 %v7979_v29  ;;  %v7987_v53 = vmul.f32 1.442695, %v11023_v28  ;;  %v7933_v28 = vmul.f32 0.999995, %v16525_v50 }
 0xae7   :  { %v13460_v45 = vpop.eup %13459  ;;  %v8041_v36 = vmul.f32 %v13458_v16, %v7929_v58  ;;  %13479 = vpow2.f32 %v7989_v9  ;;  %v7941_v22 = vmul.f32 0.999995, %v16557_v33  ;;  %v7944_v7 = vmul.f32 0.999995, %v16562_v10 }
 0xae8   :  { %v13462_v56 = vpop.eup %13461  ;;  %v8059_v4 = vmul.f32 %v14210_v18, %v8043_v51  ;;  %v8044_v19 = vmul.f32 %v13460_v45, %v7932_v41  ;;  %13481 = vpow2.f32 %v7985_v55  ;;  %v7936_v45 = vmul.f32 0.999995, %v16529_v24 }
 0xae9   :  { %v13464_v21 = vpop.eup %13463  ;;  %v8057_v17 = vmul.f32 %v14220_v0, %v8041_v36  ;;  %v8042_v14 = vmul.f32 %v13462_v56, %v7930_v52  ;;  %13483 = vpow2.f32 %v7991_v31  ;;  %v7934_v52 = vmul.f32 0.999995, %v16533_v48 }
 0xaea   :  { %v13466_v59 = vpop.eup %13465  ;;  %v8060_v29 = vmul.f32 %v14208_v43, %v8044_v19  ;;  %v8003_v13 = vadd.f32 1.0, %v13464_v21  ;;  %13485 = vpow2.f32 %v7987_v53  ;;  %v8351_v21 = vsel %vm7002_vm9, %v16495_v40, 0 }
 0xaeb   :  { %v13468_v58 = vpop.eup %13467  ;;  %v8058_v9 = vmul.f32 %v14212_v44, %v8042_v14  ;;  %v8001_v16 = vadd.f32 1.0, %v13466_v59 }
 0xaec   :  { %v13470_v51 = vpop.eup %13469  ;;  %v16579_v55 = vpack.c.bf16 %v8060_v29, %v8059_v4  ;;  %v8047_v41 = vmul.f32 %v13468_v58, %v7935_v57  ;;  %13487 = vrcp.f32 %v8003_v13 }
 0xaed   :  { %v13472_v31 = vpop.eup %13471  ;;  %v16582_v36 = vpack.c.bf16 %v8058_v9, %v8057_v17  ;;  %v8045_v19 = vmul.f32 %v13470_v51, %v7933_v28  ;;  %13489 = vrcp.f32 %v8001_v16 }
 0xaee   :  { %v13474_v53 = vpop.eup %13473  ;;  %v17582_v56 = vshrl.u32 %v16579_v55, 16  ;;  %v8048_v14 = vmul.f32 %v13472_v31, %v7936_v45  ;;  %v8063_v59 = vmul.f32 %v14237_v26, %v8047_v41  ;;  %v17587_v17 = vshll.u32 %v16579_v55, 16 }
 0xaef   :  { %v13476_v4 = vpop.eup %13475  ;;  %v8046_v29 = vmul.f32 %v13474_v53, %v7934_v52  ;;  %v17584_v57 = vshrl.u32 %v16582_v36, 16  ;;  %v8061_v58 = vmul.f32 %v14243_v8, %v8045_v19  ;;  %v8126_v31 = vshll.u32 %v16582_v36, 16 }
 0xaf0   :  { %v13478_v13 = vpop.eup %13477  ;;  %v8064_v9 = vmul.f32 %v14227_v49, %v8048_v14  ;;  %v8004_v28 = vadd.f32 1.0, %v13476_v4  ;;  %v8132_v16 = vrot.slane %v17582_v56, 7 }
 0xaf1   :  { %v13480_v51 = vpop.eup %13479  ;;  %v8062_v40 = vmul.f32 %v14241_v35, %v8046_v29  ;;  %v8002_v45 = vadd.f32 1.0, %v13478_v13  ;;  %v8125_v41 = vrot.slane %v17584_v57, 7  ;;  %v17918_v35 = vld [vmem:[#allocation46_spill] sm:$0xff] }
 0xaf2   :  { %v13482_v52 = vpop.eup %13481  ;;  %v16599_v53 = vpack.c.bf16 %v8064_v9, %v8063_v59  ;;  %13491 = vrcp.f32 %v8004_v28  ;;  %v8007_v19 = vadd.f32 1.0, %v13480_v51  ;;  %v8135_v14 = vor.u32 %v17587_v17, %v8132_v16 }
 0xaf3   :  { %v13484_v4 = vpop.eup %13483  ;;  %v16603_v48 = vpack.c.bf16 %v8062_v40, %v8061_v58  ;;  %13493 = vrcp.f32 %v8002_v45  ;;  %v8005_v56 = vadd.f32 1.0, %v13482_v52  ;;  %v8128_v29 = vor.u32 %v8126_v31, %v8125_v41  ;;  %v17912_v58 = vld [vmem:[#allocation30_spill] sm:$0xff] }
 0xaf4   :  { %v13486_v13 = vpop.eup %13485  ;;  %13495 = vrcp.f32 %v8007_v19  ;;  %v8008_v24 = vadd.f32 1.0, %v13484_v4  ;;  %v8136_v57 = vsel %vm1294_vm2, %v8125_v41, %v8135_v14  ;;  %v17586_v50 = vshrl.u32 %v16599_v53, 16  ;;  %v17913_v19 = vld [vmem:[#allocation27_spill] sm:$0xff] }
 0xaf5   :  { %v7939_v59 = vmul.f32 0.999995, %v16538_v39  ;;  %13497 = vrcp.f32 %v8005_v56  ;;  %v8006_v9 = vadd.f32 1.0, %v13486_v13  ;;  %v8193_v28 = vsel %vm14303_vm3, 0, %v8128_v29  ;;  %v16623_v13 = vld [vmem:[%s17421_s7 + $0x1c] sm:$0xf] }
 0xaf6   :  { %v13488_v51 = vpop.eup %13487  ;;  %13499 = vrcp.f32 %v8008_v24  ;;  %v8194_v40 = vmul.bf16 %v8193_v28, %v17912_v58  ;;  %v8138_v45 = vshrl.u32 %v16603_v48, 16  ;;  %v8141_v52 = vshll.u32 %v16603_v48, 16 }
 0xaf7   :  { %13501 = vrcp.f32 %v8006_v9  ;;  %v8195_v41 = vmul.bf16 %v8136_v57, %v17913_v19  ;;  %v16616_v14 = vrot.slane %v17586_v50, 7  ;;  %v8149_v56 = vshll.u32 %v16599_v53, 16  ;;  %v13490_v4 = vpop.eup %13489  ;;  %v17916_v19 = vld [vmem:[#allocation45_spill] sm:$0xff] }
 0xaf8   :  { %12184 = vmatprep.mubr.msk.bf16.mxu1 %vm6977_vm10, %v8194_v40  ;;  %v8582_v29 = vrot.slane %v8126_v31, 1  ;;  %v8140_v24 = vrot.slane %v8138_v45, 7  ;;  %v8051_v28 = vmul.f32 %v13488_v51, %v7939_v59  ;;  %v7937_v9 = vmul.f32 0.999995, %v16541_v3 }
 0xaf9   :  { %12185 = vmatmul.mubr.msk.bf16.vlgmr.msra.gmra.mrb[64].mxu1 %vm6977_vm10, %v8195_v41  ;;  %v8151_v57 = vor.u32 %v8149_v56, %v16616_v14  ;;  %v7940_v50 = vmul.f32 0.999995, %v16546_v47  ;;  %v7938_v17 = vmul.f32 0.999995, %v16549_v2  ;;  %v8587_v31 = vrot.slane %v8141_v52, 1 }
 0xafa   :  { %12201 = vmatpush3.bf16.msra.mxu1 %v8351_v21  ;;  %v8143_v40 = vor.u32 %v8141_v52, %v8140_v24  ;;  %v7943_v39 = vmul.f32 0.999995, %v16554_v15  ;;  %v8049_v41 = vmul.f32 %v13490_v4, %v7937_v9  ;;  %v7942_v47 = vmul.f32 0.999995, %v16565_v63  ;;  %v17915_v15 = vld [vmem:[#allocation42_spill] sm:$0xff] }
 0xafb   :  { %v8152_v59 = vsel %vm1294_vm2, %v8140_v24, %v8151_v57  ;;  %12939 = vmatprep.subr.msk.bf16.mxu1 %vm7002_vm9, %v16623_v13  ;;  %v17914_v21 = vshrl.u32 %v16582_v36, 16  ;;  %v8067_v12 = vmul.f32 %v17915_v15, %v8051_v28  ;;  %v17917_v24 = vshll.u32 %v16579_v55, 16 }
 0xafc   :  { %v13492_v51 = vpop.eup %13491  ;;  %v8144_v2 = vsel %vm1294_vm2, %v8132_v16, %v8143_v40  ;;  %v8197_v4 = vmul.bf16 %v8152_v59, %v17918_v35  ;;  %v8589_v9 = vor.u32 %v8587_v31, %v8138_v45  ;;  %v8590_v63 = vrot.slane %v8149_v56, 1  ;;  %v17919_v16 = vld [vmem:[#allocation39_spill] sm:$0xff] }
 0xafd   :  { %v8583_v52 = vor.u32 %v8582_v29, %v17914_v21  ;;  %v13494_v3 = vpop.eup %13493  ;;  %v8052_v33 = vmul.f32 %v13492_v51, %v7940_v50  ;;  %v8196_v10 = vmul.bf16 %v8144_v2, %v17916_v19  ;;  %v8584_v57 = vrot.slane %v17917_v24, 1 }
 0xafe   :  { %v13496_v58 = vpop.eup %13495  ;;  %v8050_v6 = vmul.f32 %v13494_v3, %v7938_v17  ;;  %v17920_v50 = vshrl.u32 %v16579_v55, 16  ;;  %v8065_v51 = vmul.f32 %v17852_v23, %v8049_v41  ;;  %v16655_v45 = vsel %vm1824_vm5, %v8589_v9, %v8590_v63 }
 0xaff   :  { %v13498_v8 = vpop.eup %13497  ;;  %v8068_v40 = vmul.f32 %v17919_v16, %v8052_v33  ;;  %v8055_v49 = vmul.f32 %v13496_v58, %v7943_v39  ;;  %12188 = vmatprep.mubr.msk.bf16.mxu1 %vm6977_vm10, %v8196_v10  ;;  %v16648_v29 = vsel %vm1824_vm5, %v8583_v52, %v8584_v57  ;;  %v17921_v24 = vshrl.u32 %v16599_v53, 16 }
 0xb00   :  { %v8586_v2 = vor.u32 %v8584_v57, %v17920_v50  ;;  %v13500_v28 = vpop.eup %13499  ;;  %v8066_v3 = vmul.f32 %v17853_v46, %v8050_v6  ;;  %v8053_v17 = vmul.f32 %v13498_v8, %v7941_v22 }
 0xb01   :  { %v13502_v56 = vpop.eup %13501  ;;  %v16657_v33 = vpack.c.bf16 %v8068_v40, %v8067_v12  ;;  %v8056_v39 = vmul.f32 %v13500_v28, %v7944_v7  ;;  %12189 = vmatmul.mubr.msk.bf16.gmra.mrb[68].mxu1 %vm6977_vm10, %v8197_v4  ;;  %v8071_v41 = vmul.f32 %v14388_v30, %v8055_v49 }
 0xb02   :  { %v16661_v10 = vsel %vm1824_vm5, %v8586_v2, %v8587_v31  ;;  %v16663_v58 = vpack.c.bf16 %v8066_v3, %v8065_v51  ;;  %v8054_v59 = vmul.f32 %v13502_v56, %v7942_v47  ;;  %v8069_v22 = vmul.f32 %v14363_v1, %v8053_v17 }
 0xb03   :  { %v8072_v6 = vmul.f32 %v14386_v60, %v8056_v39  ;;  %v8162_v8 = vshrl.u32 %v16657_v33, 16  ;;  %v8165_v31 = vshll.u32 %v16657_v33, 16  ;;  %v8592_v47 = vor.u32 %v8590_v63, %v17921_v24 }
 0xb04   :  { %v8070_v12 = vmul.f32 %v14360_v37, %v8054_v59  ;;  %v8154_v7 = vshrl.u32 %v16663_v58, 16  ;;  %v8157_v4 = vshll.u32 %v16663_v58, 16 }
 0xb05   :  { %v16671_v21 = vpack.c.bf16 %v8072_v6, %v8071_v41  ;;  %v8164_v52 = vrot.slane %v8162_v8, 7 }
 0xb06   :  { %v16676_v57 = vpack.c.bf16 %v8070_v12, %v8069_v22  ;;  %v8156_v49 = vrot.slane %v8154_v7, 7  ;;  %v8593_v39 = vrot.slane %v8157_v4, 1 }
 0xb07   :  { %v8167_v9 = vor.u32 %v8165_v31, %v8164_v52  ;;  %v8178_v40 = vshrl.u32 %v16671_v21, 16  ;;  %v8181_v3 = vshll.u32 %v16671_v21, 16 }
 0xb08   :  { %v8159_v50 = vor.u32 %v8157_v4, %v8156_v49  ;;  %v8170_v2 = vshrl.u32 %v16676_v57, 16  ;;  %v8173_v56 = vshll.u32 %v16676_v57, 16  ;;  %v16689_v22 = vsel %vm1824_vm5, %v8592_v47, %v8593_v39 }
 0xb09   :  { %v8168_v28 = vsel %vm1294_vm2, %v8156_v49, %v8167_v9  ;;  %v8180_v51 = vrot.slane %v8178_v40, 7  ;;  %v8595_v24 = vor.u32 %v8593_v39, %v8154_v7  ;;  %v8596_v49 = vrot.slane %v8165_v31, 1 }
 0xb0a   :  { %v8160_v17 = vsel %vm1294_vm2, %v16616_v14, %v8159_v50  ;;  %v8172_v63 = vrot.slane %v8170_v2, 7  ;;  %v8199_v41 = vmul.bf16 %v8168_v28, %v14404_v25  ;;  %v8089_v9 = vrot.slane %v16582_v36, 7 }
 0xb0b   :  { %v8198_v59 = vmul.bf16 %v8160_v17, %v14391_v27  ;;  %v8183_v12 = vor.u32 %v8181_v3, %v8180_v51  ;;  %v8599_v4 = vrot.slane %v8173_v56, 1  ;;  %v8602_v50 = vrot.slane %v8181_v3, 1 }
 0xb0c   :  { %v8175_v6 = vor.u32 %v8173_v56, %v8172_v63  ;;  %v16697_v28 = vsel %vm1824_vm5, %v8595_v24, %v8596_v49  ;;  %v8598_v47 = vor.u32 %v8596_v49, %v8162_v8  ;;  %v8090_v56 = vrot.slane %v16579_v55, 7 }
 0xb0d   :  { %12192 = vmatprep.mubr.msk.bf16.mxu1 %vm6977_vm10, %v8198_v59  ;;  %v8601_v25 = vor.u32 %v8599_v4, %v8170_v2  ;;  %v16699_v27 = vor.u32 %v8602_v50, %v8178_v40  ;;  %v8184_v7 = vsel %vm1294_vm2, %v8172_v63, %v8183_v12  ;;  %v8092_v40 = vrot.slane %v16603_v48, 7 }
 0xb0e   :  { %12193 = vmatmul.mubr.msk.bf16.gmra.mrb[72].mxu1 %vm6977_vm10, %v8199_v41  ;;  %v8176_v14 = vsel %vm1294_vm2, %v8164_v52, %v8175_v6  ;;  %v16704_v31 = vsel %vm1824_vm5, %v8598_v47, %v8599_v4  ;;  %v8112_v52 = vsel %vm1218_vm0, 0, %v8089_v9  ;;  %v8201_v3 = vmul.bf16 %v8184_v7, %v14439_v42  ;;  %v11001_v6 = vld [vmem:[%s17421_s7 + $0x20] sm:$0xf] }
 0xb0f   :  { %v8200_v17 = vmul.bf16 %v8176_v14, %v14422_v62  ;;  %v16708_v51 = vsel %vm1824_vm5, %v8601_v25, %v8602_v50  ;;  %v8114_v8 = vmul.bf16 %v8112_v52, %v14442_v32  ;;  %v8091_v2 = vsel %vm1218_vm0, %v8089_v9, %v8090_v56 }
 0xb10   :  { %v8093_v63 = vsel %vm1218_vm0, %v8090_v56, %v8092_v40  ;;  %v8115_v39 = vmul.bf16 %v8091_v2, %v14452_v54  ;;  %v8467_v25 = vsel %vm7002_vm9, %v16623_v13, 0  ;;  %v8094_v41 = vrot.slane %v16599_v53, 7  ;;  %v17922_v2 = vld [vmem:[#allocation55_spill] sm:$0xff] }
 0xb11   :  { %12196 = vmatprep.mubr.msk.bf16.mxu1 %vm6977_vm10, %v8200_v17  ;;  %v8116_v59 = vmul.bf16 %v8093_v63, %v17824_v11  ;;  %v8096_v12 = vrot.slane %v16663_v58, 7  ;;  %v8098_v9 = vrot.slane %v16657_v33, 7  ;;  %v8100_v4 = vrot.slane %v16676_v57, 7 }
 0xb12   :  { %v8095_v24 = vsel %vm1218_vm0, %v8092_v40, %v8094_v41  ;;  %v8102_v52 = vrot.slane %v16671_v21, 7  ;;  %v11002_v40 = vld [vmem:[%s17421_s7 + $0x24] sm:$0xf]  ;;  %v8614_v63 = vmul.bf16 %v16648_v29, %v17922_v2  ;;  %v17926_v29 = vld [vmem:[#allocation58_spill] sm:$0xff] }
 0xb13   :  { %v8097_v13 = vsel %vm1218_vm0, %v8094_v41, %v8096_v12  ;;  %v8117_v49 = vmul.bf16 %v8095_v24, %v17825_v20  ;;  %v8099_v50 = vsel %vm1218_vm0, %v8096_v12, %v8098_v9  ;;  %v8101_v17 = vsel %vm1218_vm0, %v8098_v9, %v8100_v4  ;;  %v17924_v41 = vld [vmem:[#allocation57_spill] sm:$0xff] }
 0xb14   :  { %v8118_v14 = vmul.bf16 %v8097_v13, %v17826_v61  ;;  %v8119_v47 = vmul.bf16 %v8099_v50, %v17827_v5  ;;  %v8120_v7 = vmul.bf16 %v8101_v17, %v17828_v38  ;;  %v17925_v12 = vmov 0.0   ;;  %v17927_v13 = vld [vmem:[#allocation59_spill] sm:$0xff] }
 0xb15   :  { %v8617_v24 = vmul.bf16 %v16689_v22, %v17926_v29  ;;  %v8763_v50 = vrot.slane %v16579_v55, 1 }
 0xb16   :  { %12197 = vmatmul.mubr.msk.bf16.gmra.mrb[76].mxu1 %vm6977_vm10, %v8201_v3  ;;  %v8103_v3 = vsel %vm1218_vm0, %v8100_v4, %v8102_v52  ;;  %v8762_v4 = vrot.slane %v16582_v36, 1  ;;  %v17932_v52 = vld [vmem:[#allocation63_spill] sm:$0xff] }
 0xb17   :  { %12202 = vmatprep.mubr.msk.bf16.mxu1 %vm6977_vm10, %v8114_v8  ;;  %v8121_v56 = vmul.bf16 %v8103_v3, %v17829_v34  ;;  %v8647_v8 = vsel %vm7002_vm9, %v11001_v6, 0 }
 0xb18   :  { %v8764_v17 = vsel %vm2056_vm8, %v8762_v4, %v8763_v50  ;;  %v17937_v4 = vld [vmem:[#allocation69_spill] sm:$0xff] }
 0xb1e   :  { %12203 = vmatmul.mubr.msk.bf16.vlgmr.msra.gmra.mrb[64].mxu1 %vm6977_vm10, %v8115_v39  ;;  %v17923_v39 = vld [vmem:[#allocation56_spill] sm:$0xff] }
 0xb1f   :  { %12219 = vmatpush3.bf16.msra.mxu1 %v8467_v25  ;;  %12206 = vmatprep.mubr.msk.bf16.mxu1 %vm6977_vm10, %v8116_v59  ;;  %v8615_v25 = vmul.bf16 %v16661_v10, %v17923_v39  ;;  %v8820_v59 = vsel %vm7002_vm9, %v11002_v40, 0  ;;  %v17928_v10 = vld [vmem:[#allocation60_spill] sm:$0xff] }
 0xb20   :  { %12940 = vmatprep.subr.msk.bf16.mxu1 %vm7002_vm9, %v11001_v6  ;;  %v8616_v6 = vmul.bf16 %v16655_v45, %v17924_v41  ;;  %v8619_v45 = vmul.bf16 %v16704_v31, %v17928_v10  ;;  %v8765_v31 = vrot.slane %v16603_v48, 1 }
 0xb26   :  { %12207 = vmatmul.mubr.msk.bf16.gmra.mrb[68].mxu1 %vm6977_vm10, %v8117_v49  ;;  %v8618_v49 = vmul.bf16 %v16697_v28, %v17927_v13  ;;  %v8613_v28 = vsel %vm14557_vm7, %v16699_v27, 0 }
 0xb27   :  { %12210 = vmatprep.mubr.msk.bf16.mxu1 %vm6977_vm10, %v8118_v14  ;;  %v17929_v14 = vld [vmem:[#allocation61_spill] sm:$0xff] }
 0xb28   :  { %v8620_v9 = vmul.bf16 %v16708_v51, %v17929_v14  ;;  %v8787_v51 = vmul.bf16 %v8764_v17, %v17932_v52 }
 0xb2e   :  { %12211 = vmatmul.mubr.msk.bf16.gmra.mrb[72].mxu1 %vm6977_vm10, %v8119_v47  ;;  %v17931_v47 = vld [vmem:[#allocation64_spill] sm:$0xff] }
 0xb2f   :  { %12214 = vmatprep.mubr.msk.bf16.mxu1 %vm6977_vm10, %v8120_v7  ;;  %v8621_v7 = vmul.bf16 %v8613_v28, %v17931_v47  ;;  %v17938_v28 = vld [vmem:[#allocation70_spill] sm:$0xff] }
 0xb36   :  { %12215 = vmatmul.mubr.msk.bf16.gmra.mrb[76].mxu1 %vm6977_vm10, %v8121_v56  ;;  %v17933_v56 = vld [vmem:[#allocation65_spill] sm:$0xff] }
 0xb37   :  { %12220 = vmatprep.mubr.msk.bf16.mxu1 %vm6977_vm10, %v16582_v36  ;;  %v8767_v36 = vrot.slane %v16599_v53, 1 }
 0xb39   :  { %v8768_v3 = vsel %vm2056_vm8, %v8765_v31, %v8767_v36 }
 0xb3e   :  { %12221 = vmatmul.mubr.msk.bf16.vlgmr.msra.gmra.mrb[64].mxu1 %vm6977_vm10, %v16579_v55  ;;  %v8766_v55 = vsel %vm2056_vm8, %v8763_v50, %v8765_v31 }
 0xb3f   :  { %12237 = vmatpush3.bf16.msra.mxu1 %v8647_v8  ;;  %12224 = vmatprep.mubr.msk.bf16.mxu1 %vm6977_vm10, %v16603_v48  ;;  %v8788_v27 = vmul.bf16 %v8766_v55, %v17933_v56  ;;  %v17934_v8 = vld [vmem:[#allocation66_spill] sm:$0xff]  ;;  %v8771_v48 = vrot.slane %v16657_v33, 1  ;;  %v16844_v55 = vld [vmem:[%s17424_s8 + $0x1] ss:$0 sm:$0xff] }
 0xb40   :  { %12941 = vmatprep.subr.msk.bf16.mxu1 %vm7002_vm9, %v11002_v40  ;;  %v8789_v40 = vmul.bf16 %v8768_v3, %v17934_v8 }
 0xb46   :  { %12225 = vmatmul.mubr.msk.bf16.gmra.mrb[68].mxu1 %vm6977_vm10, %v16599_v53 }
 0xb47   :  { %12228 = vmatprep.mubr.msk.bf16.mxu1 %vm6977_vm10, %v16663_v58 }
 0xb4e   :  { %12229 = vmatmul.mubr.msk.bf16.gmra.mrb[72].mxu1 %vm6977_vm10, %v16657_v33 }
 0xb4f   :  { %12232 = vmatprep.mubr.msk.bf16.mxu1 %vm6977_vm10, %v16676_v57 }
 0xb56   :  { %12233 = vmatmul.mubr.msk.bf16.gmra.mrb[76].mxu1 %vm6977_vm10, %v16671_v21 }
 0xb57   :  { %12238 = vmatprep.mubr.msk.bf16.mxu1 %vm6977_vm10, %v8614_v63  ;;  %v8769_v63 = vrot.slane %v16663_v58, 1  ;;  %v8775_v58 = vrot.slane %v16671_v21, 1  ;;  %v11005_v21 = vld [vmem:[%s17421_s7 + $0x2c] sm:$0xf] }
 0xb58   :  { %12942 = vmatprep.subr.msk.bf16.mxu0 %vm7002_vm9, %v11005_v21 }
 0xb59   :  { %v8770_v53 = vsel %vm2056_vm8, %v8767_v36, %v8769_v63  ;;  %v16837_v36 = vld [vmem:[%s17421_s7 + $0x28] sm:$0xf] }
 0xb5e   :  { %12239 = vmatmul.mubr.msk.bf16.vlgmr.msra.gmra.mrb[64].mxu1 %vm6977_vm10, %v8615_v25  ;;  %v8772_v25 = vsel %vm2056_vm8, %v8769_v63, %v8771_v48 }
 0xb5f   :  { %12255 = vmatpush3.bf16.msra.mxu1 %v8820_v59  ;;  %12242 = vmatprep.mubr.msk.bf16.mxu1 %vm6977_vm10, %v8616_v6  ;;  %v17935_v59 = vld [vmem:[#allocation67_spill] sm:$0xff] }
 0xb60   :  { %12362 = vmatprep.subr.bf16.mxu1 %v17925_v12  ;;  %v8790_v6 = vmul.bf16 %v8770_v53, %v17935_v59 }
 0xb66   :  { %12243 = vmatmul.mubr.msk.bf16.gmra.mrb[68].mxu1 %vm6977_vm10, %v8617_v24  ;;  %v17936_v24 = vld [vmem:[#allocation68_spill] sm:$0xff] }
 0xb67   :  { %12246 = vmatprep.mubr.msk.bf16.mxu1 %vm6977_vm10, %v8618_v49  ;;  %v8791_v49 = vmul.bf16 %v8772_v25, %v17936_v24 }
 0xb6e   :  { %12247 = vmatmul.mubr.msk.bf16.gmra.mrb[72].mxu1 %vm6977_vm10, %v8619_v45  ;;  %v8773_v45 = vrot.slane %v16676_v57, 1  ;;  %v8785_v57 = vsel %vm2056_vm8, %v8775_v58, 0 }
 0xb6f   :  { %12250 = vmatprep.mubr.msk.bf16.mxu1 %vm6977_vm10, %v8620_v9 }
 0xb70   :  { %v8774_v33 = vsel %vm2056_vm8, %v8771_v48, %v8773_v45  ;;  %v8776_v9 = vsel %vm2056_vm8, %v8773_v45, %v8775_v58 }
 0xb71   :  { %v8792_v50 = vmul.bf16 %v8774_v33, %v17937_v4  ;;  %v8793_v17 = vmul.bf16 %v8776_v9, %v17938_v28 }
 0xb76   :  { %12251 = vmatmul.mubr.msk.bf16.gmra.mrb[76].mxu1 %vm6977_vm10, %v8621_v7  ;;  %v17939_v7 = vld [vmem:[#allocation71_spill] sm:$0xff] }
 0xb77   :  { %12256 = vmatprep.mubr.msk.bf16.mxu1 %vm6977_vm10, %v8787_v51  ;;  %v8794_v31 = vmul.bf16 %v8785_v57, %v17939_v7  ;;  %v9255_v51 = vsel %vm7002_vm9, %v11005_v21, 0 }
 0xb78   :  { %12273 = vmatpush3.bf16.msra.mxu0 %v9255_v51 }
 0xb79   :  { %12943 = vmatprep.subr.msk.bf16.mxu0 %vm7002_vm9, %v16837_v36 }
 0xb7e   :  { %12257 = vmatmul.mubr.msk.bf16.vlgmr.msra.gmra.mrb[64].mxu1 %vm6977_vm10, %v8788_v27 }
 0xb7f   :  { %12260 = vmatprep.mubr.msk.bf16.mxu1 %vm6977_vm10, %v8789_v40 }
 0xb86   :  { %12261 = vmatmul.mubr.msk.bf16.gmra.mrb[68].mxu1 %vm6977_vm10, %v8790_v6 }
 0xb87   :  { %12264 = vmatprep.mubr.msk.bf16.mxu1 %vm6977_vm10, %v8791_v49 }
 0xb8e   :  { %12265 = vmatmul.mubr.msk.bf16.gmra.mrb[72].mxu1 %vm6977_vm10, %v8792_v50 }
 0xb8f   :  { %12268 = vmatprep.mubr.msk.bf16.mxu1 %vm6977_vm10, %v8793_v17 }
 0xb96   :  { %12269 = vmatmul.mubr.msk.bf16.gmra.mrb[76].mxu1 %vm6977_vm10, %v8794_v31 }
 0xc51   :  { %v12258_v3 = vpop.f32.mrb[64].mxu1 }
 0xc52   :  { %v16847_v27 = vadd.f32 %v12258_v3, %v16844_v55  ;;  %v8856_v40 = vpop.f32.mrb[65].mxu1 }
 0xc53   :  { %v16850_v63 = vadd.f32 %v16844_v55, %v8856_v40  ;;  %v12259_v48 = vpop.f32.mrb[66].mxu1 }
 0xc54   :  { %v11069_v53 = vmul.f32 -0.999995, %v16847_v27  ;;  %v16854_v25 = vadd.f32 %v12259_v48, %v16844_v55  ;;  %v8859_v6 = vpop.f32.mrb[67].mxu1 }
 0xc55   :  { %v11067_v49 = vmul.f32 -0.999995, %v16850_v63  ;;  %v16858_v45 = vadd.f32 %v16844_v55, %v8859_v6 }
 0xc56   :  { %v8993_v58 = vmul.f32 1.442695, %v11069_v53  ;;  %v11070_v33 = vmul.f32 -0.999995, %v16854_v25 }
 0xc57   :  { %v8989_v9 = vmul.f32 1.442695, %v11067_v49  ;;  %v11068_v50 = vmul.f32 -0.999995, %v16858_v45 }
 0xc58   :  { %13503 = vpow2.f32 %v8993_v58  ;;  %v8995_v17 = vmul.f32 1.442695, %v11070_v33 }
 0xc59   :  { %13505 = vpow2.f32 %v8989_v9  ;;  %v8991_v57 = vmul.f32 1.442695, %v11068_v50  ;;  %v12262_v31 = vpop.f32.mrb[68].mxu1 }
 0xc5a   :  { %13507 = vpow2.f32 %v8995_v17  ;;  %v16863_v21 = vadd.f32 %v12262_v31, %v16844_v55  ;;  %v8872_v51 = vpop.f32.mrb[69].mxu1 }
 0xc5b   :  { %13509 = vpow2.f32 %v8991_v57  ;;  %v16866_v3 = vadd.f32 %v16844_v55, %v8872_v51  ;;  %v12263_v40 = vpop.f32.mrb[70].mxu1 }
 0xc5c   :  { %v11073_v48 = vmul.f32 -0.999995, %v16863_v21  ;;  %v16870_v53 = vadd.f32 %v12263_v40, %v16844_v55  ;;  %v8875_v6 = vpop.f32.mrb[71].mxu1  ;;  %v8963_v41 = vmul.f32 0.999995, %v16863_v21 }
 0xc5d   :  { %v11071_v49 = vmul.f32 -0.999995, %v16866_v3  ;;  %v16874_v58 = vadd.f32 %v16844_v55, %v8875_v6 }
 0xc5e   :  { %v9001_v33 = vmul.f32 1.442695, %v11073_v48  ;;  %v11074_v9 = vmul.f32 -0.999995, %v16870_v53 }
 0xc5f   :  { %v8997_v50 = vmul.f32 1.442695, %v11071_v49  ;;  %v11072_v17 = vmul.f32 -0.999995, %v16874_v58 }
 0xc60   :  { %13511 = vpow2.f32 %v9001_v33  ;;  %v9003_v57 = vmul.f32 1.442695, %v11074_v9 }
 0xc61   :  { %13513 = vpow2.f32 %v8997_v50  ;;  %v8999_v31 = vmul.f32 1.442695, %v11072_v17  ;;  %v12266_v51 = vpop.f32.mrb[72].mxu1 }
 0xc62   :  { %v13504_v7 = vpop.eup %13503  ;;  %13515 = vpow2.f32 %v9003_v57  ;;  %v16879_v40 = vadd.f32 %v12266_v51, %v16844_v55  ;;  %v8888_v28 = vpop.f32.mrb[73].mxu1 }
 0xc63   :  { %v13506_v4 = vpop.eup %13505  ;;  %v9023_v6 = vadd.f32 1.0, %v13504_v7  ;;  %13517 = vpow2.f32 %v8999_v31  ;;  %v16882_v48 = vadd.f32 %v16844_v55, %v8888_v28  ;;  %v12267_v49 = vpop.f32.mrb[74].mxu1 }
 0xc64   :  { %v13508_v24 = vpop.eup %13507  ;;  %v9021_v59 = vadd.f32 1.0, %v13506_v4  ;;  %v11077_v33 = vmul.f32 -0.999995, %v16879_v40  ;;  %v16886_v9 = vadd.f32 %v12267_v49, %v16844_v55  ;;  %v8891_v50 = vpop.f32.mrb[75].mxu1 }
 0xc65   :  { %v13510_v17 = vpop.eup %13509  ;;  %13519 = vrcp.f32 %v9023_v6  ;;  %v9024_v57 = vadd.f32 1.0, %v13508_v24  ;;  %v11075_v51 = vmul.f32 -0.999995, %v16882_v48  ;;  %v16891_v4 = vadd.f32 %v16844_v55, %v8891_v50 }
 0xc66   :  { %13521 = vrcp.f32 %v9021_v59  ;;  %v9022_v7 = vadd.f32 1.0, %v13510_v17  ;;  %v9009_v31 = vmul.f32 1.442695, %v11077_v33  ;;  %v11078_v8 = vmul.f32 -0.999995, %v16886_v9 }
 0xc67   :  { %13523 = vrcp.f32 %v9024_v57  ;;  %v9005_v28 = vmul.f32 1.442695, %v11075_v51  ;;  %v11076_v56 = vmul.f32 -0.999995, %v16891_v4  ;;  %v8959_v57 = vmul.f32 0.999995, %v16847_v27 }
 0xc68   :  { %13525 = vrcp.f32 %v9022_v7  ;;  %v9011_v49 = vmul.f32 1.442695, %v11078_v8  ;;  %v8960_v27 = vmul.f32 0.999995, %v16854_v25 }
 0xc69   :  { %13527 = vpow2.f32 %v9009_v31  ;;  %v12270_v24 = vpop.f32.mrb[76].mxu1 }
 0xc6a   :  { %v13512_v52 = vpop.eup %13511  ;;  %13529 = vpow2.f32 %v9005_v28  ;;  %v16895_v59 = vadd.f32 %v12270_v24, %v16844_v55  ;;  %v8904_v33 = vpop.f32.mrb[77].mxu1  ;;  %v9007_v28 = vmul.f32 1.442695, %v11076_v56 }
 0xc6b   :  { %v13514_v6 = vpop.eup %13513  ;;  %v9027_v47 = vadd.f32 1.0, %v13512_v52  ;;  %13531 = vpow2.f32 %v9011_v49  ;;  %v16899_v51 = vadd.f32 %v16844_v55, %v8904_v33  ;;  %v12271_v8 = vpop.f32.mrb[78].mxu1  ;;  %v8957_v49 = vmul.f32 0.999995, %v16850_v63 }
 0xc6c   :  { %v13516_v17 = vpop.eup %13515  ;;  %v9025_v50 = vadd.f32 1.0, %v13514_v6  ;;  %v11081_v22 = vmul.f32 -0.999995, %v16895_v59  ;;  %v8907_v52 = vpop.f32.mrb[79].mxu1  ;;  %v16906_v33 = vadd.f32 %v12271_v8, %v16844_v55 }
 0xc6d   :  { %v13518_v7 = vpop.eup %13517  ;;  %13533 = vrcp.f32 %v9027_v47  ;;  %v9028_v31 = vadd.f32 1.0, %v13516_v17  ;;  %v11079_v14 = vmul.f32 -0.999995, %v16899_v51  ;;  %v16909_v13 = vadd.f32 %v16844_v55, %v8907_v52 }
 0xc6e   :  { %13535 = vrcp.f32 %v9025_v50  ;;  %v9026_v24 = vadd.f32 1.0, %v13518_v7  ;;  %v9017_v6 = vmul.f32 1.442695, %v11081_v22  ;;  %v8958_v7 = vmul.f32 0.999995, %v16858_v45 }
 0xc6f   :  { %v13520_v10 = vpop.eup %13519  ;;  %13537 = vrcp.f32 %v9028_v31  ;;  %v9013_v56 = vmul.f32 1.442695, %v11079_v14  ;;  %v11082_v29 = vmul.f32 -0.999995, %v16906_v33  ;;  %v11080_v45 = vmul.f32 -0.999995, %v16909_v13 }
 0xc70   :  { %v13522_v47 = vpop.eup %13521  ;;  %v9071_v17 = vmul.f32 %v13520_v10, %v8959_v57  ;;  %13539 = vrcp.f32 %v9026_v24 }
 0xc71   :  { %v13524_v63 = vpop.eup %13523  ;;  %v9069_v50 = vmul.f32 %v13522_v47, %v8957_v49  ;;  %13541 = vpow2.f32 %v9007_v28  ;;  %v9019_v10 = vmul.f32 1.442695, %v11082_v29  ;;  %v9015_v29 = vmul.f32 1.442695, %v11080_v45 }
 0xc72   :  { %v13526_v25 = vpop.eup %13525  ;;  %v9072_v31 = vmul.f32 %v13524_v63, %v8960_v27  ;;  %13543 = vpow2.f32 %v9017_v6  ;;  %v9087_v55 = vmul.f32 %v14210_v18, %v9071_v17 }
 0xc73   :  { %v13528_v22 = vpop.eup %13527  ;;  %v9070_v8 = vmul.f32 %v13526_v25, %v8958_v7  ;;  %13545 = vpow2.f32 %v9013_v56  ;;  %v9085_v49 = vmul.f32 %v14220_v0, %v9069_v50  ;;  %v8964_v0 = vmul.f32 0.999995, %v16870_v53 }
 0xc74   :  { %v13530_v14 = vpop.eup %13529  ;;  %v9088_v57 = vmul.f32 %v14208_v43, %v9072_v31  ;;  %v9031_v52 = vadd.f32 1.0, %v13528_v22  ;;  %13547 = vpow2.f32 %v9019_v10  ;;  %v8961_v43 = vmul.f32 0.999995, %v16866_v3 }
 0xc75   :  { %v13532_v28 = vpop.eup %13531  ;;  %v9086_v24 = vmul.f32 %v14212_v44, %v9070_v8  ;;  %v9029_v27 = vadd.f32 1.0, %v13530_v14  ;;  %v8962_v7 = vmul.f32 0.999995, %v16874_v58  ;;  %v9379_v58 = vsel %vm7002_vm9, %v16837_v36, 0 }
 0xc76   :  { %v16919_v6 = vpack.c.bf16 %v9088_v57, %v9087_v55  ;;  %13549 = vrcp.f32 %v9031_v52  ;;  %v9032_v21 = vadd.f32 1.0, %v13532_v28  ;;  %v17940_v52 = vld [vmem:[#allocation29_spill] sm:$0xff] }
 0xc77   :  { %v13534_v47 = vpop.eup %13533  ;;  %v16921_v56 = vpack.c.bf16 %v9086_v24, %v9085_v49 }
 0xc78   :  { %v13536_v18 = vpop.eup %13535  ;;  %v9158_v17 = vshrl.u32 %v16919_v6, 16  ;;  %v9075_v63 = vmul.f32 %v13534_v47, %v8963_v41  ;;  %13551 = vrcp.f32 %v9032_v21  ;;  %v9161_v3 = vshll.u32 %v16919_v6, 16 }
 0xc79   :  { %v13538_v44 = vpop.eup %13537  ;;  %v9073_v50 = vmul.f32 %v13536_v18, %v8961_v43  ;;  %13553 = vpow2.f32 %v9015_v29  ;;  %v9151_v25 = vshrl.u32 %v16921_v56, 16  ;;  %v9154_v14 = vshll.u32 %v16921_v56, 16  ;;  %v17942_v29 = vld [vmem:[#allocation33_spill] sm:$0xff] }
 0xc7a   :  { %v13540_v31 = vpop.eup %13539  ;;  %v16930_v22 = vrot.slane %v9158_v17, 7  ;;  %v9076_v8 = vmul.f32 %v13538_v44, %v8964_v0  ;;  %13555 = vrcp.f32 %v9029_v27  ;;  %v9091_v57 = vmul.f32 %v14237_v26, %v9075_v63  ;;  %v17941_v27 = vld [vmem:[#allocation34_spill] sm:$0xff] }
 0xc7b   :  { %v13542_v41 = vpop.eup %13541  ;;  %v9074_v10 = vmul.f32 %v13540_v31, %v8962_v7  ;;  %v9153_v53 = vrot.slane %v9151_v25, 7  ;;  %v9089_v21 = vmul.f32 %v17941_v27, %v9073_v50  ;;  %v8967_v7 = vmul.f32 0.999995, %v16879_v40 }
 0xc7c   :  { %v13544_v55 = vpop.eup %13543  ;;  %v9092_v45 = vmul.f32 %v17940_v52, %v9076_v8  ;;  %v9030_v28 = vadd.f32 1.0, %v13542_v41  ;;  %v9163_v49 = vor.u32 %v9161_v3, %v16930_v22  ;;  %v8965_v31 = vmul.f32 0.999995, %v16882_v48 }
 0xc7d   :  { %v13546_v24 = vpop.eup %13545  ;;  %v9090_v47 = vmul.f32 %v17942_v29, %v9074_v10  ;;  %v9035_v43 = vadd.f32 1.0, %v13544_v55  ;;  %v9156_v18 = vor.u32 %v9154_v14, %v9153_v53  ;;  %v17944_v10 = vld [vmem:[#allocation30_spill] sm:$0xff] }
 0xc7e   :  { %v16945_v0 = vpack.c.bf16 %v9092_v45, %v9091_v57  ;;  %13557 = vrcp.f32 %v9030_v28  ;;  %v9033_v36 = vadd.f32 1.0, %v13546_v24  ;;  %v9164_v26 = vsel %vm1294_vm2, %v9153_v53, %v9163_v49  ;;  %v13548_v63 = vpop.eup %13547  ;;  %v17945_v53 = vld [vmem:[#allocation27_spill] sm:$0xff] }
 0xc7f   :  { %v16948_v44 = vpack.c.bf16 %v9090_v47, %v9089_v21  ;;  %13559 = vrcp.f32 %v9035_v43  ;;  %v9221_v8 = vsel %vm14303_vm3, 0, %v9156_v18  ;;  %v9036_v41 = vadd.f32 1.0, %v13548_v63  ;;  %v16967_v21 = vld [vmem:[%s17421_s7 + $0x30] sm:$0xf] }
 0xc80   :  { %v13550_v50 = vpop.eup %13549  ;;  %13561 = vrcp.f32 %v9033_v36  ;;  %v9222_v55 = vmul.bf16 %v9221_v8, %v17944_v10  ;;  %v9174_v57 = vshrl.u32 %v16945_v0, 16  ;;  %v8968_v45 = vmul.f32 0.999995, %v16886_v9 }
 0xc81   :  { %v9079_v52 = vmul.f32 %v13550_v50, %v8967_v7  ;;  %v9223_v28 = vmul.bf16 %v9164_v26, %v17945_v53  ;;  %v9166_v49 = vshrl.u32 %v16948_v44, 16  ;;  %13563 = vrcp.f32 %v9036_v41 }
 0xc82   :  { %v13552_v24 = vpop.eup %13551  ;;  %12274 = vmatprep.mubr.msk.bf16.mxu0 %vm6977_vm10, %v9222_v55  ;;  %v16961_v40 = vrot.slane %v9174_v57, 7  ;;  %v9177_v27 = vshll.u32 %v16945_v0, 16  ;;  %v9610_v47 = vrot.slane %v9154_v14, 1  ;;  %v9169_v18 = vshll.u32 %v16948_v44, 16 }
 0xc83   :  { %v13554_v9 = vpop.eup %13553  ;;  %v9080_v29 = vmul.f32 %v13552_v24, %v8968_v45  ;;  %12275 = vmatmul.mubr.msk.bf16.vlgmr.msra.gmra.mrb[48].mxu0 %vm6977_vm10, %v9223_v28  ;;  %v9168_v43 = vrot.slane %v9166_v49, 7  ;;  %v9095_v7 = vmul.f32 %v17915_v15, %v9079_v52  ;;  %v8966_v14 = vmul.f32 0.999995, %v16891_v4 }
 0xc84   :  { %v13556_v36 = vpop.eup %13555  ;;  %v9034_v26 = vadd.f32 1.0, %v13554_v9  ;;  %12291 = vmatpush3.bf16.msra.mxu0 %v9379_v58  ;;  %v9179_v63 = vor.u32 %v9177_v27, %v16961_v40  ;;  %v9611_v15 = vor.u32 %v9610_v47, %v9151_v25  ;;  %v9615_v52 = vrot.slane %v9169_v18, 1 }
 0xc85   :  { %v9096_v8 = vmul.f32 %v17919_v16, %v9080_v29  ;;  %v9171_v50 = vor.u32 %v9169_v18, %v9168_v43  ;;  %12944 = vmatprep.subr.msk.bf16.mxu0 %vm7002_vm9, %v16967_v21  ;;  %v9077_v10 = vmul.f32 %v13556_v36, %v8965_v31  ;;  %v9612_v45 = vrot.slane %v9161_v3, 1 }
 0xc86   :  { %13565 = vrcp.f32 %v9034_v26  ;;  %v9180_v41 = vsel %vm1294_vm2, %v9168_v43, %v9179_v63  ;;  %v8971_v28 = vmul.f32 0.999995, %v16895_v59  ;;  %v8972_v25 = vmul.f32 0.999995, %v16906_v33 }
 0xc87   :  { %v16979_v55 = vpack.c.bf16 %v9096_v8, %v9095_v7  ;;  %v9172_v58 = vsel %vm1294_vm2, %v16930_v22, %v9171_v50  ;;  %v9225_v24 = vmul.bf16 %v9180_v41, %v17918_v35  ;;  %v8969_v22 = vmul.f32 0.999995, %v16899_v51 }
 0xc88   :  { %v13558_v48 = vpop.eup %13557  ;;  %v9224_v16 = vmul.bf16 %v9172_v58, %v17916_v19  ;;  %v16996_v47 = vsel %vm1824_vm5, %v9611_v15, %v9612_v45  ;;  %v9093_v3 = vmul.f32 %v17852_v23, %v9077_v10  ;;  %v9614_v35 = vor.u32 %v9612_v45, %v9158_v17 }
 0xc89   :  { %v13560_v4 = vpop.eup %13559  ;;  %v9078_v53 = vmul.f32 %v13558_v48, %v8966_v14  ;;  %v9190_v9 = vshrl.u32 %v16979_v55, 16  ;;  %v9193_v19 = vshll.u32 %v16979_v55, 16  ;;  %v9617_v33 = vor.u32 %v9615_v52, %v9166_v49 }
 0xc8a   :  { %v13562_v29 = vpop.eup %13561  ;;  %12278 = vmatprep.mubr.msk.bf16.mxu0 %vm6977_vm10, %v9224_v16  ;;  %v9083_v43 = vmul.f32 %v13560_v4, %v8971_v28  ;;  %v9618_v36 = vrot.slane %v9177_v27, 1  ;;  %v8970_v31 = vmul.f32 0.999995, %v16909_v13  ;;  %v17007_v23 = vsel %vm1824_vm5, %v9614_v35, %v9615_v52 }
 0xc8b   :  { %v9094_v59 = vmul.f32 %v17853_v46, %v9078_v53  ;;  %12279 = vmatmul.mubr.msk.bf16.gmra.mrb[52].mxu0 %vm6977_vm10, %v9225_v24  ;;  %v13564_v51 = vpop.eup %13563  ;;  %v9192_v18 = vrot.slane %v9190_v9, 7  ;;  %v9081_v63 = vmul.f32 %v13562_v29, %v8969_v22  ;;  %v9624_v17 = vrot.slane %v9193_v19, 1  ;;  %v17946_v29 = vld [vmem:[#allocation47_spill] sm:$0xff] }
 0xc8c   :  { %v9084_v7 = vmul.f32 %v13564_v51, %v8972_v25  ;;  %v17010_v46 = vsel %vm1824_vm5, %v9617_v33, %v9618_v36  ;;  %v9620_v8 = vor.u32 %v9618_v36, %v9174_v57  ;;  %v9099_v50 = vmul.f32 %v14388_v30, %v9083_v43 }
 0xc8d   :  { %v17003_v26 = vpack.c.bf16 %v9094_v59, %v9093_v3  ;;  %v9195_v13 = vor.u32 %v9193_v19, %v9192_v18  ;;  %v9626_v10 = vor.u32 %v9624_v17, %v9190_v9  ;;  %v9097_v52 = vmul.f32 %v14363_v1, %v9081_v63  ;;  %v17947_v19 = vld [vmem:[#allocation48_spill] sm:$0xff] }
 0xc8e   :  { %v9100_v49 = vmul.f32 %v14386_v60, %v9084_v7  ;;  %v9118_v35 = vrot.slane %v16919_v6, 7  ;;  %v9120_v51 = vrot.slane %v16948_v44, 7  ;;  %v9122_v7 = vrot.slane %v16945_v0, 7 }
 0xc8f   :  { %v9182_v27 = vshrl.u32 %v17003_v26, 16  ;;  %v9185_v14 = vshll.u32 %v17003_v26, 16 }
 0xc90   :  { %v13566_v41 = vpop.eup %13565  ;;  %v17018_v58 = vpack.c.bf16 %v9100_v49, %v9099_v50 }
 0xc91   :  { %v9082_v15 = vmul.f32 %v13566_v41, %v8970_v31  ;;  %v9184_v48 = vrot.slane %v9182_v27, 7  ;;  %v9621_v16 = vrot.slane %v9185_v14, 1  ;;  %v9124_v31 = vrot.slane %v17003_v26, 7 }
 0xc92   :  { %v9206_v30 = vshrl.u32 %v17018_v58, 16  ;;  %v9209_v4 = vshll.u32 %v17018_v58, 16  ;;  %v17055_v41 = vsel %vm1218_vm0, %v9118_v35, %v9120_v51 }
 0xc93   :  { %v9098_v57 = vmul.f32 %v14360_v37, %v9082_v15  ;;  %v9187_v45 = vor.u32 %v9185_v14, %v9184_v48  ;;  %v9196_v60 = vsel %vm1294_vm2, %v9184_v48, %v9195_v13  ;;  %v17030_v9 = vsel %vm1824_vm5, %v9620_v8, %v9621_v16 }
 0xc94   :  { %v9208_v24 = vrot.slane %v9206_v30, 7  ;;  %v9117_v37 = vrot.slane %v16921_v56, 7  ;;  %v9623_v22 = vor.u32 %v9621_v16, %v9182_v27  ;;  %v9630_v25 = vrot.slane %v9209_v4, 1 }
 0xc95   :  { %v17025_v53 = vpack.c.bf16 %v9098_v57, %v9097_v52  ;;  %v9188_v28 = vsel %vm1294_vm2, %v16961_v40, %v9187_v45  ;;  %v9227_v3 = vmul.bf16 %v9196_v60, %v17947_v19  ;;  %v9126_v8 = vrot.slane %v16979_v55, 7  ;;  %v17948_v19 = vld [vmem:[#allocation5_spill] sm:$0xff] }
 0xc96   :  { %v9226_v1 = vmul.bf16 %v9188_v28, %v17946_v29  ;;  %v9211_v40 = vor.u32 %v9209_v4, %v9208_v24  ;;  %v17041_v33 = vsel %vm1824_vm5, %v9623_v22, %v9624_v17  ;;  %v17043_v36 = vor.u32 %v9630_v25, %v9206_v30  ;;  %v13585_v22 = vld [vmem:[%s17415_s0 + $0x18] sm:$0xff] }
 0xc97   :  { %v9198_v59 = vshrl.u32 %v17025_v53, 16  ;;  %v9201_v43 = vshll.u32 %v17025_v53, 16  ;;  %v17050_v27 = vsel %vm1218_vm0, %v9117_v37, %v9118_v35  ;;  %v9140_v14 = vsel %vm1218_vm0, 0, %v9117_v37  ;;  %v13584_v37 = vld [vmem:[%s17415_s0 + $0x10] sm:$0xff] }
 0xc98   :  { %12282 = vmatprep.mubr.msk.bf16.mxu0 %vm6977_vm10, %v9226_v1  ;;  %v17062_v16 = vsel %vm1218_vm0, %v9120_v51, %v9122_v7  ;;  %v17065_v52 = vsel %vm1218_vm0, %v9122_v7, %v9124_v31  ;;  %v17068_v57 = vsel %vm1218_vm0, %v9124_v31, %v9126_v8  ;;  %v9128_v30 = vrot.slane %v17025_v53, 7  ;;  %v17951_v31 = vld [vmem:[#allocation10_spill] sm:$0xff] }
 0xc99   :  { %12283 = vmatmul.mubr.msk.bf16.gmra.mrb[56].mxu0 %vm6977_vm10, %v9227_v3  ;;  %v9200_v63 = vrot.slane %v9198_v59, 7  ;;  %v9627_v50 = vrot.slane %v9201_v43, 1  ;;  %v9130_v60 = vrot.slane %v17018_v58, 7  ;;  %v9142_v4 = vmul.bf16 %v9140_v14, %v14442_v32  ;;  %v13588_v14 = vld [vmem:[%s17415_s0 + $0x38] sm:$0xff] }
 0xc9a   :  { %v9143_v28 = vmul.bf16 %v17050_v27, %v14452_v54  ;;  %v9495_v24 = vsel %vm7002_vm9, %v16967_v21, 0  ;;  %v9145_v29 = vmul.bf16 %v17062_v16, %v17825_v20  ;;  %v9147_v32 = vmul.bf16 %v17068_v57, %v17827_v5  ;;  %v13598_v5 = vld [vmem:[%s17415_s0 + $0x70] sm:$0xff] }
 0xc9b   :  { %v9203_v49 = vor.u32 %v9201_v43, %v9200_v63  ;;  %v9212_v17 = vsel %vm1294_vm2, %v9200_v63, %v9211_v40  ;;  %v17058_v13 = vsel %vm1824_vm5, %v9626_v10, %v9627_v50  ;;  %v9629_v15 = vor.u32 %v9627_v50, %v9198_v59  ;;  %v17949_v40 = vld [vmem:[#allocation3_spill] sm:$0xff]  ;;  %v17950_v63 = vld [vmem:[#allocation4_spill] sm:$0xff] }
 0xc9c   :  { %v17094_v54 = vsel %vm1218_vm0, %v9126_v8, %v9128_v30  ;;  %v17097_v21 = vsel %vm1218_vm0, %v9128_v30, %v9130_v60  ;;  %vm113_vm13 = vcmp.ne.s32.totalorder %v13584_v37, 1  ;;  %vm114_vm14 = vcmp.ne.s32.totalorder %v13585_v22, 1  ;;  %v13587_v50 = vld [vmem:[%s17415_s0 + $0x8] sm:$0xff]  ;;  %v17140_v60 = vld [vmem:[%s17421_s7 + $0x34] sm:$0xf] }
 0xc9d   :  { %v9204_v48 = vsel %vm1294_vm2, %v9192_v18, %v9203_v49  ;;  %v17074_v10 = vsel %vm1824_vm5, %v9629_v15, %v9630_v25  ;;  %v9229_v18 = vmul.bf16 %v9212_v17, %v14439_v42  ;;  %v9146_v42 = vmul.bf16 %v17065_v52, %v17826_v61  ;;  %v13586_v25 = vld [vmem:[%s17415_s0 + $0x28] sm:$0xff]  ;;  %v13589_v17 = vld [vmem:[%s17415_s0 + $0x20] sm:$0xff] }
 0xc9e   :  { %v9228_v45 = vmul.bf16 %v9204_v48, %v14422_v62  ;;  %v9144_v62 = vmul.bf16 %v17055_v41, %v17824_v11  ;;  %v13583_v11 = vld [vmem:[%s17415_s0] sm:$0xff]  ;;  %vm116_vm15 = vcmp.ne.s32.totalorder %v13586_v25, 1  ;;  %v10422_v59 = vsel %vm113_vm13, 1.0, %v17925_v12  ;;  %v17953_v22 = vld [vmem:[#allocation8_spill] sm:$0xff] }
 0xc9f   :  { %vm111_vm11 = vcmp.ne.s32.totalorder %v13583_v11, 1  ;;  %v10423_v43 = vsel %vm114_vm14, 1.0, %v17925_v12  ;;  %v10425_v35 = vsel %vm116_vm15, 1.0, %v17925_v12  ;;  %v161_v51 = vmul.f32 %v10422_v59, %v17949_v40 }
 0xca0   :  { %12286 = vmatprep.mubr.msk.bf16.mxu0 %vm6977_vm10, %v9228_v45  ;;  %v10420_v1 = vsel %vm111_vm11, 1.0, %v17925_v12  ;;  %v162_v7 = vmul.f32 %v10423_v43, %v17950_v63  ;;  %v17119_v8 = vmul.f32 %v10425_v35, %v17951_v31  ;;  %vm112_vm1 = vcmp.ne.s32.totalorder %v13587_v50, 1  ;;  %v17952_v45 = vld [vmem:[#allocation6_spill] sm:$0xff]  ;;  %v17955_v31 = vld [vmem:[#allocation12_spill] sm:$0xff] }
 0xca1   :  { %12287 = vmatmul.mubr.msk.bf16.gmra.mrb[60].mxu0 %vm6977_vm10, %v9229_v18  ;;  %v159_v3 = vmul.f32 %v10420_v1, %v17948_v19  ;;  %v10421_v27 = vsel %vm112_vm1, 1.0, %v17925_v12  ;;  %vm118_vm0 = vcmp.ne.s32.totalorder %v13588_v14, 1  ;;  %vm115_vm2 = vcmp.ne.s32.totalorder %v13589_v17, 1  ;;  %v13590_v1 = vld [vmem:[%s17415_s0 + $0x48] sm:$0xff]  ;;  %v17954_v19 = vld [vmem:[#allocation9_spill] sm:$0xff] }
 0xca2   :  { %12292 = vmatprep.mubr.msk.bf16.mxu0 %vm6977_vm10, %v9142_v4  ;;  %v10179_v41 = vsel %vm10169_vm12, %v161_v51, 0.0  ;;  %v10180_v15 = vsel %vm10169_vm12, %v162_v7, 0.0  ;;  %v10189_v48 = vsel %vm10169_vm12, %v17119_v8, 0.0  ;;  %v160_v30 = vmul.f32 %v10421_v27, %v17952_v45  ;;  %v13592_v50 = vld [vmem:[%s17415_s0 + $0x58] sm:$0xff]  ;;  %v13593_v45 = vld [vmem:[%s17415_s0 + $0x40] sm:$0xff] }
 0xca3   :  { %10003 = vperm.xlu1 %13001, %v159_v3   ;;  %v10170_v49 = vsel %vm10169_vm12, %v159_v3, 0.0  ;;  %v10181_v18 = vadd.f32 %v10180_v15, %v10179_v41  ;;  %v10427_v4 = vsel %vm118_vm0, 1.0, %v17925_v12  ;;  %v10424_v11 = vsel %vm115_vm2, 1.0, %v17925_v12 }
 0xca4   :  { %vm120_vm3 = vcmp.ne.s32.totalorder %v13590_v1, 1  ;;  %v10171_v37 = vsel %vm10169_vm12, %v160_v30, 0.0  ;;  %10008 = vperm.xlu0 %13002, %v160_v30   ;;  %v17150_v25 = vmul.f32 %v10427_v4, %v17953_v22  ;;  %v163_v3 = vmul.f32 %v10424_v11, %v17954_v19  ;;  %v13594_v30 = vld [vmem:[%s17415_s0 + $0x68] sm:$0xff] }
 0xca5   :  { %v10429_v59 = vsel %vm120_vm3, 1.0, %v17925_v12  ;;  %v9148_v43 = vmul.bf16 %v17094_v54, %v17828_v38  ;;  %v10182_v35 = vrot.slane %v10181_v18, 4  ;;  %v10172_v40 = vadd.f32 %v10171_v37, %v10170_v49  ;;  %v17957_v1 = vld [vmem:[#allocation16_spill] sm:$0xff] }
 0xca6   :  { %v10188_v63 = vsel %vm10169_vm12, %v163_v3, 0.0  ;;  %vm122_vm5 = vcmp.ne.s32.totalorder %v13592_v50, 1  ;;  %v10198_v14 = vsel %vm10169_vm12, %v17150_v25, 0.0  ;;  %vm119_vm6 = vcmp.ne.s32.totalorder %v13593_v45, 1 }
 0xca7   :  { %10013 = vperm.xlu1 %13001, %v161_v51   ;;  %v10183_v49 = vadd.f32 %v10182_v35, %v10181_v18  ;;  %v10173_v27 = vrot.slane %v10172_v40, 4  ;;  %v10190_v17 = vadd.f32 %v10189_v48, %v10188_v63  ;;  %v17956_v51 = vld [vmem:[#allocation7_spill] sm:$0xff]  ;;  %v10431_v15 = vsel %vm122_vm5, 1.0, %v17925_v12 }
 0xca8   :  { %10023 = vperm.xlu0 %13002, %v163_v3   ;;  %vm124_vm11 = vcmp.ne.s32.totalorder %v13594_v30, 1  ;;  %v17181_v48 = vmul.f32 %v10431_v15, %v17957_v1  ;;  %v10428_v22 = vsel %vm119_vm6, 1.0, %v17925_v12  ;;  %v13595_v3 = vld [vmem:[%s17415_s0 + $0x50] sm:$0xff]  ;;  %v17958_v63 = vld [vmem:[#allocation11_spill] sm:$0xff]  ;;  %v13596_v15 = vld [vmem:[%s17415_s0 + $0x78] sm:$0xff]  ;;  %vm125_vm1 = vcmp.ne.s32.totalorder %v13598_v5, 1 }
 0xca9   :  { %12293 = vmatmul.mubr.msk.bf16.vlgmr.msra.gmra.mrb[48].mxu0 %vm6977_vm10, %v9143_v28  ;;  %v13591_v28 = vld [vmem:[%s17415_s0 + $0x30] sm:$0xff]  ;;  %v10184_v18 = vrot.slane %v10183_v49, 2  ;;  %v10174_v4 = vadd.f32 %v10173_v27, %v10172_v40  ;;  %v10191_v11 = vrot.slane %v10190_v17, 4  ;;  %v10433_v19 = vsel %vm124_vm11, 1.0, %v17925_v12 }
 0xcaa   :  { %12309 = vmatpush3.bf16.msra.mxu0 %v9495_v24  ;;  %12296 = vmatprep.mubr.msk.bf16.mxu0 %vm6977_vm10, %v9144_v62  ;;  %vm117_vm4 = vcmp.ne.s32.totalorder %v13591_v28, 1  ;;  %v17164_v24 = vmul.f32 %v10429_v59, %v17955_v31  ;;  %vm121_vm13 = vcmp.ne.s32.totalorder %v13595_v3, 1  ;;  %v167_v31 = vmul.f32 %v10428_v22, %v17958_v63 }
 0xcab   :  { %12945 = vmatprep.subr.msk.bf16.mxu0 %vm7002_vm9, %v17140_v60  ;;  %v10426_v62 = vsel %vm117_vm4, 1.0, %v17925_v12  ;;  %10018 = vperm.xlu1 %13001, %v162_v7   ;;  %v10185_v59 = vadd.f32 %v10184_v18, %v10183_v49  ;;  %v10175_v35 = vrot.slane %v10174_v4, 2  ;;  %v10192_v28 = vadd.f32 %v10191_v11, %v10190_v17 }
 0xcac   :  { %v165_v41 = vmul.f32 %v10426_v62, %v17956_v51  ;;  %v10207_v7 = vsel %vm10169_vm12, %v17164_v24, 0.0  ;;  %v17959_v62 = vld [vmem:[#allocation18_spill] sm:$0xff]  ;;  %v10430_v27 = vsel %vm121_vm13, 1.0, %v17925_v12  ;;  %v10206_v17 = vsel %vm10169_vm12, %v167_v31, 0.0  ;;  %v17960_v51 = vld [vmem:[#allocation15_spill] sm:$0xff] }
 0xcad   :  { %v17197_v50 = vmul.f32 %v10433_v19, %v17959_v62  ;;  %v10186_v49 = vrot.slane %v10185_v59, 1  ;;  %v10176_v20 = vadd.f32 %v10175_v35, %v10174_v4  ;;  %v10193_v16 = vrot.slane %v10192_v28, 2  ;;  %v13597_v4 = vld [vmem:[%s17415_s0 + $0x60] sm:$0xff] }
 0xcae   :  { %v10197_v37 = vsel %vm10169_vm12, %v165_v41, 0.0  ;;  %10033 = vperm.xlu0 %13002, %v165_v41   ;;  %v169_v41 = vmul.f32 %v10430_v27, %v17960_v51  ;;  %vm126_vm14 = vcmp.ne.s32.totalorder %v13596_v15, 1  ;;  %v10208_v30 = vadd.f32 %v10207_v7, %v10206_v17 }
 0xcaf   :  { %v10199_v40 = vadd.f32 %v10198_v14, %v10197_v37  ;;  %10028 = vperm.xlu1 %13001, %v17119_v8   ;;  %v10216_v14 = vsel %vm10169_vm12, %v17181_v48, 0.0  ;;  %v10187_v61 = vadd.f32 %v10186_v49, %v10185_v59  ;;  %v10177_v52 = vrot.slane %v10176_v20, 1  ;;  %v17961_v59 = vld [vmem:[#allocation14_spill] sm:$0xff]  ;;  %v17962_v49 = vld [vmem:[#allocation17_spill] sm:$0xff] }
 0xcb0   :  { %v10215_v8 = vsel %vm10169_vm12, %v169_v41, 0.0  ;;  %v10435_v18 = vsel %vm126_vm14, 1.0, %v17925_v12  ;;  %vm123_vm15 = vcmp.ne.s32.totalorder %v13597_v4, 1  ;;  %v10225_v22 = vsel %vm10169_vm12, %v17197_v50, 0.0 }
 0xcb1   :  { %12297 = vmatmul.mubr.msk.bf16.gmra.mrb[52].mxu0 %vm6977_vm10, %v9145_v29  ;;  %v10200_v29 = vrot.slane %v10199_v40, 4  ;;  %v10178_v11 = vadd.f32 %v10177_v52, %v10176_v20  ;;  %v10209_v19 = vrot.slane %v10208_v30, 4  ;;  %v10217_v3 = vadd.f32 %v10216_v14, %v10215_v8 }
 0xcb2   :  { %12300 = vmatprep.mubr.msk.bf16.mxu0 %vm6977_vm10, %v9146_v42  ;;  %v10194_v42 = vadd.f32 %v10193_v16, %v10192_v28  ;;  %10043 = vperm.xlu0 %13002, %v167_v31   ;;  %v174_v35 = vmul.f32 %v10435_v18, %v17961_v59  ;;  %v10432_v28 = vsel %vm123_vm15, 1.0, %v17925_v12  ;;  %v10434_v17 = vsel %vm125_vm1, 1.0, %v17925_v12 }
 0xcb3   :  { %v10201_v45 = vadd.f32 %v10200_v29, %v10199_v40  ;;  %10038 = vperm.xlu1 %13001, %v17150_v25   ;;  %v10243_v40 = vadd.f32 1e-06, %v10187_v61  ;;  %v10242_v7 = vadd.f32 1e-06, %v10178_v11  ;;  %v10210_v62 = vadd.f32 %v10209_v19, %v10208_v30 }
 0xcb4   :  { %v10195_v1 = vrot.slane %v10194_v42, 1  ;;  %v10218_v27 = vrot.slane %v10217_v3, 4  ;;  %v10234_v25 = vsel %vm10169_vm12, %v174_v35, 0.0  ;;  %v171_v20 = vmul.f32 %v10432_v28, %v17962_v49 }
 0xcb5   :  { %v10202_v37 = vrot.slane %v10201_v45, 2  ;;  %13567 = vrcp.f32 %v10242_v7  ;;  %v10211_v57 = vrot.slane %v10210_v62, 2  ;;  %v9675_v7 = vsel %vm7002_vm9, %v17140_v60, 0 }
 0xcb6   :  { %v10196_v63 = vadd.f32 %v10195_v1, %v10194_v42  ;;  %10053 = vperm.xlu0 %13002, %v169_v41   ;;  %v10224_v14 = vsel %vm10169_vm12, %v171_v20, 0.0  ;;  %vm10342_vm0 = vcmask 1043459   ;;  %vm10344_vm2 = vcmask 1044484  }
 0xcb7   :  { %v10203_v31 = vadd.f32 %v10202_v37, %v10201_v45  ;;  %10048 = vperm.xlu1 %13001, %v17164_v24   ;;  %v10226_v54 = vadd.f32 %v10225_v22, %v10224_v14  ;;  %v10212_v41 = vadd.f32 %v10211_v57, %v10210_v62  ;;  %v9149_v24 = vmul.bf16 %v17097_v21, %v17829_v34 }
 0xcb8   :  { %v10244_v16 = vadd.f32 1e-06, %v10196_v63  ;;  %v9642_v57 = vmul.bf16 %v16996_v47, %v17922_v2  ;;  %v17966_v47 = vld [vmem:[#allocation59_spill] sm:$0xff]  ;;  %vm10346_vm3 = vcmask 1045509   ;;  %vm10348_vm4 = vcmask 1046534  }
 0xcb9   :  { %12301 = vmatmul.mubr.msk.bf16.gmra.mrb[56].mxu0 %vm6977_vm10, %v9147_v32  ;;  %v10204_v29 = vrot.slane %v10203_v31, 1  ;;  %v10219_v32 = vadd.f32 %v10218_v27, %v10217_v3  ;;  %v10227_v52 = vrot.slane %v10226_v54, 4  ;;  %v10213_v45 = vrot.slane %v10212_v41, 1 }
 0xcba   :  { %12304 = vmatprep.mubr.msk.bf16.mxu0 %vm6977_vm10, %v9148_v43  ;;  %13569 = vrcp.f32 %v10244_v16  ;;  %v17963_v43 = vld [vmem:[#allocation13_spill] sm:$0xff]  ;;  %10063 = vperm.xlu0 %13002, %v171_v20   ;;  %vm10350_vm5 = vcmask 1047559  }
 0xcbb   :  { %v10205_v38 = vadd.f32 %v10204_v29, %v10203_v31  ;;  %v173_v51 = vmul.f32 %v10434_v17, %v17963_v43  ;;  %v10220_v15 = vrot.slane %v10219_v32, 2  ;;  %13571 = vrcp.f32 %v10243_v40  ;;  %10058 = vperm.xlu1 %13001, %v17181_v48   ;;  %v17964_v17 = vld [vmem:[#allocation57_spill] sm:$0xff] }
 0xcbc   :  { %v10228_v18 = vadd.f32 %v10227_v52, %v10226_v54  ;;  %v10214_v4 = vadd.f32 %v10213_v45, %v10212_v41  ;;  %v17965_v54 = vld [vmem:[#allocation58_spill] sm:$0xff]  ;;  %v9646_v43 = vmul.bf16 %v17041_v33, %v17966_v47  ;;  %v9790_v41 = vrot.slane %v16921_v56, 1  ;;  %v17970_v52 = vld [vmem:[#allocation64_spill] sm:$0xff] }
 0xcbd   :  { %v10245_v61 = vadd.f32 1e-06, %v10205_v38  ;;  %v10233_v42 = vsel %vm10169_vm12, %v173_v51, 0.0  ;;  %v10221_v30 = vadd.f32 %v10220_v15, %v10219_v32  ;;  %v9643_v32 = vmul.bf16 %v17007_v23, %v17923_v39  ;;  %v17967_v39 = vld [vmem:[#allocation60_spill] sm:$0xff] }
 0xcbe   :  { %v10235_v8 = vadd.f32 %v10234_v25, %v10233_v42  ;;  %10073 = vperm.xlu0 %13002, %v173_v51   ;;  %v10229_v37 = vrot.slane %v10228_v18, 2  ;;  %v10246_v22 = vadd.f32 1e-06, %v10214_v4  ;;  %v9644_v38 = vmul.bf16 %v17010_v46, %v17964_v17  ;;  %v17968_v51 = vld [vmem:[#allocation61_spill] sm:$0xff] }
 0xcbf   :  { %v10222_v11 = vrot.slane %v10221_v30, 1  ;;  %13573 = vrcp.f32 %v10245_v61  ;;  %10068 = vperm.xlu1 %13001, %v17197_v50   ;;  %v13568_v48 = vpop.eup %13567  ;;  %v11008_v50 = vld [vmem:[%s17421_s7 + $0x38] sm:$0xf]  ;;  %v9645_v2 = vmul.bf16 %v17030_v9, %v17965_v54  ;;  %v9647_v23 = vmul.bf16 %v17058_v13, %v17967_v39 }
 0xcc0   :  { %v10236_v1 = vrot.slane %v10235_v8, 4  ;;  %v10230_v19 = vadd.f32 %v10229_v37, %v10228_v18  ;;  %13575 = vrcp.f32 %v10246_v22  ;;  %v9848_v14 = vsel %vm7002_vm9, %v11008_v50, 0  ;;  %v17975_v22 = vld [vmem:[#allocation68_spill] sm:$0xff] }
 0xcc1   :  { %12305 = vmatmul.mubr.msk.bf16.gmra.mrb[60].mxu0 %vm6977_vm10, %v9149_v24  ;;  %v10223_v34 = vadd.f32 %v10222_v11, %v10221_v30  ;;  %v9648_v46 = vmul.bf16 %v17074_v10, %v17968_v51  ;;  %v9791_v15 = vrot.slane %v16919_v6, 1  ;;  %v9641_v33 = vsel %vm14557_vm7, %v17043_v36, 0  ;;  %v17971_v24 = vld [vmem:[#allocation63_spill] sm:$0xff]  ;;  %v17972_v30 = vld [vmem:[#allocation65_spill] sm:$0xff] }
 0xcc2   :  { %12310 = vmatprep.mubr.msk.bf16.mxu0 %vm6977_vm10, %v16921_v56  ;;  %v10237_v21 = vadd.f32 %v10236_v1, %v10235_v8  ;;  %10260 = vperm.xlu0 %13002, %v13568_v48   ;;  %v10231_v40 = vrot.slane %v10230_v19, 1  ;;  %v9649_v42 = vmul.bf16 %v9641_v33, %v17970_v52  ;;  %v9793_v13 = vrot.slane %v16948_v44, 1  ;;  %v17973_v8 = vld [vmem:[#allocation66_spill] sm:$0xff]  ;;  %v17974_v1 = vld [vmem:[#allocation67_spill] sm:$0xff] }
 0xcc3   :  { %v10247_v3 = vadd.f32 1e-06, %v10223_v34  ;;  %10078 = vperm.xlu1 %13001, %v174_v35   ;;  %v9792_v61 = vsel %vm2056_vm8, %v9790_v41, %v9791_v15  ;;  %v9795_v56 = vrot.slane %v16945_v0, 1  ;;  %v9797_v4 = vrot.slane %v17003_v26, 1  ;;  %v17981_v41 = vld [vmem:[#allocation50_spill] sm:$0xff] }
 0xcc4   :  { %v10238_v59 = vrot.slane %v10237_v21, 2  ;;  %v13570_v28 = vpop.eup %13569  ;;  %v10232_v62 = vadd.f32 %v10231_v40, %v10230_v19  ;;  %v9815_v10 = vmul.bf16 %v9792_v61, %v17971_v24  ;;  %v17976_v19 = vld [vmem:[#allocation69_spill] sm:$0xff]  ;;  %v17978_v40 = vld [vmem:[#allocation71_spill] sm:$0xff]  ;;  %vm13602_vm7 = vmmov 0   ;;  %v17982_v61 = vld [vmem:[#allocation52_spill] sm:$0xff] }
 0xcc5   :  { %13577 = vrcp.f32 %v10247_v3  ;;  %v13572_v31 = vpop.eup %13571  ;;  %v9796_v45 = vsel %vm2056_vm8, %v9793_v13, %v9795_v56  ;;  %12364 = vmatprep.mubr.msk.bf16.mxu1 %vm13602_vm7, %v17925_v12  ;;  %v17337_v12 = vld [vmem:[%s17424_s8 + $0x2] ss:$0 sm:$0xff] }
 0xcc6   :  { %v10239_v63 = vadd.f32 %v10238_v59, %v10237_v21  ;;  %10270 = vperm.xlu0 %13002, %v13570_v28   ;;  %v10248_v25 = vadd.f32 1e-06, %v10232_v62  ;;  %v9817_v18 = vmul.bf16 %v9796_v45, %v17973_v8  ;;  %v9801_v21 = vrot.slane %v17025_v53, 1  ;;  %v17977_v59 = vld [vmem:[#allocation70_spill] sm:$0xff] }
 0xcc7   :  { %10265 = vperm.xlu1 %13001, %v13572_v31   ;;  %v18_v31 = vstv %s17427_s12 }
 0xcc8   :  { %v10240_v27 = vrot.slane %v10239_v63, 1  ;;  %13579 = vrcp.f32 %v10248_v25  ;;  %19 = vst [vmem:[#allocation2] sm:$0x1] %v18_v31 }
 0xcc9   :  { %12311 = vmatmul.mubr.msk.bf16.vlgmr.msra.gmra.mrb[48].mxu0 %vm6977_vm10, %v16919_v6  ;;  %v13574_v35 = vpop.eup %13573  ;;  %v9794_v6 = vsel %vm2056_vm8, %v9791_v15, %v9793_v13 }
 0xcca   :  { %12327 = vmatpush3.bf16.msra.mxu0 %v9675_v7  ;;  %12314 = vmatprep.mubr.msk.bf16.mxu0 %vm6977_vm10, %v16948_v44  ;;  %v10241_v60 = vadd.f32 %v10240_v27, %v10239_v63  ;;  %v13576_v20 = vpop.eup %13575  ;;  %v9816_v36 = vmul.bf16 %v9794_v6, %v17972_v30  ;;  %v9799_v44 = vrot.slane %v16979_v55, 1 }
 0xccb   :  { %12946 = vmatprep.subr.msk.bf16.mxu0 %vm7002_vm9, %v11008_v50  ;;  %10275 = vperm.xlu1 %13001, %v13574_v35  }
 0xccc   :  { %v10249_v49 = vadd.f32 1e-06, %v10241_v60  ;;  %10280 = vperm.xlu0 %13002, %v13576_v20   ;;  %v9800_v11 = vsel %vm2056_vm8, %v9797_v4, %v9799_v44 }
 0xccd   :  { %v9819_v34 = vmul.bf16 %v9800_v11, %v17975_v22  ;;  %v17983_v11 = vld [vmem:[#allocation53_spill] sm:$0xff] }
 0xcce   :  { %13581 = vrcp.f32 %v10249_v49 }
 0xccf   :  { %v13578_v16 = vpop.eup %13577 }
 0xcd0   :  { %10285 = vperm.xlu1 %13001, %v13578_v16  }
 0xcd1   :  { %12315 = vmatmul.mubr.msk.bf16.gmra.mrb[52].mxu0 %vm6977_vm10, %v16945_v0  ;;  %v9798_v0 = vsel %vm2056_vm8, %v9795_v56, %v9797_v4 }
 0xcd2   :  { %12318 = vmatprep.mubr.msk.bf16.mxu0 %vm6977_vm10, %v17003_v26  ;;  %v13580_v29 = vpop.eup %13579  ;;  %v9818_v37 = vmul.bf16 %v9798_v0, %v17974_v1  ;;  %v9803_v26 = vrot.slane %v17018_v58, 1 }
 0xcd3   :  { %10290 = vperm.xlu0 %13002, %v13580_v29  }
 0xcd4   :  { %v9804_v48 = vsel %vm2056_vm8, %v9801_v21, %v9803_v26 }
 0xcd5   :  { %v9821_v28 = vmul.bf16 %v9804_v48, %v17977_v59  ;;  %v17985_v59 = vld [vmem:[#allocation37_spill] sm:$0xff] }
 0xcd8   :  { %v13582_v5 = vpop.eup %13581 }
 0xcd9   :  { %12319 = vmatmul.mubr.msk.bf16.gmra.mrb[56].mxu0 %vm6977_vm10, %v16979_v55  ;;  %10295 = vperm.xlu1 %13001, %v13582_v5   ;;  %v9802_v55 = vsel %vm2056_vm8, %v9799_v44, %v9801_v21 }
 0xcda   :  { %12322 = vmatprep.mubr.msk.bf16.mxu0 %vm6977_vm10, %v17025_v53  ;;  %v9820_v3 = vmul.bf16 %v9802_v55, %v17976_v19  ;;  %v9813_v53 = vsel %vm2056_vm8, %v9803_v26, 0  ;;  %v17984_v26 = vld [vmem:[#allocation54_spill] sm:$0xff]  ;;  %vm10338_vm8 = vcmask 1041409  }
 0xcdb   :  { %v9822_v7 = vmul.bf16 %v9813_v53, %v17978_v40 }
 0xce1   :  { %12323 = vmatmul.mubr.msk.bf16.gmra.mrb[60].mxu0 %vm6977_vm10, %v17018_v58  ;;  %v10314_v58 = vld [vmem:[%s17426_s11] sm:$0xf] }
 0xce2   :  { %12328 = vmatprep.mubr.msk.bf16.mxu0 %vm6977_vm10, %v9642_v57  ;;  %v10357_v63 = vsel %vm7002_vm9, %v10314_v58, 0  ;;  %vm10340_vm9 = vcmask 1042434  }
 0xce3   :  { %12363 = vmatpush3.bf16.msra.mxu1 %v10357_v63 }
 0xce9   :  { %12329 = vmatmul.mubr.msk.bf16.vlgmr.msra.gmra.mrb[48].mxu0 %vm6977_vm10, %v9643_v32 }
 0xcea   :  { %12345 = vmatpush3.bf16.msra.mxu0 %v9848_v14  ;;  %12332 = vmatprep.mubr.msk.bf16.mxu0 %vm6977_vm10, %v9644_v38  ;;  %v17979_v38 = vld [vmem:[#allocation49_spill] sm:$0xff] }
 0xcf1   :  { %12333 = vmatmul.mubr.msk.bf16.gmra.mrb[52].mxu0 %vm6977_vm10, %v9645_v2 }
 0xcf2   :  { %12336 = vmatprep.mubr.msk.bf16.mxu0 %vm6977_vm10, %v9646_v43  ;;  %v17980_v43 = vld [vmem:[#allocation51_spill] sm:$0xff] }
 0xcf9   :  { %12337 = vmatmul.mubr.msk.bf16.gmra.mrb[56].mxu0 %vm6977_vm10, %v9647_v23 }
 0xcfa   :  { %12340 = vmatprep.mubr.msk.bf16.mxu0 %vm6977_vm10, %v9648_v46 }
 0xd01   :  { %12341 = vmatmul.mubr.msk.bf16.gmra.mrb[60].mxu0 %vm6977_vm10, %v9649_v42 }
 0xd02   :  { %12346 = vmatprep.mubr.msk.bf16.mxu0 %vm6977_vm10, %v9815_v10 }
 0xd09   :  { %12347 = vmatmul.mubr.msk.bf16.vlgmr.msra.gmra.mrb[48].mxu0 %vm6977_vm10, %v9816_v36 }
 0xd0a   :  { %12350 = vmatprep.mubr.msk.bf16.mxu0 %vm6977_vm10, %v9817_v18 }
 0xd11   :  { %12351 = vmatmul.mubr.msk.bf16.gmra.mrb[52].mxu0 %vm6977_vm10, %v9818_v37 }
 0xd12   :  { %12354 = vmatprep.mubr.msk.bf16.mxu0 %vm6977_vm10, %v9819_v34 }
 0xd19   :  { %12355 = vmatmul.mubr.msk.bf16.gmra.mrb[56].mxu0 %vm6977_vm10, %v9820_v3 }
 0xd1a   :  { %12358 = vmatprep.mubr.msk.bf16.mxu0 %vm6977_vm10, %v9821_v28 }
 0xd21   :  { %12359 = vmatmul.mubr.msk.bf16.gmra.mrb[60].mxu0 %vm6977_vm10, %v9822_v7  ;;  %v17986_v7 = vld [vmem:[#allocation36_spill] sm:$0xff] }
 0xd22   :  { %v10004_v50 = vpop.permute.xlu1 %10003 }
 0xd23   :  { %v10009_v25 = vpop.permute.xlu0 %10008 }
 0xd26   :  { %v10014_v62 = vpop.permute.xlu1 %10013 }
 0xd27   :  { %v10024_v35 = vpop.permute.xlu0 %10023 }
 0xd2a   :  { %v10019_v27 = vpop.permute.xlu1 %10018 }
 0xd2d   :  { %v10034_v20 = vpop.permute.xlu0 %10033 }
 0xd2e   :  { %v10029_v60 = vpop.permute.xlu1 %10028 }
 0xd31   :  { %v17341_v29 = vpop.permute.xlu0 %10043 }
 0xd32   :  { %v10039_v49 = vpop.permute.xlu1 %10038 }
 0xd35   :  { %v10054_v9 = vpop.permute.xlu0 %10053 }
 0xd36   :  { %v17339_v16 = vpop.permute.xlu1 %10048 }
 0xd39   :  { %v17363_v34 = vpop.permute.xlu0 %10063 }
 0xd3a   :  { %v17349_v51 = vpop.permute.xlu1 %10058 }
 0xd3e   :  { %v17359_v44 = vpop.permute.xlu1 %10068 }
 0xddc   :  { %v12348_v5 = vpop.f32.mrb[48].mxu0 }
 0xddd   :  { %v9971_v57 = vadd.f32 %v12348_v5, %v17337_v12  ;;  %v9884_v32 = vpop.f32.mrb[49].mxu0  ;;  %v17370_v5 = vpop.permute.xlu1 %10078 }
 0xdde   :  { %v9969_v14 = vadd.f32 %v17337_v12, %v9884_v32  ;;  %v12349_v17 = vpop.f32.mrb[50].mxu0 }
 0xddf   :  { %v9987_v54 = vadd.f32 %v17979_v38, %v9971_v57  ;;  %v9972_v2 = vadd.f32 %v12349_v17, %v17337_v12  ;;  %v9887_v47 = vpop.f32.mrb[51].mxu0 }
 0xde0   :  { %v9985_v39 = vadd.f32 %v17980_v43, %v9969_v14  ;;  %v9970_v23 = vadd.f32 %v17337_v12, %v9887_v47 }
 0xde1   :  { %v10083_v46 = vmul.f32 %v10014_v62, %v9987_v54  ;;  %v9988_v15 = vadd.f32 %v17981_v41, %v9972_v2 }
 0xde2   :  { %v10081_v33 = vmul.f32 %v10004_v50, %v9985_v39  ;;  %v9986_v52 = vadd.f32 %v17982_v61, %v9970_v23  ;;  %v17987_v39 = vld [vmem:[#allocation19_spill] sm:$0xff]  ;;  %v17988_v61 = vld [vmem:[#allocation21_spill] sm:$0xff] }
 0xde3   :  { %v10084_v42 = vmul.f32 %v10019_v27, %v9988_v15  ;;  %v10106_v10 = vsel %vm6977_vm10, %v10083_v46, 0.0 }
 0xde4   :  { %v10082_v13 = vmul.f32 %v10009_v25, %v9986_v52  ;;  %v12352_v24 = vpop.f32.mrb[52].mxu0  ;;  %v10097_v30 = vsel %vm6977_vm10, %v10081_v33, 0.0 }
 0xde5   :  { %v10107_v56 = vsel %vm6977_vm10, %v10084_v42, 0.0  ;;  %v9975_v6 = vadd.f32 %v12352_v24, %v17337_v12  ;;  %v9900_v45 = vpop.f32.mrb[53].mxu0 }
 0xde6   :  { %v10108_v36 = vadd.f32 %v10107_v56, %v10106_v10  ;;  %v10098_v8 = vsel %vm6977_vm10, %v10082_v13, 0.0  ;;  %v9973_v18 = vadd.f32 %v17337_v12, %v9900_v45  ;;  %v12353_v4 = vpop.f32.mrb[54].mxu0  ;;  %v17989_v56 = vld [vmem:[#allocation20_spill] sm:$0xff] }
 0xde7   :  { %v10099_v0 = vadd.f32 %v10098_v8, %v10097_v30  ;;  %v9991_v1 = vadd.f32 %v17983_v11, %v9975_v6  ;;  %v9976_v37 = vadd.f32 %v12353_v4, %v17337_v12  ;;  %v9903_v22 = vpop.f32.mrb[55].mxu0  ;;  %v17990_v8 = vld [vmem:[#allocation22_spill] sm:$0xff]  ;;  %v10266_v4 = vpop.permute.xlu1 %10265 }
 0xde8   :  { %v10109_v21 = vrot.slane %v10108_v36, 4  ;;  %v9989_v55 = vadd.f32 %v17984_v26, %v9973_v18  ;;  %v9974_v48 = vadd.f32 %v17337_v12, %v9903_v22 }
 0xde9   :  { %v10100_v19 = vrot.slane %v10099_v0, 4  ;;  %v10087_v3 = vmul.f32 %v10034_v20, %v9991_v1  ;;  %v9992_v28 = vadd.f32 %v17985_v59, %v9976_v37 }
 0xdea   :  { %v10110_v53 = vadd.f32 %v10109_v21, %v10108_v36  ;;  %v10085_v40 = vmul.f32 %v10024_v35, %v9989_v55  ;;  %v9990_v58 = vadd.f32 %v17986_v7, %v9974_v48  ;;  %v17375_v35 = vpop.permute.xlu0 %10073 }
 0xdeb   :  { %v10101_v63 = vadd.f32 %v10100_v19, %v10099_v0  ;;  %v10088_v31 = vmul.f32 %v10039_v49, %v9992_v28  ;;  %v10124_v62 = vsel %vm6977_vm10, %v10087_v3, 0.0 }
 0xdec   :  { %v10111_v50 = vrot.slane %v10110_v53, 2  ;;  %v10086_v27 = vmul.f32 %v10029_v60, %v9990_v58  ;;  %v12356_v25 = vpop.f32.mrb[56].mxu0  ;;  %v10115_v32 = vsel %vm6977_vm10, %v10085_v40, 0.0 }
 0xded   :  { %v10102_v57 = vrot.slane %v10101_v63, 2  ;;  %v10125_v20 = vsel %vm6977_vm10, %v10088_v31, 0.0  ;;  %v9979_v14 = vadd.f32 %v12356_v25, %v17337_v12  ;;  %v9916_v17 = vpop.f32.mrb[57].mxu0 }
 0xdee   :  { %v10112_v38 = vadd.f32 %v10111_v50, %v10110_v53  ;;  %v10126_v54 = vadd.f32 %v10125_v20, %v10124_v62  ;;  %v10116_v49 = vsel %vm6977_vm10, %v10086_v27, 0.0  ;;  %v9977_v2 = vadd.f32 %v17337_v12, %v9916_v17  ;;  %v12357_v60 = vpop.f32.mrb[58].mxu0  ;;  %v10261_v22 = vpop.permute.xlu0 %10260  ;;  %v17991_v62 = vld [vmem:[#allocation23_spill] sm:$0xff] }
 0xdef   :  { %v10103_v47 = vadd.f32 %v10102_v57, %v10101_v63  ;;  %v10117_v43 = vadd.f32 %v10116_v49, %v10115_v32  ;;  %v9995_v23 = vadd.f32 %v17987_v39, %v9979_v14  ;;  %v9980_v46 = vadd.f32 %v12357_v60, %v17337_v12  ;;  %v9919_v41 = vpop.f32.mrb[59].mxu0 }
 0xdf0   :  { %v10113_v15 = vrot.slane %v10112_v38, 1  ;;  %v10127_v33 = vrot.slane %v10126_v54, 4  ;;  %v9993_v52 = vadd.f32 %v17988_v61, %v9977_v2  ;;  %v9978_v42 = vadd.f32 %v17337_v12, %v9919_v41  ;;  %v17992_v2 = vld [vmem:[#allocation25_spill] sm:$0xff] }
 0xdf1   :  { %v10104_v13 = vrot.slane %v10103_v47, 1  ;;  %v10118_v24 = vrot.slane %v10117_v43, 4  ;;  %v10091_v10 = vmul.f32 %v10054_v9, %v9995_v23  ;;  %v9996_v6 = vadd.f32 %v17989_v56, %v9980_v46 }
 0xdf2   :  { %v10114_v45 = vadd.f32 %v10113_v15, %v10112_v38  ;;  %v10128_v30 = vadd.f32 %v10127_v33, %v10126_v54  ;;  %v10089_v36 = vmul.f32 %v17341_v29, %v9993_v52  ;;  %v9994_v18 = vadd.f32 %v17990_v8, %v9978_v42  ;;  %v10271_v41 = vpop.permute.xlu0 %10270  ;;  %v17993_v52 = vld [vmem:[#allocation24_spill] sm:$0xff] }
 0xdf3   :  { %v10105_v0 = vadd.f32 %v10104_v13, %v10103_v47  ;;  %v10119_v11 = vadd.f32 %v10118_v24, %v10117_v43  ;;  %v10142_v1 = vsel %vm6977_vm10, %v10091_v10, 0.0  ;;  %v10092_v37 = vmul.f32 %v17349_v51, %v9996_v6  ;;  %v10276_v43 = vpop.permute.xlu1 %10275 }
 0xdf4   :  { %v10299_v21 = vmul.f32 %v10266_v4, %v10114_v45  ;;  %v10129_v26 = vrot.slane %v10128_v30, 2  ;;  %v10133_v9 = vsel %vm6977_vm10, %v10089_v36, 0.0  ;;  %v10090_v55 = vmul.f32 %v17339_v16, %v9994_v18  ;;  %v12360_v48 = vpop.f32.mrb[60].mxu0  ;;  %v17994_v18 = vld [vmem:[#allocation26_spill] sm:$0xff] }
 0xdf5   :  { %v10298_v19 = vmul.f32 %v10261_v22, %v10105_v0  ;;  %v10120_v3 = vrot.slane %v10119_v11, 2  ;;  %v10143_v29 = vsel %vm6977_vm10, %v10092_v37, 0.0  ;;  %v9983_v59 = vadd.f32 %v12360_v48, %v17337_v12  ;;  %v9932_v28 = vpop.f32.mrb[61].mxu0 }
 0xdf6   :  { %v10307_v53 = vpack.c.bf16 %v10299_v21, %v10299_v21  ;;  %v10130_v40 = vadd.f32 %v10129_v26, %v10128_v30  ;;  %v10144_v7 = vadd.f32 %v10143_v29, %v10142_v1  ;;  %v10134_v51 = vsel %vm6977_vm10, %v10090_v55, 0.0  ;;  %v12361_v58 = vpop.f32.mrb[62].mxu0 }
 0xdf7   :  { %v10306_v63 = vpack.c.bf16 %v10298_v19, %v10298_v19  ;;  %v10121_v31 = vadd.f32 %v10120_v3, %v10119_v11  ;;  %v10135_v50 = vadd.f32 %v10134_v51, %v10133_v9  ;;  %v9999_v27 = vadd.f32 %v17991_v62, %v9983_v59  ;;  %v9935_v16 = vpop.f32.mrb[63].mxu0  ;;  %v10286_v26 = vpop.permute.xlu1 %10285 }
 0xdf8   :  { %v10331_v25 = vunpack.c.l.b16 %v10307_v53  ;;  %v10131_v57 = vrot.slane %v10130_v40, 1  ;;  %v10145_v32 = vrot.slane %v10144_v7, 4  ;;  %v9981_v20 = vadd.f32 %v17337_v12, %v9932_v28  ;;  %v10281_v3 = vpop.permute.xlu0 %10280 }
 0xdf9   :  { %v10330_v14 = vunpack.c.l.b16 %v10306_v63  ;;  %v10122_v17 = vrot.slane %v10121_v31, 1  ;;  %v10136_v38 = vrot.slane %v10135_v50, 4  ;;  %v9984_v47 = vadd.f32 %v12361_v58, %v17337_v12 }
 0xdfa   :  { %v10132_v54 = vadd.f32 %v10131_v57, %v10130_v40  ;;  %v10146_v49 = vadd.f32 %v10145_v32, %v10144_v7  ;;  %v9997_v60 = vadd.f32 %v17992_v2, %v9981_v20  ;;  %v10095_v61 = vmul.f32 %v17375_v35, %v9999_v27 }
 0xdfb   :  { %v10339_v39 = vsel %vm10338_vm8, %v10331_v25, %v10330_v14  ;;  %v10123_v23 = vadd.f32 %v10122_v17, %v10121_v31  ;;  %v10137_v46 = vadd.f32 %v10136_v38, %v10135_v50  ;;  %v10000_v42 = vadd.f32 %v17993_v52, %v9984_v47  ;;  %v10296_v14 = vpop.permute.xlu1 %10295 }
 0xdfc   :  { %v10301_v15 = vmul.f32 %v10276_v43, %v10132_v54  ;;  %v10147_v33 = vrot.slane %v10146_v49, 2  ;;  %v9982_v10 = vadd.f32 %v17337_v12, %v9935_v16  ;;  %v10093_v45 = vmul.f32 %v17363_v34, %v9997_v60 }
 0xdfd   :  { %v10300_v13 = vmul.f32 %v10271_v41, %v10123_v23  ;;  %v10138_v24 = vrot.slane %v10137_v46, 2  ;;  %v10096_v30 = vmul.f32 %v17370_v5, %v10000_v42  ;;  %v10160_v35 = vsel %vm6977_vm10, %v10095_v61, 0.0 }
 0xdfe   :  { %v10309_v56 = vpack.c.bf16 %v10301_v15, %v10301_v15  ;;  %v10148_v6 = vadd.f32 %v10147_v33, %v10146_v49  ;;  %v9998_v4 = vadd.f32 %v17994_v18, %v9982_v10  ;;  %v10151_v5 = vsel %vm6977_vm10, %v10093_v45, 0.0  ;;  %v10291_v49 = vpop.permute.xlu0 %10290  ;;  %v11124_v15 = vld [vmem:[#allocation2] ss:$0 sm:$0xff] }
 0xdff   :  { %v10308_v36 = vpack.c.bf16 %v10300_v13, %v10300_v13  ;;  %v10139_v8 = vadd.f32 %v10138_v24, %v10137_v46  ;;  %v10161_v11 = vsel %vm6977_vm10, %v10096_v30, 0.0 }
 0xe00   :  { %v10149_v0 = vrot.slane %v10148_v6, 1  ;;  %v10162_v12 = vadd.f32 %v10161_v11, %v10160_v35  ;;  %v10094_v22 = vmul.f32 %v17359_v44, %v9998_v4  ;;  %v10333_v21 = vunpack.c.l.b16 %v10309_v56 }
 0xe01   :  { %v10332_v1 = vunpack.c.l.b16 %v10308_v36  ;;  %v10140_v37 = vrot.slane %v10139_v8, 1 }
 0xe02   :  { %v10150_v34 = vadd.f32 %v10149_v0, %v10148_v6  ;;  %v10163_v48 = vrot.slane %v10162_v12, 4  ;;  %v10152_v19 = vsel %vm6977_vm10, %v10094_v22, 0.0 }
 0xe03   :  { %v10341_v9 = vsel %vm10340_vm9, %v10332_v1, %v10339_v39  ;;  %v10141_v55 = vadd.f32 %v10140_v37, %v10139_v8  ;;  %v10153_v28 = vadd.f32 %v10152_v19, %v10151_v5 }
 0xe04   :  { %v10303_v29 = vmul.f32 %v10286_v26, %v10150_v34  ;;  %v10343_v59 = vsel %vm10342_vm0, %v10333_v21, %v10341_v9  ;;  %v10164_v40 = vadd.f32 %v10163_v48, %v10162_v12 }
 0xe05   :  { %v10302_v53 = vmul.f32 %v10281_v3, %v10141_v55  ;;  %v10154_v51 = vrot.slane %v10153_v28, 4 }
 0xe06   :  { %v10311_v7 = vpack.c.bf16 %v10303_v29, %v10303_v29  ;;  %v10165_v58 = vrot.slane %v10164_v40, 2 }
 0xe07   :  { %v10310_v44 = vpack.c.bf16 %v10302_v53, %v10302_v53  ;;  %v10155_v63 = vadd.f32 %v10154_v51, %v10153_v28 }
 0xe08   :  { %v10166_v50 = vadd.f32 %v10165_v58, %v10164_v40  ;;  %v10335_v62 = vunpack.c.l.b16 %v10311_v7 }
 0xe09   :  { %v10334_v31 = vunpack.c.l.b16 %v10310_v44  ;;  %v10156_v27 = vrot.slane %v10155_v63, 2 }
 0xe0a   :  { %v10167_v25 = vrot.slane %v10166_v50, 1 }
 0xe0b   :  { %v10345_v16 = vsel %vm10344_vm2, %v10334_v31, %v10343_v59  ;;  %v10157_v57 = vadd.f32 %v10156_v27, %v10155_v63 }
 0xe0c   :  { %v10347_v32 = vsel %vm10346_vm3, %v10335_v62, %v10345_v16  ;;  %v10168_v20 = vadd.f32 %v10167_v25, %v10166_v50 }
 0xe0d   :  { %v10158_v17 = vrot.slane %v10157_v57, 1 }
 0xe0e   :  { %v10305_v38 = vmul.f32 %v10296_v14, %v10168_v20 }
 0xe0f   :  { %v10159_v54 = vadd.f32 %v10158_v17, %v10157_v57 }
 0xe10   :  { %v10313_v60 = vpack.c.bf16 %v10305_v38, %v10305_v38 }
 0xe11   :  { %v10304_v2 = vmul.f32 %v10291_v49, %v10159_v54 }
 0xe12   :  { %v10337_v39 = vunpack.c.l.b16 %v10313_v60 }
 0xe13   :  { %v10312_v47 = vpack.c.bf16 %v10304_v2, %v10304_v2 }
 0xe15   :  { %v10336_v43 = vunpack.c.l.b16 %v10312_v47 }
 0xe17   :  { %v10349_v23 = vsel %vm10348_vm4, %v10336_v43, %v10347_v32 }
 0xe18   :  { %v10351_v46 = vsel %vm10350_vm5, %v10337_v39, %v10349_v23 }
 0xe19   :  { %v10352_v41 = vpack.c.b16 %v10351_v46, %v10351_v46 }
 0xe1b   :  { %12365 = vmatmul.mubr.msk.bf16.vlgmr.msra.gmra.mrb[80].mxu1 %vm6977_vm10, %v10352_v41 }
 0xeee   :  { %v10393_v33 = vpop.f32.mrb[80].mxu1 }
 0xeef   :  { %v10394_v61 = vadd.f32 %v11124_v15, %v10393_v33  ;;  %v12366_v52 = vpop.f32.mrb[81].mxu1 }
 0xef0   :  { %v10396_v42 = vpop.f32.mrb[82].mxu1 }
 0xef1   :  { %10399 = vst.msk [vmem:[%s17428_s13] sm:$0xff] %vm10169_vm12, %v10394_v61  ;;  %v12367_v13 = vpop.f32.mrb[83].mxu1 }

</bundles_post_ra>
